<compile_context>
chip_gen: v7x
topology: tpu7x:2x2x1
jax: 0.10.0
libtpu: 0.0.40
codegen_flags: <defaults>
</compile_context>

<pallas_src>
import functools

import numpy as np
import jax
import jax.numpy as jnp
from jax.experimental import pallas as pl
from jax.experimental.pallas import tpu as pltpu

LRELU_SLOPE = 0.1
PERIODS = (2, 3)                      # MPD periods (small synthetic config)
RESOLUTIONS = ((32, 8), (16, 4))      # MRD (n_fft, hop) (small synthetic config)

MPD_STRIDE = 3
MPD_PAD = 2
MPD_POST_PAD = 1

VMEM_LIMIT = 32 * 1024 * 1024
MAG_EPS = 1e-9


def _compiler_params():
    return pltpu.CompilerParams(
        dimension_semantics=("parallel",),
        vmem_limit_bytes=VMEM_LIMIT,
    )


def _leaky(x):
    return jnp.where(x >= 0.0, x, LRELU_SLOPE * x)


def _stack_w(w):
    """(Cout, Cin, kh, kw) -> (Cout, kh*kw*Cin), matching tap-major stacking."""
    cout, cin, kh, kw = w.shape
    return jnp.transpose(w, (0, 2, 3, 1)).reshape(cout, kh * kw * cin).astype(jnp.float32)


def _col_b(b):
    return jnp.asarray(b, jnp.float32).reshape(-1, 1)


# ----------------------------------------------------------------------------
# Fused MPD stack kernel: 2 strided convs + conv_post, all in VMEM.
# Flat column layout per half-batch: col = (b, h, w), conv taps are shifted
# lane slices stacked along sublanes; the stride-3 subsample + zero re-pad is
# a constant selection matmul.
# ----------------------------------------------------------------------------
def _mpd_stack_kernel(x_ref, w1_ref, b1_ref, s1_ref, w2_ref, b2_ref, s2_ref,
                      w3_ref, b3_ref, o1_ref, o2_ref, o3_ref, *,
                      n1, n2, n3, offs1, offs2, offs3):
    def tap_stack(xw, offs, ncols):
        return jnp.concatenate([xw[:, o:o + ncols] for o in offs], axis=0)

    x1 = x_ref[0]                                                 # (1, n1+halo1)
    h1 = _leaky(jnp.dot(w1_ref[...], tap_stack(x1, offs1, n1),
                        preferred_element_type=jnp.float32) + b1_ref[...])
    # stride-3 subsample + zero re-pad (constant selection matmul, stays in VMEM)
    x2 = jnp.dot(h1, s1_ref[...], preferred_element_type=jnp.float32)  # (C1, n2+halo2)
    o1_ref[0] = x2[:, :n2]
    h2 = _leaky(jnp.dot(w2_ref[...], tap_stack(x2, offs2, n2),
                        preferred_element_type=jnp.float32) + b2_ref[...])
    x3 = jnp.dot(h2, s2_ref[...], preferred_element_type=jnp.float32)  # (C2, n3+halo3)
    o2_ref[0] = x3[:, :n3]
    h3 = jnp.dot(w3_ref[...], tap_stack(x3, offs3, n3),
                 preferred_element_type=jnp.float32) + b3_ref[...]
    o3_ref[0] = h3


def _mpd_selection(bh, w, hp_in, ho, stride, pad_next, halo_next):
    """0/1 matrix mapping full stride-1 results -> next layer's padded input."""
    hp_out = ho + 2 * pad_next
    n_in = bh * hp_in * w
    n_out = bh * hp_out * w
    sel = np.zeros((n_in, n_out + halo_next), np.float32)
    for b in range(bh):
        for h in range(ho):
            for ww in range(w):
                src = (b * hp_in + h * stride) * w + ww
                dst = (b * hp_out + h + pad_next) * w + ww
                sel[src, dst] = 1.0
    return jnp.asarray(sel)


def discriminator_p_fused(yy, pparams, period):
    """yy: (2B, T) -> (score (2B, Tflat), 3 NCHW feature maps), one pallas_call."""
    twoB, T = yy.shape
    Bh = twoB // 2
    if T % period != 0:
        n_pad = period - (T % period)
        yy = jnp.pad(yy, ((0, 0), (0, n_pad)), mode="reflect")
        T = T + n_pad
    H, W = T // period, period

    (w1, b1), (w2, b2) = pparams["convs"]
    w3, b3 = pparams["conv_post"]
    C1, C2 = w1.shape[0], w2.shape[0]
    k1, k2, k3 = w1.shape[2], w2.shape[2], w3.shape[2]

    Hp1 = H + 2 * MPD_PAD
    Ho1 = (Hp1 - k1) // MPD_STRIDE + 1
    Hp2 = Ho1 + 2 * MPD_PAD
    Ho2 = (Hp2 - k2) // MPD_STRIDE + 1
    Hp3 = Ho2 + 2 * MPD_POST_PAD
    Ho3 = Hp3 - k3 + 1

    n1, n2, n3 = Bh * Hp1 * W, Bh * Hp2 * W, Bh * Hp3 * W
    halo1, halo2, halo3 = (k1 - 1) * W, (k2 - 1) * W, (k3 - 1) * W
    offs1 = tuple(d * W for d in range(k1))
    offs2 = tuple(d * W for d in range(k2))
    offs3 = tuple(d * W for d in range(k3))

    # flat padded input, grouped into (y, y_hat) halves; channel dim = 1
    x = yy.reshape(twoB, H, W)
    x = jnp.pad(x, ((0, 0), (MPD_PAD, MPD_PAD), (0, 0)))
    x = x.reshape(2, Bh * Hp1 * W)[:, None, :]
    x = jnp.pad(x, ((0, 0), (0, 0), (0, halo1))).astype(jnp.float32)

    sel1 = _mpd_selection(Bh, W, Hp1, Ho1, MPD_STRIDE, MPD_PAD, halo2)
    sel2 = _mpd_selection(Bh, W, Hp2, Ho2, MPD_STRIDE, MPD_POST_PAD, halo3)

    kernel = functools.partial(_mpd_stack_kernel, n1=n1, n2=n2, n3=n3,
                               offs1=offs1, offs2=offs2, offs3=offs3)
    o1, o2, o3 = pl.pallas_call(
        kernel,
        grid=(2,),
        in_specs=[
            pl.BlockSpec((1, 1, n1 + halo1), lambda i: (i, 0, 0)),
            pl.BlockSpec((C1, k1), lambda i: (0, 0)),
            pl.BlockSpec((C1, 1), lambda i: (0, 0)),
            pl.BlockSpec((n1, n2 + halo2), lambda i: (0, 0)),
            pl.BlockSpec((C2, k2 * C1), lambda i: (0, 0)),
            pl.BlockSpec((C2, 1), lambda i: (0, 0)),
            pl.BlockSpec((n2, n3 + halo3), lambda i: (0, 0)),
            pl.BlockSpec((1, k3 * C2), lambda i: (0, 0)),
            pl.BlockSpec((1, 1), lambda i: (0, 0)),
        ],
        out_specs=(
            pl.BlockSpec((1, C1, n2), lambda i: (i, 0, 0)),
            pl.BlockSpec((1, C2, n3), lambda i: (i, 0, 0)),
            pl.BlockSpec((1, 1, n3), lambda i: (i, 0, 0)),
        ),
        out_shape=(
            jax.ShapeDtypeStruct((2, C1, n2), jnp.float32),
            jax.ShapeDtypeStruct((2, C2, n3), jnp.float32),
            jax.ShapeDtypeStruct((2, 1, n3), jnp.float32),
        ),
        compiler_params=_compiler_params(),
    )(x, _stack_w(w1), _col_b(b1), sel1, _stack_w(w2), _col_b(b2), sel2,
      _stack_w(w3), _col_b(b3))

    def unflat(o, c, hp):
        o = o.reshape(2, c, Bh, hp, W).transpose(0, 2, 1, 3, 4)
        return o.reshape(twoB, c, hp, W)

    f1 = unflat(o1, C1, Hp2)[:, :, MPD_PAD:MPD_PAD + Ho1, :]
    f2 = unflat(o2, C2, Hp3)[:, :, MPD_POST_PAD:MPD_POST_PAD + Ho2, :]
    f3 = unflat(o3, 1, Hp3)[:, :, 0:Ho3, :]
    score = f3.reshape(twoB, -1)
    return score, [f1, f2, f3]


# ----------------------------------------------------------------------------
# Fused spectrogram kernel: window + DFT (single stacked cos/sin matmul) + |.|
# ----------------------------------------------------------------------------
def _spec_mag_kernel(fr_ref, dft_ref, o_ref, *, nbins, eps):
    ri = jnp.dot(dft_ref[...], fr_ref[0], preferred_element_type=jnp.float32)
    re = ri[:nbins]
    im = ri[nbins:]
    o_ref[0] = jnp.sqrt(re * re + im * im + eps)


def _frame_signal(y, n_fft, hop):
    """(2B, T) -> (2B, n_frames, n_fft) without advanced-index gathers."""
    B, T = y.shape
    n_frames = (T - n_fft) // hop + 1
    if n_fft % hop == 0:
        r = n_fft // hop
        n_chunks = n_frames - 1 + r
        chunks = y[:, :n_chunks * hop].reshape(B, n_chunks, hop)
        pieces = [chunks[:, j:j + n_frames, :] for j in range(r)]
        return jnp.concatenate(pieces, axis=-1)
    cols = [y[:, d:d + (n_frames - 1) * hop + 1:hop] for d in range(n_fft)]
    return jnp.stack(cols, axis=-1)


def spectrogram(y, n_fft, hop):
    """y: (2B, T) -> magnitude spectrogram (2B, n_fft//2+1, n_frames)."""
    twoB = y.shape[0]
    Bh = twoB // 2
    frames = _frame_signal(y, n_fft, hop)                   # (2B, nfr, n_fft)
    nfr = frames.shape[1]
    Mh = Bh * nfr
    fr = frames.reshape(2, Mh, n_fft).transpose(0, 2, 1).astype(jnp.float32)

    F = n_fft // 2 + 1
    nn = np.arange(n_fft, dtype=np.float64)
    kk = np.arange(F, dtype=np.float64)
    ang = 2.0 * np.pi * kk[:, None] * nn[None, :] / n_fft
    window = 0.5 - 0.5 * np.cos(2.0 * np.pi * nn / n_fft)
    dft = np.concatenate([np.cos(ang) * window, -np.sin(ang) * window],
                         axis=0).astype(np.float32)          # (2F, n_fft)

    mag = pl.pallas_call(
        functools.partial(_spec_mag_kernel, nbins=F, eps=MAG_EPS),
        grid=(2,),
        in_specs=[
            pl.BlockSpec((1, n_fft, Mh), lambda i: (i, 0, 0)),
            pl.BlockSpec((2 * F, n_fft), lambda i: (0, 0)),
        ],
        out_specs=pl.BlockSpec((1, F, Mh), lambda i: (i, 0, 0)),
        out_shape=jax.ShapeDtypeStruct((2, F, Mh), jnp.float32),
        compiler_params=_compiler_params(),
    )(fr, jnp.asarray(dft))

    mag = mag.reshape(2, F, Bh, nfr).transpose(0, 2, 1, 3).reshape(twoB, F, nfr)
    return mag


# ----------------------------------------------------------------------------
# Fused MRD stack kernel: 3 "same" 3x3 convs; inter-layer zero re-pad is a
# lane shift + interior mask done entirely in VMEM.
# ----------------------------------------------------------------------------
def _mrd_stack_kernel(x_ref, m_ref, w1_ref, b1_ref, w2_ref, b2_ref, w3_ref,
                      b3_ref, o1_ref, o2_ref, o3_ref, *, n, halo, shift, offs):
    def tap_stack(xw):
        return jnp.concatenate([xw[:, o:o + n] for o in offs], axis=0)

    def repad(h):
        # full-grid conv result (C, n) -> next layer's zero-padded input:
        # shift by (Wp+1) columns (pad-ring offset), zero everything outside
        # the interior, append `halo` zero columns for the tap windows.
        c = h.shape[0]
        zs = jnp.zeros((c, shift), jnp.float32)
        x_next = jnp.concatenate([zs, h], axis=1)[:, :n] * m_ref[...]
        x_wide = jnp.concatenate(
            [x_next, jnp.zeros((c, halo), jnp.float32)], axis=1)
        return x_next, x_wide

    x1 = x_ref[0]                                                 # (1, n+halo)
    h1 = _leaky(jnp.dot(w1_ref[...], tap_stack(x1),
                        preferred_element_type=jnp.float32) + b1_ref[...])
    x2, x2w = repad(h1)
    o1_ref[0] = x2
    h2 = _leaky(jnp.dot(w2_ref[...], tap_stack(x2w),
                        preferred_element_type=jnp.float32) + b2_ref[...])
    x3, x3w = repad(h2)
    o2_ref[0] = x3
    h3 = jnp.dot(w3_ref[...], tap_stack(x3w),
                 preferred_element_type=jnp.float32) + b3_ref[...]
    o3_ref[0] = h3


def discriminator_r_fused(yy, rparams, n_fft, hop):
    """yy: (2B, T) -> (score (2B, Tflat), 3 NCHW feature maps)."""
    twoB = yy.shape[0]
    Bh = twoB // 2
    spec = spectrogram(yy, n_fft, hop)                       # (2B, F, nfr)
    F, nfr = spec.shape[1], spec.shape[2]

    (w1, b1), (w2, b2) = rparams["convs"]
    w3, b3 = rparams["conv_post"]
    C1, C2 = w1.shape[0], w2.shape[0]

    Fp, Wp = F + 2, nfr + 2
    n = Bh * Fp * Wp
    halo = 2 * Wp + 2
    shift = Wp + 1
    offs = tuple(i * Wp + j for i in range(3) for j in range(3))

    x = jnp.pad(spec, ((0, 0), (1, 1), (1, 1)))
    x = x.reshape(2, Bh * Fp * Wp)[:, None, :]
    x = jnp.pad(x, ((0, 0), (0, 0), (0, halo))).astype(jnp.float32)

    m = np.zeros((Fp, Wp), np.float32)
    m[1:F + 1, 1:nfr + 1] = 1.0
    mask = jnp.asarray(np.tile(m.reshape(-1), Bh)[None, :])   # (1, n)

    kernel = functools.partial(_mrd_stack_kernel, n=n, halo=halo, shift=shift,
                               offs=offs)
    o1, o2, o3 = pl.pallas_call(
        kernel,
        grid=(2,),
        in_specs=[
            pl.BlockSpec((1, 1, n + halo), lambda i: (i, 0, 0)),
            pl.BlockSpec((1, n), lambda i: (0, 0)),
            pl.BlockSpec((C1, 9), lambda i: (0, 0)),
            pl.BlockSpec((C1, 1), lambda i: (0, 0)),
            pl.BlockSpec((C2, 9 * C1), lambda i: (0, 0)),
            pl.BlockSpec((C2, 1), lambda i: (0, 0)),
            pl.BlockSpec((1, 9 * C2), lambda i: (0, 0)),
            pl.BlockSpec((1, 1), lambda i: (0, 0)),
        ],
        out_specs=(
            pl.BlockSpec((1, C1, n), lambda i: (i, 0, 0)),
            pl.BlockSpec((1, C2, n), lambda i: (i, 0, 0)),
            pl.BlockSpec((1, 1, n), lambda i: (i, 0, 0)),
        ),
        out_shape=(
            jax.ShapeDtypeStruct((2, C1, n), jnp.float32),
            jax.ShapeDtypeStruct((2, C2, n), jnp.float32),
            jax.ShapeDtypeStruct((2, 1, n), jnp.float32),
        ),
        compiler_params=_compiler_params(),
    )(x, mask, _stack_w(w1), _col_b(b1), _stack_w(w2), _col_b(b2),
      _stack_w(w3), _col_b(b3))

    def unflat(o, c):
        o = o.reshape(2, c, Bh, Fp, Wp).transpose(0, 2, 1, 3, 4)
        return o.reshape(twoB, c, Fp, Wp)

    f1 = unflat(o1, C1)[:, :, 1:F + 1, 1:nfr + 1]
    f2 = unflat(o2, C2)[:, :, 1:F + 1, 1:nfr + 1]
    f3 = unflat(o3, 1)[:, :, 0:F, 0:nfr]
    score = f3.reshape(twoB, -1)
    return score, [f1, f2, f3]


# ----------------------------------------------------------------------------
# MultipleDiscriminator forward (the wrapper module); y & y_hat batched
# ----------------------------------------------------------------------------
def multiple_discriminator_forward(params, y, y_hat):
    B = y.shape[0]
    yy = jnp.concatenate([y, y_hat], axis=0)                  # (2B, T)
    y_d_rs, y_d_gs, fmap_rs, fmap_gs = [], [], [], []

    # --- MPD branch: y.unsqueeze(dim=1) ---
    for period, pparams in zip(PERIODS, params["mpd"]):
        d, fm = discriminator_p_fused(yy, pparams, period)
        y_d_rs.append(d[:B]); y_d_gs.append(d[B:])
        fmap_rs.append([f[:B] for f in fm])
        fmap_gs.append([f[B:] for f in fm])

    # --- MRD branch: raw y ---
    for (n_fft, hop), rparams in zip(RESOLUTIONS, params["mrd"]):
        d, fm = discriminator_r_fused(yy, rparams, n_fft, hop)
        y_d_rs.append(d[:B]); y_d_gs.append(d[B:])
        fmap_rs.append([f[:B] for f in fm])
        fmap_gs.append([f[B:] for f in fm])

    return y_d_rs, y_d_gs, fmap_rs, fmap_gs


# ----------------------------------------------------------------------------
# Deterministic parameter init (synthetic; no checkpoint load)
# ----------------------------------------------------------------------------
def _conv_params(key, cout, cin, kh, kw, scale=0.1):
    kw_, kb_ = jax.random.split(key)
    w = scale * jax.random.normal(kw_, (cout, cin, kh, kw), jnp.float32)
    b = scale * jax.random.normal(kb_, (cout,), jnp.float32)
    return w, b


def init_params(key):
    params = {"mpd": [], "mrd": []}
    for _ in PERIODS:
        key, k1, k2, k3 = jax.random.split(key, 4)
        params["mpd"].append({
            "convs": [_conv_params(k1, 4, 1, 5, 1),
                      _conv_params(k2, 8, 4, 5, 1)],
            "conv_post": _conv_params(k3, 1, 8, 3, 1),
        })
    for _ in RESOLUTIONS:
        key, k1, k2, k3 = jax.random.split(key, 4)
        params["mrd"].append({
            "convs": [_conv_params(k1, 8, 1, 3, 3),
                      _conv_params(k2, 8, 8, 3, 3)],
            "conv_post": _conv_params(k3, 1, 8, 3, 3),
        })
    return params


if __name__ == "__main__":
    key = jax.random.PRNGKey(0)
    kp, ky, kyh = jax.random.split(key, 3)
    params = init_params(kp)

    B, T = 2, 240
    y = 0.1 * jax.random.normal(ky, (B, T), jnp.float32)
    y_hat = 0.1 * jax.random.normal(kyh, (B, T), jnp.float32)

    fwd = jax.jit(multiple_discriminator_forward)
    out = jax.block_until_ready(fwd(params, y, y_hat))

    y_d_rs, y_d_gs, fmap_rs, fmap_gs = out
    n_disc = len(PERIODS) + len(RESOLUTIONS)
    assert len(y_d_rs) == n_disc and len(y_d_gs) == n_disc
    assert len(fmap_rs) == n_disc and len(fmap_gs) == n_disc
    assert all(len(f) == 3 for f in fmap_rs)      # 2 convs + conv_post each
    assert all(f.shape[0] == B for fm in fmap_rs for f in fm)
    assert all(f.shape[0] == B for fm in fmap_gs for f in fm)
    assert all(bool(jnp.all(jnp.isfinite(d))) for d in y_d_rs + y_d_gs)
    print("KERNEL_OK")
</pallas_src>

<mosaic_0001>
module attributes {stable_mosaic.version = 11 : i64} {
  func.func @_spec_mag_kernel(%arg0: i32, %arg1: memref<1x16x114xf32, #tpu.memory_space<vmem>>, %arg2: memref<18x16xf32, #tpu.memory_space<vmem>>, %arg3: memref<1x9x114xf32, #tpu.memory_space<vmem>>) attributes {dimension_semantics = [#tpu.dimension_semantics<parallel>], iteration_bounds = array<i64: 2>, scalar_prefetch = 0 : i64, scratch_operands = 0 : i64, tpu.core_type = #tpu.core_type<tc>, window_params = [{transform_indices = @transform_0, window_bounds = array<i64: 1, 16, 114>}, {pipeline_mode = #tpu.pipeline_mode<synchronous>, transform_indices = @transform_1, window_bounds = array<i64: 18, 16>}, {transform_indices = @transform_2, window_bounds = array<i64: 1, 9, 114>}]} {
    %c0 = arith.constant 0 : index
    %c0_0 = arith.constant 0 : index
    %0 = vector.load %arg2[%c0, %c0_0] : memref<18x16xf32, #tpu.memory_space<vmem>>, vector<18x16xf32>
    %c0_1 = arith.constant 0 : index
    %c0_2 = arith.constant 0 : index
    %c0_3 = arith.constant 0 : index
    %1 = vector.load %arg1[%c0_1, %c0_2, %c0_3] : memref<1x16x114xf32, #tpu.memory_space<vmem>>, vector<1x16x114xf32>
    %2 = vector.shape_cast %1 : vector<1x16x114xf32> to vector<16x114xf32>
    %cst = arith.constant dense<0.000000e+00> : vector<18x114xf32>
    %3 = tpu.matmul %0, %2, %cst {dimension_numbers = #tpu.dot_dimension_numbers<[1], [0], [0], [1], [0, 0, 1, 1], [], []>} : vector<18x16xf32>, vector<16x114xf32>, vector<18x114xf32> -> vector<18x114xf32>
    %4 = vector.extract_strided_slice %3 {offsets = [0, 0], sizes = [9, 114], strides = [1, 1]} : vector<18x114xf32> to vector<9x114xf32>
    %5 = vector.extract_strided_slice %3 {offsets = [9, 0], sizes = [9, 114], strides = [1, 1]} : vector<18x114xf32> to vector<9x114xf32>
    %6 = arith.mulf %4, %4 : vector<9x114xf32>
    %7 = arith.mulf %5, %5 : vector<9x114xf32>
    %8 = arith.addf %6, %7 : vector<9x114xf32>
    %cst_4 = arith.constant 9.99999971E-10 : f32
    %9 = vector.broadcast %cst_4 : f32 to vector<9x114xf32>
    %10 = arith.addf %8, %9 : vector<9x114xf32>
    %11 = math.sqrt %10 : vector<9x114xf32>
    %c0_5 = arith.constant 0 : index
    %c0_6 = arith.constant 0 : index
    %c0_7 = arith.constant 0 : index
    %12 = vector.load %arg3[%c0_5, %c0_6, %c0_7] : memref<1x9x114xf32, #tpu.memory_space<vmem>>, vector<1x9x114xf32>
    %13 = vector.shape_cast %12 : vector<1x9x114xf32> to vector<9x114xf32>
    %14 = vector.shape_cast %11 : vector<9x114xf32> to vector<1x9x114xf32>
    tpu.vector_store %arg3[%c0_5, %c0_6, %c0_7], %14 {strides = array<i32>} : memref<1x9x114xf32, #tpu.memory_space<vmem>>, vector<1x9x114xf32>,
    return
  }
  func.func @transform_0(%arg0: i32) -> (i32, i32, i32) {
    %c0_i32 = arith.constant 0 : i32
    %c0_i32_0 = arith.constant 0 : i32
    %c0_i32_1 = arith.constant 0 : i32
    return %arg0, %c0_i32, %c0_i32_0 : i32, i32, i32
  }
  func.func @transform_1(%arg0: i32) -> (i32, i32) {
    %c0_i32 = arith.constant 0 : i32
    %c0_i32_0 = arith.constant 0 : i32
    %c0_i32_1 = arith.constant 0 : i32
    return %c0_i32, %c0_i32_0 : i32, i32
  }
  func.func @transform_2(%arg0: i32) -> (i32, i32, i32) {
    %c0_i32 = arith.constant 0 : i32
    %c0_i32_0 = arith.constant 0 : i32
    %c0_i32_1 = arith.constant 0 : i32
    return %arg0, %c0_i32, %c0_i32_0 : i32, i32, i32
  }
}

module attributes {stable_mosaic.version = 11 : i64} {
  func.func @_mrd_stack_kernel(%arg0: i32, %arg1: memref<1x1x1418xf32, #tpu.memory_space<vmem>>, %arg2: memref<1x1298xf32, #tpu.memory_space<vmem>>, %arg3: memref<8x9xf32, #tpu.memory_space<vmem>>, %arg4: memref<8x1xf32, #tpu.memory_space<vmem>>, %arg5: memref<8x72xf32, #tpu.memory_space<vmem>>, %arg6: memref<8x1xf32, #tpu.memory_space<vmem>>, %arg7: memref<1x72xf32, #tpu.memory_space<vmem>>, %arg8: memref<1x1xf32, #tpu.memory_space<vmem>>, %arg9: memref<1x8x1298xf32, #tpu.memory_space<vmem>>, %arg10: memref<1x8x1298xf32, #tpu.memory_space<vmem>>, %arg11: memref<1x1x1298xf32, #tpu.memory_space<vmem>>) attributes {dimension_semantics = [#tpu.dimension_semantics<parallel>], iteration_bounds = array<i64: 2>, scalar_prefetch = 0 : i64, scratch_operands = 0 : i64, tpu.core_type = #tpu.core_type<tc>, window_params = [{transform_indices = @transform_0, window_bounds = array<i64: 1, 1, 1418>}, {pipeline_mode = #tpu.pipeline_mode<synchronous>, transform_indices = @transform_1, window_bounds = array<i64: 1, 1298>}, {pipeline_mode = #tpu.pipeline_mode<synchronous>, transform_indices = @transform_2, window_bounds = array<i64: 8, 9>}, {pipeline_mode = #tpu.pipeline_mode<synchronous>, transform_indices = @transform_3, window_bounds = array<i64: 8, 1>}, {pipeline_mode = #tpu.pipeline_mode<synchronous>, transform_indices = @transform_4, window_bounds = array<i64: 8, 72>}, {pipeline_mode = #tpu.pipeline_mode<synchronous>, transform_indices = @transform_5, window_bounds = array<i64: 8, 1>}, {pipeline_mode = #tpu.pipeline_mode<synchronous>, transform_indices = @transform_6, window_bounds = array<i64: 1, 72>}, {pipeline_mode = #tpu.pipeline_mode<synchronous>, transform_indices = @transform_7, window_bounds = array<i64: 1, 1>}, {transform_indices = @transform_8, window_bounds = array<i64: 1, 8, 1298>}, {transform_indices = @transform_9, window_bounds = array<i64: 1, 8, 1298>}, {transform_indices = @transform_10, window_bounds = array<i64: 1, 1, 1298>}]} {
    %c0 = arith.constant 0 : index
    %c0_0 = arith.constant 0 : index
    %c0_1 = arith.constant 0 : index
    %0 = vector.load %arg1[%c0, %c0_0, %c0_1] : memref<1x1x1418xf32, #tpu.memory_space<vmem>>, vector<1x1x1418xf32>
    %1 = vector.shape_cast %0 : vector<1x1x1418xf32> to vector<1x1418xf32>
    %c0_2 = arith.constant 0 : index
    %c0_3 = arith.constant 0 : index
    %2 = vector.load %arg3[%c0_2, %c0_3] : memref<8x9xf32, #tpu.memory_space<vmem>>, vector<8x9xf32>
    %3 = vector.extract_strided_slice %1 {offsets = [0, 0], sizes = [1, 1298], strides = [1, 1]} : vector<1x1418xf32> to vector<1x1298xf32>
    %4 = vector.extract_strided_slice %1 {offsets = [0, 1], sizes = [1, 1298], strides = [1, 1]} : vector<1x1418xf32> to vector<1x1298xf32>
    %5 = vector.extract_strided_slice %1 {offsets = [0, 2], sizes = [1, 1298], strides = [1, 1]} : vector<1x1418xf32> to vector<1x1298xf32>
    %6 = vector.extract_strided_slice %1 {offsets = [0, 59], sizes = [1, 1298], strides = [1, 1]} : vector<1x1418xf32> to vector<1x1298xf32>
    %7 = vector.extract_strided_slice %1 {offsets = [0, 60], sizes = [1, 1298], strides = [1, 1]} : vector<1x1418xf32> to vector<1x1298xf32>
    %8 = vector.extract_strided_slice %1 {offsets = [0, 61], sizes = [1, 1298], strides = [1, 1]} : vector<1x1418xf32> to vector<1x1298xf32>
    %9 = vector.extract_strided_slice %1 {offsets = [0, 118], sizes = [1, 1298], strides = [1, 1]} : vector<1x1418xf32> to vector<1x1298xf32>
    %10 = vector.extract_strided_slice %1 {offsets = [0, 119], sizes = [1, 1298], strides = [1, 1]} : vector<1x1418xf32> to vector<1x1298xf32>
    %11 = vector.extract_strided_slice %1 {offsets = [0, 120], sizes = [1, 1298], strides = [1, 1]} : vector<1x1418xf32> to vector<1x1298xf32>
    %12 = tpu.concatenate %3, %4, %5, %6, %7, %8, %9, %10, %11 in 0 : vector<1x1298xf32>, vector<1x1298xf32>, vector<1x1298xf32>, vector<1x1298xf32>, vector<1x1298xf32>, vector<1x1298xf32>, vector<1x1298xf32>, vector<1x1298xf32>, vector<1x1298xf32> -> vector<9x1298xf32>
    %cst = arith.constant dense<0.000000e+00> : vector<8x1298xf32>
    %13 = tpu.matmul %2, %12, %cst {dimension_numbers = #tpu.dot_dimension_numbers<[1], [0], [0], [1], [0, 0, 1, 1], [], []>} : vector<8x9xf32>, vector<9x1298xf32>, vector<8x1298xf32> -> vector<8x1298xf32>
    %c0_4 = arith.constant 0 : index
    %c0_5 = arith.constant 0 : index
    %14 = vector.load %arg4[%c0_4, %c0_5] : memref<8x1xf32, #tpu.memory_space<vmem>>, vector<8x1xf32>
    %15 = vector.broadcast %14 : vector<8x1xf32> to vector<8x1298xf32>
    %16 = arith.addf %13, %15 : vector<8x1298xf32>
    %cst_6 = arith.constant 0.000000e+00 : f32
    %17 = vector.broadcast %cst_6 : f32 to vector<8x1298xf32>
    %18 = arith.cmpf oge, %16, %17 : vector<8x1298xf32>
    %cst_7 = arith.constant 1.000000e-01 : f32
    %19 = vector.broadcast %cst_7 : f32 to vector<8x1298xf32>
    %20 = arith.mulf %19, %16 : vector<8x1298xf32>
    %21 = arith.select %18, %16, %20 : vector<8x1298xi1>, vector<8x1298xf32>
    %cst_8 = arith.constant 0.000000e+00 : f32
    %22 = vector.broadcast %cst_8 : f32 to vector<8x60xf32>
    %23 = tpu.concatenate %22, %21 in 1 : vector<8x60xf32>, vector<8x1298xf32> -> vector<8x1358xf32>
    %24 = vector.extract_strided_slice %23 {offsets = [0, 0], sizes = [8, 1298], strides = [1, 1]} : vector<8x1358xf32> to vector<8x1298xf32>
    %c0_9 = arith.constant 0 : index
    %c0_10 = arith.constant 0 : index
    %25 = vector.load %arg2[%c0_9, %c0_10] : memref<1x1298xf32, #tpu.memory_space<vmem>>, vector<1x1298xf32>
    %26 = vector.broadcast %25 : vector<1x1298xf32> to vector<8x1298xf32>
    %27 = arith.mulf %24, %26 : vector<8x1298xf32>
    %cst_11 = arith.constant 0.000000e+00 : f32
    %28 = vector.broadcast %cst_11 : f32 to vector<8x120xf32>
    %29 = tpu.concatenate %27, %28 in 1 : vector<8x1298xf32>, vector<8x120xf32> -> vector<8x1418xf32>
    %c0_12 = arith.constant 0 : index
    %c0_13 = arith.constant 0 : index
    %c0_14 = arith.constant 0 : index
    %30 = vector.load %arg9[%c0_12, %c0_13, %c0_14] : memref<1x8x1298xf32, #tpu.memory_space<vmem>>, vector<1x8x1298xf32>
    %31 = vector.shape_cast %30 : vector<1x8x1298xf32> to vector<8x1298xf32>
    %32 = vector.shape_cast %27 : vector<8x1298xf32> to vector<1x8x1298xf32>
    tpu.vector_store %arg9[%c0_12, %c0_13, %c0_14], %32 {strides = array<i32>} : memref<1x8x1298xf32, #tpu.memory_space<vmem>>, vector<1x8x1298xf32>,
    %c0_15 = arith.constant 0 : index
    %c0_16 = arith.constant 0 : index
    %33 = vector.load %arg5[%c0_15, %c0_16] : memref<8x72xf32, #tpu.memory_space<vmem>>, vector<8x72xf32>
    %34 = vector.extract_strided_slice %29 {offsets = [0, 0], sizes = [8, 1298], strides = [1, 1]} : vector<8x1418xf32> to vector<8x1298xf32>
    %35 = vector.extract_strided_slice %29 {offsets = [0, 1], sizes = [8, 1298], strides = [1, 1]} : vector<8x1418xf32> to vector<8x1298xf32>
    %36 = vector.extract_strided_slice %29 {offsets = [0, 2], sizes = [8, 1298], strides = [1, 1]} : vector<8x1418xf32> to vector<8x1298xf32>
    %37 = vector.extract_strided_slice %29 {offsets = [0, 59], sizes = [8, 1298], strides = [1, 1]} : vector<8x1418xf32> to vector<8x1298xf32>
    %38 = vector.extract_strided_slice %29 {offsets = [0, 60], sizes = [8, 1298], strides = [1, 1]} : vector<8x1418xf32> to vector<8x1298xf32>
    %39 = vector.extract_strided_slice %29 {offsets = [0, 61], sizes = [8, 1298], strides = [1, 1]} : vector<8x1418xf32> to vector<8x1298xf32>
    %40 = vector.extract_strided_slice %29 {offsets = [0, 118], sizes = [8, 1298], strides = [1, 1]} : vector<8x1418xf32> to vector<8x1298xf32>
    %41 = vector.extract_strided_slice %29 {offsets = [0, 119], sizes = [8, 1298], strides = [1, 1]} : vector<8x1418xf32> to vector<8x1298xf32>
    %42 = vector.extract_strided_slice %29 {offsets = [0, 120], sizes = [8, 1298], strides = [1, 1]} : vector<8x1418xf32> to vector<8x1298xf32>
    %43 = tpu.concatenate %34, %35, %36, %37, %38, %39, %40, %41, %42 in 0 : vector<8x1298xf32>, vector<8x1298xf32>, vector<8x1298xf32>, vector<8x1298xf32>, vector<8x1298xf32>, vector<8x1298xf32>, vector<8x1298xf32>, vector<8x1298xf32>, vector<8x1298xf32> -> vector<72x1298xf32>
    %cst_17 = arith.constant dense<0.000000e+00> : vector<8x1298xf32>
    %44 = tpu.matmul %33, %43, %cst_17 {dimension_numbers = #tpu.dot_dimension_numbers<[1], [0], [0], [1], [0, 0, 1, 1], [], []>} : vector<8x72xf32>, vector<72x1298xf32>, vector<8x1298xf32> -> vector<8x1298xf32>
    %c0_18 = arith.constant 0 : index
    %c0_19 = arith.constant 0 : index
    %45 = vector.load %arg6[%c0_18, %c0_19] : memref<8x1xf32, #tpu.memory_space<vmem>>, vector<8x1xf32>
    %46 = vector.broadcast %45 : vector<8x1xf32> to vector<8x1298xf32>
    %47 = arith.addf %44, %46 : vector<8x1298xf32>
    %cst_20 = arith.constant 0.000000e+00 : f32
    %48 = vector.broadcast %cst_20 : f32 to vector<8x1298xf32>
    %49 = arith.cmpf oge, %47, %48 : vector<8x1298xf32>
    %cst_21 = arith.constant 1.000000e-01 : f32
    %50 = vector.broadcast %cst_21 : f32 to vector<8x1298xf32>
    %51 = arith.mulf %50, %47 : vector<8x1298xf32>
    %52 = arith.select %49, %47, %51 : vector<8x1298xi1>, vector<8x1298xf32>
    %cst_22 = arith.constant 0.000000e+00 : f32
    %53 = vector.broadcast %cst_22 : f32 to vector<8x60xf32>
    %54 = tpu.concatenate %53, %52 in 1 : vector<8x60xf32>, vector<8x1298xf32> -> vector<8x1358xf32>
    %55 = vector.extract_strided_slice %54 {offsets = [0, 0], sizes = [8, 1298], strides = [1, 1]} : vector<8x1358xf32> to vector<8x1298xf32>
    %c0_23 = arith.constant 0 : index
    %c0_24 = arith.constant 0 : index
    %56 = vector.load %arg2[%c0_23, %c0_24] : memref<1x1298xf32, #tpu.memory_space<vmem>>, vector<1x1298xf32>
    %57 = vector.broadcast %56 : vector<1x1298xf32> to vector<8x1298xf32>
    %58 = arith.mulf %55, %57 : vector<8x1298xf32>
    %cst_25 = arith.constant 0.000000e+00 : f32
    %59 = vector.broadcast %cst_25 : f32 to vector<8x120xf32>
    %60 = tpu.concatenate %58, %59 in 1 : vector<8x1298xf32>, vector<8x120xf32> -> vector<8x1418xf32>
    %c0_26 = arith.constant 0 : index
    %c0_27 = arith.constant 0 : index
    %c0_28 = arith.constant 0 : index
    %61 = vector.load %arg10[%c0_26, %c0_27, %c0_28] : memref<1x8x1298xf32, #tpu.memory_space<vmem>>, vector<1x8x1298xf32>
    %62 = vector.shape_cast %61 : vector<1x8x1298xf32> to vector<8x1298xf32>
    %63 = vector.shape_cast %58 : vector<8x1298xf32> to vector<1x8x1298xf32>
    tpu.vector_store %arg10[%c0_26, %c0_27, %c0_28], %63 {strides = array<i32>} : memref<1x8x1298xf32, #tpu.memory_space<vmem>>, vector<1x8x1298xf32>,
    %c0_29 = arith.constant 0 : index
    %c0_30 = arith.constant 0 : index
    %64 = vector.load %arg7[%c0_29, %c0_30] : memref<1x72xf32, #tpu.memory_space<vmem>>, vector<1x72xf32>
    %65 = vector.extract_strided_slice %60 {offsets = [0, 0], sizes = [8, 1298], strides = [1, 1]} : vector<8x1418xf32> to vector<8x1298xf32>
    %66 = vector.extract_strided_slice %60 {offsets = [0, 1], sizes = [8, 1298], strides = [1, 1]} : vector<8x1418xf32> to vector<8x1298xf32>
    %67 = vector.extract_strided_slice %60 {offsets = [0, 2], sizes = [8, 1298], strides = [1, 1]} : vector<8x1418xf32> to vector<8x1298xf32>
    %68 = vector.extract_strided_slice %60 {offsets = [0, 59], sizes = [8, 1298], strides = [1, 1]} : vector<8x1418xf32> to vector<8x1298xf32>
    %69 = vector.extract_strided_slice %60 {offsets = [0, 60], sizes = [8, 1298], strides = [1, 1]} : vector<8x1418xf32> to vector<8x1298xf32>
    %70 = vector.extract_strided_slice %60 {offsets = [0, 61], sizes = [8, 1298], strides = [1, 1]} : vector<8x1418xf32> to vector<8x1298xf32>
    %71 = vector.extract_strided_slice %60 {offsets = [0, 118], sizes = [8, 1298], strides = [1, 1]} : vector<8x1418xf32> to vector<8x1298xf32>
    %72 = vector.extract_strided_slice %60 {offsets = [0, 119], sizes = [8, 1298], strides = [1, 1]} : vector<8x1418xf32> to vector<8x1298xf32>
    %73 = vector.extract_strided_slice %60 {offsets = [0, 120], sizes = [8, 1298], strides = [1, 1]} : vector<8x1418xf32> to vector<8x1298xf32>
    %74 = tpu.concatenate %65, %66, %67, %68, %69, %70, %71, %72, %73 in 0 : vector<8x1298xf32>, vector<8x1298xf32>, vector<8x1298xf32>, vector<8x1298xf32>, vector<8x1298xf32>, vector<8x1298xf32>, vector<8x1298xf32>, vector<8x1298xf32>, vector<8x1298xf32> -> vector<72x1298xf32>
    %cst_31 = arith.constant dense<0.000000e+00> : vector<1x1298xf32>
    %75 = tpu.matmul %64, %74, %cst_31 {dimension_numbers = #tpu.dot_dimension_numbers<[1], [0], [0], [1], [0, 0, 1, 1], [], []>} : vector<1x72xf32>, vector<72x1298xf32>, vector<1x1298xf32> -> vector<1x1298xf32>
    %c0_32 = arith.constant 0 : index
    %c0_33 = arith.constant 0 : index
    %76 = vector.load %arg8[%c0_32, %c0_33] : memref<1x1xf32, #tpu.memory_space<vmem>>, vector<1x1xf32>
    %77 = vector.broadcast %76 : vector<1x1xf32> to vector<1x1298xf32>
    %78 = arith.addf %75, %77 : vector<1x1298xf32>
    %c0_34 = arith.constant 0 : index
    %c0_35 = arith.constant 0 : index
    %c0_36 = arith.constant 0 : index
    %79 = vector.load %arg11[%c0_34, %c0_35, %c0_36] : memref<1x1x1298xf32, #tpu.memory_space<vmem>>, vector<1x1x1298xf32>
    %80 = vector.shape_cast %79 : vector<1x1x1298xf32> to vector<1x1298xf32>
    %81 = vector.shape_cast %78 : vector<1x1298xf32> to vector<1x1x1298xf32>
    tpu.vector_store %arg11[%c0_34, %c0_35, %c0_36], %81 {strides = array<i32>} : memref<1x1x1298xf32, #tpu.memory_space<vmem>>, vector<1x1x1298xf32>,
    return
  }
  func.func @transform_0(%arg0: i32) -> (i32, i32, i32) {
    %c0_i32 = arith.constant 0 : i32
    %c0_i32_0 = arith.constant 0 : i32
    %c0_i32_1 = arith.constant 0 : i32
    return %arg0, %c0_i32, %c0_i32_0 : i32, i32, i32
  }
  func.func @transform_1(%arg0: i32) -> (i32, i32) {
    %c0_i32 = arith.constant 0 : i32
    %c0_i32_0 = arith.constant 0 : i32
    %c0_i32_1 = arith.constant 0 : i32
    return %c0_i32, %c0_i32_0 : i32, i32
  }
  func.func @transform_2(%arg0: i32) -> (i32, i32) {
    %c0_i32 = arith.constant 0 : i32
    %c0_i32_0 = arith.constant 0 : i32
    %c0_i32_1 = arith.constant 0 : i32
    return %c0_i32, %c0_i32_0 : i32, i32
  }
  func.func @transform_3(%arg0: i32) -> (i32, i32) {
    %c0_i32 = arith.constant 0 : i32
    %c0_i32_0 = arith.constant 0 : i32
    %c0_i32_1 = arith.constant 0 : i32
    return %c0_i32, %c0_i32_0 : i32, i32
  }
  func.func @transform_4(%arg0: i32) -> (i32, i32) {
    %c0_i32 = arith.constant 0 : i32
    %c0_i32_0 = arith.constant 0 : i32
    %c0_i32_1 = arith.constant 0 : i32
    return %c0_i32, %c0_i32_0 : i32, i32
  }
  func.func @transform_5(%arg0: i32) -> (i32, i32) {
    %c0_i32 = arith.constant 0 : i32
    %c0_i32_0 = arith.constant 0 : i32
    %c0_i32_1 = arith.constant 0 : i32
    return %c0_i32, %c0_i32_0 : i32, i32
  }
  func.func @transform_6(%arg0: i32) -> (i32, i32) {
    %c0_i32 = arith.constant 0 : i32
    %c0_i32_0 = arith.constant 0 : i32
    %c0_i32_1 = arith.constant 0 : i32
    return %c0_i32, %c0_i32_0 : i32, i32
  }
  func.func @transform_7(%arg0: i32) -> (i32, i32) {
    %c0_i32 = arith.constant 0 : i32
    %c0_i32_0 = arith.constant 0 : i32
    %c0_i32_1 = arith.constant 0 : i32
    return %c0_i32, %c0_i32_0 : i32, i32
  }
  func.func @transform_8(%arg0: i32) -> (i32, i32, i32) {
    %c0_i32 = arith.constant 0 : i32
    %c0_i32_0 = arith.constant 0 : i32
    %c0_i32_1 = arith.constant 0 : i32
    return %arg0, %c0_i32, %c0_i32_0 : i32, i32, i32
  }
  func.func @transform_9(%arg0: i32) -> (i32, i32, i32) {
    %c0_i32 = arith.constant 0 : i32
    %c0_i32_0 = arith.constant 0 : i32
    %c0_i32_1 = arith.constant 0 : i32
    return %arg0, %c0_i32, %c0_i32_0 : i32, i32, i32
  }
  func.func @transform_10(%arg0: i32) -> (i32, i32, i32) {
    %c0_i32 = arith.constant 0 : i32
    %c0_i32_0 = arith.constant 0 : i32
    %c0_i32_1 = arith.constant 0 : i32
    return %arg0, %c0_i32, %c0_i32_0 : i32, i32, i32
  }
}

module attributes {stable_mosaic.version = 11 : i64} {
  func.func @_spec_mag_kernel(%arg0: i32, %arg1: memref<1x32x54xf32, #tpu.memory_space<vmem>>, %arg2: memref<34x32xf32, #tpu.memory_space<vmem>>, %arg3: memref<1x17x54xf32, #tpu.memory_space<vmem>>) attributes {dimension_semantics = [#tpu.dimension_semantics<parallel>], iteration_bounds = array<i64: 2>, scalar_prefetch = 0 : i64, scratch_operands = 0 : i64, tpu.core_type = #tpu.core_type<tc>, window_params = [{transform_indices = @transform_0, window_bounds = array<i64: 1, 32, 54>}, {pipeline_mode = #tpu.pipeline_mode<synchronous>, transform_indices = @transform_1, window_bounds = array<i64: 34, 32>}, {transform_indices = @transform_2, window_bounds = array<i64: 1, 17, 54>}]} {
    %c0 = arith.constant 0 : index
    %c0_0 = arith.constant 0 : index
    %0 = vector.load %arg2[%c0, %c0_0] : memref<34x32xf32, #tpu.memory_space<vmem>>, vector<34x32xf32>
    %c0_1 = arith.constant 0 : index
    %c0_2 = arith.constant 0 : index
    %c0_3 = arith.constant 0 : index
    %1 = vector.load %arg1[%c0_1, %c0_2, %c0_3] : memref<1x32x54xf32, #tpu.memory_space<vmem>>, vector<1x32x54xf32>
    %2 = vector.shape_cast %1 : vector<1x32x54xf32> to vector<32x54xf32>
    %cst = arith.constant dense<0.000000e+00> : vector<34x54xf32>
    %3 = tpu.matmul %0, %2, %cst {dimension_numbers = #tpu.dot_dimension_numbers<[1], [0], [0], [1], [0, 0, 1, 1], [], []>} : vector<34x32xf32>, vector<32x54xf32>, vector<34x54xf32> -> vector<34x54xf32>
    %4 = vector.extract_strided_slice %3 {offsets = [0, 0], sizes = [17, 54], strides = [1, 1]} : vector<34x54xf32> to vector<17x54xf32>
    %5 = vector.extract_strided_slice %3 {offsets = [17, 0], sizes = [17, 54], strides = [1, 1]} : vector<34x54xf32> to vector<17x54xf32>
    %6 = arith.mulf %4, %4 : vector<17x54xf32>
    %7 = arith.mulf %5, %5 : vector<17x54xf32>
    %8 = arith.addf %6, %7 : vector<17x54xf32>
    %cst_4 = arith.constant 9.99999971E-10 : f32
    %9 = vector.broadcast %cst_4 : f32 to vector<17x54xf32>
    %10 = arith.addf %8, %9 : vector<17x54xf32>
    %11 = math.sqrt %10 : vector<17x54xf32>
    %c0_5 = arith.constant 0 : index
    %c0_6 = arith.constant 0 : index
    %c0_7 = arith.constant 0 : index
    %12 = vector.load %arg3[%c0_5, %c0_6, %c0_7] : memref<1x17x54xf32, #tpu.memory_space<vmem>>, vector<1x17x54xf32>
    %13 = vector.shape_cast %12 : vector<1x17x54xf32> to vector<17x54xf32>
    %14 = vector.shape_cast %11 : vector<17x54xf32> to vector<1x17x54xf32>
    tpu.vector_store %arg3[%c0_5, %c0_6, %c0_7], %14 {strides = array<i32>} : memref<1x17x54xf32, #tpu.memory_space<vmem>>, vector<1x17x54xf32>,
    return
  }
  func.func @transform_0(%arg0: i32) -> (i32, i32, i32) {
    %c0_i32 = arith.constant 0 : i32
    %c0_i32_0 = arith.constant 0 : i32
    %c0_i32_1 = arith.constant 0 : i32
    return %arg0, %c0_i32, %c0_i32_0 : i32, i32, i32
  }
  func.func @transform_1(%arg0: i32) -> (i32, i32) {
    %c0_i32 = arith.constant 0 : i32
    %c0_i32_0 = arith.constant 0 : i32
    %c0_i32_1 = arith.constant 0 : i32
    return %c0_i32, %c0_i32_0 : i32, i32
  }
  func.func @transform_2(%arg0: i32) -> (i32, i32, i32) {
    %c0_i32 = arith.constant 0 : i32
    %c0_i32_0 = arith.constant 0 : i32
    %c0_i32_1 = arith.constant 0 : i32
    return %arg0, %c0_i32, %c0_i32_0 : i32, i32, i32
  }
}

module attributes {stable_mosaic.version = 11 : i64} {
  func.func @_mrd_stack_kernel(%arg0: i32, %arg1: memref<1x1x1162xf32, #tpu.memory_space<vmem>>, %arg2: memref<1x1102xf32, #tpu.memory_space<vmem>>, %arg3: memref<8x9xf32, #tpu.memory_space<vmem>>, %arg4: memref<8x1xf32, #tpu.memory_space<vmem>>, %arg5: memref<8x72xf32, #tpu.memory_space<vmem>>, %arg6: memref<8x1xf32, #tpu.memory_space<vmem>>, %arg7: memref<1x72xf32, #tpu.memory_space<vmem>>, %arg8: memref<1x1xf32, #tpu.memory_space<vmem>>, %arg9: memref<1x8x1102xf32, #tpu.memory_space<vmem>>, %arg10: memref<1x8x1102xf32, #tpu.memory_space<vmem>>, %arg11: memref<1x1x1102xf32, #tpu.memory_space<vmem>>) attributes {dimension_semantics = [#tpu.dimension_semantics<parallel>], iteration_bounds = array<i64: 2>, scalar_prefetch = 0 : i64, scratch_operands = 0 : i64, tpu.core_type = #tpu.core_type<tc>, window_params = [{transform_indices = @transform_0, window_bounds = array<i64: 1, 1, 1162>}, {pipeline_mode = #tpu.pipeline_mode<synchronous>, transform_indices = @transform_1, window_bounds = array<i64: 1, 1102>}, {pipeline_mode = #tpu.pipeline_mode<synchronous>, transform_indices = @transform_2, window_bounds = array<i64: 8, 9>}, {pipeline_mode = #tpu.pipeline_mode<synchronous>, transform_indices = @transform_3, window_bounds = array<i64: 8, 1>}, {pipeline_mode = #tpu.pipeline_mode<synchronous>, transform_indices = @transform_4, window_bounds = array<i64: 8, 72>}, {pipeline_mode = #tpu.pipeline_mode<synchronous>, transform_indices = @transform_5, window_bounds = array<i64: 8, 1>}, {pipeline_mode = #tpu.pipeline_mode<synchronous>, transform_indices = @transform_6, window_bounds = array<i64: 1, 72>}, {pipeline_mode = #tpu.pipeline_mode<synchronous>, transform_indices = @transform_7, window_bounds = array<i64: 1, 1>}, {transform_indices = @transform_8, window_bounds = array<i64: 1, 8, 1102>}, {transform_indices = @transform_9, window_bounds = array<i64: 1, 8, 1102>}, {transform_indices = @transform_10, window_bounds = array<i64: 1, 1, 1102>}]} {
    %c0 = arith.constant 0 : index
    %c0_0 = arith.constant 0 : index
    %c0_1 = arith.constant 0 : index
    %0 = vector.load %arg1[%c0, %c0_0, %c0_1] : memref<1x1x1162xf32, #tpu.memory_space<vmem>>, vector<1x1x1162xf32>
    %1 = vector.shape_cast %0 : vector<1x1x1162xf32> to vector<1x1162xf32>
    %c0_2 = arith.constant 0 : index
    %c0_3 = arith.constant 0 : index
    %2 = vector.load %arg3[%c0_2, %c0_3] : memref<8x9xf32, #tpu.memory_space<vmem>>, vector<8x9xf32>
    %3 = vector.extract_strided_slice %1 {offsets = [0, 0], sizes = [1, 1102], strides = [1, 1]} : vector<1x1162xf32> to vector<1x1102xf32>
    %4 = vector.extract_strided_slice %1 {offsets = [0, 1], sizes = [1, 1102], strides = [1, 1]} : vector<1x1162xf32> to vector<1x1102xf32>
    %5 = vector.extract_strided_slice %1 {offsets = [0, 2], sizes = [1, 1102], strides = [1, 1]} : vector<1x1162xf32> to vector<1x1102xf32>
    %6 = vector.extract_strided_slice %1 {offsets = [0, 29], sizes = [1, 1102], strides = [1, 1]} : vector<1x1162xf32> to vector<1x1102xf32>
    %7 = vector.extract_strided_slice %1 {offsets = [0, 30], sizes = [1, 1102], strides = [1, 1]} : vector<1x1162xf32> to vector<1x1102xf32>
    %8 = vector.extract_strided_slice %1 {offsets = [0, 31], sizes = [1, 1102], strides = [1, 1]} : vector<1x1162xf32> to vector<1x1102xf32>
    %9 = vector.extract_strided_slice %1 {offsets = [0, 58], sizes = [1, 1102], strides = [1, 1]} : vector<1x1162xf32> to vector<1x1102xf32>
    %10 = vector.extract_strided_slice %1 {offsets = [0, 59], sizes = [1, 1102], strides = [1, 1]} : vector<1x1162xf32> to vector<1x1102xf32>
    %11 = vector.extract_strided_slice %1 {offsets = [0, 60], sizes = [1, 1102], strides = [1, 1]} : vector<1x1162xf32> to vector<1x1102xf32>
    %12 = tpu.concatenate %3, %4, %5, %6, %7, %8, %9, %10, %11 in 0 : vector<1x1102xf32>, vector<1x1102xf32>, vector<1x1102xf32>, vector<1x1102xf32>, vector<1x1102xf32>, vector<1x1102xf32>, vector<1x1102xf32>, vector<1x1102xf32>, vector<1x1102xf32> -> vector<9x1102xf32>
    %cst = arith.constant dense<0.000000e+00> : vector<8x1102xf32>
    %13 = tpu.matmul %2, %12, %cst {dimension_numbers = #tpu.dot_dimension_numbers<[1], [0], [0], [1], [0, 0, 1, 1], [], []>} : vector<8x9xf32>, vector<9x1102xf32>, vector<8x1102xf32> -> vector<8x1102xf32>
    %c0_4 = arith.constant 0 : index
    %c0_5 = arith.constant 0 : index
    %14 = vector.load %arg4[%c0_4, %c0_5] : memref<8x1xf32, #tpu.memory_space<vmem>>, vector<8x1xf32>
    %15 = vector.broadcast %14 : vector<8x1xf32> to vector<8x1102xf32>
    %16 = arith.addf %13, %15 : vector<8x1102xf32>
    %cst_6 = arith.constant 0.000000e+00 : f32
    %17 = vector.broadcast %cst_6 : f32 to vector<8x1102xf32>
    %18 = arith.cmpf oge, %16, %17 : vector<8x1102xf32>
    %cst_7 = arith.constant 1.000000e-01 : f32
    %19 = vector.broadcast %cst_7 : f32 to vector<8x1102xf32>
    %20 = arith.mulf %19, %16 : vector<8x1102xf32>
    %21 = arith.select %18, %16, %20 : vector<8x1102xi1>, vector<8x1102xf32>
    %cst_8 = arith.constant 0.000000e+00 : f32
    %22 = vector.broadcast %cst_8 : f32 to vector<8x30xf32>
    %23 = tpu.concatenate %22, %21 in 1 : vector<8x30xf32>, vector<8x1102xf32> -> vector<8x1132xf32>
    %24 = vector.extract_strided_slice %23 {offsets = [0, 0], sizes = [8, 1102], strides = [1, 1]} : vector<8x1132xf32> to vector<8x1102xf32>
    %c0_9 = arith.constant 0 : index
    %c0_10 = arith.constant 0 : index
    %25 = vector.load %arg2[%c0_9, %c0_10] : memref<1x1102xf32, #tpu.memory_space<vmem>>, vector<1x1102xf32>
    %26 = vector.broadcast %25 : vector<1x1102xf32> to vector<8x1102xf32>
    %27 = arith.mulf %24, %26 : vector<8x1102xf32>
    %cst_11 = arith.constant 0.000000e+00 : f32
    %28 = vector.broadcast %cst_11 : f32 to vector<8x60xf32>
    %29 = tpu.concatenate %27, %28 in 1 : vector<8x1102xf32>, vector<8x60xf32> -> vector<8x1162xf32>
    %c0_12 = arith.constant 0 : index
    %c0_13 = arith.constant 0 : index
    %c0_14 = arith.constant 0 : index
    %30 = vector.load %arg9[%c0_12, %c0_13, %c0_14] : memref<1x8x1102xf32, #tpu.memory_space<vmem>>, vector<1x8x1102xf32>
    %31 = vector.shape_cast %30 : vector<1x8x1102xf32> to vector<8x1102xf32>
    %32 = vector.shape_cast %27 : vector<8x1102xf32> to vector<1x8x1102xf32>
    tpu.vector_store %arg9[%c0_12, %c0_13, %c0_14], %32 {strides = array<i32>} : memref<1x8x1102xf32, #tpu.memory_space<vmem>>, vector<1x8x1102xf32>,
    %c0_15 = arith.constant 0 : index
    %c0_16 = arith.constant 0 : index
    %33 = vector.load %arg5[%c0_15, %c0_16] : memref<8x72xf32, #tpu.memory_space<vmem>>, vector<8x72xf32>
    %34 = vector.extract_strided_slice %29 {offsets = [0, 0], sizes = [8, 1102], strides = [1, 1]} : vector<8x1162xf32> to vector<8x1102xf32>
    %35 = vector.extract_strided_slice %29 {offsets = [0, 1], sizes = [8, 1102], strides = [1, 1]} : vector<8x1162xf32> to vector<8x1102xf32>
    %36 = vector.extract_strided_slice %29 {offsets = [0, 2], sizes = [8, 1102], strides = [1, 1]} : vector<8x1162xf32> to vector<8x1102xf32>
    %37 = vector.extract_strided_slice %29 {offsets = [0, 29], sizes = [8, 1102], strides = [1, 1]} : vector<8x1162xf32> to vector<8x1102xf32>
    %38 = vector.extract_strided_slice %29 {offsets = [0, 30], sizes = [8, 1102], strides = [1, 1]} : vector<8x1162xf32> to vector<8x1102xf32>
    %39 = vector.extract_strided_slice %29 {offsets = [0, 31], sizes = [8, 1102], strides = [1, 1]} : vector<8x1162xf32> to vector<8x1102xf32>
    %40 = vector.extract_strided_slice %29 {offsets = [0, 58], sizes = [8, 1102], strides = [1, 1]} : vector<8x1162xf32> to vector<8x1102xf32>
    %41 = vector.extract_strided_slice %29 {offsets = [0, 59], sizes = [8, 1102], strides = [1, 1]} : vector<8x1162xf32> to vector<8x1102xf32>
    %42 = vector.extract_strided_slice %29 {offsets = [0, 60], sizes = [8, 1102], strides = [1, 1]} : vector<8x1162xf32> to vector<8x1102xf32>
    %43 = tpu.concatenate %34, %35, %36, %37, %38, %39, %40, %41, %42 in 0 : vector<8x1102xf32>, vector<8x1102xf32>, vector<8x1102xf32>, vector<8x1102xf32>, vector<8x1102xf32>, vector<8x1102xf32>, vector<8x1102xf32>, vector<8x1102xf32>, vector<8x1102xf32> -> vector<72x1102xf32>
    %cst_17 = arith.constant dense<0.000000e+00> : vector<8x1102xf32>
    %44 = tpu.matmul %33, %43, %cst_17 {dimension_numbers = #tpu.dot_dimension_numbers<[1], [0], [0], [1], [0, 0, 1, 1], [], []>} : vector<8x72xf32>, vector<72x1102xf32>, vector<8x1102xf32> -> vector<8x1102xf32>
    %c0_18 = arith.constant 0 : index
    %c0_19 = arith.constant 0 : index
    %45 = vector.load %arg6[%c0_18, %c0_19] : memref<8x1xf32, #tpu.memory_space<vmem>>, vector<8x1xf32>
    %46 = vector.broadcast %45 : vector<8x1xf32> to vector<8x1102xf32>
    %47 = arith.addf %44, %46 : vector<8x1102xf32>
    %cst_20 = arith.constant 0.000000e+00 : f32
    %48 = vector.broadcast %cst_20 : f32 to vector<8x1102xf32>
    %49 = arith.cmpf oge, %47, %48 : vector<8x1102xf32>
    %cst_21 = arith.constant 1.000000e-01 : f32
    %50 = vector.broadcast %cst_21 : f32 to vector<8x1102xf32>
    %51 = arith.mulf %50, %47 : vector<8x1102xf32>
    %52 = arith.select %49, %47, %51 : vector<8x1102xi1>, vector<8x1102xf32>
    %cst_22 = arith.constant 0.000000e+00 : f32
    %53 = vector.broadcast %cst_22 : f32 to vector<8x30xf32>
    %54 = tpu.concatenate %53, %52 in 1 : vector<8x30xf32>, vector<8x1102xf32> -> vector<8x1132xf32>
    %55 = vector.extract_strided_slice %54 {offsets = [0, 0], sizes = [8, 1102], strides = [1, 1]} : vector<8x1132xf32> to vector<8x1102xf32>
    %c0_23 = arith.constant 0 : index
    %c0_24 = arith.constant 0 : index
    %56 = vector.load %arg2[%c0_23, %c0_24] : memref<1x1102xf32, #tpu.memory_space<vmem>>, vector<1x1102xf32>
    %57 = vector.broadcast %56 : vector<1x1102xf32> to vector<8x1102xf32>
    %58 = arith.mulf %55, %57 : vector<8x1102xf32>
    %cst_25 = arith.constant 0.000000e+00 : f32
    %59 = vector.broadcast %cst_25 : f32 to vector<8x60xf32>
    %60 = tpu.concatenate %58, %59 in 1 : vector<8x1102xf32>, vector<8x60xf32> -> vector<8x1162xf32>
    %c0_26 = arith.constant 0 : index
    %c0_27 = arith.constant 0 : index
    %c0_28 = arith.constant 0 : index
    %61 = vector.load %arg10[%c0_26, %c0_27, %c0_28] : memref<1x8x1102xf32, #tpu.memory_space<vmem>>, vector<1x8x1102xf32>
    %62 = vector.shape_cast %61 : vector<1x8x1102xf32> to vector<8x1102xf32>
    %63 = vector.shape_cast %58 : vector<8x1102xf32> to vector<1x8x1102xf32>
    tpu.vector_store %arg10[%c0_26, %c0_27, %c0_28], %63 {strides = array<i32>} : memref<1x8x1102xf32, #tpu.memory_space<vmem>>, vector<1x8x1102xf32>,
    %c0_29 = arith.constant 0 : index
    %c0_30 = arith.constant 0 : index
    %64 = vector.load %arg7[%c0_29, %c0_30] : memref<1x72xf32, #tpu.memory_space<vmem>>, vector<1x72xf32>
    %65 = vector.extract_strided_slice %60 {offsets = [0, 0], sizes = [8, 1102], strides = [1, 1]} : vector<8x1162xf32> to vector<8x1102xf32>
    %66 = vector.extract_strided_slice %60 {offsets = [0, 1], sizes = [8, 1102], strides = [1, 1]} : vector<8x1162xf32> to vector<8x1102xf32>
    %67 = vector.extract_strided_slice %60 {offsets = [0, 2], sizes = [8, 1102], strides = [1, 1]} : vector<8x1162xf32> to vector<8x1102xf32>
    %68 = vector.extract_strided_slice %60 {offsets = [0, 29], sizes = [8, 1102], strides = [1, 1]} : vector<8x1162xf32> to vector<8x1102xf32>
    %69 = vector.extract_strided_slice %60 {offsets = [0, 30], sizes = [8, 1102], strides = [1, 1]} : vector<8x1162xf32> to vector<8x1102xf32>
    %70 = vector.extract_strided_slice %60 {offsets = [0, 31], sizes = [8, 1102], strides = [1, 1]} : vector<8x1162xf32> to vector<8x1102xf32>
    %71 = vector.extract_strided_slice %60 {offsets = [0, 58], sizes = [8, 1102], strides = [1, 1]} : vector<8x1162xf32> to vector<8x1102xf32>
    %72 = vector.extract_strided_slice %60 {offsets = [0, 59], sizes = [8, 1102], strides = [1, 1]} : vector<8x1162xf32> to vector<8x1102xf32>
    %73 = vector.extract_strided_slice %60 {offsets = [0, 60], sizes = [8, 1102], strides = [1, 1]} : vector<8x1162xf32> to vector<8x1102xf32>
    %74 = tpu.concatenate %65, %66, %67, %68, %69, %70, %71, %72, %73 in 0 : vector<8x1102xf32>, vector<8x1102xf32>, vector<8x1102xf32>, vector<8x1102xf32>, vector<8x1102xf32>, vector<8x1102xf32>, vector<8x1102xf32>, vector<8x1102xf32>, vector<8x1102xf32> -> vector<72x1102xf32>
    %cst_31 = arith.constant dense<0.000000e+00> : vector<1x1102xf32>
    %75 = tpu.matmul %64, %74, %cst_31 {dimension_numbers = #tpu.dot_dimension_numbers<[1], [0], [0], [1], [0, 0, 1, 1], [], []>} : vector<1x72xf32>, vector<72x1102xf32>, vector<1x1102xf32> -> vector<1x1102xf32>
    %c0_32 = arith.constant 0 : index
    %c0_33 = arith.constant 0 : index
    %76 = vector.load %arg8[%c0_32, %c0_33] : memref<1x1xf32, #tpu.memory_space<vmem>>, vector<1x1xf32>
    %77 = vector.broadcast %76 : vector<1x1xf32> to vector<1x1102xf32>
    %78 = arith.addf %75, %77 : vector<1x1102xf32>
    %c0_34 = arith.constant 0 : index
    %c0_35 = arith.constant 0 : index
    %c0_36 = arith.constant 0 : index
    %79 = vector.load %arg11[%c0_34, %c0_35, %c0_36] : memref<1x1x1102xf32, #tpu.memory_space<vmem>>, vector<1x1x1102xf32>
    %80 = vector.shape_cast %79 : vector<1x1x1102xf32> to vector<1x1102xf32>
    %81 = vector.shape_cast %78 : vector<1x1102xf32> to vector<1x1x1102xf32>
    tpu.vector_store %arg11[%c0_34, %c0_35, %c0_36], %81 {strides = array<i32>} : memref<1x1x1102xf32, #tpu.memory_space<vmem>>, vector<1x1x1102xf32>,
    return
  }
  func.func @transform_0(%arg0: i32) -> (i32, i32, i32) {
    %c0_i32 = arith.constant 0 : i32
    %c0_i32_0 = arith.constant 0 : i32
    %c0_i32_1 = arith.constant 0 : i32
    return %arg0, %c0_i32, %c0_i32_0 : i32, i32, i32
  }
  func.func @transform_1(%arg0: i32) -> (i32, i32) {
    %c0_i32 = arith.constant 0 : i32
    %c0_i32_0 = arith.constant 0 : i32
    %c0_i32_1 = arith.constant 0 : i32
    return %c0_i32, %c0_i32_0 : i32, i32
  }
  func.func @transform_2(%arg0: i32) -> (i32, i32) {
    %c0_i32 = arith.constant 0 : i32
    %c0_i32_0 = arith.constant 0 : i32
    %c0_i32_1 = arith.constant 0 : i32
    return %c0_i32, %c0_i32_0 : i32, i32
  }
  func.func @transform_3(%arg0: i32) -> (i32, i32) {
    %c0_i32 = arith.constant 0 : i32
    %c0_i32_0 = arith.constant 0 : i32
    %c0_i32_1 = arith.constant 0 : i32
    return %c0_i32, %c0_i32_0 : i32, i32
  }
  func.func @transform_4(%arg0: i32) -> (i32, i32) {
    %c0_i32 = arith.constant 0 : i32
    %c0_i32_0 = arith.constant 0 : i32
    %c0_i32_1 = arith.constant 0 : i32
    return %c0_i32, %c0_i32_0 : i32, i32
  }
  func.func @transform_5(%arg0: i32) -> (i32, i32) {
    %c0_i32 = arith.constant 0 : i32
    %c0_i32_0 = arith.constant 0 : i32
    %c0_i32_1 = arith.constant 0 : i32
    return %c0_i32, %c0_i32_0 : i32, i32
  }
  func.func @transform_6(%arg0: i32) -> (i32, i32) {
    %c0_i32 = arith.constant 0 : i32
    %c0_i32_0 = arith.constant 0 : i32
    %c0_i32_1 = arith.constant 0 : i32
    return %c0_i32, %c0_i32_0 : i32, i32
  }
  func.func @transform_7(%arg0: i32) -> (i32, i32) {
    %c0_i32 = arith.constant 0 : i32
    %c0_i32_0 = arith.constant 0 : i32
    %c0_i32_1 = arith.constant 0 : i32
    return %c0_i32, %c0_i32_0 : i32, i32
  }
  func.func @transform_8(%arg0: i32) -> (i32, i32, i32) {
    %c0_i32 = arith.constant 0 : i32
    %c0_i32_0 = arith.constant 0 : i32
    %c0_i32_1 = arith.constant 0 : i32
    return %arg0, %c0_i32, %c0_i32_0 : i32, i32, i32
  }
  func.func @transform_9(%arg0: i32) -> (i32, i32, i32) {
    %c0_i32 = arith.constant 0 : i32
    %c0_i32_0 = arith.constant 0 : i32
    %c0_i32_1 = arith.constant 0 : i32
    return %arg0, %c0_i32, %c0_i32_0 : i32, i32, i32
  }
  func.func @transform_10(%arg0: i32) -> (i32, i32, i32) {
    %c0_i32 = arith.constant 0 : i32
    %c0_i32_0 = arith.constant 0 : i32
    %c0_i32_1 = arith.constant 0 : i32
    return %arg0, %c0_i32, %c0_i32_0 : i32, i32, i32
  }
}

module attributes {stable_mosaic.version = 11 : i64} {
  func.func @_mpd_stack_kernel(%arg0: i32, %arg1: memref<1x1x504xf32, #tpu.memory_space<vmem>>, %arg2: memref<4x5xf32, #tpu.memory_space<vmem>>, %arg3: memref<4x1xf32, #tpu.memory_space<vmem>>, %arg4: memref<496x184xf32, #tpu.memory_space<vmem>>, %arg5: memref<8x20xf32, #tpu.memory_space<vmem>>, %arg6: memref<8x1xf32, #tpu.memory_space<vmem>>, %arg7: memref<176x68xf32, #tpu.memory_space<vmem>>, %arg8: memref<1x24xf32, #tpu.memory_space<vmem>>, %arg9: memref<1x1xf32, #tpu.memory_space<vmem>>, %arg10: memref<1x4x176xf32, #tpu.memory_space<vmem>>, %arg11: memref<1x8x64xf32, #tpu.memory_space<vmem>>, %arg12: memref<1x1x64xf32, #tpu.memory_space<vmem>>) attributes {dimension_semantics = [#tpu.dimension_semantics<parallel>], iteration_bounds = array<i64: 2>, scalar_prefetch = 0 : i64, scratch_operands = 0 : i64, tpu.core_type = #tpu.core_type<tc>, window_params = [{transform_indices = @transform_0, window_bounds = array<i64: 1, 1, 504>}, {pipeline_mode = #tpu.pipeline_mode<synchronous>, transform_indices = @transform_1, window_bounds = array<i64: 4, 5>}, {pipeline_mode = #tpu.pipeline_mode<synchronous>, transform_indices = @transform_2, window_bounds = array<i64: 4, 1>}, {pipeline_mode = #tpu.pipeline_mode<synchronous>, transform_indices = @transform_3, window_bounds = array<i64: 496, 184>}, {pipeline_mode = #tpu.pipeline_mode<synchronous>, transform_indices = @transform_4, window_bounds = array<i64: 8, 20>}, {pipeline_mode = #tpu.pipeline_mode<synchronous>, transform_indices = @transform_5, window_bounds = array<i64: 8, 1>}, {pipeline_mode = #tpu.pipeline_mode<synchronous>, transform_indices = @transform_6, window_bounds = array<i64: 176, 68>}, {pipeline_mode = #tpu.pipeline_mode<synchronous>, transform_indices = @transform_7, window_bounds = array<i64: 1, 24>}, {pipeline_mode = #tpu.pipeline_mode<synchronous>, transform_indices = @transform_8, window_bounds = array<i64: 1, 1>}, {transform_indices = @transform_9, window_bounds = array<i64: 1, 4, 176>}, {transform_indices = @transform_10, window_bounds = array<i64: 1, 8, 64>}, {transform_indices = @transform_11, window_bounds = array<i64: 1, 1, 64>}]} {
    %c0 = arith.constant 0 : index
    %c0_0 = arith.constant 0 : index
    %c0_1 = arith.constant 0 : index
    %0 = vector.load %arg1[%c0, %c0_0, %c0_1] : memref<1x1x504xf32, #tpu.memory_space<vmem>>, vector<1x1x504xf32>
    %1 = vector.shape_cast %0 : vector<1x1x504xf32> to vector<1x504xf32>
    %c0_2 = arith.constant 0 : index
    %c0_3 = arith.constant 0 : index
    %2 = vector.load %arg2[%c0_2, %c0_3] : memref<4x5xf32, #tpu.memory_space<vmem>>, vector<4x5xf32>
    %3 = vector.extract_strided_slice %1 {offsets = [0, 0], sizes = [1, 496], strides = [1, 1]} : vector<1x504xf32> to vector<1x496xf32>
    %4 = vector.extract_strided_slice %1 {offsets = [0, 2], sizes = [1, 496], strides = [1, 1]} : vector<1x504xf32> to vector<1x496xf32>
    %5 = vector.extract_strided_slice %1 {offsets = [0, 4], sizes = [1, 496], strides = [1, 1]} : vector<1x504xf32> to vector<1x496xf32>
    %6 = vector.extract_strided_slice %1 {offsets = [0, 6], sizes = [1, 496], strides = [1, 1]} : vector<1x504xf32> to vector<1x496xf32>
    %7 = vector.extract_strided_slice %1 {offsets = [0, 8], sizes = [1, 496], strides = [1, 1]} : vector<1x504xf32> to vector<1x496xf32>
    %8 = tpu.concatenate %3, %4, %5, %6, %7 in 0 : vector<1x496xf32>, vector<1x496xf32>, vector<1x496xf32>, vector<1x496xf32>, vector<1x496xf32> -> vector<5x496xf32>
    %cst = arith.constant dense<0.000000e+00> : vector<4x496xf32>
    %9 = tpu.matmul %2, %8, %cst {dimension_numbers = #tpu.dot_dimension_numbers<[1], [0], [0], [1], [0, 0, 1, 1], [], []>} : vector<4x5xf32>, vector<5x496xf32>, vector<4x496xf32> -> vector<4x496xf32>
    %c0_4 = arith.constant 0 : index
    %c0_5 = arith.constant 0 : index
    %10 = vector.load %arg3[%c0_4, %c0_5] : memref<4x1xf32, #tpu.memory_space<vmem>>, vector<4x1xf32>
    %11 = vector.broadcast %10 : vector<4x1xf32> to vector<4x496xf32>
    %12 = arith.addf %9, %11 : vector<4x496xf32>
    %cst_6 = arith.constant 0.000000e+00 : f32
    %13 = vector.broadcast %cst_6 : f32 to vector<4x496xf32>
    %14 = arith.cmpf oge, %12, %13 : vector<4x496xf32>
    %cst_7 = arith.constant 1.000000e-01 : f32
    %15 = vector.broadcast %cst_7 : f32 to vector<4x496xf32>
    %16 = arith.mulf %15, %12 : vector<4x496xf32>
    %17 = arith.select %14, %12, %16 : vector<4x496xi1>, vector<4x496xf32>
    %c0_8 = arith.constant 0 : index
    %c0_9 = arith.constant 0 : index
    %18 = vector.load %arg4[%c0_8, %c0_9] : memref<496x184xf32, #tpu.memory_space<vmem>>, vector<496x184xf32>
    %cst_10 = arith.constant dense<0.000000e+00> : vector<4x184xf32>
    %19 = tpu.matmul %17, %18, %cst_10 {dimension_numbers = #tpu.dot_dimension_numbers<[1], [0], [0], [1], [0, 0, 1, 1], [], []>} : vector<4x496xf32>, vector<496x184xf32>, vector<4x184xf32> -> vector<4x184xf32>
    %20 = vector.extract_strided_slice %19 {offsets = [0, 0], sizes = [4, 176], strides = [1, 1]} : vector<4x184xf32> to vector<4x176xf32>
    %c0_11 = arith.constant 0 : index
    %c0_12 = arith.constant 0 : index
    %c0_13 = arith.constant 0 : index
    %21 = vector.load %arg10[%c0_11, %c0_12, %c0_13] : memref<1x4x176xf32, #tpu.memory_space<vmem>>, vector<1x4x176xf32>
    %22 = vector.shape_cast %21 : vector<1x4x176xf32> to vector<4x176xf32>
    %23 = vector.shape_cast %20 : vector<4x176xf32> to vector<1x4x176xf32>
    tpu.vector_store %arg10[%c0_11, %c0_12, %c0_13], %23 {strides = array<i32>} : memref<1x4x176xf32, #tpu.memory_space<vmem>>, vector<1x4x176xf32>,
    %c0_14 = arith.constant 0 : index
    %c0_15 = arith.constant 0 : index
    %24 = vector.load %arg5[%c0_14, %c0_15] : memref<8x20xf32, #tpu.memory_space<vmem>>, vector<8x20xf32>
    %25 = vector.extract_strided_slice %19 {offsets = [0, 0], sizes = [4, 176], strides = [1, 1]} : vector<4x184xf32> to vector<4x176xf32>
    %26 = vector.extract_strided_slice %19 {offsets = [0, 2], sizes = [4, 176], strides = [1, 1]} : vector<4x184xf32> to vector<4x176xf32>
    %27 = vector.extract_strided_slice %19 {offsets = [0, 4], sizes = [4, 176], strides = [1, 1]} : vector<4x184xf32> to vector<4x176xf32>
    %28 = vector.extract_strided_slice %19 {offsets = [0, 6], sizes = [4, 176], strides = [1, 1]} : vector<4x184xf32> to vector<4x176xf32>
    %29 = vector.extract_strided_slice %19 {offsets = [0, 8], sizes = [4, 176], strides = [1, 1]} : vector<4x184xf32> to vector<4x176xf32>
    %30 = tpu.concatenate %25, %26, %27, %28, %29 in 0 : vector<4x176xf32>, vector<4x176xf32>, vector<4x176xf32>, vector<4x176xf32>, vector<4x176xf32> -> vector<20x176xf32>
    %cst_16 = arith.constant dense<0.000000e+00> : vector<8x176xf32>
    %31 = tpu.matmul %24, %30, %cst_16 {dimension_numbers = #tpu.dot_dimension_numbers<[1], [0], [0], [1], [0, 0, 1, 1], [], []>} : vector<8x20xf32>, vector<20x176xf32>, vector<8x176xf32> -> vector<8x176xf32>
    %c0_17 = arith.constant 0 : index
    %c0_18 = arith.constant 0 : index
    %32 = vector.load %arg6[%c0_17, %c0_18] : memref<8x1xf32, #tpu.memory_space<vmem>>, vector<8x1xf32>
    %33 = vector.broadcast %32 : vector<8x1xf32> to vector<8x176xf32>
    %34 = arith.addf %31, %33 : vector<8x176xf32>
    %cst_19 = arith.constant 0.000000e+00 : f32
    %35 = vector.broadcast %cst_19 : f32 to vector<8x176xf32>
    %36 = arith.cmpf oge, %34, %35 : vector<8x176xf32>
    %cst_20 = arith.constant 1.000000e-01 : f32
    %37 = vector.broadcast %cst_20 : f32 to vector<8x176xf32>
    %38 = arith.mulf %37, %34 : vector<8x176xf32>
    %39 = arith.select %36, %34, %38 : vector<8x176xi1>, vector<8x176xf32>
    %c0_21 = arith.constant 0 : index
    %c0_22 = arith.constant 0 : index
    %40 = vector.load %arg7[%c0_21, %c0_22] : memref<176x68xf32, #tpu.memory_space<vmem>>, vector<176x68xf32>
    %cst_23 = arith.constant dense<0.000000e+00> : vector<8x68xf32>
    %41 = tpu.matmul %39, %40, %cst_23 {dimension_numbers = #tpu.dot_dimension_numbers<[1], [0], [0], [1], [0, 0, 1, 1], [], []>} : vector<8x176xf32>, vector<176x68xf32>, vector<8x68xf32> -> vector<8x68xf32>
    %42 = vector.extract_strided_slice %41 {offsets = [0, 0], sizes = [8, 64], strides = [1, 1]} : vector<8x68xf32> to vector<8x64xf32>
    %c0_24 = arith.constant 0 : index
    %c0_25 = arith.constant 0 : index
    %c0_26 = arith.constant 0 : index
    %43 = vector.load %arg11[%c0_24, %c0_25, %c0_26] : memref<1x8x64xf32, #tpu.memory_space<vmem>>, vector<1x8x64xf32>
    %44 = vector.shape_cast %43 : vector<1x8x64xf32> to vector<8x64xf32>
    %45 = vector.shape_cast %42 : vector<8x64xf32> to vector<1x8x64xf32>
    tpu.vector_store %arg11[%c0_24, %c0_25, %c0_26], %45 {strides = array<i32>} : memref<1x8x64xf32, #tpu.memory_space<vmem>>, vector<1x8x64xf32>,
    %c0_27 = arith.constant 0 : index
    %c0_28 = arith.constant 0 : index
    %46 = vector.load %arg8[%c0_27, %c0_28] : memref<1x24xf32, #tpu.memory_space<vmem>>, vector<1x24xf32>
    %47 = vector.extract_strided_slice %41 {offsets = [0, 0], sizes = [8, 64], strides = [1, 1]} : vector<8x68xf32> to vector<8x64xf32>
    %48 = vector.extract_strided_slice %41 {offsets = [0, 2], sizes = [8, 64], strides = [1, 1]} : vector<8x68xf32> to vector<8x64xf32>
    %49 = vector.extract_strided_slice %41 {offsets = [0, 4], sizes = [8, 64], strides = [1, 1]} : vector<8x68xf32> to vector<8x64xf32>
    %50 = tpu.concatenate %47, %48, %49 in 0 : vector<8x64xf32>, vector<8x64xf32>, vector<8x64xf32> -> vector<24x64xf32>
    %cst_29 = arith.constant dense<0.000000e+00> : vector<1x64xf32>
    %51 = tpu.matmul %46, %50, %cst_29 {dimension_numbers = #tpu.dot_dimension_numbers<[1], [0], [0], [1], [0, 0, 1, 1], [], []>} : vector<1x24xf32>, vector<24x64xf32>, vector<1x64xf32> -> vector<1x64xf32>
    %c0_30 = arith.constant 0 : index
    %c0_31 = arith.constant 0 : index
    %52 = vector.load %arg9[%c0_30, %c0_31] : memref<1x1xf32, #tpu.memory_space<vmem>>, vector<1x1xf32>
    %53 = vector.broadcast %52 : vector<1x1xf32> to vector<1x64xf32>
    %54 = arith.addf %51, %53 : vector<1x64xf32>
    %c0_32 = arith.constant 0 : index
    %c0_33 = arith.constant 0 : index
    %c0_34 = arith.constant 0 : index
    %55 = vector.load %arg12[%c0_32, %c0_33, %c0_34] : memref<1x1x64xf32, #tpu.memory_space<vmem>>, vector<1x1x64xf32>
    %56 = vector.shape_cast %55 : vector<1x1x64xf32> to vector<1x64xf32>
    %57 = vector.shape_cast %54 : vector<1x64xf32> to vector<1x1x64xf32>
    tpu.vector_store %arg12[%c0_32, %c0_33, %c0_34], %57 {strides = array<i32>} : memref<1x1x64xf32, #tpu.memory_space<vmem>>, vector<1x1x64xf32>,
    return
  }
  func.func @transform_0(%arg0: i32) -> (i32, i32, i32) {
    %c0_i32 = arith.constant 0 : i32
    %c0_i32_0 = arith.constant 0 : i32
    %c0_i32_1 = arith.constant 0 : i32
    return %arg0, %c0_i32, %c0_i32_0 : i32, i32, i32
  }
  func.func @transform_1(%arg0: i32) -> (i32, i32) {
    %c0_i32 = arith.constant 0 : i32
    %c0_i32_0 = arith.constant 0 : i32
    %c0_i32_1 = arith.constant 0 : i32
    return %c0_i32, %c0_i32_0 : i32, i32
  }
  func.func @transform_2(%arg0: i32) -> (i32, i32) {
    %c0_i32 = arith.constant 0 : i32
    %c0_i32_0 = arith.constant 0 : i32
    %c0_i32_1 = arith.constant 0 : i32
    return %c0_i32, %c0_i32_0 : i32, i32
  }
  func.func @transform_3(%arg0: i32) -> (i32, i32) {
    %c0_i32 = arith.constant 0 : i32
    %c0_i32_0 = arith.constant 0 : i32
    %c0_i32_1 = arith.constant 0 : i32
    return %c0_i32, %c0_i32_0 : i32, i32
  }
  func.func @transform_4(%arg0: i32) -> (i32, i32) {
    %c0_i32 = arith.constant 0 : i32
    %c0_i32_0 = arith.constant 0 : i32
    %c0_i32_1 = arith.constant 0 : i32
    return %c0_i32, %c0_i32_0 : i32, i32
  }
  func.func @transform_5(%arg0: i32) -> (i32, i32) {
    %c0_i32 = arith.constant 0 : i32
    %c0_i32_0 = arith.constant 0 : i32
    %c0_i32_1 = arith.constant 0 : i32
    return %c0_i32, %c0_i32_0 : i32, i32
  }
  func.func @transform_6(%arg0: i32) -> (i32, i32) {
    %c0_i32 = arith.constant 0 : i32
    %c0_i32_0 = arith.constant 0 : i32
    %c0_i32_1 = arith.constant 0 : i32
    return %c0_i32, %c0_i32_0 : i32, i32
  }
  func.func @transform_7(%arg0: i32) -> (i32, i32) {
    %c0_i32 = arith.constant 0 : i32
    %c0_i32_0 = arith.constant 0 : i32
    %c0_i32_1 = arith.constant 0 : i32
    return %c0_i32, %c0_i32_0 : i32, i32
  }
  func.func @transform_8(%arg0: i32) -> (i32, i32) {
    %c0_i32 = arith.constant 0 : i32
    %c0_i32_0 = arith.constant 0 : i32
    %c0_i32_1 = arith.constant 0 : i32
    return %c0_i32, %c0_i32_0 : i32, i32
  }
  func.func @transform_9(%arg0: i32) -> (i32, i32, i32) {
    %c0_i32 = arith.constant 0 : i32
    %c0_i32_0 = arith.constant 0 : i32
    %c0_i32_1 = arith.constant 0 : i32
    return %arg0, %c0_i32, %c0_i32_0 : i32, i32, i32
  }
  func.func @transform_10(%arg0: i32) -> (i32, i32, i32) {
    %c0_i32 = arith.constant 0 : i32
    %c0_i32_0 = arith.constant 0 : i32
    %c0_i32_1 = arith.constant 0 : i32
    return %arg0, %c0_i32, %c0_i32_0 : i32, i32, i32
  }
  func.func @transform_11(%arg0: i32) -> (i32, i32, i32) {
    %c0_i32 = arith.constant 0 : i32
    %c0_i32_0 = arith.constant 0 : i32
    %c0_i32_1 = arith.constant 0 : i32
    return %arg0, %c0_i32, %c0_i32_0 : i32, i32, i32
  }
}

module attributes {stable_mosaic.version = 11 : i64} {
  func.func @_mpd_stack_kernel(%arg0: i32, %arg1: memref<1x1x516xf32, #tpu.memory_space<vmem>>, %arg2: memref<4x5xf32, #tpu.memory_space<vmem>>, %arg3: memref<4x1xf32, #tpu.memory_space<vmem>>, %arg4: memref<504x198xf32, #tpu.memory_space<vmem>>, %arg5: memref<8x20xf32, #tpu.memory_space<vmem>>, %arg6: memref<8x1xf32, #tpu.memory_space<vmem>>, %arg7: memref<186x72xf32, #tpu.memory_space<vmem>>, %arg8: memref<1x24xf32, #tpu.memory_space<vmem>>, %arg9: memref<1x1xf32, #tpu.memory_space<vmem>>, %arg10: memref<1x4x186xf32, #tpu.memory_space<vmem>>, %arg11: memref<1x8x66xf32, #tpu.memory_space<vmem>>, %arg12: memref<1x1x66xf32, #tpu.memory_space<vmem>>) attributes {dimension_semantics = [#tpu.dimension_semantics<parallel>], iteration_bounds = array<i64: 2>, scalar_prefetch = 0 : i64, scratch_operands = 0 : i64, tpu.core_type = #tpu.core_type<tc>, window_params = [{transform_indices = @transform_0, window_bounds = array<i64: 1, 1, 516>}, {pipeline_mode = #tpu.pipeline_mode<synchronous>, transform_indices = @transform_1, window_bounds = array<i64: 4, 5>}, {pipeline_mode = #tpu.pipeline_mode<synchronous>, transform_indices = @transform_2, window_bounds = array<i64: 4, 1>}, {pipeline_mode = #tpu.pipeline_mode<synchronous>, transform_indices = @transform_3, window_bounds = array<i64: 504, 198>}, {pipeline_mode = #tpu.pipeline_mode<synchronous>, transform_indices = @transform_4, window_bounds = array<i64: 8, 20>}, {pipeline_mode = #tpu.pipeline_mode<synchronous>, transform_indices = @transform_5, window_bounds = array<i64: 8, 1>}, {pipeline_mode = #tpu.pipeline_mode<synchronous>, transform_indices = @transform_6, window_bounds = array<i64: 186, 72>}, {pipeline_mode = #tpu.pipeline_mode<synchronous>, transform_indices = @transform_7, window_bounds = array<i64: 1, 24>}, {pipeline_mode = #tpu.pipeline_mode<synchronous>, transform_indices = @transform_8, window_bounds = array<i64: 1, 1>}, {transform_indices = @transform_9, window_bounds = array<i64: 1, 4, 186>}, {transform_indices = @transform_10, window_bounds = array<i64: 1, 8, 66>}, {transform_indices = @transform_11, window_bounds = array<i64: 1, 1, 66>}]} {
    %c0 = arith.constant 0 : index
    %c0_0 = arith.constant 0 : index
    %c0_1 = arith.constant 0 : index
    %0 = vector.load %arg1[%c0, %c0_0, %c0_1] : memref<1x1x516xf32, #tpu.memory_space<vmem>>, vector<1x1x516xf32>
    %1 = vector.shape_cast %0 : vector<1x1x516xf32> to vector<1x516xf32>
    %c0_2 = arith.constant 0 : index
    %c0_3 = arith.constant 0 : index
    %2 = vector.load %arg2[%c0_2, %c0_3] : memref<4x5xf32, #tpu.memory_space<vmem>>, vector<4x5xf32>
    %3 = vector.extract_strided_slice %1 {offsets = [0, 0], sizes = [1, 504], strides = [1, 1]} : vector<1x516xf32> to vector<1x504xf32>
    %4 = vector.extract_strided_slice %1 {offsets = [0, 3], sizes = [1, 504], strides = [1, 1]} : vector<1x516xf32> to vector<1x504xf32>
    %5 = vector.extract_strided_slice %1 {offsets = [0, 6], sizes = [1, 504], strides = [1, 1]} : vector<1x516xf32> to vector<1x504xf32>
    %6 = vector.extract_strided_slice %1 {offsets = [0, 9], sizes = [1, 504], strides = [1, 1]} : vector<1x516xf32> to vector<1x504xf32>
    %7 = vector.extract_strided_slice %1 {offsets = [0, 12], sizes = [1, 504], strides = [1, 1]} : vector<1x516xf32> to vector<1x504xf32>
    %8 = tpu.concatenate %3, %4, %5, %6, %7 in 0 : vector<1x504xf32>, vector<1x504xf32>, vector<1x504xf32>, vector<1x504xf32>, vector<1x504xf32> -> vector<5x504xf32>
    %cst = arith.constant dense<0.000000e+00> : vector<4x504xf32>
    %9 = tpu.matmul %2, %8, %cst {dimension_numbers = #tpu.dot_dimension_numbers<[1], [0], [0], [1], [0, 0, 1, 1], [], []>} : vector<4x5xf32>, vector<5x504xf32>, vector<4x504xf32> -> vector<4x504xf32>
    %c0_4 = arith.constant 0 : index
    %c0_5 = arith.constant 0 : index
    %10 = vector.load %arg3[%c0_4, %c0_5] : memref<4x1xf32, #tpu.memory_space<vmem>>, vector<4x1xf32>
    %11 = vector.broadcast %10 : vector<4x1xf32> to vector<4x504xf32>
    %12 = arith.addf %9, %11 : vector<4x504xf32>
    %cst_6 = arith.constant 0.000000e+00 : f32
    %13 = vector.broadcast %cst_6 : f32 to vector<4x504xf32>
    %14 = arith.cmpf oge, %12, %13 : vector<4x504xf32>
    %cst_7 = arith.constant 1.000000e-01 : f32
    %15 = vector.broadcast %cst_7 : f32 to vector<4x504xf32>
    %16 = arith.mulf %15, %12 : vector<4x504xf32>
    %17 = arith.select %14, %12, %16 : vector<4x504xi1>, vector<4x504xf32>
    %c0_8 = arith.constant 0 : index
    %c0_9 = arith.constant 0 : index
    %18 = vector.load %arg4[%c0_8, %c0_9] : memref<504x198xf32, #tpu.memory_space<vmem>>, vector<504x198xf32>
    %cst_10 = arith.constant dense<0.000000e+00> : vector<4x198xf32>
    %19 = tpu.matmul %17, %18, %cst_10 {dimension_numbers = #tpu.dot_dimension_numbers<[1], [0], [0], [1], [0, 0, 1, 1], [], []>} : vector<4x504xf32>, vector<504x198xf32>, vector<4x198xf32> -> vector<4x198xf32>
    %20 = vector.extract_strided_slice %19 {offsets = [0, 0], sizes = [4, 186], strides = [1, 1]} : vector<4x198xf32> to vector<4x186xf32>
    %c0_11 = arith.constant 0 : index
    %c0_12 = arith.constant 0 : index
    %c0_13 = arith.constant 0 : index
    %21 = vector.load %arg10[%c0_11, %c0_12, %c0_13] : memref<1x4x186xf32, #tpu.memory_space<vmem>>, vector<1x4x186xf32>
    %22 = vector.shape_cast %21 : vector<1x4x186xf32> to vector<4x186xf32>
    %23 = vector.shape_cast %20 : vector<4x186xf32> to vector<1x4x186xf32>
    tpu.vector_store %arg10[%c0_11, %c0_12, %c0_13], %23 {strides = array<i32>} : memref<1x4x186xf32, #tpu.memory_space<vmem>>, vector<1x4x186xf32>,
    %c0_14 = arith.constant 0 : index
    %c0_15 = arith.constant 0 : index
    %24 = vector.load %arg5[%c0_14, %c0_15] : memref<8x20xf32, #tpu.memory_space<vmem>>, vector<8x20xf32>
    %25 = vector.extract_strided_slice %19 {offsets = [0, 0], sizes = [4, 186], strides = [1, 1]} : vector<4x198xf32> to vector<4x186xf32>
    %26 = vector.extract_strided_slice %19 {offsets = [0, 3], sizes = [4, 186], strides = [1, 1]} : vector<4x198xf32> to vector<4x186xf32>
    %27 = vector.extract_strided_slice %19 {offsets = [0, 6], sizes = [4, 186], strides = [1, 1]} : vector<4x198xf32> to vector<4x186xf32>
    %28 = vector.extract_strided_slice %19 {offsets = [0, 9], sizes = [4, 186], strides = [1, 1]} : vector<4x198xf32> to vector<4x186xf32>
    %29 = vector.extract_strided_slice %19 {offsets = [0, 12], sizes = [4, 186], strides = [1, 1]} : vector<4x198xf32> to vector<4x186xf32>
    %30 = tpu.concatenate %25, %26, %27, %28, %29 in 0 : vector<4x186xf32>, vector<4x186xf32>, vector<4x186xf32>, vector<4x186xf32>, vector<4x186xf32> -> vector<20x186xf32>
    %cst_16 = arith.constant dense<0.000000e+00> : vector<8x186xf32>
    %31 = tpu.matmul %24, %30, %cst_16 {dimension_numbers = #tpu.dot_dimension_numbers<[1], [0], [0], [1], [0, 0, 1, 1], [], []>} : vector<8x20xf32>, vector<20x186xf32>, vector<8x186xf32> -> vector<8x186xf32>
    %c0_17 = arith.constant 0 : index
    %c0_18 = arith.constant 0 : index
    %32 = vector.load %arg6[%c0_17, %c0_18] : memref<8x1xf32, #tpu.memory_space<vmem>>, vector<8x1xf32>
    %33 = vector.broadcast %32 : vector<8x1xf32> to vector<8x186xf32>
    %34 = arith.addf %31, %33 : vector<8x186xf32>
    %cst_19 = arith.constant 0.000000e+00 : f32
    %35 = vector.broadcast %cst_19 : f32 to vector<8x186xf32>
    %36 = arith.cmpf oge, %34, %35 : vector<8x186xf32>
    %cst_20 = arith.constant 1.000000e-01 : f32
    %37 = vector.broadcast %cst_20 : f32 to vector<8x186xf32>
    %38 = arith.mulf %37, %34 : vector<8x186xf32>
    %39 = arith.select %36, %34, %38 : vector<8x186xi1>, vector<8x186xf32>
    %c0_21 = arith.constant 0 : index
    %c0_22 = arith.constant 0 : index
    %40 = vector.load %arg7[%c0_21, %c0_22] : memref<186x72xf32, #tpu.memory_space<vmem>>, vector<186x72xf32>
    %cst_23 = arith.constant dense<0.000000e+00> : vector<8x72xf32>
    %41 = tpu.matmul %39, %40, %cst_23 {dimension_numbers = #tpu.dot_dimension_numbers<[1], [0], [0], [1], [0, 0, 1, 1], [], []>} : vector<8x186xf32>, vector<186x72xf32>, vector<8x72xf32> -> vector<8x72xf32>
    %42 = vector.extract_strided_slice %41 {offsets = [0, 0], sizes = [8, 66], strides = [1, 1]} : vector<8x72xf32> to vector<8x66xf32>
    %c0_24 = arith.constant 0 : index
    %c0_25 = arith.constant 0 : index
    %c0_26 = arith.constant 0 : index
    %43 = vector.load %arg11[%c0_24, %c0_25, %c0_26] : memref<1x8x66xf32, #tpu.memory_space<vmem>>, vector<1x8x66xf32>
    %44 = vector.shape_cast %43 : vector<1x8x66xf32> to vector<8x66xf32>
    %45 = vector.shape_cast %42 : vector<8x66xf32> to vector<1x8x66xf32>
    tpu.vector_store %arg11[%c0_24, %c0_25, %c0_26], %45 {strides = array<i32>} : memref<1x8x66xf32, #tpu.memory_space<vmem>>, vector<1x8x66xf32>,
    %c0_27 = arith.constant 0 : index
    %c0_28 = arith.constant 0 : index
    %46 = vector.load %arg8[%c0_27, %c0_28] : memref<1x24xf32, #tpu.memory_space<vmem>>, vector<1x24xf32>
    %47 = vector.extract_strided_slice %41 {offsets = [0, 0], sizes = [8, 66], strides = [1, 1]} : vector<8x72xf32> to vector<8x66xf32>
    %48 = vector.extract_strided_slice %41 {offsets = [0, 3], sizes = [8, 66], strides = [1, 1]} : vector<8x72xf32> to vector<8x66xf32>
    %49 = vector.extract_strided_slice %41 {offsets = [0, 6], sizes = [8, 66], strides = [1, 1]} : vector<8x72xf32> to vector<8x66xf32>
    %50 = tpu.concatenate %47, %48, %49 in 0 : vector<8x66xf32>, vector<8x66xf32>, vector<8x66xf32> -> vector<24x66xf32>
    %cst_29 = arith.constant dense<0.000000e+00> : vector<1x66xf32>
    %51 = tpu.matmul %46, %50, %cst_29 {dimension_numbers = #tpu.dot_dimension_numbers<[1], [0], [0], [1], [0, 0, 1, 1], [], []>} : vector<1x24xf32>, vector<24x66xf32>, vector<1x66xf32> -> vector<1x66xf32>
    %c0_30 = arith.constant 0 : index
    %c0_31 = arith.constant 0 : index
    %52 = vector.load %arg9[%c0_30, %c0_31] : memref<1x1xf32, #tpu.memory_space<vmem>>, vector<1x1xf32>
    %53 = vector.broadcast %52 : vector<1x1xf32> to vector<1x66xf32>
    %54 = arith.addf %51, %53 : vector<1x66xf32>
    %c0_32 = arith.constant 0 : index
    %c0_33 = arith.constant 0 : index
    %c0_34 = arith.constant 0 : index
    %55 = vector.load %arg12[%c0_32, %c0_33, %c0_34] : memref<1x1x66xf32, #tpu.memory_space<vmem>>, vector<1x1x66xf32>
    %56 = vector.shape_cast %55 : vector<1x1x66xf32> to vector<1x66xf32>
    %57 = vector.shape_cast %54 : vector<1x66xf32> to vector<1x1x66xf32>
    tpu.vector_store %arg12[%c0_32, %c0_33, %c0_34], %57 {strides = array<i32>} : memref<1x1x66xf32, #tpu.memory_space<vmem>>, vector<1x1x66xf32>,
    return
  }
  func.func @transform_0(%arg0: i32) -> (i32, i32, i32) {
    %c0_i32 = arith.constant 0 : i32
    %c0_i32_0 = arith.constant 0 : i32
    %c0_i32_1 = arith.constant 0 : i32
    return %arg0, %c0_i32, %c0_i32_0 : i32, i32, i32
  }
  func.func @transform_1(%arg0: i32) -> (i32, i32) {
    %c0_i32 = arith.constant 0 : i32
    %c0_i32_0 = arith.constant 0 : i32
    %c0_i32_1 = arith.constant 0 : i32
    return %c0_i32, %c0_i32_0 : i32, i32
  }
  func.func @transform_2(%arg0: i32) -> (i32, i32) {
    %c0_i32 = arith.constant 0 : i32
    %c0_i32_0 = arith.constant 0 : i32
    %c0_i32_1 = arith.constant 0 : i32
    return %c0_i32, %c0_i32_0 : i32, i32
  }
  func.func @transform_3(%arg0: i32) -> (i32, i32) {
    %c0_i32 = arith.constant 0 : i32
    %c0_i32_0 = arith.constant 0 : i32
    %c0_i32_1 = arith.constant 0 : i32
    return %c0_i32, %c0_i32_0 : i32, i32
  }
  func.func @transform_4(%arg0: i32) -> (i32, i32) {
    %c0_i32 = arith.constant 0 : i32
    %c0_i32_0 = arith.constant 0 : i32
    %c0_i32_1 = arith.constant 0 : i32
    return %c0_i32, %c0_i32_0 : i32, i32
  }
  func.func @transform_5(%arg0: i32) -> (i32, i32) {
    %c0_i32 = arith.constant 0 : i32
    %c0_i32_0 = arith.constant 0 : i32
    %c0_i32_1 = arith.constant 0 : i32
    return %c0_i32, %c0_i32_0 : i32, i32
  }
  func.func @transform_6(%arg0: i32) -> (i32, i32) {
    %c0_i32 = arith.constant 0 : i32
    %c0_i32_0 = arith.constant 0 : i32
    %c0_i32_1 = arith.constant 0 : i32
    return %c0_i32, %c0_i32_0 : i32, i32
  }
  func.func @transform_7(%arg0: i32) -> (i32, i32) {
    %c0_i32 = arith.constant 0 : i32
    %c0_i32_0 = arith.constant 0 : i32
    %c0_i32_1 = arith.constant 0 : i32
    return %c0_i32, %c0_i32_0 : i32, i32
  }
  func.func @transform_8(%arg0: i32) -> (i32, i32) {
    %c0_i32 = arith.constant 0 : i32
    %c0_i32_0 = arith.constant 0 : i32
    %c0_i32_1 = arith.constant 0 : i32
    return %c0_i32, %c0_i32_0 : i32, i32
  }
  func.func @transform_9(%arg0: i32) -> (i32, i32, i32) {
    %c0_i32 = arith.constant 0 : i32
    %c0_i32_0 = arith.constant 0 : i32
    %c0_i32_1 = arith.constant 0 : i32
    return %arg0, %c0_i32, %c0_i32_0 : i32, i32, i32
  }
  func.func @transform_10(%arg0: i32) -> (i32, i32, i32) {
    %c0_i32 = arith.constant 0 : i32
    %c0_i32_0 = arith.constant 0 : i32
    %c0_i32_1 = arith.constant 0 : i32
    return %arg0, %c0_i32, %c0_i32_0 : i32, i32, i32
  }
  func.func @transform_11(%arg0: i32) -> (i32, i32, i32) {
    %c0_i32 = arith.constant 0 : i32
    %c0_i32_0 = arith.constant 0 : i32
    %c0_i32_1 = arith.constant 0 : i32
    return %arg0, %c0_i32, %c0_i32_0 : i32, i32, i32
  }
}

</mosaic_0001>

<bundles_post_ra>
// kernel: multiple_discriminator_forward.10
= control target key start
LH: loop header
LB: loop body
LE: loop exit
PB: predicated region body
PF: predicated region fallthrough
CT: control target
= control target key end

     0   :  { %s407_s9 = smov 0   ;;  %s443_s0 = inlined_call_operand.vmem [shape: f32[2,16,114], index: 0, kind: input, shape index: {}]   ;;  %s444_s1 = inlined_call_operand.vmem [shape: f32[18,16], index: 1, kind: input, shape index: {}]   ;;  %s445_s2 = inlined_call_operand.vmem [shape: f32[2,9,114], index: 2, kind: output, shape index: {}]  }
   0x1 LB: > { %s327_s10 = sadd.s32 4294967295, %s387_s9   ;;  %p331_p0 = scmp.ge.s32.totalorder %s387_s9, 1  ;;  %s387_s9 = sphi %s407_s9, %s12_s9  }
   0x2   : > { %p112_p1 = scmp.lt.s32.totalorder %s387_s9, 3 }
   0x4   : > { %p113_p2 = pnand %p331_p0, %p112_p1 }
   0x5   : > { %p134_p3 = scmp.lt.s32.totalorder (!%p113_p2), %s327_s10, 1  ;;  %v389_v0 = vmov (!%p113_p2), 0.0|0.0   ;;  %vm390_vm0 = vmmov (!%p113_p2), 0   ;;  %v391_v1 = vmov (!%p113_p2), 0.0   ;;  %v145_v5 = vld [vmem:[%s444_s1 + $0x8] sm:$0xff] (!%p113_p2)  ;;  %vm149_vm1 = vcmask (!%p113_p2), 130048  }
   0x6   : > { %116 = sbr.rel (%p113_p2) target bundleno = 263 (0x107), region = 28  ;;  %364 = vmatprep.subr.bf16.mxu1 (!%p113_p2), %v389_v0  ;;  %355 = vmatprep.mubr.msk.f32.mxu1 (!%p113_p2), %vm390_vm0, %v391_v1  ;;  %v144_v6 = vld [vmem:[%s444_s1] sm:$0xff] (!%p113_p2)  ;;  %v146_v7 = vld [vmem:[%s444_s1 + $0x10] sm:$0x3] (!%p113_p2)  ;;  %vm244_vm2 = vcmask (!%p113_p2), 1046528   ;;  %vm270_vm3 = vcmask (!%p113_p2), 925696  }
   0x7   : > { %361 = vmatprep.subr.bf16.mxu0 (!%p113_p2), %v389_v0  ;;  %352 = vmatprep.mubr.msk.f32.mxu0 (!%p113_p2), %vm390_vm0, %v391_v1  ;;  %vm268_vm5 = vcmask (!%p113_p2), 932864  }
   0xd   : > { %s447_s10 = smov (!%p134_p3, %s327_s10), 1 }
   0xe   : > { %s341_s11 = sshll.u32 %s447_s10, 4 }
   0xf   : > { %s138_s14 = scalar_lea.vmem %s443_s0, %s341_s11  ;;  %s143_s23 = scalar_lea.vmem %s445_s2, %s341_s11 }
  0x10   : > { %v147_v2 = vld [vmem:[%s138_s14] sm:$0xff]  ;;  %v148_v3 = vld [vmem:[%s138_s14 + $0x8] sm:$0xff] }
  0x11   : > { %v362_v4 = vpack.c.bf16 %v148_v3, %v147_v2 }
  0x13   : > { %365 = vmatpush3.bf16.msra.mxu1 %v362_v4  ;;  %363 = vmatpush3.bf16.msra.mxu0 %v362_v4 }
  0x16   : > { %356 = vmatmul.mubr.msk.f32.vlgmr.msra.gmra.mrb[0].mxu1 %vm149_vm1, %v145_v5  ;;  %353 = vmatmul.mubr.msk.f32.vlgmr.msra.gmra.mrb[0].mxu0 %vm149_vm1, %v144_v6 }
  0x17   : > { %358 = vmatprep.mubr.msk.f32.mxu1 %vm390_vm0, %v391_v1 }
  0x1a   : > { %359 = vmatmul.mubr.msk.f32.gmra.mrb[2].mxu1 %vm149_vm1, %v146_v7 }
  0xe9   : > { %v230_v8 = vpop.f32.mrb[0].mxu1  ;;  %v225_v9 = vpop.f32.mrb[0].mxu0 }
  0xea   : > { %v357_v10 = vpop.f32.mrb[1].mxu1  ;;  %v354_v11 = vpop.f32.mrb[1].mxu0  ;;  %v240_v12 = vmul.f32 %v230_v8, %v230_v8  ;;  %v239_v16 = vmul.f32 %v225_v9, %v225_v9 }
  0xec   : > { %v245_v17 = vrot.slane %v240_v12, 1 }
  0xed   : > { %v235_v13 = vpop.f32.mrb[2].mxu1 }
  0xee   : > { %v241_v14 = vmul.f32 %v235_v13, %v235_v13  ;;  %v360_v15 = vpop.f32.mrb[3].mxu1 }
  0xf0   : > { %v246_v18 = vrot.slane %v241_v14, 1 }
  0xf2   : > { %v251_v19 = vadd.f32 %v246_v18, %v240_v12  ;;  %v247_v20 = vsel %vm244_vm2, %v245_v17, %v246_v18 }
  0xf3   : > { %v250_v21 = vadd.f32 %v247_v20, %v239_v16 }
  0xf4   : > { %v253_v22 = vadd.f32 1e-09, %v251_v19 }
  0xf5   : > { %v252_v23 = vadd.f32 1e-09, %v250_v21 }
  0xf6   : > { %377 = vrsqrt.f32 %v253_v22  ;;  %vm263_vm4 = vcmp.eq.f32.partialorder %v253_v22, inf  ;;  %v266_v27 = vand.u32 2147483648, %v253_v22  ;;  %vm265_vm6 = vcmp.eq.f32.partialorder %v253_v22, 0.0 }
  0xf7   : > { %379 = vrsqrt.f32 %v252_v23  ;;  %vm256_vm7 = vcmp.eq.f32.partialorder %v252_v23, inf  ;;  %v259_v30 = vand.u32 2147483648, %v252_v23  ;;  %vm258_vm8 = vcmp.eq.f32.partialorder %v252_v23, 0.0 }
 0x100   : > { %v378_v24 = vpop.eup %377 }
 0x101   : > { %v380_v25 = vpop.eup %379  ;;  %v262_v26 = vmul.f32 %v378_v24, %v253_v22 }
 0x102   : > { %v255_v28 = vmul.f32 %v380_v25, %v252_v23 }
 0x103   : > { %v264_v29 = vsel %vm263_vm4, %v253_v22, %v262_v26 }
 0x104   : > { %v267_v31 = vsel %vm265_vm6, %v266_v27, %v264_v29  ;;  %v257_v32 = vsel %vm256_vm7, %v252_v23, %v255_v28 }
 0x105   : > { %271 = vst.msk [vmem:[%s143_s23 + $0x8] sm:$0x1] %vm270_vm3, %v267_v31  ;;  %v260_v33 = vsel %vm258_vm8, %v259_v30, %v257_v32 }
 0x106   : > { %269 = vst.msk [vmem:[%s143_s23] sm:$0xff] %vm268_vm5, %v260_v33 }
 0x107 PF: > { %s12_s9 = sadd.s32 1, %s387_s9  }
 0x108   : > { %p9_p4 = scmp.ge.s32.totalorder %s12_s9, 4  }
 0x10a   :  { %11 = sbr.rel (!%p9_p4) target bundleno = 1 (0x1), region = 58 }

// kernel: multiple_discriminator_forward.8
= control target key start
LH: loop header
LB: loop body
LE: loop exit
PB: predicated region body
PF: predicated region fallthrough
CT: control target
= control target key end

     0   :  { %s465_s9 = smov 0   ;;  %s508_s0 = inlined_call_operand.vmem [shape: f32[2,32,54], index: 0, kind: input, shape index: {}]   ;;  %s509_s1 = inlined_call_operand.vmem [shape: f32[34,32], index: 1, kind: input, shape index: {}]   ;;  %s510_s2 = inlined_call_operand.vmem [shape: f32[2,17,54], index: 2, kind: output, shape index: {}]  }
   0x1 LB: > { %s363_s10 = sadd.s32 4294967295, %s445_s9   ;;  %p367_p0 = scmp.ge.s32.totalorder %s445_s9, 1  ;;  %s445_s9 = sphi %s465_s9, %s12_s9  }
   0x2   : > { %p112_p1 = scmp.lt.s32.totalorder %s445_s9, 3 }
   0x4   : > { %p113_p2 = pnand %p367_p0, %p112_p1 }
   0x5   : > { %p134_p3 = scmp.lt.s32.totalorder (!%p113_p2), %s363_s10, 1  ;;  %v447_v0 = vmov (!%p113_p2), 0.0|0.0   ;;  %vm448_vm0 = vmmov (!%p113_p2), 0   ;;  %v449_v1 = vmov (!%p113_p2), 0.0   ;;  %v144_v8 = vld [vmem:[%s509_s1] sm:$0xff] (!%p113_p2)  ;;  %vm153_vm1 = vcmask (!%p113_p2), 261120  }
   0x6   : > { %116 = sbr.rel (%p113_p2) target bundleno = 271 (0x10f), region = 28  ;;  %411 = vmatprep.subr.bf16.mxu0 (!%p113_p2), %v447_v0  ;;  %417 = vmatprep.subr.bf16.mxu1 (!%p113_p2), %v447_v0  ;;  %v147_v9 = vld [vmem:[%s509_s1 + $0x18] sm:$0xff] (!%p113_p2)  ;;  %v145_v10 = vld [vmem:[%s509_s1 + $0x8] sm:$0xff] (!%p113_p2)  ;;  %v148_v11 = vld [vmem:[%s509_s1 + $0x20] sm:$0x3] (!%p113_p2)  ;;  %vm267_vm2 = vcmask (!%p113_p2), 1046528  }
   0x7   : > { %396 = vmatprep.mubr.msk.f32.mxu0 (!%p113_p2), %vm448_vm0, %v449_v1  ;;  %405 = vmatprep.mubr.msk.f32.mxu1 (!%p113_p2), %vm448_vm0, %v449_v1  ;;  %v146_v12 = vld [vmem:[%s509_s1 + $0x10] sm:$0xff] (!%p113_p2)  ;;  %vm303_vm3 = vcmask (!%p113_p2), 441344   ;;  %vm306_vm5 = vcmask (!%p113_p2), 434176  }
   0xd   : > { %s512_s10 = smov (!%p134_p3, %s363_s10), 1 }
   0xe   : > { %s378_s11 = sshll.u32 %s512_s10, 5  ;;  %s421_s25 = smul.u32 24, %s512_s10 }
   0xf   : > { %s138_s14 = scalar_lea.vmem %s508_s0, %s378_s11 }
  0x10   : > { %v149_v2 = vld [vmem:[%s138_s14] sm:$0xff]  ;;  %v150_v3 = vld [vmem:[%s138_s14 + $0x8] sm:$0xff]  ;;  %v151_v4 = vld [vmem:[%s138_s14 + $0x10] sm:$0xff]  ;;  %s143_s28 = scalar_lea.vmem %s510_s2, %s421_s25 }
  0x11   : > { %v412_v5 = vpack.c.bf16 %v150_v3, %v149_v2  ;;  %v152_v6 = vld [vmem:[%s138_s14 + $0x18] sm:$0xff] }
  0x12   : > { %v415_v7 = vpack.c.bf16 %v152_v6, %v151_v4 }
  0x13   : > { %413 = vmatpush3.bf16.msra.mxu0 %v412_v5  ;;  %419 = vmatpush3.bf16.msra.mxu1 %v412_v5 }
  0x14   : > { %414 = vmatprep.subr.bf16.mxu0 %v447_v0  ;;  %418 = vmatprep.subr.bf16.mxu1 %v447_v0 }
  0x17   : > { %416 = vmatpush3.bf16.msra.mxu0 %v415_v7  ;;  %420 = vmatpush3.bf16.msra.mxu1 %v415_v7 }
  0x1a   : > { %397 = vmatmul.mubr.msk.f32.vlgmr.msra.gmra.mrb[0].mxu0 %vm153_vm1, %v144_v8  ;;  %406 = vmatmul.mubr.msk.f32.vlgmr.msra.gmra.mrb[0].mxu1 %vm153_vm1, %v147_v9 }
  0x1b   : > { %399 = vmatprep.mubr.msk.f32.mxu0 %vm448_vm0, %v449_v1  ;;  %408 = vmatprep.mubr.msk.f32.mxu1 %vm448_vm0, %v449_v1 }
  0x1e   : > { %400 = vmatmul.mubr.msk.f32.gmra.mrb[2].mxu0 %vm153_vm1, %v145_v10  ;;  %409 = vmatmul.mubr.msk.f32.gmra.mrb[2].mxu1 %vm153_vm1, %v148_v11 }
  0x1f   : > { %402 = vmatprep.mubr.msk.f32.mxu0 %vm448_vm0, %v449_v1 }
  0x22   : > { %403 = vmatmul.mubr.msk.f32.gmra.mrb[4].mxu0 %vm153_vm1, %v146_v12 }
  0xed   : > { %v235_v13 = vpop.f32.mrb[0].mxu0  ;;  %v250_v14 = vpop.f32.mrb[0].mxu1 }
  0xee   : > { %v398_v15 = vpop.f32.mrb[1].mxu0  ;;  %v262_v16 = vmul.f32 %v250_v14, %v250_v14  ;;  %v407_v17 = vpop.f32.mrb[1].mxu1  ;;  %v259_v34 = vmul.f32 %v235_v13, %v235_v13 }
  0xf0   : > { %v269_v20 = vrot.slane %v262_v16, 1 }
  0xf1   : > { %v240_v18 = vpop.f32.mrb[2].mxu0  ;;  %v255_v19 = vpop.f32.mrb[2].mxu1 }
  0xf2   : > { %v263_v21 = vmul.f32 %v255_v19, %v255_v19  ;;  %v401_v22 = vpop.f32.mrb[3].mxu0  ;;  %v410_v23 = vpop.f32.mrb[3].mxu1  ;;  %v260_v25 = vmul.f32 %v240_v18, %v240_v18 }
  0xf4   : > { %v271_v24 = vrot.slane %v263_v21, 1 }
  0xf5   : > { %v245_v26 = vpop.f32.mrb[4].mxu0 }
  0xf6   : > { %v272_v27 = vsel %vm267_vm2, %v269_v20, %v271_v24  ;;  %v261_v28 = vmul.f32 %v245_v26, %v245_v26  ;;  %v404_v29 = vpop.f32.mrb[5].mxu0 }
  0xf7   : > { %v277_v30 = vadd.f32 %v272_v27, %v260_v25 }
  0xf8   : > { %v268_v31 = vrot.slane %v261_v28, 1  ;;  %v278_v32 = vadd.f32 %v271_v24, %v261_v28 }
  0xf9   : > { %v280_v33 = vadd.f32 1e-09, %v277_v30 }
  0xfa   : > { %v270_v35 = vsel %vm267_vm2, %v268_v31, %v269_v20  ;;  %v281_v36 = vadd.f32 1e-09, %v278_v32 }
  0xfb   : > { %433 = vrsqrt.f32 %v280_v33  ;;  %v276_v37 = vadd.f32 %v270_v35, %v259_v34  ;;  %vm291_vm4 = vcmp.eq.f32.partialorder %v280_v33, inf  ;;  %v294_v42 = vand.u32 2147483648, %v280_v33 }
  0xfc   : > { %435 = vrsqrt.f32 %v281_v36  ;;  %vm293_vm6 = vcmp.eq.f32.partialorder %v280_v33, 0.0  ;;  %vm298_vm7 = vcmp.eq.f32.partialorder %v281_v36, inf  ;;  %v301_v45 = vand.u32 2147483648, %v281_v36 }
  0xfd   : > { %v279_v38 = vadd.f32 1e-09, %v276_v37  ;;  %vm300_vm8 = vcmp.eq.f32.partialorder %v281_v36, 0.0 }
  0xff   : > { %437 = vrsqrt.f32 %v279_v38  ;;  %vm284_vm9 = vcmp.eq.f32.partialorder %v279_v38, inf  ;;  %v287_v51 = vand.u32 2147483648, %v279_v38  ;;  %vm286_vm10 = vcmp.eq.f32.partialorder %v279_v38, 0.0 }
 0x105   : > { %v434_v39 = vpop.eup %433 }
 0x106   : > { %v436_v40 = vpop.eup %435  ;;  %v290_v41 = vmul.f32 %v434_v39, %v280_v33 }
 0x107   : > { %v297_v43 = vmul.f32 %v436_v40, %v281_v36 }
 0x108   : > { %v292_v44 = vsel %vm291_vm4, %v280_v33, %v290_v41 }
 0x109   : > { %v295_v46 = vsel %vm293_vm6, %v294_v42, %v292_v44  ;;  %v299_v47 = vsel %vm298_vm7, %v281_v36, %v297_v43  ;;  %v438_v48 = vpop.eup %437 }
 0x10a   : > { %305 = vst.msk [vmem:[%s143_s28 + $0x8] sm:$0xff] %vm303_vm3, %v295_v46  ;;  %v302_v49 = vsel %vm300_vm8, %v301_v45, %v299_v47  ;;  %v283_v50 = vmul.f32 %v438_v48, %v279_v38 }
 0x10b   : > { %307 = vst.msk [vmem:[%s143_s28 + $0x10] sm:$0x1] %vm306_vm5, %v302_v49 }
 0x10c   : > { %v285_v52 = vsel %vm284_vm9, %v279_v38, %v283_v50 }
 0x10d   : > { %v288_v53 = vsel %vm286_vm10, %v287_v51, %v285_v52 }
 0x10e   : > { %304 = vst.msk [vmem:[%s143_s28] sm:$0xff] %vm303_vm3, %v288_v53 }
 0x10f PF: > { %s12_s9 = sadd.s32 1, %s445_s9  }
 0x110   : > { %p9_p4 = scmp.ge.s32.totalorder %s12_s9, 4  }
 0x112   :  { %11 = sbr.rel (!%p9_p4) target bundleno = 1 (0x1), region = 58 }

// kernel: multiple_discriminator_forward.11
= control target key start
LH: loop header
LB: loop body
LE: loop exit
PB: predicated region body
PF: predicated region fallthrough
CT: control target
= control target key end

     0   :  { %s4477_s15 = smov 0   ;;  %s6015_s0 = inlined_call_operand.vmem [shape: f32[2,1,1418], index: 0, kind: input, shape index: {}]   ;;  %s6016_s1 = inlined_call_operand.vmem [shape: f32[1,1298], index: 1, kind: input, shape index: {}]   ;;  %s6017_s2 = inlined_call_operand.vmem [shape: f32[8,9], index: 2, kind: input, shape index: {}]   ;;  %s6018_s3 = inlined_call_operand.vmem [shape: f32[8,1], index: 3, kind: input, shape index: {}]   ;;  %s6019_s4 = inlined_call_operand.vmem [shape: f32[8,72], index: 4, kind: input, shape index: {}]   ;;  %s6020_s5 = inlined_call_operand.vmem [shape: f32[8,1], index: 5, kind: input, shape index: {}]   ;;  %s6021_s6 = inlined_call_operand.vmem [shape: f32[1,72], index: 6, kind: input, shape index: {}]   ;;  %s6022_s7 = inlined_call_operand.<no memory space> [shape: f32[1,1], index: 7, kind: input, shape index: {}]   ;;  %s6023_s8 = inlined_call_operand.vmem [shape: f32[2,8,1298], index: 8, kind: output, shape index: {0}]   ;;  %s6024_s9 = inlined_call_operand.vmem [shape: f32[2,8,1298], index: 9, kind: output, shape index: {1}]   ;;  %s6025_s10 = inlined_call_operand.vmem [shape: f32[2,1,1298], index: 10, kind: output, shape index: {2}]  }
   0x1   :  { %v16_v0 = vstv %s6022_s7 }
   0x2   :  { %17 = vst [vmem:[#allocation2] sm:$0x1] %v16_v0 }
   0x3 LB: > { %s3486_s16 = sadd.s32 4294967295, %s4402_s15   ;;  %p3490_p0 = scmp.ge.s32.totalorder %s4402_s15, 1  ;;  %s4402_s15 = sphi %s4477_s15, %s23_s15  }
   0x4   : > { %p318_p1 = scmp.lt.s32.totalorder %s4402_s15, 3 }
   0x6   : > { %p319_p2 = pnand %p3490_p0, %p318_p1 }
   0x7   : > { %p364_p3 = scmp.lt.s32.totalorder (!%p319_p2), %s3486_s16, 1  ;;  %v387_v1 = vlaneseq (!%p319_p2)  ;;  %s4404_s20 = smov (!%p319_p2), 127   ;;  %v4411_v21 = vmov (!%p319_p2), 0.0   ;;  %v4413_v32 = vmov (!%p319_p2), 0   ;;  %v880_v33 = vld [vmem:[%s6018_s3] sm:$0xff] (!%p319_p2)  ;;  %vm464_vm0 = vcmask (!%p319_p2), 1039360  }
   0x8   : > { %322 = sbr.rel (%p319_p2) target bundleno = 1498 (0x5da), region = 52  ;;  %s4405_s21 = smov (!%p319_p2), 126   ;;  %975 = vmatprep.mubr.f32.mxu0 (!%p319_p2), %v4411_v21  ;;  %1046 = vmatprep.mubr.f32.mxu1 (!%p319_p2), %v4411_v21  ;;  %vm508_vm1 = vcmask (!%p319_p2), 1031168   ;;  %vm796_vm2 = vcmask (!%p319_p2), 1040384   ;;  %vm808_vm3 = vcmask (!%p319_p2), 1041408   ;;  %vm552_vm4 = vcmask (!%p319_p2), 564224  }
   0x9   : > { %v4488_v2 = vshrl.u32 (!%p319_p2), %v387_v1, 7  ;;  %s4406_s22 = smov (!%p319_p2), 69   ;;  %s4407_s23 = smov (!%p319_p2), 68   ;;  %4044 = vset.pattern.permute.xlu1 (!%p319_p2), %v4413_v32  ;;  %4395 = vset.pattern.permute.xlu0 (!%p319_p2), %v4413_v32  ;;  %vm820_vm5 = vcmask (!%p319_p2), 1042432   ;;  %vm596_vm6 = vcmask (!%p319_p2), 556032   ;;  %vm832_vm7 = vcmask (!%p319_p2), 1043456  }
   0xa   : > { %s4408_s24 = smov (!%p319_p2), 67   ;;  %s4409_s25 = smov (!%p319_p2), 10   ;;  %vm6026_vm8 = vcmask (!%p319_p2), 547840   ;;  %vm690_vm9 = vcmask (!%p319_p2), 80896   ;;  %vm844_vm10 = vcmask (!%p319_p2), 1044480   ;;  %vm737_vm11 = vcmask (!%p319_p2), 72704  }
   0xb   : > { %v4492_v3 = vsub.s32 (!%p319_p2), 4, %v4488_v2  ;;  %v4495_v4 = vsub.s32 (!%p319_p2), 5, %v4488_v2  ;;  %v4498_v5 = vsub.s32 (!%p319_p2), 1, %v4488_v2  ;;  %v4501_v6 = vsub.s32 (!%p319_p2), 2, %v4488_v2  ;;  %s4410_s26 = smov (!%p319_p2), 9   ;;  %s4412_s27 = smov (!%p319_p2), 8  }
   0xc   : > { %v4504_v7 = vsub.s32 (!%p319_p2), 0, %v4488_v2  ;;  %v4507_v8 = vsub.s32 (!%p319_p2), 3, %v4488_v2  ;;  %v4558_v19 = vsub.s32 (!%p319_p2), 6, %v4488_v2  ;;  %v4563_v20 = vsub.s32 (!%p319_p2), 7, %v4488_v2  ;;  %s4417_s12 = smov (!%p319_p2), 60  }
   0xd   : > { %vm856_vm12 = vcmask (!%p319_p2), 1045504   ;;  %vm784_vm13 = vcmask (!%p319_p2), 64512   ;;  %vm868_vm14 = vcmask (!%p319_p2), 1046528   ;;  %vm6027_vm15 = vmmov (!%p319_p2), 1  }
   0xf   : > { %s6058_s16 = smov (!%p364_p3, %s3486_s16), 1 }
  0x10   : > { %s3818_s7 = smul.u32 12, %s6058_s16 }
  0x12   : > { %s4512_s19 = scalar_lea.vmem %s6015_s0, %s3818_s7  ;;  %s3819_s7 = smul.u32 88, %s6058_s16 }
  0x13   : > { %v382_v9 = vld [vmem:[%s4512_s19] sm:$0xff]  ;;  %v383_v25 = vld [vmem:[%s4512_s19 + $0x8] sm:$0xf] }
  0x14   : > { %v4516_v10 = vrot.slane %v382_v9, %v4492_v3  ;;  %v4519_v11 = vrot.slane %v382_v9, %v4495_v4  ;;  %v4522_v12 = vrot.slane %v382_v9, %v4498_v5  ;;  %v4525_v13 = vrot.slane %v382_v9, %v4501_v6  ;;  %s5031_s19 = scalar_lea.vmem %s6023_s8, %s3819_s7  ;;  %s5534_s29 = scalar_lea.vmem %s6024_s9, %s3819_s7 }
  0x15   : > { %v4528_v14 = vrot.slane %v382_v9, %v4504_v7  ;;  %v4531_v15 = vrot.slane %v382_v9, %v4507_v8  ;;  %v4568_v22 = vrot.slane %v382_v9, %v4558_v19  ;;  %v4573_v23 = vrot.slane %v382_v9, %v4563_v20 }
  0x16   : > { %v3854_v16 = vpack.i.bf16 %v4519_v11, %v4516_v10  ;;  %v3844_v17 = vpack.i.bf16 %v4525_v13, %v4522_v12  ;;  %v4583_v26 = vrot.slane %v383_v25, %v4504_v7  ;;  %v4586_v27 = vrot.slane %v383_v25, %v4498_v5 }
  0x17   : > { %v3849_v18 = vpack.i.bf16 %v4531_v15, %v4528_v14  ;;  %v3969_v24 = vpack.i.bf16 %v4573_v23, %v4568_v22  ;;  %v4608_v29 = vrot.slane %v383_v25, %v4501_v6  ;;  %v665_v31 = vrot.slane %v383_v25, %v4507_v8 }
  0x18   : > { %3855 = vrot.lane.b32.xlu1 %v3854_v16, %s4404_s20  ;;  %3845 = vrot.lane.b32.xlu0 %v3844_v17, %s4404_s20  ;;  %v3984_v28 = vpack.i.bf16 %v4586_v27, %v4583_v26 }
  0x19   : > { %v4029_v30 = vpack.i.bf16 %v4608_v29, %v4586_v27 }
  0x1c   : > { %3860 = vrot.lane.b32.xlu1 %v3844_v17, %s4405_s21  ;;  %3850 = vrot.lane.b32.xlu0 %v3849_v18, %s4404_s20 }
  0x20   : > { %3870 = vrot.lane.b32.xlu1 %v3854_v16, %s4405_s21  ;;  %3865 = vrot.lane.b32.xlu0 %v3849_v18, %s4405_s21 }
  0x24   : > { %3880 = vrot.lane.b32.xlu1 %v3849_v18, %s4406_s22  ;;  %3875 = vrot.lane.b32.xlu0 %v3844_v17, %s4406_s22 }
  0x28   : > { %3890 = vrot.lane.b32.xlu1 %v3844_v17, %s4407_s23  ;;  %3885 = vrot.lane.b32.xlu0 %v3854_v16, %s4406_s22 }
  0x2c   : > { %3900 = vrot.lane.b32.xlu1 %v3854_v16, %s4407_s23  ;;  %3895 = vrot.lane.b32.xlu0 %v3849_v18, %s4407_s23 }
  0x30   : > { %3910 = vrot.lane.b32.xlu1 %v3849_v18, %s4408_s24  ;;  %3905 = vrot.lane.b32.xlu0 %v3844_v17, %s4408_s24 }
  0x34   : > { %3920 = vrot.lane.b32.xlu1 %v3844_v17, %s4409_s25  ;;  %3915 = vrot.lane.b32.xlu0 %v3854_v16, %s4408_s24 }
  0x38   : > { %3930 = vrot.lane.b32.xlu1 %v3854_v16, %s4409_s25  ;;  %3925 = vrot.lane.b32.xlu0 %v3849_v18, %s4409_s25 }
  0x3c   : > { %3940 = vrot.lane.b32.xlu1 %v3849_v18, %s4410_s26  ;;  %3935 = vrot.lane.b32.xlu0 %v3844_v17, %s4410_s26 }
  0x40   : > { %3950 = vrot.lane.b32.xlu1 %v3844_v17, %s4412_s27  ;;  %3945 = vrot.lane.b32.xlu0 %v3854_v16, %s4410_s26 }
  0x44   : > { %3960 = vrot.lane.b32.xlu1 %v3854_v16, %s4412_s27  ;;  %3955 = vrot.lane.b32.xlu0 %v3849_v18, %s4412_s27 }
  0x48   : > { %3970 = vrot.lane.b32.xlu1 %v3969_v24, %s4405_s21  ;;  %3965 = vrot.lane.b32.xlu0 %v3969_v24, %s4404_s20 }
  0x4c   : > { %3980 = vrot.lane.b32.xlu1 %v3969_v24, %s4407_s23  ;;  %3975 = vrot.lane.b32.xlu0 %v3969_v24, %s4406_s22 }
  0x50   : > { %3990 = vrot.lane.b32.xlu1 %v3969_v24, %s4408_s24  ;;  %3985 = vrot.lane.b32.xlu0 %v3984_v28, %s4404_s20 }
  0x54   : > { %4000 = vrot.lane.b32.xlu1 %v3969_v24, %s4409_s25  ;;  %3995 = vrot.lane.b32.xlu0 %v3984_v28, %s4405_s21 }
  0x58   : > { %4010 = vrot.lane.b32.xlu1 %v3969_v24, %s4410_s26  ;;  %4005 = vrot.lane.b32.xlu0 %v3984_v28, %s4406_s22 }
  0x5c   : > { %4020 = vrot.lane.b32.xlu1 %v3969_v24, %s4412_s27  ;;  %4015 = vrot.lane.b32.xlu0 %v3984_v28, %s4407_s23 }
  0x60   : > { %682 = vrot.lane.b32.xlu1 %v4583_v26, %s4409_s25  ;;  %4025 = vrot.lane.b32.xlu0 %v3984_v28, %s4408_s24 }
  0x64   : > { %776 = vrot.lane.b32.xlu1 %v4583_v26, %s4412_s27  ;;  %729 = vrot.lane.b32.xlu0 %v4583_v26, %s4410_s26 }
  0x68   : > { %506 = vrot.lane.b32.xlu1 %v4608_v29, %s4405_s21  ;;  %462 = vrot.lane.b32.xlu0 %v4608_v29, %s4404_s20 }
  0x6c   : > { %594 = vrot.lane.b32.xlu1 %v4608_v29, %s4407_s23  ;;  %550 = vrot.lane.b32.xlu0 %v4608_v29, %s4406_s22 }
  0x70   : > { %4030 = vrot.lane.b32.xlu1 %v4029_v30, %s4409_s25  ;;  %638 = vrot.lane.b32.xlu0 %v4608_v29, %s4408_s24 }
  0x74   : > { %4040 = vrot.lane.b32.xlu1 %v4029_v30, %s4412_s27  ;;  %4035 = vrot.lane.b32.xlu0 %v4029_v30, %s4410_s26 }
  0x78   : > { %688 = vrot.lane.b32.xlu0 %v665_v31, %s4409_s25  ;;  %735 = vrot.lane.b32.xlu1 %v665_v31, %s4410_s26 }
  0x7c   : > { %782 = vrot.lane.b32.xlu0 %v665_v31, %s4412_s27  ;;  %883 = vperm.xlu1 %4044, %v880_v33  }
  0x8a   : > { %v4632_v34 = vpop.permute.xlu1 %3855  ;;  %v3846_v35 = vpop.permute.xlu0 %3845 }
  0x8b   : > { %v3848_v44 = vunpack.i.h.bf16 %v3846_v35  ;;  %v3847_v45 = vunpack.i.l.bf16 %v3846_v35  ;;  %v3857_v52 = vunpack.i.l.bf16 %v4632_v34 }
  0x8d   : > { %v466_v53 = vsel %vm464_vm0, %v3847_v45, %v3848_v44 }
  0x8e   : > { %v3861_v36 = vpop.permute.xlu1 %3860  ;;  %v3851_v37 = vpop.permute.xlu0 %3850  ;;  %v798_v62 = vsel %vm796_vm2, %v4522_v12, %v466_v53 }
  0x8f   : > { %v3863_v48 = vunpack.i.h.bf16 %v3861_v36  ;;  %v3862_v49 = vunpack.i.l.bf16 %v3861_v36  ;;  %v3853_v50 = vunpack.i.h.bf16 %v3851_v37  ;;  %v3852_v51 = vunpack.i.l.bf16 %v3851_v37 }
  0x91   : > { %v510_v58 = vsel %vm508_vm1, %v3862_v49, %v3863_v48  ;;  %v467_v59 = vsel %vm464_vm0, %v3848_v44, %v3853_v50  ;;  %v465_v60 = vsel %vm464_vm0, %v3852_v51, %v3847_v45  ;;  %v468_v63 = vsel %vm464_vm0, %v3853_v50, %v3857_v52 }
  0x92   : > { %v4634_v38 = vpop.permute.xlu1 %3870  ;;  %v3866_v39 = vpop.permute.xlu0 %3865  ;;  %v810_v25 = vsel %vm808_vm3, %v798_v62, %v510_v58  ;;  %v799_v28 = vsel %vm796_vm2, %v4525_v13, %v467_v59  ;;  %v797_v12 = vsel %vm796_vm2, %v4528_v14, %v465_v60  ;;  %v800_v14 = vsel %vm796_vm2, %v4531_v15, %v468_v63 }
  0x93   : > { %v3867_v54 = vunpack.i.l.bf16 %v3866_v39  ;;  %v3868_v55 = vunpack.i.h.bf16 %v3866_v39  ;;  %v3872_v61 = vunpack.i.l.bf16 %v4634_v38 }
  0x95   : > { %v509_v16 = vsel %vm508_vm1, %v3867_v54, %v3862_v49  ;;  %v511_v30 = vsel %vm508_vm1, %v3863_v48, %v3868_v55  ;;  %v512_v33 = vsel %vm508_vm1, %v3868_v55, %v3872_v61 }
  0x96   : > { %v3881_v40 = vpop.permute.xlu1 %3880  ;;  %v3876_v41 = vpop.permute.xlu0 %3875  ;;  %v809_v37 = vsel %vm808_vm3, %v797_v12, %v509_v16  ;;  %v811_v48 = vsel %vm808_vm3, %v799_v28, %v511_v30  ;;  %v812_v15 = vsel %vm808_vm3, %v800_v14, %v512_v33 }
  0x97   : > { %v3882_v0 = vunpack.i.l.bf16 %v3881_v40  ;;  %v3877_v9 = vunpack.i.l.bf16 %v3876_v41  ;;  %v3883_v17 = vunpack.i.h.bf16 %v3881_v40  ;;  %v3878_v18 = vunpack.i.h.bf16 %v3876_v41 }
  0x99   : > { %v553_v39 = vsel %vm552_vm4, %v3882_v0, %v3877_v9  ;;  %v555_v41 = vsel %vm552_vm4, %v3878_v18, %v3883_v17  ;;  %v554_v44 = vsel %vm552_vm4, %v3877_v9, %v3878_v18 }
  0x9a   : > { %v4636_v42 = vpop.permute.xlu1 %3890  ;;  %v4638_v43 = vpop.permute.xlu0 %3885  ;;  %v821_v53 = vsel %vm820_vm5, %v809_v37, %v553_v39  ;;  %v822_v59 = vsel %vm820_vm5, %v810_v25, %v554_v44  ;;  %v823_v60 = vsel %vm820_vm5, %v811_v48, %v555_v41 }
  0x9b   : > { %v3887_v24 = vunpack.i.l.bf16 %v4638_v43  ;;  %v3893_v35 = vunpack.i.h.bf16 %v4636_v42  ;;  %v3892_v36 = vunpack.i.l.bf16 %v4636_v42 }
  0x9d   : > { %v556_v42 = vsel %vm552_vm4, %v3883_v17, %v3887_v24  ;;  %v598_v54 = vsel %vm596_vm6, %v3892_v36, %v3893_v35 }
  0x9e   : > { %v4640_v46 = vpop.permute.xlu1 %3900  ;;  %v4642_v47 = vpop.permute.xlu0 %3895  ;;  %v824_v62 = vsel %vm820_vm5, %v812_v15, %v556_v42  ;;  %v834_v30 = vsel %vm832_vm7, %v822_v59, %v598_v54 }
  0x9f   : > { %v3897_v13 = vunpack.i.l.bf16 %v4642_v47  ;;  %v3898_v40 = vunpack.i.h.bf16 %v4642_v47  ;;  %v3902_v45 = vunpack.i.l.bf16 %v4640_v46 }
  0xa1   : > { %v597_v55 = vsel %vm596_vm6, %v3897_v13, %v3892_v36  ;;  %v599_v63 = vsel %vm596_vm6, %v3893_v35, %v3898_v40  ;;  %v600_v0 = vsel %vm596_vm6, %v3898_v40, %v3902_v45 }
  0xa2   : > { %v4646_v56 = vpop.permute.xlu1 %3910  ;;  %v4648_v57 = vpop.permute.xlu0 %3905  ;;  %v836_v37 = vsel %vm832_vm7, %v824_v62, %v600_v0 }
  0xa3   : > { %v3912_v49 = vunpack.i.l.bf16 %v4646_v56  ;;  %v3907_v50 = vunpack.i.l.bf16 %v4648_v57  ;;  %v3908_v58 = vunpack.i.h.bf16 %v4648_v57  ;;  %v3913_v9 = vunpack.i.h.bf16 %v4646_v56 }
  0xa4   : > { %v833_v57 = vsel %vm832_vm7, %v821_v53, %v597_v55  ;;  %v835_v56 = vsel %vm832_vm7, %v823_v60, %v599_v63 }
  0xa5   : > { %v641_v18 = vsel %vm6026_vm8, %v3912_v49, %v3907_v50  ;;  %v642_v33 = vsel %vm6026_vm8, %v3907_v50, %v3908_v58  ;;  %v643_v39 = vsel %vm6026_vm8, %v3908_v58, %v3913_v9 }
  0xa6   : > { %v4667_v31 = vpop.permute.xlu1 %3920  ;;  %v4669_v32 = vpop.permute.xlu0 %3915  ;;  %v846_v50 = vsel %vm844_vm10, %v834_v30, %v642_v33  ;;  %v847_v63 = vsel %vm844_vm10, %v835_v56, %v643_v39 }
  0xa7   : > { %v3923_v16 = vunpack.i.h.bf16 %v4667_v31  ;;  %v3922_v17 = vunpack.i.l.bf16 %v4667_v31  ;;  %v3917_v25 = vunpack.i.l.bf16 %v4669_v32 }
  0xa9   : > { %v692_v44 = vsel %vm690_vm9, %v3922_v17, %v3923_v16  ;;  %v644_v42 = vsel %vm6026_vm8, %v3913_v9, %v3917_v25  ;;  %vm4738_vm8 = vmpackc.low %vm796_vm2, %vm6027_vm15  ;;  %vm6031_vm15 = vcmask 547840  }
  0xaa   : > { %v4692_v47 = vpop.permute.xlu1 %3930  ;;  %v3926_v51 = vpop.permute.xlu0 %3925  ;;  %v858_v60 = vsel %vm856_vm12, %v846_v50, %v692_v44 }
  0xab   : > { %v3927_v35 = vunpack.i.l.bf16 %v3926_v51  ;;  %v3932_v14 = vunpack.i.l.bf16 %v4692_v47  ;;  %v3928_v31 = vunpack.i.h.bf16 %v3926_v51  ;;  %v845_v51 = vsel %vm844_vm10, %v833_v57, %v641_v18 }
  0xad   : > { %v691_v53 = vsel %vm690_vm9, %v3927_v35, %v3922_v17  ;;  %v693_v59 = vsel %vm690_vm9, %v3923_v16, %v3928_v31  ;;  %v694_v62 = vsel %vm690_vm9, %v3928_v31, %v3932_v14  ;;  %v848_v35 = vsel %vm844_vm10, %v836_v37, %v644_v42 }
  0xae   : > { %v3941_v28 = vpop.permute.xlu1 %3940  ;;  %v3936_v12 = vpop.permute.xlu0 %3935  ;;  %v857_v30 = vsel %vm856_vm12, %v845_v51, %v691_v53 }
  0xaf   : > { %v3938_v36 = vunpack.i.h.bf16 %v3936_v12  ;;  %v3937_v13 = vunpack.i.l.bf16 %v3936_v12  ;;  %v3943_v40 = vunpack.i.h.bf16 %v3941_v28  ;;  %v3942_v41 = vunpack.i.l.bf16 %v3941_v28 }
  0xb1   : > { %v739_v49 = vsel %vm737_vm11, %v3937_v13, %v3938_v36  ;;  %v738_v16 = vsel %vm737_vm11, %v3942_v41, %v3937_v13  ;;  %v740_v57 = vsel %vm737_vm11, %v3938_v36, %v3943_v40  ;;  %v859_v13 = vsel %vm856_vm12, %v847_v63, %v693_v59 }
  0xb2   : > { %v3951_v48 = vpop.permute.xlu1 %3950  ;;  %v4721_v15 = vpop.permute.xlu0 %3945  ;;  %v870_v9 = vsel %vm868_vm14, %v858_v60, %v739_v49  ;;  %v869_v36 = vsel %vm868_vm14, %v857_v30, %v738_v16  ;;  %v860_v41 = vsel %vm856_vm12, %v848_v35, %v694_v62  ;;  %v871_v44 = vsel %vm868_vm14, %v859_v13, %v740_v57 }
  0xb3   : > { %v3953_v54 = vunpack.i.h.bf16 %v3951_v48  ;;  %v3952_v55 = vunpack.i.l.bf16 %v3951_v48  ;;  %v3947_v58 = vunpack.i.l.bf16 %v4721_v15  ;;  %v3858_v60 = vunpack.i.h.bf16 %v4632_v34 }
  0xb4   : > { %v3873_v62 = vunpack.i.h.bf16 %v4634_v38  ;;  %v3903_v63 = vunpack.i.h.bf16 %v4640_v46 }
  0xb5   : > { %v786_v0 = vsel %vm784_vm13, %v3952_v55, %v3953_v54  ;;  %v741_v33 = vsel %vm737_vm11, %v3943_v40, %v3947_v58  ;;  %v469_v16 = vsel %vm464_vm0, %v3857_v52, %v3858_v60 }
  0xb6   : > { %v4744_v18 = vpop.permute.xlu1 %3960  ;;  %v3956_v28 = vpop.permute.xlu0 %3955  ;;  %v3598_v12 = vpack.c.bf16 %v786_v0, %v870_v9  ;;  %v872_v40 = vsel %vm868_vm14, %v860_v41, %v741_v33  ;;  %v513_v57 = vsel %vm508_vm1, %v3872_v61, %v3873_v62  ;;  %v801_v38 = vsel %vm796_vm2, %v4516_v10, %v469_v16 }
  0xb7   : > { %v3962_v56 = vunpack.i.l.bf16 %v4744_v18  ;;  %v3958_v31 = vunpack.i.h.bf16 %v3956_v28  ;;  %v3957_v39 = vunpack.i.l.bf16 %v3956_v28  ;;  %v601_v52 = vsel %vm596_vm6, %v3902_v45, %v3903_v63 }
  0xb8   : > { %3600 = vmatprep.subr.msk.bf16.mxu0 %vm4738_vm8, %v3598_v12  ;;  %v3918_v61 = vunpack.i.h.bf16 %v4669_v32 }
  0xb9   : > { %v785_v48 = vsel %vm784_vm13, %v3957_v39, %v3952_v55  ;;  %v788_v37 = vsel %vm784_vm13, %v3958_v31, %v3962_v56  ;;  %v787_v42 = vsel %vm784_vm13, %v3953_v54, %v3958_v31  ;;  %v4777_v54 = vld [vmem:[%s6017_s2] sm:$0xff]  ;;  %v3888_v55 = vunpack.i.h.bf16 %v4638_v43 }
  0xba   : > { %v4764_v49 = vpop.permute.xlu1 %3970  ;;  %v4766_v50 = vpop.permute.xlu0 %3965  ;;  %v3601_v51 = vpack.c.bf16 %v785_v48, %v869_v36  ;;  %v3604_v53 = vpack.c.bf16 %v788_v37, %v872_v40  ;;  %v3607_v59 = vpack.c.bf16 %v787_v42, %v871_v44  ;;  %v813_v43 = vsel %vm808_vm3, %v801_v38, %v513_v57 }
  0xbb   : > { %v3968_v28 = vunpack.i.h.bf16 %v4766_v50  ;;  %v3967_v12 = vunpack.i.l.bf16 %v4766_v50  ;;  %v557_v34 = vsel %vm552_vm4, %v3887_v24, %v3888_v55  ;;  %v3972_v30 = vunpack.i.l.bf16 %v4764_v49 }
  0xbc   : > { %3603 = vmatpush1.bf16.msk.msra.mxu0 %vm4738_vm8, %v3601_v51  ;;  %3606 = vmatprep.subr.msk.bf16.mxu1 %vm4738_vm8, %v3604_v53  ;;  %v3973_v24 = vunpack.i.h.bf16 %v4764_v49  ;;  %v825_v31 = vsel %vm820_vm5, %v813_v43, %v557_v34  ;;  %v645_v13 = vsel %vm6031_vm15, %v3917_v25, %v3918_v61  ;;  %v3933_v36 = vunpack.i.h.bf16 %v4692_v47 }
  0xbd   : > { %3609 = vmatpush1.bf16.msk.msra.mxu1 %vm4738_vm8, %v3607_v59  ;;  %v470_v10 = vsel %vm464_vm0, %v3858_v60, %v3967_v12  ;;  %v471_v46 = vsel %vm464_vm0, %v3967_v12, %v3968_v28  ;;  %v837_v39 = vsel %vm832_vm7, %v825_v31, %v601_v52  ;;  %v514_v41 = vsel %vm508_vm1, %v3873_v62, %v3972_v30 }
  0xbe   : > { %v4783_v0 = vpop.permute.xlu1 %3980  ;;  %v4785_v9 = vpop.permute.xlu0 %3975  ;;  %v515_v40 = vsel %vm508_vm1, %v3972_v30, %v3973_v24  ;;  %v802_v42 = vsel %vm796_vm2, %v4519_v11, %v470_v10  ;;  %v803_v32 = vsel %vm796_vm2, %v4568_v22, %v471_v46  ;;  %v3948_v49 = vunpack.i.h.bf16 %v4721_v15 }
  0xbf   : > { %3495 = vmatmul.mubr.msk.f32.vlgmr.msra.gmra.mrb[0].mxu0 %vm737_vm11, %v4777_v54  ;;  %v3977_v45 = vunpack.i.l.bf16 %v4785_v9  ;;  %v3978_v44 = vunpack.i.h.bf16 %v4785_v9  ;;  %v3982_v25 = vunpack.i.l.bf16 %v4783_v0  ;;  %v3983_v51 = vunpack.i.h.bf16 %v4783_v0 }
  0xc0   : > { %3498 = vmatmul.mubr.msk.f32.vlgmr.msra.gmra.mrb[0].mxu1 %vm737_vm11, %v4777_v54  ;;  %1117 = vmatprep.mubr.f32.mxu0 %v4411_v21  ;;  %v849_v60 = vsel %vm844_vm10, %v837_v39, %v645_v13  ;;  %v695_v11 = vsel %vm690_vm9, %v3932_v14, %v3933_v36  ;;  %v814_v9 = vsel %vm808_vm3, %v802_v42, %v514_v41 }
  0xc1   : > { %1188 = vmatprep.mubr.f32.mxu1 %v4411_v21  ;;  %v558_v53 = vsel %vm552_vm4, %v3888_v55, %v3977_v45  ;;  %v559_v22 = vsel %vm552_vm4, %v3977_v45, %v3978_v44  ;;  %v815_v16 = vsel %vm808_vm3, %v803_v32, %v515_v40  ;;  %v3963_v55 = vunpack.i.h.bf16 %v4744_v18 }
  0xc2   : > { %v4811_v33 = vpop.permute.xlu1 %3990  ;;  %v4813_v35 = vpop.permute.xlu0 %3985  ;;  %v602_v12 = vsel %vm596_vm6, %v3903_v63, %v3982_v25  ;;  %v826_v34 = vsel %vm820_vm5, %v814_v9, %v558_v53  ;;  %v742_v47 = vsel %vm737_vm11, %v3947_v58, %v3948_v49  ;;  %v603_v14 = vsel %vm596_vm6, %v3982_v25, %v3983_v51 }
  0xc3   : > { %v3992_v59 = vunpack.i.l.bf16 %v4811_v33  ;;  %v3987_v30 = vunpack.i.l.bf16 %v4813_v35  ;;  %v827_v43 = vsel %vm820_vm5, %v815_v16, %v559_v22  ;;  %v3993_v31 = vunpack.i.h.bf16 %v4811_v33 }
  0xc4   : > { %v861_v46 = vsel %vm856_vm12, %v849_v60, %v695_v11  ;;  %v838_v15 = vsel %vm832_vm7, %v826_v34, %v602_v12  ;;  %v789_v13 = vsel %vm784_vm13, %v3962_v56, %v3963_v55  ;;  %v839_v40 = vsel %vm832_vm7, %v827_v43, %v603_v14 }
  0xc5   : > { %v646_v52 = vsel %vm6031_vm15, %v3918_v61, %v3992_v59  ;;  %v873_v33 = vsel %vm868_vm14, %v861_v46, %v742_v47  ;;  %v472_v42 = vsel %vm464_vm0, %v3968_v28, %v3987_v30 }
  0xc6   : > { %v4830_v48 = vpop.permute.xlu1 %4000  ;;  %v4832_v37 = vpop.permute.xlu0 %3995  ;;  %v3613_v16 = vpack.c.bf16 %v789_v13, %v873_v33 }
  0xc7   : > { %v4002_v62 = vunpack.i.l.bf16 %v4830_v48  ;;  %v3997_v63 = vunpack.i.l.bf16 %v4832_v37  ;;  %v4003_v60 = vunpack.i.h.bf16 %v4830_v48  ;;  %v3988_v48 = vunpack.i.h.bf16 %v4813_v35 }
  0xc8   : > { %v3998_v34 = vunpack.i.h.bf16 %v4832_v37 }
  0xc9   : > { %v696_v10 = vsel %vm690_vm9, %v3933_v36, %v4002_v62  ;;  %v850_v36 = vsel %vm844_vm10, %v838_v15, %v646_v52  ;;  %v516_v18 = vsel %vm508_vm1, %v3973_v24, %v3997_v63  ;;  %v804_v24 = vsel %vm796_vm2, %v4573_v23, %v472_v42 }
  0xca   : > { %v4011_v57 = vpop.permute.xlu1 %4010  ;;  %v4852_v0 = vpop.permute.xlu0 %4005  ;;  %v862_v32 = vsel %vm856_vm12, %v850_v36, %v696_v10  ;;  %v517_v42 = vsel %vm508_vm1, %v3997_v63, %v3998_v34 }
  0xcb   : > { %v4012_v38 = vunpack.i.l.bf16 %v4011_v57  ;;  %v4007_v45 = vunpack.i.l.bf16 %v4852_v0  ;;  %v4013_v11 = vunpack.i.h.bf16 %v4011_v57  ;;  %v816_v57 = vsel %vm808_vm3, %v804_v24, %v516_v18 }
  0xcc   : > { %v4008_v13 = vunpack.i.h.bf16 %v4852_v0 }
  0xcd   : > { %v743_v58 = vsel %vm737_vm11, %v3948_v49, %v4012_v38  ;;  %v647_v49 = vsel %vm6031_vm15, %v3992_v59, %v3993_v31  ;;  %v560_v50 = vsel %vm552_vm4, %v3978_v44, %v4007_v45  ;;  %v744_v35 = vsel %vm737_vm11, %v4012_v38, %v4013_v11 }
  0xce   : > { %v4021_v39 = vpop.permute.xlu1 %4020  ;;  %v4871_v61 = vpop.permute.xlu0 %4015  ;;  %v874_v53 = vsel %vm868_vm14, %v862_v32, %v743_v58  ;;  %v851_v12 = vsel %vm844_vm10, %v839_v40, %v647_v49  ;;  %v828_v23 = vsel %vm820_vm5, %v816_v57, %v560_v50  ;;  %v473_v38 = vsel %vm464_vm0, %v3987_v30, %v3988_v48 }
  0xcf   : > { %v4022_v41 = vunpack.i.l.bf16 %v4021_v39  ;;  %v4017_v25 = vunpack.i.l.bf16 %v4871_v61  ;;  %v561_v63 = vsel %vm552_vm4, %v4007_v45, %v4008_v13  ;;  %v4415_v50 = vmov 0.0|0.0  }
  0xd1   : > { %v790_v56 = vsel %vm784_vm13, %v3963_v55, %v4022_v41  ;;  %v604_v59 = vsel %vm596_vm6, %v3983_v51, %v4017_v25  ;;  %v4023_v55 = vunpack.i.h.bf16 %v4021_v39  ;;  %v697_v51 = vsel %vm690_vm9, %v4002_v62, %v4003_v60 }
  0xd2   : > { %v4892_v28 = vpop.permute.xlu1 %682  ;;  %v4894_v22 = vpop.permute.xlu0 %4025  ;;  %v3610_v9 = vpack.c.bf16 %v790_v56, %v874_v53  ;;  %v840_v47 = vsel %vm832_vm7, %v828_v23, %v604_v59  ;;  %v863_v58 = vsel %vm856_vm12, %v851_v12, %v697_v51  ;;  %v4018_v56 = vunpack.i.h.bf16 %v4871_v61 }
  0xd3   : > { %v4027_v44 = vunpack.i.l.bf16 %v4894_v22  ;;  %v698_v37 = vsel %vm690_vm9, %v4003_v60, %v4892_v28  ;;  %v791_v15 = vsel %vm784_vm13, %v4022_v41, %v4023_v55  ;;  %v875_v33 = vsel %vm868_vm14, %v863_v58, %v744_v35 }
  0xd4   : > { %3612 = vmatprep.subr.msk.bf16.mxu0 %vm4738_vm8, %v3610_v9  ;;  %v805_v41 = vsel %vm796_vm2, %v4583_v26, %v473_v38  ;;  %v3619_v32 = vpack.c.bf16 %v791_v15, %v875_v33  ;;  %v4028_v9 = vunpack.i.h.bf16 %v4894_v22  ;;  %v605_v45 = vsel %vm596_vm6, %v4017_v25, %v4018_v56 }
  0xd5   : > { %3615 = vmatpush1.bf16.msk.msra.mxu0 %vm4738_vm8, %v3613_v16  ;;  %v648_v14 = vsel %vm6031_vm15, %v3993_v31, %v4027_v44  ;;  %v817_v26 = vsel %vm808_vm3, %v805_v41, %v517_v42 }
  0xd6   : > { %v4915_v52 = vpop.permute.xlu1 %776  ;;  %v4917_v43 = vpop.permute.xlu0 %729  ;;  %v852_v62 = vsel %vm844_vm10, %v840_v47, %v648_v14  ;;  %v829_v0 = vsel %vm820_vm5, %v817_v26, %v561_v63 }
  0xd7   : > { %v792_v10 = vsel %vm784_vm13, %v4023_v55, %v4915_v52  ;;  %v745_v46 = vsel %vm737_vm11, %v4013_v11, %v4917_v43  ;;  %v864_v31 = vsel %vm856_vm12, %v852_v62, %v698_v37  ;;  %v841_v25 = vsel %vm832_vm7, %v829_v0, %v605_v45 }
  0xd8   : > { %3501 = vmatmul.mubr.msk.f32.vlgmr.msra.gmra.mrb[2].mxu0 %vm737_vm11, %v4777_v54  ;;  %v876_v39 = vsel %vm868_vm14, %v864_v31, %v745_v46 }
  0xd9   : > { %1259 = vmatprep.mubr.f32.mxu0 %v4411_v21  ;;  %v3616_v36 = vpack.c.bf16 %v792_v10, %v876_v39 }
  0xda   : > { %v507_v40 = vpop.permute.xlu1 %506  ;;  %v463_v30 = vpop.permute.xlu0 %462 }
  0xdb   : > { %v474_v49 = vsel %vm464_vm0, %v3988_v48, %v463_v30  ;;  %v807_v18 = vsel %vm796_vm2, %v4608_v29, %v463_v30  ;;  %3618 = vmatprep.subr.msk.bf16.mxu1 %vm4738_vm8, %v3616_v36  ;;  %v518_v53 = vsel %vm508_vm1, %v3998_v34, %v507_v40 }
  0xdc   : > { %v806_v60 = vsel %vm796_vm2, %v4586_v27, %v474_v49  ;;  %3621 = vmatpush1.bf16.msk.msra.mxu1 %vm4738_vm8, %v3619_v32  ;;  %v819_v16 = vsel %vm808_vm3, %v807_v18, %v507_v40  ;;  %vm6028_vm2 = vmmov 0  }
  0xdd   : > { %3628 = vmatprep.subr.bf16.mxu1 %v4415_v50  ;;  %v818_v24 = vsel %vm808_vm3, %v806_v60, %v518_v53  ;;  %vm6032_vm3 = vmmov %vm6031_vm15 }
  0xde   : > { %v595_v29 = vpop.permute.xlu1 %594  ;;  %v551_v11 = vpop.permute.xlu0 %550  ;;  %v649_v12 = vsel %vm6032_vm3, %v4027_v44, %v4028_v9  ;;  %vm6033_vm15 = vmmov %vm6032_vm3 }
  0xdf   : > { %v562_v27 = vsel %vm552_vm4, %v4008_v13, %v551_v11  ;;  %3504 = vmatmul.mubr.msk.f32.vlgmr.msra.gmra.mrb[2].mxu1 %vm737_vm11, %v4777_v54  ;;  %v606_v59 = vsel %vm596_vm6, %v4018_v56, %v595_v29  ;;  %v831_v22 = vsel %vm820_vm5, %v819_v16, %v551_v11  ;;  %v853_v10 = vsel %vm844_vm10, %v841_v25, %v649_v12 }
  0xe0   : > { %v830_v48 = vsel %vm820_vm5, %v818_v24, %v562_v27  ;;  %3553 = vmatprep.mubr.msk.f32.mxu1 %vm6028_vm2, %v4411_v21  ;;  %v843_v14 = vsel %vm832_vm7, %v831_v22, %v595_v29 }
  0xe1   : > { %v842_v51 = vsel %vm832_vm7, %v830_v48, %v606_v59 }
  0xe2   : > { %v4031_v57 = vpop.permute.xlu1 %4030  ;;  %v639_v55 = vpop.permute.xlu0 %638 }
  0xe3   : > { %v4033_v34 = vunpack.i.h.bf16 %v4031_v57  ;;  %v4032_v23 = vunpack.i.l.bf16 %v4031_v57  ;;  %v650_v61 = vsel %vm6033_vm15, %v4028_v9, %v639_v55  ;;  %v855_v39 = vsel %vm844_vm10, %v843_v14, %v639_v55 }
  0xe4   : > { %v854_v37 = vsel %vm844_vm10, %v842_v51, %v650_v61 }
  0xe5   : > { %v699_v35 = vsel %vm690_vm9, %v4892_v28, %v4032_v23  ;;  %v700_v47 = vsel %vm690_vm9, %v4032_v23, %v4033_v34 }
  0xe6   : > { %v4041_v44 = vpop.permute.xlu1 %4040  ;;  %v4036_v46 = vpop.permute.xlu0 %4035  ;;  %v865_v58 = vsel %vm856_vm12, %v853_v10, %v699_v35  ;;  %v866_v28 = vsel %vm856_vm12, %v854_v37, %v700_v47 }
  0xe7   : > { %v4043_v62 = vunpack.i.h.bf16 %v4041_v44  ;;  %v4042_v38 = vunpack.i.l.bf16 %v4041_v44  ;;  %v4038_v15 = vunpack.i.h.bf16 %v4036_v46  ;;  %v4037_v31 = vunpack.i.l.bf16 %v4036_v46 }
  0xe9   : > { %v793_v13 = vsel %vm784_vm13, %v4915_v52, %v4042_v38  ;;  %v794_v33 = vsel %vm784_vm13, %v4042_v38, %v4043_v62  ;;  %v746_v36 = vsel %vm737_vm11, %v4917_v43, %v4037_v31  ;;  %v747_v40 = vsel %vm737_vm11, %v4037_v31, %v4038_v15 }
  0xea   : > { %v877_v30 = vsel %vm868_vm14, %v865_v58, %v746_v36  ;;  %v689_v41 = vpop.permute.xlu0 %688  ;;  %v736_v42 = vpop.permute.xlu1 %735  ;;  %v878_v32 = vsel %vm868_vm14, %v866_v28, %v747_v40 }
  0xeb   : > { %v3625_v49 = vpack.c.bf16 %v793_v13, %v877_v30  ;;  %v701_v18 = vsel %vm690_vm9, %v4033_v34, %v689_v41  ;;  %v748_v56 = vsel %vm737_vm11, %v4038_v15, %v736_v42  ;;  %v3622_v53 = vpack.c.bf16 %v794_v33, %v878_v32 }
  0xec   : > { %v867_v52 = vsel %vm856_vm12, %v855_v39, %v701_v18 }
  0xed   : > { %3624 = vmatprep.subr.msk.bf16.mxu0 %vm4738_vm8, %v3622_v53  ;;  %v879_v43 = vsel %vm868_vm14, %v867_v52, %v748_v56  ;;  %v1425_v53 = vld [vmem:[%s6016_s1] sm:$0xff] }
  0xee   : > { %v783_v60 = vpop.permute.xlu0 %782  ;;  %3627 = vmatpush1.bf16.msk.msra.mxu0 %vm4738_vm8, %v3625_v49  ;;  %v1432_v52 = vrot.slane %v1425_v53, %v4504_v7 }
  0xef   : > { %v795_v26 = vsel %vm784_vm13, %v4043_v62, %v783_v60 }
  0xf0   : > { %v3629_v63 = vpack.c.bf16 %v795_v26, %v879_v43  ;;  %v1436_v43 = vrot.slane %v1425_v53, %v4498_v5 }
  0xf1   : > { %3507 = vmatmul.mubr.msk.f32.vlgmr.msra.gmra.mrb[4].mxu0 %vm737_vm11, %v4777_v54 }
  0xf2   : > { %3631 = vmatpush3.bf16.msk.msra.mxu1 %vm4738_vm8, %v3629_v63  ;;  %1948 = vmatprep.mubr.f32.mxu0 %v4411_v21 }
  0xf5   : > { %3554 = vmatmul.mubr.msk.f32.vlgmr.msra.gmra.mrb[4].mxu1 %vm737_vm11, %v4777_v54 }
  0xf6   : > { %2019 = vmatprep.mubr.f32.mxu1 %v4411_v21 }
  0xfb   : > { %v884_v29 = vpop.permute.xlu1 %883 }
 0x192   : > { %v977_v11 = vpop.f32.mrb[0].mxu0 }
 0x193   : > { %v978_v9 = vadd.f32 %v977_v11, %v884_v29  ;;  %v979_v16 = vpop.f32.mrb[1].mxu0  ;;  %v1048_v27 = vpop.f32.mrb[0].mxu1 }
 0x194   : > { %v980_v24 = vadd.f32 %v979_v16, %v884_v29  ;;  %v1049_v0 = vadd.f32 %v1048_v27, %v884_v29  ;;  %v1050_v45 = vpop.f32.mrb[1].mxu1  ;;  %v1444_v27 = vrot.slane %v1425_v53, %v4507_v8 }
 0x195   : > { %v1347_v59 = vmul.f32 0.1, %v978_v9  ;;  %v1051_v48 = vadd.f32 %v1050_v45, %v884_v29  ;;  %vm1336_vm5 = vcmp.ge.f32.partialorder %v978_v9, 0.0 }
 0x196   : > { %v1348_v17 = vmul.f32 0.1, %v980_v24  ;;  %vm1337_vm7 = vcmp.ge.f32.partialorder %v980_v24, 0.0  ;;  %v1349_v22 = vmul.f32 0.1, %v1049_v0  ;;  %vm1338_vm8 = vcmp.ge.f32.partialorder %v1049_v0, 0.0 }
 0x197   : > { %v1358_v57 = vsel %vm1336_vm5, %v978_v9, %v1347_v59  ;;  %v1350_v55 = vmul.f32 0.1, %v1051_v48  ;;  %vm1339_vm10 = vcmp.ge.f32.partialorder %v1051_v48, 0.0  ;;  %v1440_v9 = vrot.slane %v1425_v53, %v4501_v6 }
 0x198   : > { %1380 = vrot.lane.b32.xlu0 %v1358_v57, %s4417_s12  ;;  %v1359_v54 = vsel %vm1337_vm7, %v980_v24, %v1348_v17  ;;  %v1360_v12 = vsel %vm1338_vm8, %v1049_v0, %v1349_v22 }
 0x199   : > { %1382 = vrot.lane.b32.xlu1 %v1359_v54, %s4417_s12  ;;  %v1361_v34 = vsel %vm1339_vm10, %v1051_v48, %v1350_v55  ;;  %vm1402_vm10 = vcmask 490496   ;;  %v1448_v55 = vrot.slane %v1425_v53, %v4492_v3  ;;  %v1452_v54 = vrot.slane %v1425_v53, %v4495_v4 }
 0x19c   : > { %1384 = vrot.lane.b32.xlu0 %v1360_v12, %s4417_s12 }
 0x19d   : > { %1386 = vrot.lane.b32.xlu1 %v1361_v34, %s4417_s12 }
 0x1ab   : > { %v1119_v23 = vpop.f32.mrb[2].mxu0 }
 0x1ac   : > { %v1120_v61 = vadd.f32 %v1119_v23, %v884_v29  ;;  %v1121_v25 = vpop.f32.mrb[3].mxu0 }
 0x1ad   : > { %v1122_v51 = vadd.f32 %v1121_v25, %v884_v29 }
 0x1ae   : > { %v1351_v35 = vmul.f32 0.1, %v1120_v61  ;;  %vm1340_vm12 = vcmp.ge.f32.partialorder %v1120_v61, 0.0 }
 0x1af   : > { %v1352_v47 = vmul.f32 0.1, %v1122_v51  ;;  %vm1341_vm14 = vcmp.ge.f32.partialorder %v1122_v51, 0.0 }
 0x1b0   : > { %v1362_v14 = vsel %vm1340_vm12, %v1120_v61, %v1351_v35  ;;  %v1456_v35 = vrot.slane %v1425_v53, %v4558_v19  ;;  %vm1495_vm12 = vcmask 146432  }
 0x1b1   : > { %1388 = vrot.lane.b32.xlu0 %v1362_v14, %s4417_s12  ;;  %v1363_v37 = vsel %vm1341_vm14, %v1122_v51, %v1352_v47  ;;  %v1460_v47 = vrot.slane %v1425_v53, %v4563_v20  ;;  %vm6034_vm14 = vcmask 547840  }
 0x1b2   : > { %1390 = vrot.lane.b32.xlu1 %v1363_v37, %s4417_s12  ;;  %v1190_v10 = vpop.f32.mrb[2].mxu1 }
 0x1b3   : > { %v1191_v44 = vadd.f32 %v1190_v10, %v884_v29  ;;  %v1192_v46 = vpop.f32.mrb[3].mxu1 }
 0x1b4   : > { %v1193_v62 = vadd.f32 %v1192_v46, %v884_v29 }
 0x1b5   : > { %v1353_v38 = vmul.f32 0.1, %v1191_v44  ;;  %vm1342_vm3 = vcmp.ge.f32.partialorder %v1191_v44, 0.0 }
 0x1b6   : > { %v1354_v15 = vmul.f32 0.1, %v1193_v62  ;;  %vm1343_vm15 = vcmp.ge.f32.partialorder %v1193_v62, 0.0 }
 0x1b7   : > { %v1364_v31 = vsel %vm1342_vm3, %v1191_v44, %v1353_v38  ;;  %vm6035_vm3 = vmmov %vm6034_vm14 }
 0x1b8   : > { %1392 = vrot.lane.b32.xlu0 %v1364_v31, %s4417_s12  ;;  %v1365_v58 = vsel %vm1343_vm15, %v1193_v62, %v1354_v15  ;;  %v1426_v31 = vld [vmem:[%s6016_s1 + $0x8] sm:$0x7]  ;;  %vm1880_vm15 = vcmask 588800  }
 0x1b9   : > { %1394 = vrot.lane.b32.xlu1 %v1365_v58, %s4417_s12  ;;  %v1464_v58 = vrot.slane %v1426_v31, %v4504_v7 }
 0x1c4   : > { %v1261_v39 = vpop.f32.mrb[4].mxu0 }
 0x1c5   : > { %v1262_v28 = vadd.f32 %v1261_v39, %v884_v29  ;;  %v1263_v13 = vpop.f32.mrb[5].mxu0  ;;  %v1468_v39 = vrot.slane %v1426_v31, %v4498_v5 }
 0x1c6   : > { %v1264_v33 = vadd.f32 %v1263_v13, %v884_v29 }
 0x1c7   : > { %v1355_v36 = vmul.f32 0.1, %v1262_v28  ;;  %vm1344_vm5 = vcmp.ge.f32.partialorder %v1262_v28, 0.0 }
 0x1c8   : > { %v1356_v40 = vmul.f32 0.1, %v1264_v33  ;;  %v1332_v30 = vpop.f32.mrb[4].mxu1  ;;  %vm1345_vm7 = vcmp.ge.f32.partialorder %v1264_v33, 0.0 }
 0x1c9   : > { %v1333_v41 = vadd.f32 %v1332_v30, %v884_v29  ;;  %v1366_v42 = vsel %vm1344_vm5, %v1262_v28, %v1355_v36  ;;  %v3555_v32 = vpop.f32.mrb[5].mxu1  ;;  %v1472_v30 = vrot.slane %v1426_v31, %v4501_v6  ;;  %vm6036_vm5 = vmmov %vm6035_vm3 }
 0x1ca   : > { %1396 = vrot.lane.b32.xlu0 %v1366_v42, %s4417_s12  ;;  %v1367_v49 = vsel %vm1345_vm7, %v1264_v33, %v1356_v40  ;;  %vm6037_vm7 = vmmov %vm6035_vm3 }
 0x1cb   : > { %v1357_v18 = vmul.f32 0.1, %v1333_v41  ;;  %1398 = vrot.lane.b32.xlu1 %v1367_v49, %s4417_s12  ;;  %vm1346_vm8 = vcmp.ge.f32.partialorder %v1333_v41, 0.0 }
 0x1cd   : > { %v1368_v56 = vsel %vm1346_vm8, %v1333_v41, %v1357_v18  ;;  %vm6038_vm8 = vmmov %vm6035_vm3 }
 0x1ce   : > { %1400 = vrot.lane.b32.xlu0 %v1368_v56, %s4417_s12 }
 0x20a   : > { %v1381_v60 = vpop.permute.xlu0 %1380 }
 0x20b   : > { %v1424_v26 = vsel %vm1402_vm10, 0.0, %v1381_v60  ;;  %v1383_v63 = vpop.permute.xlu1 %1382 }
 0x20c   : > { %v5033_v29 = vmul.f32 %v1432_v52, %v1424_v26  ;;  %v1403_v11 = vsel %vm1402_vm10, %v1381_v60, %v1383_v63 }
 0x20d   : > { %v5037_v16 = vmul.f32 %v1436_v43, %v1403_v11  ;;  %v1874_v43 = vld [vmem:[%s6020_s5] sm:$0xff] }
 0x20e   : > { %1828 = vrot.lane.b32.xlu1 %v5033_v29, %s4412_s27  ;;  %v1385_v24 = vpop.permute.xlu0 %1384  ;;  %1497 = vst [vmem:[%s5031_s19] sm:$0xff] %v5033_v29 }
 0x20f   : > { %v1404_v0 = vsel %vm1402_vm10, %v1383_v63, %v1385_v24  ;;  %v1387_v45 = vpop.permute.xlu1 %1386  ;;  %1498 = vst [vmem:[%s5031_s19 + $0x8] sm:$0xff] %v5037_v16 }
 0x210   : > { %v5047_v59 = vmul.f32 %v1440_v9, %v1404_v0  ;;  %v1405_v48 = vsel %vm1402_vm10, %v1385_v24, %v1387_v45 }
 0x211   : > { %v5050_v17 = vmul.f32 %v1444_v27, %v1405_v48 }
 0x212   : > { %v4045_v22 = vpack.i.bf16 %v5047_v59, %v5037_v16  ;;  %1499 = vst [vmem:[%s5031_s19 + $0x10] sm:$0xff] %v5047_v59 }
 0x213   : > { %v4050_v57 = vpack.i.bf16 %v5050_v17, %v5033_v29  ;;  %1500 = vst [vmem:[%s5031_s19 + $0x18] sm:$0xff] %v5050_v17 }
 0x214   : > { %4046 = vrot.lane.b32.xlu1 %v4045_v22, %s4404_s20 }
 0x215   : > { %4051 = vrot.lane.b32.xlu0 %v4050_v57, %s4404_s20 }
 0x218   : > { %4056 = vrot.lane.b32.xlu1 %v4045_v22, %s4405_s21 }
 0x219   : > { %4061 = vrot.lane.b32.xlu0 %v4045_v22, %s4406_s22 }
 0x21c   : > { %4066 = vrot.lane.b32.xlu1 %v4050_v57, %s4405_s21 }
 0x21d   : > { %4071 = vrot.lane.b32.xlu0 %v4050_v57, %s4406_s22 }
 0x220   : > { %4076 = vrot.lane.b32.xlu1 %v4045_v22, %s4407_s23 }
 0x221   : > { %4081 = vrot.lane.b32.xlu0 %v4045_v22, %s4408_s24 }
 0x223   : > { %v1389_v12 = vpop.permute.xlu0 %1388 }
 0x224   : > { %v1406_v34 = vsel %vm1402_vm10, %v1387_v45, %v1389_v12  ;;  %v1391_v23 = vpop.permute.xlu1 %1390  ;;  %4086 = vrot.lane.b32.xlu1 %v4050_v57, %s4407_s23 }
 0x225   : > { %v5072_v61 = vmul.f32 %v1448_v55, %v1406_v34  ;;  %v1407_v25 = vsel %vm1402_vm10, %v1389_v12, %v1391_v23  ;;  %4091 = vrot.lane.b32.xlu0 %v4050_v57, %s4408_s24 }
 0x226   : > { %v5076_v51 = vmul.f32 %v1452_v54, %v1407_v25 }
 0x227   : > { %1501 = vst [vmem:[%s5031_s19 + $0x20] sm:$0xff] %v5072_v61 }
 0x228   : > { %4096 = vrot.lane.b32.xlu1 %v4045_v22, %s4409_s25  ;;  %1502 = vst [vmem:[%s5031_s19 + $0x28] sm:$0xff] %v5076_v51  ;;  %v4115_v38 = vpack.i.bf16 %v5076_v51, %v5072_v61 }
 0x229   : > { %4101 = vrot.lane.b32.xlu0 %v4045_v22, %s4410_s26 }
 0x22a   : > { %v1393_v14 = vpop.permute.xlu0 %1392 }
 0x22b   : > { %v1408_v37 = vsel %vm1402_vm10, %v1391_v23, %v1393_v14  ;;  %v1395_v10 = vpop.permute.xlu1 %1394 }
 0x22c   : > { %4106 = vrot.lane.b32.xlu1 %v4050_v57, %s4409_s25  ;;  %v5088_v44 = vmul.f32 %v1456_v35, %v1408_v37  ;;  %v1409_v46 = vsel %vm1402_vm10, %v1393_v14, %v1395_v10 }
 0x22d   : > { %4111 = vrot.lane.b32.xlu0 %v4050_v57, %s4410_s26  ;;  %v5092_v62 = vmul.f32 %v1460_v47, %v1409_v46 }
 0x22e   : > { %1503 = vst [vmem:[%s5031_s19 + $0x30] sm:$0xff] %v5088_v44 }
 0x22f   : > { %1504 = vst [vmem:[%s5031_s19 + $0x38] sm:$0xff] %v5092_v62  ;;  %v4120_v15 = vpack.i.bf16 %v5092_v62, %v5088_v44 }
 0x230   : > { %1830 = vrot.lane.b32.xlu1 %v5037_v16, %s4412_s27 }
 0x231   : > { %1832 = vrot.lane.b32.xlu0 %v5047_v59, %s4412_s27 }
 0x234   : > { %1834 = vrot.lane.b32.xlu1 %v5050_v17, %s4412_s27 }
 0x235   : > { %1836 = vrot.lane.b32.xlu0 %v5072_v61, %s4412_s27 }
 0x238   : > { %4116 = vrot.lane.b32.xlu1 %v4115_v38, %s4404_s20 }
 0x239   : > { %4121 = vrot.lane.b32.xlu0 %v4120_v15, %s4404_s20 }
 0x23c   : > { %4126 = vrot.lane.b32.xlu1 %v4115_v38, %s4405_s21  ;;  %v1397_v28 = vpop.permute.xlu0 %1396 }
 0x23d   : > { %v1410_v13 = vsel %vm1402_vm10, %v1395_v10, %v1397_v28  ;;  %v1399_v33 = vpop.permute.xlu1 %1398  ;;  %4131 = vrot.lane.b32.xlu0 %v4115_v38, %s4406_s22 }
 0x23e   : > { %v5120_v36 = vmul.f32 %v1464_v58, %v1410_v13  ;;  %v1411_v40 = vsel %vm1402_vm10, %v1397_v28, %v1399_v33 }
 0x23f   : > { %v5124_v41 = vmul.f32 %v1468_v39, %v1411_v40 }
 0x240   : > { %4141 = vrot.lane.b32.xlu1 %v4120_v15, %s4406_s22  ;;  %1505 = vst [vmem:[%s5031_s19 + $0x40] sm:$0xff] %v5120_v36  ;;  %v1401_v42 = vpop.permute.xlu0 %1400  ;;  %v4180_v18 = vpack.i.bf16 %v5120_v36, %v5092_v62 }
 0x241   : > { %1506 = vst [vmem:[%s5031_s19 + $0x48] sm:$0xff] %v5124_v41  ;;  %v1412_v32 = vsel %vm1402_vm10, %v1399_v33, %v1401_v42  ;;  %4136 = vrot.lane.b32.xlu0 %v4120_v15, %s4405_s21  ;;  %v4195_v56 = vpack.i.bf16 %v5124_v41, %v5120_v36 }
 0x242   : > { %v5133_v49 = vmul.f32 %v1472_v30, %v1412_v32 }
 0x244   : > { %1507 = vst.msk [vmem:[%s5031_s19 + $0x50] sm:$0xff] %vm1495_vm12, %v5133_v49  ;;  %4151 = vrot.lane.b32.xlu1 %v4115_v38, %s4408_s24  ;;  %v1496_v53 = vsel %vm1495_vm12, %v5133_v49, 0.0 }
 0x245   : > { %4146 = vrot.lane.b32.xlu0 %v4115_v38, %s4407_s23  ;;  %v4215_v52 = vpack.i.bf16 %v1496_v53, %v5124_v41 }
 0x248   : > { %4161 = vrot.lane.b32.xlu1 %v4120_v15, %s4408_s24 }
 0x249   : > { %4156 = vrot.lane.b32.xlu0 %v4120_v15, %s4407_s23 }
 0x24c   : > { %4171 = vrot.lane.b32.xlu1 %v4115_v38, %s4410_s26 }
 0x24d   : > { %4166 = vrot.lane.b32.xlu0 %v4115_v38, %s4409_s25 }
 0x250   : > { %1794 = vrot.lane.b32.xlu1 %v5088_v44, %s4410_s26 }
 0x251   : > { %1748 = vrot.lane.b32.xlu0 %v5088_v44, %s4409_s25 }
 0x254   : > { %1840 = vrot.lane.b32.xlu1 %v5088_v44, %s4412_s27 }
 0x255   : > { %1838 = vrot.lane.b32.xlu0 %v5076_v51, %s4412_s27 }
 0x258   : > { %4181 = vrot.lane.b32.xlu1 %v4180_v18, %s4410_s26 }
 0x259   : > { %4176 = vrot.lane.b32.xlu0 %v4180_v18, %s4409_s25 }
 0x25c   : > { %4196 = vrot.lane.b32.xlu1 %v4195_v56, %s4406_s22 }
 0x25d   : > { %4186 = vrot.lane.b32.xlu0 %v4195_v56, %s4404_s20 }
 0x260   : > { %4206 = vrot.lane.b32.xlu1 %v4195_v56, %s4408_s24 }
 0x261   : > { %4191 = vrot.lane.b32.xlu0 %v4195_v56, %s4405_s21 }
 0x264   : > { %1540 = vrot.lane.b32.xlu1 %v1496_v53, %s4404_s20 }
 0x265   : > { %4201 = vrot.lane.b32.xlu0 %v4195_v56, %s4407_s23 }
 0x268   : > { %1626 = vrot.lane.b32.xlu1 %v1496_v53, %s4406_s22 }
 0x269   : > { %1583 = vrot.lane.b32.xlu0 %v1496_v53, %s4405_s21 }
 0x26c   : > { %1712 = vrot.lane.b32.xlu1 %v1496_v53, %s4408_s24 }
 0x26d   : > { %1669 = vrot.lane.b32.xlu0 %v1496_v53, %s4407_s23 }
 0x270   : > { %4216 = vrot.lane.b32.xlu1 %v4215_v52, %s4410_s26 }
 0x271   : > { %4211 = vrot.lane.b32.xlu0 %v4215_v52, %s4409_s25 }
 0x274   : > { %1844 = vrot.lane.b32.xlu1 %v5120_v36, %s4412_s27 }
 0x275   : > { %1842 = vrot.lane.b32.xlu0 %v5092_v62, %s4412_s27 }
 0x278   : > { %1848 = vrot.lane.b32.xlu1 %v1496_v53, %s4412_s27 }
 0x279   : > { %1846 = vrot.lane.b32.xlu0 %v5124_v41, %s4412_s27 }
 0x27c   : > { %1804 = vrot.lane.b32.xlu1 %v4411_v21, %s4410_s26 }
 0x27d   : > { %1758 = vrot.lane.b32.xlu0 %v4411_v21, %s4409_s25 }
 0x280   : > { %1877 = vperm.xlu1 %4044, %v1874_v43   ;;  %v5189_v60 = vpop.permute.xlu1 %1828 }
 0x281   : > { %1850 = vrot.lane.b32.xlu0 %v4411_v21, %s4412_s27 }
 0x286   : > { %v5191_v26 = vpop.permute.xlu1 %4046 }
 0x287   : > { %v4049_v63 = vunpack.i.h.bf16 %v5191_v26  ;;  %v4048_v11 = vunpack.i.l.bf16 %v5191_v26  ;;  %v5195_v9 = vpop.permute.xlu0 %4051 }
 0x288   : > { %v4053_v27 = vunpack.i.l.bf16 %v5195_v9 }
 0x289   : > { %v1543_v24 = vsel %vm464_vm0, %v4048_v11, %v4049_v63 }
 0x28a   : > { %v1542_v0 = vsel %vm464_vm0, %v4053_v27, %v4048_v11  ;;  %v5202_v45 = vpop.permute.xlu1 %4056  ;;  %v3632_v48 = vpack.c.bf16 %v1543_v24, %v5037_v16 }
 0x28b   : > { %v4059_v22 = vunpack.i.h.bf16 %v5202_v45  ;;  %v4058_v57 = vunpack.i.l.bf16 %v5202_v45  ;;  %v5207_v55 = vpop.permute.xlu0 %4061  ;;  %v3634_v54 = vpack.c.bf16 %v1542_v0, %v5033_v29 }
 0x28c   : > { %v4064_v12 = vunpack.i.h.bf16 %v5207_v55  ;;  %v4063_v34 = vunpack.i.l.bf16 %v5207_v55  ;;  %3633 = vmatprep.subr.bf16.mxu0 %v3632_v48 }
 0x28d   : > { %3635 = vmatpush1.bf16.msra.mxu0 %v3634_v54  ;;  %v1586_v23 = vsel %vm508_vm1, %v4058_v57, %v4059_v22 }
 0x28e   : > { %v5215_v25 = vpop.permute.xlu1 %4066  ;;  %v1629_v16 = vsel %vm552_vm4, %v4063_v34, %v4064_v12 }
 0x28f   : > { %v4068_v35 = vunpack.i.l.bf16 %v5215_v25  ;;  %v5221_v47 = vpop.permute.xlu0 %4071  ;;  %v3636_v29 = vpack.c.bf16 %v1629_v16, %v1586_v23 }
 0x290   : > { %v4073_v14 = vunpack.i.l.bf16 %v5221_v47 }
 0x291   : > { %v1585_v37 = vsel %vm508_vm1, %v4068_v35, %v4058_v57  ;;  %3637 = vmatprep.subr.bf16.mxu0 %v3636_v29 }
 0x292   : > { %v1628_v10 = vsel %vm552_vm4, %v4073_v14, %v4063_v34  ;;  %v5226_v46 = vpop.permute.xlu1 %4076 }
 0x293   : > { %v4079_v38 = vunpack.i.h.bf16 %v5226_v46  ;;  %v4078_v15 = vunpack.i.l.bf16 %v5226_v46  ;;  %v5230_v31 = vpop.permute.xlu0 %4081  ;;  %v3638_v58 = vpack.c.bf16 %v1628_v10, %v1585_v37 }
 0x294   : > { %v4084_v39 = vunpack.i.h.bf16 %v5230_v31  ;;  %v4083_v28 = vunpack.i.l.bf16 %v5230_v31 }
 0x295   : > { %3639 = vmatpush1.bf16.msra.mxu0 %v3638_v58  ;;  %v1672_v13 = vsel %vm596_vm6, %v4078_v15, %v4079_v38 }
 0x296   : > { %v5237_v33 = vpop.permute.xlu1 %4086  ;;  %v1715_v40 = vsel %vm6034_vm14, %v4083_v28, %v4084_v39  ;;  %vm6039_vm14 = vmmov %vm6035_vm3 }
 0x297   : > { %v4088_v30 = vunpack.i.l.bf16 %v5237_v33  ;;  %v5243_v42 = vpop.permute.xlu0 %4091  ;;  %v3640_v32 = vpack.c.bf16 %v1715_v40, %v1672_v13  ;;  %v4089_v55 = vunpack.i.h.bf16 %v5237_v33 }
 0x298   : > { %v4093_v18 = vunpack.i.l.bf16 %v5243_v42 }
 0x299   : > { %v1671_v56 = vsel %vm596_vm6, %v4088_v30, %v4078_v15  ;;  %3641 = vmatprep.subr.bf16.mxu0 %v3640_v32  ;;  %v5281_v30 = vld [vmem:[%s6019_s4] sm:$0xff]  ;;  %v4054_v32 = vunpack.i.h.bf16 %v5195_v9  ;;  %v4069_v9 = vunpack.i.h.bf16 %v5215_v25 }
 0x29a   : > { %v1714_v53 = vsel %vm6035_vm3, %v4093_v18, %v4083_v28  ;;  %v5248_v52 = vpop.permute.xlu1 %4096 }
 0x29b   : > { %v4099_v43 = vunpack.i.h.bf16 %v5248_v52  ;;  %v4098_v11 = vunpack.i.l.bf16 %v5248_v52  ;;  %v5252_v27 = vpop.permute.xlu0 %4101  ;;  %v3642_v24 = vpack.c.bf16 %v1714_v53, %v1671_v56 }
 0x29c   : > { %v4104_v0 = vunpack.i.h.bf16 %v5252_v27  ;;  %v4103_v48 = vunpack.i.l.bf16 %v5252_v27 }
 0x29d   : > { %3643 = vmatpush1.bf16.msra.mxu0 %v3642_v24  ;;  %v1761_v57 = vsel %vm690_vm9, %v4098_v11, %v4099_v43 }
 0x29e   : > { %v5259_v54 = vpop.permute.xlu1 %4106  ;;  %v1807_v34 = vsel %vm737_vm11, %v4103_v48, %v4104_v0 }
 0x29f   : > { %v4108_v23 = vunpack.i.l.bf16 %v5259_v54  ;;  %v5265_v16 = vpop.permute.xlu0 %4111  ;;  %v3644_v35 = vpack.c.bf16 %v1807_v34, %v1761_v57 }
 0x2a0   : > { %v4113_v29 = vunpack.i.l.bf16 %v5265_v16 }
 0x2a1   : > { %v1760_v14 = vsel %vm690_vm9, %v4108_v23, %v4098_v11  ;;  %3645 = vmatprep.subr.bf16.mxu0 %v3644_v35 }
 0x2a2   : > { %v1806_v37 = vsel %vm737_vm11, %v4113_v29, %v4103_v48  ;;  %v1831_v10 = vpop.permute.xlu1 %1830  ;;  %v1544_v48 = vsel %vm464_vm0, %v4049_v63, %v4054_v32 }
 0x2a3   : > { %v5270_v15 = vpop.permute.xlu0 %1832  ;;  %v3646_v58 = vpack.c.bf16 %v1806_v37, %v1760_v14  ;;  %v1852_v18 = vsel %vm784_vm13, %v5189_v60, %v1831_v10  ;;  %v4074_v60 = vunpack.i.h.bf16 %v5221_v47  ;;  %v3650_v63 = vpack.c.bf16 %v1544_v48, %v5047_v59 }
 0x2a4   : > { %v1853_v28 = vsel %vm784_vm13, %v1831_v10, %v5270_v15  ;;  %v1587_v47 = vsel %vm508_vm1, %v4059_v22, %v4069_v9 }
 0x2a5   : > { %3647 = vmatpush1.bf16.msra.mxu0 %v3646_v58 }
 0x2a6   : > { %v5274_v13 = vpop.permute.xlu1 %1834  ;;  %1900 = vmatprep.subr.mxu0 %v1853_v28 }
 0x2a7   : > { %v5276_v40 = vpop.permute.xlu0 %1836 }
 0x2a9   : > { %1901 = vmatpush1.msra.mxu0 %v1852_v18 }
 0x2aa   : > { %v4117_v56 = vpop.permute.xlu1 %4116  ;;  %3510 = vmatmul.mubr.msk.f32.vlgmr.msra.gmra.mrb[6].mxu0 %vm1880_vm15, %v5281_v30 }
 0x2ab   : > { %v4119_v53 = vunpack.i.h.bf16 %v4117_v56  ;;  %v4118_v11 = vunpack.i.l.bf16 %v4117_v56  ;;  %v5288_v24 = vpop.permute.xlu0 %4121  ;;  %2090 = vmatprep.mubr.f32.mxu0 %v4411_v21 }
 0x2ac   : > { %v4123_v57 = vunpack.i.l.bf16 %v5288_v24 }
 0x2ad   : > { %v1546_v34 = vsel %vm464_vm0, %v4118_v11, %v4119_v53  ;;  %v1545_v23 = vsel %vm464_vm0, %v4054_v32, %v4118_v11 }
 0x2ae   : > { %v4127_v35 = vpop.permute.xlu1 %4126  ;;  %v3648_v29 = vpack.c.bf16 %v1545_v23, %v5050_v17  ;;  %v1547_v14 = vsel %vm464_vm0, %v4119_v53, %v4123_v57  ;;  %v3666_v58 = vpack.c.bf16 %v1546_v34, %v5072_v61  ;;  %v1630_v17 = vsel %vm552_vm4, %v4064_v12, %v4074_v60 }
 0x2af   : > { %v4128_v26 = vunpack.i.l.bf16 %v4127_v35  ;;  %v4132_v37 = vpop.permute.xlu0 %4131  ;;  %v3664_v25 = vpack.c.bf16 %v1547_v14, %v5076_v51  ;;  %v4129_v28 = vunpack.i.h.bf16 %v4127_v35  ;;  %v3654_v56 = vpack.c.bf16 %v1630_v17, %v1587_v47 }
 0x2b0   : > { %v4133_v10 = vunpack.i.l.bf16 %v4132_v37  ;;  %3649 = vmatprep.subr.bf16.mxu1 %v3648_v29  ;;  %v4134_v32 = vunpack.i.h.bf16 %v4132_v37  ;;  %v4094_v53 = vunpack.i.h.bf16 %v5243_v42  ;;  %v1673_v42 = vsel %vm596_vm6, %v4079_v38, %v4089_v55 }
 0x2b1   : > { %3651 = vmatpush1.bf16.msra.mxu1 %v3650_v63  ;;  %3665 = vmatprep.subr.bf16.mxu0 %v3664_v25  ;;  %v1588_v59 = vsel %vm508_vm1, %v4069_v9, %v4128_v26  ;;  %v1589_v11 = vsel %vm508_vm1, %v4128_v26, %v4129_v28  ;;  %v4109_v17 = vunpack.i.h.bf16 %v5259_v54 }
 0x2b2   : > { %v5313_v18 = vpop.permute.xlu1 %4141  ;;  %3667 = vmatpush1.bf16.msra.mxu0 %v3666_v58  ;;  %v1631_v51 = vsel %vm552_vm4, %v4074_v60, %v4133_v10  ;;  %v1632_v48 = vsel %vm552_vm4, %v4133_v10, %v4134_v32  ;;  %v1716_v26 = vsel %vm6036_vm5, %v4084_v39, %v4094_v53  ;;  %vm6040_vm5 = vmmov %vm6035_vm3 }
 0x2b3   : > { %v4143_v45 = vunpack.i.l.bf16 %v5313_v18  ;;  %v5317_v22 = vpop.permute.xlu0 %4136  ;;  %v3652_v61 = vpack.c.bf16 %v1631_v51, %v1588_v59  ;;  %v3670_v14 = vpack.c.bf16 %v1632_v48, %v1589_v11  ;;  %v3658_v39 = vpack.c.bf16 %v1716_v26, %v1673_v42 }
 0x2b4   : > { %v4138_v12 = vunpack.i.l.bf16 %v5317_v22 }
 0x2b5   : > { %3653 = vmatprep.subr.bf16.mxu1 %v3652_v61  ;;  %v1633_v9 = vsel %vm552_vm4, %v4134_v32, %v4143_v45 }
 0x2b6   : > { %v4152_v60 = vpop.permute.xlu1 %4151  ;;  %3655 = vmatpush1.bf16.msra.mxu1 %v3654_v56  ;;  %v1590_v33 = vsel %vm508_vm1, %v4129_v28, %v4138_v12  ;;  %v4114_v28 = vunpack.i.h.bf16 %v5265_v16 }
 0x2b7   : > { %v4153_v34 = vunpack.i.l.bf16 %v4152_v60  ;;  %v4147_v23 = vpop.permute.xlu0 %4146  ;;  %v3668_v35 = vpack.c.bf16 %v1633_v9, %v1590_v33  ;;  %v4154_v37 = vunpack.i.h.bf16 %v4152_v60  ;;  %v1762_v60 = vsel %vm690_vm9, %v4099_v43, %v4109_v17 }
 0x2b8   : > { %v4148_v29 = vunpack.i.l.bf16 %v4147_v23  ;;  %v4149_v63 = vunpack.i.h.bf16 %v4147_v23  ;;  %v1808_v33 = vsel %vm737_vm11, %v4104_v0, %v4114_v28 }
 0x2b9   : > { %3669 = vmatprep.subr.bf16.mxu0 %v3668_v35  ;;  %v1717_v25 = vsel %vm6037_vm7, %v4094_v53, %v4153_v34  ;;  %v1718_v32 = vsel %vm6038_vm8, %v4153_v34, %v4154_v37  ;;  %vm6041_vm7 = vmmov %vm6035_vm3 }
 0x2ba   : > { %v5337_v47 = vpop.permute.xlu1 %4161  ;;  %3671 = vmatpush1.bf16.msra.mxu0 %v3670_v14  ;;  %v1674_v10 = vsel %vm596_vm6, %v4089_v55, %v4148_v29  ;;  %v1675_v59 = vsel %vm596_vm6, %v4148_v29, %v4149_v63  ;;  %v3662_v14 = vpack.c.bf16 %v1808_v33, %v1762_v60  ;;  %vm6042_vm8 = vmmov %vm6035_vm3 }
 0x2bb   : > { %v4163_v46 = vunpack.i.l.bf16 %v5337_v47  ;;  %v5341_v58 = vpop.permute.xlu0 %4156  ;;  %v3656_v38 = vpack.c.bf16 %v1717_v25, %v1674_v10  ;;  %v3674_v16 = vpack.c.bf16 %v1718_v32, %v1675_v59  ;;  %v1855_v25 = vsel %vm784_vm13, %v5274_v13, %v5276_v40 }
 0x2bc   : > { %v4158_v31 = vunpack.i.l.bf16 %v5341_v58  ;;  %v4124_v59 = vunpack.i.h.bf16 %v5288_v24  ;;  %v4164_v60 = vunpack.i.h.bf16 %v5337_v47  ;;  %v4159_v33 = vunpack.i.h.bf16 %v5341_v58 }
 0x2bd   : > { %3657 = vmatprep.subr.bf16.mxu1 %v3656_v38  ;;  %v1719_v51 = vsel %vm6039_vm14, %v4154_v37, %v4163_v46  ;;  %vm6043_vm14 = vmmov 1  }
 0x2be   : > { %v4172_v61 = vpop.permute.xlu1 %4171  ;;  %3659 = vmatpush1.bf16.msra.mxu1 %v3658_v39  ;;  %v1676_v54 = vsel %vm596_vm6, %v4149_v63, %v4158_v31 }
 0x2bf   : > { %v4174_v55 = vunpack.i.h.bf16 %v4172_v61  ;;  %v4173_v56 = vunpack.i.l.bf16 %v4172_v61  ;;  %v4167_v53 = vpop.permute.xlu0 %4166  ;;  %v3672_v11 = vpack.c.bf16 %v1719_v51, %v1676_v54  ;;  %v4139_v61 = vunpack.i.h.bf16 %v5317_v22 }
 0x2c0   : > { %v4169_v48 = vunpack.i.h.bf16 %v4167_v53  ;;  %v4168_v9 = vunpack.i.l.bf16 %v4167_v53 }
 0x2c1   : > { %3673 = vmatprep.subr.bf16.mxu0 %v3672_v11  ;;  %v1809_v34 = vsel %vm737_vm11, %v4114_v28, %v4173_v56  ;;  %v1810_v42 = vsel %vm737_vm11, %v4173_v56, %v4174_v55 }
 0x2c2   : > { %v5361_v23 = vpop.permute.xlu1 %1794  ;;  %3675 = vmatpush1.bf16.msra.mxu0 %v3674_v16  ;;  %v1763_v35 = vsel %vm690_vm9, %v4109_v17, %v4168_v9  ;;  %v1764_v29 = vsel %vm690_vm9, %v4168_v9, %v4169_v48  ;;  %v1854_v17 = vsel %vm784_vm13, %v5270_v15, %v5274_v13  ;;  %v4144_v13 = vunpack.i.h.bf16 %v5313_v18 }
 0x2c3   : > { %v1811_v52 = vsel %vm737_vm11, %v4174_v55, %v5361_v23  ;;  %v5368_v43 = vpop.permute.xlu0 %1748  ;;  %v3660_v27 = vpack.c.bf16 %v1809_v34, %v1763_v35  ;;  %v3678_v37 = vpack.c.bf16 %v1810_v42, %v1764_v29 }
 0x2c4   : > { %v1765_v0 = vsel %vm690_vm9, %v4169_v48, %v5368_v43  ;;  %v1634_v16 = vsel %vm552_vm4, %v4143_v45, %v4144_v13 }
 0x2c5   : > { %v3676_v26 = vpack.c.bf16 %v1811_v52, %v1765_v0  ;;  %3661 = vmatprep.subr.bf16.mxu1 %v3660_v27 }
 0x2c6   : > { %v5372_v63 = vpop.permute.xlu1 %1840  ;;  %3663 = vmatpush1.bf16.msra.mxu1 %v3662_v14 }
 0x2c7   : > { %v1839_v10 = vpop.permute.xlu0 %1838  ;;  %1971 = vmatprep.subr.mxu1 %v1855_v25  ;;  %3677 = vmatprep.subr.bf16.mxu0 %v3676_v26  ;;  %v1720_v26 = vsel %vm6035_vm3, %v4163_v46, %v4164_v60  ;;  %vm5473_vm3 = vmpackc.low %vm6043_vm14, %vm1495_vm12 }
 0x2c8   : > { %3679 = vmatpush1.bf16.msra.mxu0 %v3678_v37  ;;  %v1857_v38 = vsel %vm784_vm13, %v1839_v10, %v5372_v63  ;;  %v1856_v28 = vsel %vm784_vm13, %v5276_v40, %v1839_v10  ;;  %v1548_v40 = vsel %vm464_vm0, %v4123_v57, %v4124_v59  ;;  %v1591_v57 = vsel %vm508_vm1, %v4138_v12, %v4139_v61 }
 0x2c9   : > { %2042 = vmatprep.subr.mxu0 %v1857_v38  ;;  %v3682_v24 = vpack.c.bf16 %v1548_v40, %v5088_v44  ;;  %v3686_v10 = vpack.c.bf16 %v1634_v16, %v1591_v57  ;;  %v1677_v38 = vsel %vm596_vm6, %v4158_v31, %v4159_v33 }
 0x2ca   : > { %v5382_v39 = vpop.permute.xlu1 %4181  ;;  %1972 = vmatpush1.msra.mxu1 %v1854_v17  ;;  %v3690_v40 = vpack.c.bf16 %v1720_v26, %v1677_v38 }
 0x2cb   : > { %v5386_v32 = vpop.permute.xlu0 %4176  ;;  %3511 = vmatmul.mubr.msk.f32.vlgmr.msra.gmra.mrb[6].mxu1 %vm1880_vm15, %v5281_v30  ;;  %v4184_v35 = vunpack.i.h.bf16 %v5382_v39  ;;  %v4183_v18 = vunpack.i.l.bf16 %v5382_v39 }
 0x2cc   : > { %2043 = vmatpush1.msra.mxu0 %v1856_v28  ;;  %2161 = vmatprep.mubr.f32.mxu1 %v4411_v21  ;;  %v4179_v45 = vunpack.i.h.bf16 %v5386_v32  ;;  %v4178_v42 = vunpack.i.l.bf16 %v5386_v32 }
 0x2cd   : > { %3512 = vmatmul.mubr.msk.f32.vlgmr.msra.gmra.mrb[8].mxu0 %vm1880_vm15, %v5281_v30 }
 0x2ce   : > { %v4197_v15 = vpop.permute.xlu1 %4196  ;;  %2232 = vmatprep.mubr.f32.mxu0 %v4411_v21  ;;  %v1767_v46 = vsel %vm690_vm9, %v4178_v42, %v4179_v45 }
 0x2cf   : > { %v4187_v51 = vpop.permute.xlu0 %4186  ;;  %v4198_v55 = vunpack.i.l.bf16 %v4197_v15  ;;  %v4199_v17 = vunpack.i.h.bf16 %v4197_v15 }
 0x2d0   : > { %v4188_v54 = vunpack.i.l.bf16 %v4187_v51  ;;  %v4189_v56 = vunpack.i.h.bf16 %v4187_v51 }
 0x2d1   : > { %v1635_v29 = vsel %vm552_vm4, %v4144_v13, %v4198_v55 }
 0x2d2   : > { %v5400_v53 = vpop.permute.xlu1 %4206  ;;  %v1549_v11 = vsel %vm464_vm0, %v4124_v59, %v4188_v54  ;;  %v1550_v44 = vsel %vm464_vm0, %v4188_v54, %v4189_v56  ;;  %v1813_v59 = vsel %vm737_vm11, %v4183_v18, %v4184_v35  ;;  %v1766_v54 = vsel %vm690_vm9, %v5368_v43, %v4178_v42 }
 0x2d3   : > { %v4192_v48 = vpop.permute.xlu0 %4191  ;;  %v3680_v9 = vpack.c.bf16 %v1549_v11, %v5092_v62  ;;  %v4208_v62 = vunpack.i.l.bf16 %v5400_v53  ;;  %v3698_v28 = vpack.c.bf16 %v1550_v44, %v5120_v36  ;;  %v1636_v11 = vsel %vm552_vm4, %v4198_v55, %v4199_v17 }
 0x2d4   : > { %v4193_v34 = vunpack.i.l.bf16 %v4192_v48  ;;  %v4194_v52 = vunpack.i.h.bf16 %v4192_v48  ;;  %v4209_v16 = vunpack.i.h.bf16 %v5400_v53 }
 0x2d5   : > { %3681 = vmatprep.subr.bf16.mxu1 %v3680_v9  ;;  %v1721_v47 = vsel %vm6040_vm5, %v4164_v60, %v4208_v62  ;;  %v3692_v9 = vpack.c.bf16 %v1813_v59, %v1767_v46 }
 0x2d6   : > { %v5419_v22 = vpop.permute.xlu1 %1540  ;;  %3683 = vmatpush1.bf16.msra.mxu1 %v3682_v24  ;;  %v1592_v12 = vsel %vm508_vm1, %v4139_v61, %v4193_v34  ;;  %v1593_v58 = vsel %vm508_vm1, %v4193_v34, %v4194_v52  ;;  %v1812_v61 = vsel %vm737_vm11, %v5361_v23, %v4183_v18  ;;  %v1722_v55 = vsel %vm6042_vm8, %v4208_v62, %v4209_v16 }
 0x2d7   : > { %v1551_v27 = vsel %vm464_vm0, %v4189_v56, %v5419_v22  ;;  %v4202_v0 = vpop.permute.xlu0 %4201  ;;  %v3684_v14 = vpack.c.bf16 %v1635_v29, %v1592_v12  ;;  %v3702_v24 = vpack.c.bf16 %v1636_v11, %v1593_v58  ;;  %v3694_v43 = vpack.c.bf16 %v1812_v61, %v1766_v54 }
 0x2d8   : > { %v3696_v37 = vpack.c.bf16 %v1551_v27, %v5124_v41  ;;  %v4203_v25 = vunpack.i.l.bf16 %v4202_v0  ;;  %v4204_v36 = vunpack.i.h.bf16 %v4202_v0  ;;  %v3713_v32 = vpack.c.bf16 %v5419_v22, %v5133_v49 }
 0x2d9   : > { %3685 = vmatprep.subr.bf16.mxu1 %v3684_v14 }
 0x2da   : > { %v5436_v13 = vpop.permute.xlu1 %1626  ;;  %3687 = vmatpush1.bf16.msra.mxu1 %v3686_v10  ;;  %3697 = vmatprep.subr.bf16.mxu0 %v3696_v37  ;;  %v1678_v41 = vsel %vm596_vm6, %v4159_v33, %v4203_v25  ;;  %v1679_v60 = vsel %vm596_vm6, %v4203_v25, %v4204_v36 }
 0x2db   : > { %v1637_v31 = vsel %vm552_vm4, %v4199_v17, %v5436_v13  ;;  %v5446_v15 = vpop.permute.xlu0 %1583  ;;  %3699 = vmatpush1.bf16.msra.mxu0 %v3698_v28  ;;  %v3688_v51 = vpack.c.bf16 %v1721_v47, %v1678_v41  ;;  %v3706_v18 = vpack.c.bf16 %v1722_v55, %v1679_v60 }
 0x2dc   : > { %v1594_v56 = vsel %vm508_vm1, %v4194_v52, %v5446_v15  ;;  %v3717_v49 = vpack.c.bf16 %v5436_v13, %v5446_v15 }
 0x2dd   : > { %v3700_v48 = vpack.c.bf16 %v1637_v31, %v1594_v56  ;;  %3689 = vmatprep.subr.bf16.mxu1 %v3688_v51 }
 0x2de   : > { %v1713_v57 = vpop.permute.xlu1 %1712  ;;  %3691 = vmatpush1.bf16.msra.mxu1 %v3690_v40 }
 0x2df   : > { %v1723_v23 = vsel %vm6041_vm7, %v4209_v16, %v1713_v57  ;;  %v1670_v33 = vpop.permute.xlu0 %1669  ;;  %3693 = vmatprep.subr.bf16.mxu1 %v3692_v9  ;;  %3701 = vmatprep.subr.bf16.mxu0 %v3700_v48 }
 0x2e0   : > { %v1680_v34 = vsel %vm596_vm6, %v4204_v36, %v1670_v33  ;;  %3703 = vmatpush1.bf16.msra.mxu0 %v3702_v24  ;;  %v3720_v47 = vpack.c.bf16 %v1713_v57, %v1670_v33 }
 0x2e1   : > { %v3704_v53 = vpack.c.bf16 %v1723_v23, %v1680_v34 }
 0x2e2   : > { %v4217_v42 = vpop.permute.xlu1 %4216  ;;  %3695 = vmatpush1.bf16.msra.mxu1 %v3694_v43 }
 0x2e3   : > { %v4219_v44 = vunpack.i.h.bf16 %v4217_v42  ;;  %v4218_v12 = vunpack.i.l.bf16 %v4217_v42  ;;  %v4212_v29 = vpop.permute.xlu0 %4211  ;;  %3705 = vmatprep.subr.bf16.mxu0 %v3704_v53 }
 0x2e4   : > { %v4214_v52 = vunpack.i.h.bf16 %v4212_v29  ;;  %v4213_v27 = vunpack.i.l.bf16 %v4212_v29  ;;  %3707 = vmatpush1.bf16.msra.mxu0 %v3706_v18 }
 0x2e5   : > { %v1814_v0 = vsel %vm737_vm11, %v4184_v35, %v4218_v12  ;;  %v1815_v14 = vsel %vm737_vm11, %v4218_v12, %v4219_v44 }
 0x2e6   : > { %v1768_v62 = vsel %vm690_vm9, %v4179_v45, %v4213_v27  ;;  %v1845_v26 = vpop.permute.xlu1 %1844  ;;  %v1769_v37 = vsel %vm690_vm9, %v4213_v27, %v4214_v52 }
 0x2e7   : > { %v3710_v25 = vpack.c.bf16 %v1814_v0, %v1768_v62  ;;  %v1843_v10 = vpop.permute.xlu0 %1842  ;;  %v3708_v38 = vpack.c.bf16 %v1815_v14, %v1769_v37 }
 0x2e8   : > { %v1858_v17 = vsel %vm784_vm13, %v5372_v63, %v1843_v10  ;;  %v1859_v28 = vsel %vm784_vm13, %v1843_v10, %v1845_v26 }
 0x2e9   : > { %2113 = vmatprep.subr.mxu1 %v1859_v28  ;;  %3709 = vmatprep.subr.bf16.mxu0 %v3708_v38 }
 0x2ea   : > { %v1849_v35 = vpop.permute.xlu1 %1848  ;;  %2114 = vmatpush1.msra.mxu1 %v1858_v17  ;;  %3711 = vmatpush1.bf16.msra.mxu0 %v3710_v25 }
 0x2eb   : > { %v1847_v45 = vpop.permute.xlu0 %1846  ;;  %3513 = vmatmul.mubr.msk.f32.vlgmr.msra.gmra.mrb[8].mxu1 %vm1880_vm15, %v5281_v30  ;;  %3712 = vmatprep.subr.bf16.mxu1 %v4415_v50 }
 0x2ec   : > { %v1860_v63 = vsel %vm784_vm13, %v1845_v26, %v1847_v45  ;;  %3715 = vmatpush3.bf16.msk.msra.mxu1 %vm5473_vm3, %v3713_v32  ;;  %v1861_v59 = vsel %vm784_vm13, %v1847_v45, %v1849_v35  ;;  %3574 = vmatprep.mubr.msk.f32.mxu1 %vm6028_vm2, %v4411_v21 }
 0x2ed   : > { %2184 = vmatprep.subr.mxu0 %v1861_v59  ;;  %3716 = vmatprep.subr.bf16.mxu1 %v4415_v50 }
 0x2ee   : > { %2185 = vmatpush1.msra.mxu0 %v1860_v63  ;;  %v5493_v22 = vpop.permute.xlu1 %1804 }
 0x2ef   : > { %3514 = vmatmul.mubr.msk.f32.vlgmr.msra.gmra.mrb[10].mxu0 %vm1880_vm15, %v5281_v30  ;;  %v5495_v41 = vpop.permute.xlu0 %1758  ;;  %v1816_v46 = vsel %vm737_vm11, %v4219_v44, %v5493_v22 }
 0x2f0   : > { %3718 = vmatpush3.bf16.msra.mxu1 %v3717_v49  ;;  %2915 = vmatprep.mubr.f32.mxu0 %v4411_v21  ;;  %v1770_v13 = vsel %vm690_vm9, %v4214_v52, %v5495_v41 }
 0x2f1   : > { %3719 = vmatprep.subr.bf16.mxu1 %v4415_v50  ;;  %v3723_v58 = vpack.c.bf16 %v1816_v46, %v1770_v13 }
 0x2f3   : > { %v5504_v36 = vpop.permute.xlu0 %1850 }
 0x2f4   : > { %3721 = vmatpush3.bf16.msra.mxu1 %v3720_v47  ;;  %v1862_v31 = vsel %vm784_vm13, %v1849_v35, %v5504_v36 }
 0x2f5   : > { %3722 = vmatprep.subr.bf16.mxu1 %v4415_v50 }
 0x2f8   : > { %3724 = vmatpush3.bf16.msra.mxu1 %v3723_v58  ;;  %v2397_v58 = vld [vmem:[%s6016_s1] sm:$0xff] }
 0x2f9   : > { %3572 = vmatprep.subr.mxu1 %v4411_v21 }
 0x2fc   : > { %3573 = vmatpush3.msra.mxu1 %v1862_v31  ;;  %v2404_v31 = vrot.slane %v2397_v58, %v4504_v7 }
 0x2fd   : > { %3575 = vmatmul.mubr.msk.f32.vlgmr.msra.gmra.mrb[10].mxu1 %vm1880_vm15, %v5281_v30 }
 0x2fe   : > { %2986 = vmatprep.mubr.f32.mxu1 %v4411_v21 }
 0x2ff   : > { %v1878_v15 = vpop.permute.xlu1 %1877 }
 0x37d   : > { %v1950_v51 = vpop.f32.mrb[6].mxu0 }
 0x37e   : > { %v1951_v40 = vadd.f32 %v1950_v51, %v1878_v15  ;;  %v1952_v61 = vpop.f32.mrb[7].mxu0  ;;  %v2408_v51 = vrot.slane %v2397_v58, %v4498_v5 }
 0x37f   : > { %v1953_v54 = vadd.f32 %v1952_v61, %v1878_v15 }
 0x380   : > { %vm2309_vm5 = vcmp.ge.f32.partialorder %v1951_v40, 0.0  ;;  %v2320_v56 = vmul.f32 0.1, %v1951_v40 }
 0x381   : > { %vm2310_vm7 = vcmp.ge.f32.partialorder %v1953_v54, 0.0  ;;  %v2321_v11 = vmul.f32 0.1, %v1953_v54 }
 0x382   : > { %v2331_v16 = vsel %vm2309_vm5, %v1951_v40, %v2320_v56 }
 0x383   : > { %2353 = vrot.lane.b32.xlu0 %v2331_v16, %s4417_s12  ;;  %v2332_v48 = vsel %vm2310_vm7, %v1953_v54, %v2321_v11  ;;  %v2412_v16 = vrot.slane %v2397_v58, %v4501_v6 }
 0x384   : > { %2355 = vrot.lane.b32.xlu1 %v2332_v48, %s4417_s12  ;;  %v2416_v48 = vrot.slane %v2397_v58, %v4507_v8 }
 0x39e   : > { %v2021_v9 = vpop.f32.mrb[6].mxu1 }
 0x39f   : > { %v2022_v24 = vadd.f32 %v2021_v9, %v1878_v15  ;;  %v2023_v30 = vpop.f32.mrb[7].mxu1 }
 0x3a0   : > { %v2024_v57 = vadd.f32 %v2023_v30, %v1878_v15  ;;  %v2092_v60 = vpop.f32.mrb[8].mxu0 }
 0x3a1   : > { %vm2311_vm8 = vcmp.ge.f32.partialorder %v2022_v24, 0.0  ;;  %v2322_v23 = vmul.f32 0.1, %v2022_v24  ;;  %v2093_v33 = vadd.f32 %v2092_v60, %v1878_v15  ;;  %v2094_v43 = vpop.f32.mrb[9].mxu0 }
 0x3a2   : > { %vm2312_vm14 = vcmp.ge.f32.partialorder %v2024_v57, 0.0  ;;  %v2323_v34 = vmul.f32 0.1, %v2024_v57  ;;  %v2095_v55 = vadd.f32 %v2094_v43, %v1878_v15  ;;  %v2424_v43 = vrot.slane %v2397_v58, %v4495_v4 }
 0x3a3   : > { %v2324_v53 = vmul.f32 0.1, %v2093_v33  ;;  %v2333_v18 = vsel %vm2311_vm8, %v2022_v24, %v2322_v23  ;;  %vm2313_vm5 = vcmp.ge.f32.partialorder %v2093_v33, 0.0  ;;  %v2420_v23 = vrot.slane %v2397_v58, %v4492_v3 }
 0x3a4   : > { %v2325_v42 = vmul.f32 0.1, %v2095_v55  ;;  %2357 = vrot.lane.b32.xlu0 %v2333_v18, %s4417_s12  ;;  %v2334_v44 = vsel %vm2312_vm14, %v2024_v57, %v2323_v34  ;;  %vm2314_vm7 = vcmp.ge.f32.partialorder %v2095_v55, 0.0 }
 0x3a5   : > { %2359 = vrot.lane.b32.xlu1 %v2334_v44, %s4417_s12  ;;  %v2335_v12 = vsel %vm2313_vm5, %v2093_v33, %v2324_v53  ;;  %v2428_v44 = vrot.slane %v2397_v58, %v4558_v19 }
 0x3a6   : > { %v2336_v29 = vsel %vm2314_vm7, %v2095_v55, %v2325_v42 }
 0x3a8   : > { %2361 = vrot.lane.b32.xlu0 %v2335_v12, %s4417_s12  ;;  %v2432_v12 = vrot.slane %v2397_v58, %v4563_v20 }
 0x3a9   : > { %2363 = vrot.lane.b32.xlu1 %v2336_v29, %s4417_s12  ;;  %v2398_v29 = vld [vmem:[%s6016_s1 + $0x8] sm:$0x7] }
 0x3aa   : > { %v2436_v19 = vrot.slane %v2398_v29, %v4504_v7 }
 0x3be   : > { %v2163_v52 = vpop.f32.mrb[8].mxu1 }
 0x3bf   : > { %v2164_v27 = vadd.f32 %v2163_v52, %v1878_v15  ;;  %v2165_v0 = vpop.f32.mrb[9].mxu1 }
 0x3c0   : > { %v2166_v14 = vadd.f32 %v2165_v0, %v1878_v15 }
 0x3c1   : > { %vm2315_vm2 = vcmp.ge.f32.partialorder %v2164_v27, 0.0  ;;  %v2326_v62 = vmul.f32 0.1, %v2164_v27 }
 0x3c2   : > { %vm2316_vm8 = vcmp.ge.f32.partialorder %v2166_v14, 0.0  ;;  %v2327_v26 = vmul.f32 0.1, %v2166_v14  ;;  %v2234_v37 = vpop.f32.mrb[10].mxu0 }
 0x3c3   : > { %v2235_v25 = vadd.f32 %v2234_v37, %v1878_v15  ;;  %v2236_v10 = vpop.f32.mrb[11].mxu0  ;;  %v2337_v38 = vsel %vm2315_vm2, %v2164_v27, %v2326_v62 }
 0x3c4   : > { %v2237_v17 = vadd.f32 %v2236_v10, %v1878_v15  ;;  %2365 = vrot.lane.b32.xlu0 %v2337_v38, %s4417_s12  ;;  %v2338_v28 = vsel %vm2316_vm8, %v2166_v14, %v2327_v26  ;;  %v2440_v26 = vrot.slane %v2398_v29, %v4498_v5 }
 0x3c5   : > { %vm2317_vm14 = vcmp.ge.f32.partialorder %v2235_v25, 0.0  ;;  %v2328_v32 = vmul.f32 0.1, %v2235_v25  ;;  %2367 = vrot.lane.b32.xlu1 %v2338_v28, %s4417_s12 }
 0x3c6   : > { %vm2318_vm5 = vcmp.ge.f32.partialorder %v2237_v17, 0.0  ;;  %v2329_v35 = vmul.f32 0.1, %v2237_v17 }
 0x3c7   : > { %v2339_v45 = vsel %vm2317_vm14, %v2235_v25, %v2328_v32  ;;  %v2444_v32 = vrot.slane %v2398_v29, %v4501_v6 }
 0x3c8   : > { %2369 = vrot.lane.b32.xlu0 %v2339_v45, %s4417_s12  ;;  %v2340_v63 = vsel %vm2318_vm5, %v2237_v17, %v2329_v35 }
 0x3c9   : > { %2371 = vrot.lane.b32.xlu1 %v2340_v63, %s4417_s12 }
 0x3d0   : > { %v2305_v59 = vpop.f32.mrb[10].mxu1 }
 0x3d1   : > { %v2306_v49 = vadd.f32 %v2305_v59, %v1878_v15  ;;  %v3576_v47 = vpop.f32.mrb[11].mxu1 }
 0x3d3   : > { %vm2319_vm2 = vcmp.ge.f32.partialorder %v2306_v49, 0.0  ;;  %v2330_v46 = vmul.f32 0.1, %v2306_v49 }
 0x3d5   : > { %v2341_v13 = vsel %vm2319_vm2, %v2306_v49, %v2330_v46  ;;  %v2838_v46 = vld [vmem:[#allocation2] sm:$0x1] }
 0x3d6   : > { %2373 = vrot.lane.b32.xlu0 %v2341_v13, %s4417_s12 }
 0x3f5   : > { %v2354_v40 = vpop.permute.xlu0 %2353 }
 0x3f6   : > { %v2396_v61 = vsel %vm1402_vm10, 0.0, %v2354_v40  ;;  %v2356_v54 = vpop.permute.xlu1 %2355 }
 0x3f7   : > { %v5536_v15 = vmul.f32 %v2404_v31, %v2396_v61  ;;  %v2375_v56 = vsel %vm1402_vm10, %v2354_v40, %v2356_v54 }
 0x3f8   : > { %v5539_v11 = vmul.f32 %v2408_v51, %v2375_v56 }
 0x3f9   : > { %2794 = vrot.lane.b32.xlu1 %v5536_v15, %s4412_s27  ;;  %2468 = vst [vmem:[%s5534_s29] sm:$0xff] %v5536_v15 }
 0x3fa   : > { %2469 = vst [vmem:[%s5534_s29 + $0x8] sm:$0xff] %v5539_v11 }
 0x3fd   : > { %2796 = vrot.lane.b32.xlu1 %v5539_v11, %s4412_s27 }
 0x416   : > { %v2358_v9 = vpop.permute.xlu0 %2357 }
 0x417   : > { %v2376_v24 = vsel %vm1402_vm10, %v2356_v54, %v2358_v9  ;;  %v2360_v30 = vpop.permute.xlu1 %2359 }
 0x418   : > { %v5552_v57 = vmul.f32 %v2412_v16, %v2376_v24  ;;  %v2377_v60 = vsel %vm1402_vm10, %v2358_v9, %v2360_v30 }
 0x419   : > { %v5556_v33 = vmul.f32 %v2416_v48, %v2377_v60 }
 0x41a   : > { %v2362_v34 = vpop.permute.xlu0 %2361  ;;  %v4225_v8 = vpack.i.bf16 %v5552_v57, %v5539_v11  ;;  %2470 = vst [vmem:[%s5534_s29 + $0x10] sm:$0xff] %v5552_v57 }
 0x41b   : > { %v2378_v55 = vsel %vm1402_vm10, %v2360_v30, %v2362_v34  ;;  %v2364_v53 = vpop.permute.xlu1 %2363  ;;  %2471 = vst [vmem:[%s5534_s29 + $0x18] sm:$0xff] %v5556_v33  ;;  %v4255_v4 = vpack.i.bf16 %v5556_v33, %v5536_v15 }
 0x41c   : > { %v5566_v18 = vmul.f32 %v2420_v23, %v2378_v55  ;;  %v2379_v42 = vsel %vm1402_vm10, %v2362_v34, %v2364_v53  ;;  %4226 = vrot.lane.b32.xlu0 %v4225_v8, %s4405_s21  ;;  %4221 = vrot.lane.b32.xlu1 %v4225_v8, %s4404_s20 }
 0x41d   : > { %v5571_v3 = vmul.f32 %v2424_v43, %v2379_v42 }
 0x41e   : > { %2472 = vst [vmem:[%s5534_s29 + $0x20] sm:$0xff] %v5566_v18 }
 0x41f   : > { %2473 = vst [vmem:[%s5534_s29 + $0x28] sm:$0xff] %v5571_v3  ;;  %v4290_v25 = vpack.i.bf16 %v5571_v3, %v5566_v18 }
 0x420   : > { %4236 = vrot.lane.b32.xlu0 %v4225_v8, %s4407_s23  ;;  %4231 = vrot.lane.b32.xlu1 %v4225_v8, %s4406_s22 }
 0x424   : > { %4246 = vrot.lane.b32.xlu0 %v4225_v8, %s4409_s25  ;;  %4241 = vrot.lane.b32.xlu1 %v4225_v8, %s4408_s24 }
 0x428   : > { %2798 = vrot.lane.b32.xlu0 %v5552_v57, %s4412_s27  ;;  %4251 = vrot.lane.b32.xlu1 %v4225_v8, %s4410_s26 }
 0x42c   : > { %4256 = vrot.lane.b32.xlu0 %v4255_v4, %s4404_s20  ;;  %4266 = vrot.lane.b32.xlu1 %v4255_v4, %s4406_s22 }
 0x430   : > { %4261 = vrot.lane.b32.xlu0 %v4255_v4, %s4405_s21  ;;  %4276 = vrot.lane.b32.xlu1 %v4255_v4, %s4408_s24 }
 0x434   : > { %4271 = vrot.lane.b32.xlu0 %v4255_v4, %s4407_s23  ;;  %4286 = vrot.lane.b32.xlu1 %v4255_v4, %s4410_s26 }
 0x436   : > { %v2366_v52 = vpop.permute.xlu0 %2365 }
 0x437   : > { %v2380_v27 = vsel %vm1402_vm10, %v2364_v53, %v2366_v52  ;;  %v2368_v0 = vpop.permute.xlu1 %2367 }
 0x438   : > { %v5598_v14 = vmul.f32 %v2428_v44, %v2380_v27  ;;  %v2381_v62 = vsel %vm1402_vm10, %v2366_v52, %v2368_v0  ;;  %4281 = vrot.lane.b32.xlu0 %v4255_v4, %s4409_s25  ;;  %2800 = vrot.lane.b32.xlu1 %v5556_v33, %s4412_s27 }
 0x439   : > { %v5605_v20 = vmul.f32 %v2432_v12, %v2381_v62 }
 0x43a   : > { %v2370_v37 = vpop.permute.xlu0 %2369  ;;  %2474 = vst [vmem:[%s5534_s29 + $0x30] sm:$0xff] %v5598_v14 }
 0x43b   : > { %v2382_v10 = vsel %vm1402_vm10, %v2368_v0, %v2370_v37  ;;  %v2372_v38 = vpop.permute.xlu1 %2371  ;;  %2475 = vst [vmem:[%s5534_s29 + $0x38] sm:$0xff] %v5605_v20  ;;  %v4330_v59 = vpack.i.bf16 %v5605_v20, %v5598_v14 }
 0x43c   : > { %v5615_v17 = vmul.f32 %v2436_v19, %v2382_v10  ;;  %v2383_v28 = vsel %vm1402_vm10, %v2370_v37, %v2372_v38  ;;  %4291 = vrot.lane.b32.xlu1 %v4290_v25, %s4404_s20  ;;  %2802 = vrot.lane.b32.xlu0 %v5566_v18, %s4412_s27 }
 0x43d   : > { %v5621_v5 = vmul.f32 %v2440_v26, %v2383_v28 }
 0x43e   : > { %2476 = vst [vmem:[%s5534_s29 + $0x40] sm:$0xff] %v5615_v17 }
 0x43f   : > { %2477 = vst [vmem:[%s5534_s29 + $0x48] sm:$0xff] %v5621_v5  ;;  %v4365_v6 = vpack.i.bf16 %v5621_v5, %v5615_v17 }
 0x440   : > { %4301 = vrot.lane.b32.xlu1 %v4290_v25, %s4406_s22  ;;  %4296 = vrot.lane.b32.xlu0 %v4290_v25, %s4405_s21 }
 0x444   : > { %4311 = vrot.lane.b32.xlu1 %v4290_v25, %s4408_s24  ;;  %4306 = vrot.lane.b32.xlu0 %v4290_v25, %s4407_s23 }
 0x448   : > { %4321 = vrot.lane.b32.xlu1 %v4290_v25, %s4410_s26  ;;  %4316 = vrot.lane.b32.xlu0 %v4290_v25, %s4409_s25  ;;  %v2374_v35 = vpop.permute.xlu0 %2373 }
 0x449   : > { %v2384_v45 = vsel %vm1402_vm10, %v2372_v38, %v2374_v35  ;;  %vm6046_vm10 = vcmask 547840  }
 0x44a   : > { %v5635_v63 = vmul.f32 %v2444_v32, %v2384_v45  ;;  %vm6048_vm7 = vmmov %vm6046_vm10 }
 0x44b   : > { %vm6049_vm8 = vmmov %vm6048_vm7 }
 0x44c   : > { %2478 = vst.msk [vmem:[%s5534_s29 + $0x50] sm:$0xff] %vm1495_vm12, %v5635_v63  ;;  %4331 = vrot.lane.b32.xlu1 %v4330_v59, %s4405_s21  ;;  %4326 = vrot.lane.b32.xlu0 %v4330_v59, %s4404_s20  ;;  %v2467_v49 = vsel %vm1495_vm12, %v5635_v63, 0.0  ;;  %vm6047_vm12 = vmmov %vm6046_vm10 }
 0x44d   : > { %v4370_v47 = vpack.i.bf16 %v2467_v49, %v5621_v5  ;;  %vm6050_vm14 = vmmov %vm6048_vm7 }
 0x44e   : > { %vm6051_vm5 = vmmov %vm6048_vm7 }
 0x44f   : > { %vm6052_vm2 = vmmov %vm6051_vm5 }
 0x450   : > { %4341 = vrot.lane.b32.xlu1 %v4330_v59, %s4407_s23  ;;  %4336 = vrot.lane.b32.xlu0 %v4330_v59, %s4406_s22 }
 0x454   : > { %4351 = vrot.lane.b32.xlu1 %v4330_v59, %s4409_s25  ;;  %4346 = vrot.lane.b32.xlu0 %v4330_v59, %s4408_s24 }
 0x458   : > { %2636 = vrot.lane.b32.xlu1 %v5615_v17, %s4407_s23  ;;  %2593 = vrot.lane.b32.xlu0 %v5615_v17, %s4406_s22 }
 0x45c   : > { %2722 = vrot.lane.b32.xlu1 %v5615_v17, %s4409_s25  ;;  %2679 = vrot.lane.b32.xlu0 %v5615_v17, %s4408_s24 }
 0x460   : > { %4366 = vrot.lane.b32.xlu1 %v4365_v6, %s4405_s21  ;;  %4356 = vrot.lane.b32.xlu0 %v4365_v6, %s4404_s20 }
 0x464   : > { %2806 = vrot.lane.b32.xlu1 %v5598_v14, %s4412_s27  ;;  %4361 = vrot.lane.b32.xlu0 %v4330_v59, %s4410_s26 }
 0x468   : > { %2810 = vrot.lane.b32.xlu1 %v5615_v17, %s4412_s27  ;;  %2766 = vrot.lane.b32.xlu0 %v5615_v17, %s4410_s26 }
 0x46b   : > { %v5684_v13 = vpop.permute.xlu1 %2794 }
 0x46c   : > { %2804 = vrot.lane.b32.xlu0 %v5571_v3, %s4412_s27  ;;  %2511 = vrot.lane.b32.xlu1 %v2467_v49, %s4404_s20 }
 0x46f   : > { %v5686_v58 = vpop.permute.xlu1 %2796 }
 0x470   : > { %2808 = vrot.lane.b32.xlu0 %v5605_v20, %s4412_s27  ;;  %4371 = vrot.lane.b32.xlu1 %v4370_v47, %s4406_s22  ;;  %s3820_s22 = smul.u32 11, %s6058_s16 }
 0x474   : > { %2554 = vrot.lane.b32.xlu0 %v2467_v49, %s4405_s21  ;;  %4381 = vrot.lane.b32.xlu1 %v4370_v47, %s4408_s24 }
 0x478   : > { %4376 = vrot.lane.b32.xlu0 %v4370_v47, %s4407_s23  ;;  %4391 = vrot.lane.b32.xlu1 %v4370_v47, %s4410_s26 }
 0x47c   : > { %4386 = vrot.lane.b32.xlu0 %v4370_v47, %s4409_s25  ;;  %2814 = vrot.lane.b32.xlu1 %v2467_v49, %s4412_s27  ;;  %s381_s25 = scalar_lea.vmem %s6025_s10, %s3820_s22 }
 0x480   : > { %2812 = vrot.lane.b32.xlu0 %v5621_v5, %s4412_s27 }
 0x484   : > { %2841 = vperm.xlu0 %4395, %v2838_v46  }
 0x48e   : > { %v5688_v31 = vpop.permute.xlu1 %4221  ;;  %v5690_v51 = vpop.permute.xlu0 %4226 }
 0x48f   : > { %v4224_v40 = vunpack.i.h.bf16 %v5688_v31  ;;  %v4223_v61 = vunpack.i.l.bf16 %v5688_v31  ;;  %v4229_v34 = vunpack.i.h.bf16 %v5690_v51  ;;  %v4228_v8 = vunpack.i.l.bf16 %v5690_v51 }
 0x491   : > { %v2514_v54 = vsel %vm464_vm0, %v4223_v61, %v4224_v40  ;;  %v2557_v26 = vsel %vm508_vm1, %v4228_v8, %v4229_v34 }
 0x492   : > { %v5697_v56 = vpop.permute.xlu1 %4231  ;;  %v5699_v16 = vpop.permute.xlu0 %4236  ;;  %v3725_v48 = vpack.c.bf16 %v2514_v54, %v5539_v11 }
 0x493   : > { %v4234_v23 = vunpack.i.h.bf16 %v5697_v56  ;;  %v4233_v43 = vunpack.i.l.bf16 %v5697_v56  ;;  %v4239_v52 = vunpack.i.h.bf16 %v5699_v16  ;;  %v4238_v27 = vunpack.i.l.bf16 %v5699_v16 }
 0x494   : > { %3726 = vmatprep.subr.bf16.mxu0 %v3725_v48 }
 0x495   : > { %v2600_v44 = vsel %vm552_vm4, %v4233_v43, %v4234_v23  ;;  %v2643_v46 = vsel %vm596_vm6, %v4238_v27, %v4239_v52 }
 0x496   : > { %v5702_v9 = vpop.permute.xlu1 %4241  ;;  %v5704_v24 = vpop.permute.xlu0 %4246  ;;  %v3729_v25 = vpack.c.bf16 %v2600_v44, %v2557_v26 }
 0x497   : > { %v4244_v42 = vunpack.i.h.bf16 %v5702_v9  ;;  %v4243_v4 = vunpack.i.l.bf16 %v5702_v9  ;;  %v4249_v45 = vunpack.i.h.bf16 %v5704_v24  ;;  %v4248_v59 = vunpack.i.l.bf16 %v5704_v24 }
 0x49a   : > { %v5706_v30 = vpop.permute.xlu1 %4251  ;;  %v5708_v60 = vpop.permute.xlu0 %2798 }
 0x49b   : > { %v4254_v10 = vunpack.i.h.bf16 %v5706_v30  ;;  %v4253_v38 = vunpack.i.l.bf16 %v5706_v30 }
 0x49d   : > { %v2773_v48 = vsel %vm737_vm11, %v4253_v38, %v4254_v10 }
 0x49e   : > { %v5714_v55 = vpop.permute.xlu1 %4266  ;;  %v4257_v11 = vpop.permute.xlu0 %4256 }
 0x49f   : > { %v4258_v53 = vunpack.i.l.bf16 %v4257_v11  ;;  %v4268_v12 = vunpack.i.l.bf16 %v5714_v55 }
 0x4a1   : > { %v2513_v29 = vsel %vm464_vm0, %v4258_v53, %v4223_v61  ;;  %v2599_v28 = vsel %vm552_vm4, %v4268_v12, %v4233_v43 }
 0x4a2   : > { %v3727_v0 = vpack.c.bf16 %v2513_v29, %v5536_v15  ;;  %v5726_v62 = vpop.permute.xlu1 %4276  ;;  %v5728_v19 = vpop.permute.xlu0 %4261  ;;  %v2686_v15 = vsel %vm6046_vm10, %v4243_v4, %v4244_v42  ;;  %vm6053_vm10 = vmmov %vm6052_vm2 }
 0x4a3   : > { %v4263_v37 = vunpack.i.l.bf16 %v5728_v19  ;;  %v4278_v32 = vunpack.i.l.bf16 %v5726_v62  ;;  %v3733_v54 = vpack.c.bf16 %v2686_v15, %v2643_v46  ;;  %v4264_v46 = vunpack.i.h.bf16 %v5728_v19 }
 0x4a4   : > { %3728 = vmatpush1.bf16.msra.mxu0 %v3727_v0  ;;  %v2729_v0 = vsel %vm690_vm9, %v4248_v59, %v4249_v45 }
 0x4a5   : > { %v2556_v35 = vsel %vm508_vm1, %v4263_v37, %v4228_v8  ;;  %3730 = vmatprep.subr.bf16.mxu0 %v3729_v25  ;;  %v2685_v43 = vsel %vm6047_vm12, %v4278_v32, %v4243_v4  ;;  %v3737_v37 = vpack.c.bf16 %v2773_v48, %v2729_v0  ;;  %v4259_v25 = vunpack.i.h.bf16 %v4257_v11 }
 0x4a6   : > { %v3731_v6 = vpack.c.bf16 %v2599_v28, %v2556_v35  ;;  %v5744_v49 = vpop.permute.xlu1 %4286  ;;  %v5746_v47 = vpop.permute.xlu0 %4271  ;;  %v2817_v11 = vsel %vm784_vm13, %v5686_v58, %v5708_v60 }
 0x4a7   : > { %v4273_v61 = vunpack.i.l.bf16 %v5746_v47  ;;  %v4288_v8 = vunpack.i.l.bf16 %v5744_v49 }
 0x4a8   : > { %3732 = vmatpush1.bf16.msra.mxu0 %v3731_v6  ;;  %v2515_v6 = vsel %vm464_vm0, %v4224_v40, %v4259_v25  ;;  %v2816_v40 = vsel %vm784_vm13, %v5684_v13, %v5686_v58 }
 0x4a9   : > { %v2642_v53 = vsel %vm596_vm6, %v4273_v61, %v4238_v27  ;;  %3734 = vmatprep.subr.bf16.mxu0 %v3733_v54  ;;  %v2772_v4 = vsel %vm737_vm11, %v4288_v8, %v4253_v38  ;;  %v3743_v19 = vpack.c.bf16 %v2515_v6, %v5552_v57  ;;  %v2558_v8 = vsel %vm508_vm1, %v4229_v34, %v4264_v46 }
 0x4aa   : > { %v3735_v44 = vpack.c.bf16 %v2685_v43, %v2642_v53  ;;  %v5758_v12 = vpop.permute.xlu1 %2800  ;;  %v5760_v29 = vpop.permute.xlu0 %4281  ;;  %v4279_v53 = vunpack.i.h.bf16 %v5726_v62 }
 0x4ab   : > { %v4283_v26 = vunpack.i.l.bf16 %v5760_v29 }
 0x4ac   : > { %3736 = vmatpush1.bf16.msra.mxu0 %v3735_v44 }
 0x4ad   : > { %v2728_v15 = vsel %vm690_vm9, %v4283_v26, %v4248_v59  ;;  %3738 = vmatprep.subr.bf16.mxu0 %v3737_v37  ;;  %v4269_v59 = vunpack.i.h.bf16 %v5714_v55  ;;  %v5796_v55 = vld [vmem:[%s6021_s6] sm:$0x1] }
 0x4ae   : > { %v3739_v27 = vpack.c.bf16 %v2772_v4, %v2728_v15  ;;  %v5768_v28 = vpop.permute.xlu1 %4291  ;;  %v5770_v32 = vpop.permute.xlu0 %2802  ;;  %v4289_v4 = vunpack.i.h.bf16 %v5744_v49 }
 0x4af   : > { %v4293_v35 = vunpack.i.l.bf16 %v5768_v28  ;;  %v2601_v58 = vsel %vm552_vm4, %v4234_v23, %v4269_v59  ;;  %v4284_v23 = vunpack.i.h.bf16 %v5760_v29  ;;  %v4294_v9 = vunpack.i.h.bf16 %v5768_v28 }
 0x4b0   : > { %3740 = vmatpush1.bf16.msra.mxu0 %v3739_v27  ;;  %v2819_v30 = vsel %vm784_vm13, %v5758_v12, %v5770_v32 }
 0x4b1   : > { %2867 = vmatprep.subr.mxu0 %v2817_v11  ;;  %v2516_v38 = vsel %vm464_vm0, %v4259_v25, %v4293_v35  ;;  %v2687_v25 = vsel %vm6049_vm8, %v4244_v42, %v4279_v53  ;;  %v2774_v11 = vsel %vm737_vm11, %v4254_v10, %v4289_v4 }
 0x4b2   : > { %v5782_v61 = vpop.permute.xlu1 %4301  ;;  %v5784_v54 = vpop.permute.xlu0 %4296  ;;  %v3741_v31 = vpack.c.bf16 %v2516_v38, %v5556_v33  ;;  %v4274_v33 = vunpack.i.h.bf16 %v5746_v47  ;;  %v3747_v47 = vpack.c.bf16 %v2601_v58, %v2558_v8 }
 0x4b3   : > { %v4303_v48 = vunpack.i.l.bf16 %v5782_v61  ;;  %v4298_v43 = vunpack.i.l.bf16 %v5784_v54 }
 0x4b4   : > { %2868 = vmatpush1.msra.mxu0 %v2816_v40  ;;  %3742 = vmatprep.subr.bf16.mxu1 %v3741_v31  ;;  %v2644_v56 = vsel %vm596_vm6, %v4239_v52, %v4274_v33  ;;  %v2517_v31 = vsel %vm464_vm0, %v4293_v35, %v4294_v9  ;;  %v4304_v40 = vunpack.i.h.bf16 %v5782_v61  ;;  %v2818_v61 = vsel %vm784_vm13, %v5708_v60, %v5758_v12 }
 0x4b5   : > { %3744 = vmatpush1.bf16.msra.mxu1 %v3743_v19  ;;  %v2559_v57 = vsel %vm508_vm1, %v4264_v46, %v4298_v43  ;;  %v2602_v13 = vsel %vm552_vm4, %v4269_v59, %v4303_v48  ;;  %3517 = vmatmul.mubr.msk.f32.vlgmr.msra.gmra.mrb[12].mxu0 %vm1880_vm15, %v5796_v55  ;;  %v3751_v52 = vpack.c.bf16 %v2687_v25, %v2644_v56  ;;  %v4299_v19 = vunpack.i.h.bf16 %v5784_v54 }
 0x4b6   : > { %v5808_v44 = vpop.permute.xlu1 %4311  ;;  %v5810_v51 = vpop.permute.xlu0 %4306  ;;  %v3745_v34 = vpack.c.bf16 %v2602_v13, %v2559_v57  ;;  %3057 = vmatprep.mubr.f32.mxu0 %v4411_v21  ;;  %v2730_v46 = vsel %vm690_vm9, %v4249_v45, %v4284_v23  ;;  %v3759_v54 = vpack.c.bf16 %v2517_v31, %v5566_v18  ;;  %v2603_v58 = vsel %vm552_vm4, %v4303_v48, %v4304_v40 }
 0x4b7   : > { %v4313_v0 = vunpack.i.l.bf16 %v5808_v44  ;;  %v4308_v26 = vunpack.i.l.bf16 %v5810_v51  ;;  %v3755_v28 = vpack.c.bf16 %v2774_v11, %v2730_v46 }
 0x4b8   : > { %3746 = vmatprep.subr.bf16.mxu1 %v3745_v34  ;;  %v4314_v34 = vunpack.i.h.bf16 %v5808_v44 }
 0x4b9   : > { %3748 = vmatpush1.bf16.msra.mxu1 %v3747_v47  ;;  %v2645_v62 = vsel %vm596_vm6, %v4274_v33, %v4308_v26  ;;  %v2688_v37 = vsel %vm6048_vm7, %v4279_v53, %v4313_v0  ;;  %v2560_v53 = vsel %vm508_vm1, %v4298_v43, %v4299_v19  ;;  %v4309_v47 = vunpack.i.h.bf16 %v5810_v51 }
 0x4ba   : > { %v5827_v15 = vpop.permute.xlu1 %4321  ;;  %v5829_v27 = vpop.permute.xlu0 %4316  ;;  %v3749_v16 = vpack.c.bf16 %v2688_v37, %v2645_v62  ;;  %v3763_v43 = vpack.c.bf16 %v2603_v58, %v2560_v53  ;;  %v2689_v51 = vsel %vm6050_vm14, %v4313_v0, %v4314_v34 }
 0x4bb   : > { %v4323_v29 = vunpack.i.l.bf16 %v5827_v15  ;;  %v4318_v6 = vunpack.i.l.bf16 %v5829_v27 }
 0x4bc   : > { %3750 = vmatprep.subr.bf16.mxu1 %v3749_v16 }
 0x4bd   : > { %3752 = vmatpush1.bf16.msra.mxu1 %v3751_v52  ;;  %v2731_v42 = vsel %vm690_vm9, %v4284_v23, %v4318_v6  ;;  %v2775_v49 = vsel %vm737_vm11, %v4289_v4, %v4323_v29  ;;  %v2646_v23 = vsel %vm596_vm6, %v4308_v26, %v4309_v47 }
 0x4be   : > { %v5846_v38 = vpop.permute.xlu1 %4331  ;;  %v5848_v24 = vpop.permute.xlu0 %4326  ;;  %v3753_v45 = vpack.c.bf16 %v2775_v49, %v2731_v42  ;;  %v3767_v52 = vpack.c.bf16 %v2689_v51, %v2646_v23  ;;  %v4319_v42 = vunpack.i.h.bf16 %v5829_v27 }
 0x4bf   : > { %v4328_v59 = vunpack.i.l.bf16 %v5848_v24  ;;  %v4333_v8 = vunpack.i.l.bf16 %v5846_v38  ;;  %v4329_v26 = vunpack.i.h.bf16 %v5848_v24  ;;  %v4334_v49 = vunpack.i.h.bf16 %v5846_v38 }
 0x4c0   : > { %3754 = vmatprep.subr.bf16.mxu1 %v3753_v45 }
 0x4c1   : > { %3756 = vmatpush1.bf16.msra.mxu1 %v3755_v28  ;;  %v2518_v10 = vsel %vm464_vm0, %v4294_v9, %v4328_v59  ;;  %v4324_v9 = vunpack.i.h.bf16 %v5827_v15  ;;  %v2519_v28 = vsel %vm464_vm0, %v4328_v59, %v4329_v26  ;;  %v2732_v59 = vsel %vm690_vm9, %v4318_v6, %v4319_v42 }
 0x4c2   : > { %v5859_v33 = vpop.permute.xlu1 %4341  ;;  %v4337_v57 = vpop.permute.xlu0 %4336  ;;  %2938 = vmatprep.subr.mxu1 %v2819_v30  ;;  %v3757_v35 = vpack.c.bf16 %v2518_v10, %v5571_v3  ;;  %v2561_v3 = vsel %vm508_vm1, %v4299_v19, %v4333_v8  ;;  %v2562_v27 = vsel %vm508_vm1, %v4333_v8, %v4334_v49 }
 0x4c3   : > { %v4338_v13 = vunpack.i.l.bf16 %v4337_v57  ;;  %v4343_v56 = vunpack.i.l.bf16 %v5859_v33  ;;  %v4339_v31 = vunpack.i.h.bf16 %v4337_v57  ;;  %v3775_v57 = vpack.c.bf16 %v2519_v28, %v5598_v14 }
 0x4c4   : > { %3758 = vmatprep.subr.bf16.mxu0 %v3757_v35  ;;  %v2776_v35 = vsel %vm737_vm11, %v4323_v29, %v4324_v9  ;;  %v4344_v14 = vunpack.i.h.bf16 %v5859_v33 }
 0x4c5   : > { %2939 = vmatpush1.msra.mxu1 %v2818_v61  ;;  %3760 = vmatpush1.bf16.msra.mxu0 %v3759_v54  ;;  %v2604_v18 = vsel %vm552_vm4, %v4304_v40, %v4338_v13  ;;  %v2647_v62 = vsel %vm596_vm6, %v4309_v47, %v4343_v56  ;;  %v2605_v53 = vsel %vm552_vm4, %v4338_v13, %v4339_v31 }
 0x4c6   : > { %v5875_v60 = vpop.permute.xlu1 %4351  ;;  %v4347_v12 = vpop.permute.xlu0 %4346  ;;  %v3761_v48 = vpack.c.bf16 %v2604_v18, %v2561_v3  ;;  %3518 = vmatmul.mubr.msk.f32.vlgmr.msra.gmra.mrb[12].mxu1 %vm1880_vm15, %v5796_v55  ;;  %v3771_v3 = vpack.c.bf16 %v2776_v35, %v2732_v59  ;;  %v3779_v18 = vpack.c.bf16 %v2605_v53, %v2562_v27 }
 0x4c7   : > { %v4348_v44 = vunpack.i.l.bf16 %v4347_v12  ;;  %3128 = vmatprep.mubr.f32.mxu1 %v4411_v21  ;;  %v4353_v30 = vunpack.i.l.bf16 %v5875_v60 }
 0x4c8   : > { %3762 = vmatprep.subr.bf16.mxu0 %v3761_v48 }
 0x4c9   : > { %3764 = vmatpush1.bf16.msra.mxu0 %v3763_v43  ;;  %v2690_v37 = vsel %vm6051_vm5, %v4314_v34, %v4348_v44  ;;  %v4349_v34 = vunpack.i.h.bf16 %v4347_v12 }
 0x4ca   : > { %v5886_v25 = vpop.permute.xlu1 %2636  ;;  %v5888_v4 = vpop.permute.xlu0 %2593  ;;  %v3765_v16 = vpack.c.bf16 %v2690_v37, %v2647_v62  ;;  %v4354_v62 = vunpack.i.h.bf16 %v5875_v60 }
 0x4cb   : > { %v2606_v47 = vsel %vm552_vm4, %v4339_v31, %v5888_v4  ;;  %v2691_v8 = vsel %vm6053_vm10, %v4348_v44, %v4349_v34  ;;  %v2649_v43 = vsel %vm596_vm6, %v4344_v14, %v5886_v25 }
 0x4cc   : > { %3766 = vmatprep.subr.bf16.mxu0 %v3765_v16  ;;  %v2648_v16 = vsel %vm596_vm6, %v4343_v56, %v4344_v14 }
 0x4cd   : > { %3768 = vmatpush1.bf16.msra.mxu0 %v3767_v52 }
 0x4ce   : > { %v5890_v46 = vpop.permute.xlu1 %2722  ;;  %v5892_v0 = vpop.permute.xlu0 %2679 }
 0x4cf   : > { %v2692_v6 = vsel %vm6052_vm2, %v4349_v34, %v5892_v0  ;;  %v2735_v44 = vsel %vm690_vm9, %v4354_v62, %v5890_v46 }
 0x4d0   : > { %v3781_v37 = vpack.c.bf16 %v2692_v6, %v2649_v43 }
 0x4d2   : > { %v5898_v11 = vpop.permute.xlu1 %4366  ;;  %v4357_v45 = vpop.permute.xlu0 %4356 }
 0x4d3   : > { %v4368_v40 = vunpack.i.l.bf16 %v5898_v11  ;;  %v4358_v19 = vunpack.i.l.bf16 %v4357_v45  ;;  %v4359_v51 = vunpack.i.h.bf16 %v4357_v45 }
 0x4d5   : > { %v2520_v10 = vsel %vm464_vm0, %v4329_v26, %v4358_v19  ;;  %v2563_v24 = vsel %vm508_vm1, %v4334_v49, %v4368_v40  ;;  %v3783_v26 = vpack.c.bf16 %v2691_v8, %v2648_v16  ;;  %v2521_v60 = vsel %vm464_vm0, %v4358_v19, %v4359_v51 }
 0x4d6   : > { %v5914_v61 = vpop.permute.xlu1 %2806  ;;  %v4362_v54 = vpop.permute.xlu0 %4361  ;;  %v3773_v58 = vpack.c.bf16 %v2520_v10, %v5605_v20  ;;  %v3777_v29 = vpack.c.bf16 %v2606_v47, %v2563_v24  ;;  %v2733_v20 = vsel %vm690_vm9, %v4319_v42, %v4353_v30  ;;  %v2734_v10 = vsel %vm690_vm9, %v4353_v30, %v4354_v62 }
 0x4d7   : > { %v4363_v15 = vunpack.i.l.bf16 %v4362_v54  ;;  %v4364_v23 = vunpack.i.h.bf16 %v4362_v54  ;;  %v3791_v19 = vpack.c.bf16 %v2521_v60, %v5615_v17  ;;  %v4369_v54 = vunpack.i.h.bf16 %v5898_v11 }
 0x4d8   : > { %3774 = vmatprep.subr.bf16.mxu1 %v3773_v58 }
 0x4d9   : > { %3776 = vmatpush1.bf16.msra.mxu1 %v3775_v57  ;;  %v2777_v13 = vsel %vm737_vm11, %v4324_v9, %v4363_v15  ;;  %v2778_v45 = vsel %vm737_vm11, %v4363_v15, %v4364_v23  ;;  %v2564_v47 = vsel %vm508_vm1, %v4368_v40, %v4369_v54 }
 0x4da   : > { %v5928_v12 = vpop.permute.xlu1 %2810  ;;  %v5930_v48 = vpop.permute.xlu0 %2766  ;;  %3778 = vmatprep.subr.bf16.mxu1 %v3777_v29  ;;  %v3769_v38 = vpack.c.bf16 %v2777_v13, %v2733_v20 }
 0x4db   : > { %v2779_v52 = vsel %vm737_vm11, %v4364_v23, %v5930_v48 }
 0x4dc   : > { %3770 = vmatprep.subr.bf16.mxu0 %v3769_v38  ;;  %v3785_v28 = vpack.c.bf16 %v2779_v52, %v2735_v44 }
 0x4dd   : > { %3772 = vmatpush1.bf16.msra.mxu0 %v3771_v3  ;;  %3780 = vmatpush1.bf16.msra.mxu1 %v3779_v18 }
 0x4de   : > { %v2512_v9 = vpop.permute.xlu1 %2511  ;;  %v2805_v42 = vpop.permute.xlu0 %2804  ;;  %3782 = vmatprep.subr.bf16.mxu1 %v3781_v37 }
 0x4df   : > { %v2522_v49 = vsel %vm464_vm0, %v4359_v51, %v2512_v9  ;;  %v2820_v33 = vsel %vm784_vm13, %v5770_v32, %v2805_v42  ;;  %v2821_v56 = vsel %vm784_vm13, %v2805_v42, %v5914_v61  ;;  %v3787_v32 = vpack.c.bf16 %v2778_v45, %v2734_v10 }
 0x4e0   : > { %v3789_v31 = vpack.c.bf16 %v2522_v49, %v5621_v5  ;;  %3009 = vmatprep.subr.mxu0 %v2821_v56  ;;  %vm6054_vm0 = vmmov 0  }
 0x4e1   : > { %3010 = vmatpush1.msra.mxu0 %v2820_v33  ;;  %3784 = vmatpush1.bf16.msra.mxu1 %v3783_v26 }
 0x4e2   : > { %v4372_v24 = vpop.permute.xlu1 %4371  ;;  %v2809_v35 = vpop.permute.xlu0 %2808  ;;  %3786 = vmatprep.subr.bf16.mxu1 %v3785_v28  ;;  %3790 = vmatprep.subr.bf16.mxu0 %v3789_v31 }
 0x4e3   : > { %v4374_v59 = vunpack.i.h.bf16 %v4372_v24  ;;  %v4373_v57 = vunpack.i.l.bf16 %v4372_v24  ;;  %3519 = vmatmul.mubr.msk.f32.vlgmr.msra.gmra.mrb[14].mxu0 %vm1880_vm15, %v5796_v55  ;;  %v2823_v5 = vsel %vm784_vm13, %v2809_v35, %v5928_v12  ;;  %v2822_v15 = vsel %vm784_vm13, %v5914_v61, %v2809_v35 }
 0x4e4   : > { %3792 = vmatpush1.bf16.msra.mxu0 %v3791_v19  ;;  %3199 = vmatprep.mubr.f32.mxu0 %v4411_v21 }
 0x4e5   : > { %3788 = vmatpush1.bf16.msra.mxu1 %v3787_v32  ;;  %v2607_v17 = vsel %vm552_vm4, %v5888_v4, %v4373_v57  ;;  %v2608_v53 = vsel %vm552_vm4, %v4373_v57, %v4374_v59  ;;  %v3806_v4 = vpack.c.bf16 %v2512_v9, %v5635_v63 }
 0x4e6   : > { %v4382_v30 = vpop.permute.xlu1 %4381  ;;  %v2555_v58 = vpop.permute.xlu0 %2554  ;;  %3080 = vmatprep.subr.mxu1 %v2823_v5  ;;  %v3795_v29 = vpack.c.bf16 %v2607_v17, %v2564_v47 }
 0x4e7   : > { %v2565_v34 = vsel %vm508_vm1, %v4369_v54, %v2555_v58  ;;  %v4383_v14 = vunpack.i.l.bf16 %v4382_v30  ;;  %v4384_v6 = vunpack.i.h.bf16 %v4382_v30  ;;  %vm6055_vm1 = vmmov %vm6052_vm2  ;;  %v3810_v38 = vpack.c.bf16 %v4374_v59, %v2555_v58 }
 0x4e8   : > { %v3793_v27 = vpack.c.bf16 %v2608_v53, %v2565_v34  ;;  %vm6056_vm4 = vmmov %vm6055_vm1 }
 0x4e9   : > { %3081 = vmatpush1.msra.mxu1 %v2822_v15  ;;  %v2693_v63 = vsel %vm6055_vm1, %v5892_v0, %v4383_v14  ;;  %v2694_v39 = vsel %vm6056_vm4, %v4383_v14, %v4384_v6 }
 0x4ea   : > { %v4392_v20 = vpop.permute.xlu1 %4391  ;;  %v4377_v13 = vpop.permute.xlu0 %4376  ;;  %3520 = vmatmul.mubr.msk.f32.vlgmr.msra.gmra.mrb[14].mxu1 %vm1880_vm15, %v5796_v55  ;;  %3794 = vmatprep.subr.bf16.mxu0 %v3793_v27 }
 0x4eb   : > { %v4379_v3 = vunpack.i.h.bf16 %v4377_v13  ;;  %v4378_v11 = vunpack.i.l.bf16 %v4377_v13  ;;  %3805 = vmatprep.subr.bf16.mxu1 %v4415_v50  ;;  %3796 = vmatpush1.bf16.msra.mxu0 %v3795_v29  ;;  %v4393_v40 = vunpack.i.l.bf16 %v4392_v20  ;;  %v4394_v61 = vunpack.i.h.bf16 %v4392_v20 }
 0x4ec   : > { %3808 = vmatpush3.bf16.msk.msra.mxu1 %vm5473_vm3, %v3806_v4  ;;  %3595 = vmatprep.mubr.msk.f32.mxu1 %vm6054_vm0, %v4411_v21 }
 0x4ed   : > { %v2650_v18 = vsel %vm596_vm6, %v5886_v25, %v4378_v11  ;;  %3809 = vmatprep.subr.bf16.mxu1 %v4415_v50  ;;  %v2651_v51 = vsel %vm596_vm6, %v4378_v11, %v4379_v3  ;;  %v2780_v16 = vsel %vm737_vm11, %v5930_v48, %v4393_v40  ;;  %v2781_v52 = vsel %vm737_vm11, %v4393_v40, %v4394_v61 }
 0x4ee   : > { %v3799_v8 = vpack.c.bf16 %v2693_v63, %v2650_v18  ;;  %v4387_v43 = vpop.permute.xlu0 %4386  ;;  %v3797_v37 = vpack.c.bf16 %v2694_v39, %v2651_v51  ;;  %v3813_v26 = vpack.c.bf16 %v4384_v6, %v4379_v3  ;;  %v2815_v48 = vpop.permute.xlu1 %2814  ;;  %vm3364_vm6 = vcmp.lt.s32.totalorder %v387_v1, 274 }
 0x4ef   : > { %v4389_v23 = vunpack.i.h.bf16 %v4387_v43  ;;  %v4388_v62 = vunpack.i.l.bf16 %v4387_v43 }
 0x4f0   : > { %3811 = vmatpush3.bf16.msra.mxu1 %v3810_v38  ;;  %3798 = vmatprep.subr.bf16.mxu0 %v3797_v37 }
 0x4f1   : > { %v2736_v0 = vsel %vm690_vm9, %v5890_v46, %v4388_v62  ;;  %3812 = vmatprep.subr.bf16.mxu1 %v4415_v50  ;;  %v2737_v25 = vsel %vm690_vm9, %v4388_v62, %v4389_v23  ;;  %3800 = vmatpush1.bf16.msra.mxu0 %v3799_v8  ;;  %v2738_v42 = vsel %vm690_vm9, %v4389_v23, %v5495_v41 }
 0x4f2   : > { %v3803_v44 = vpack.c.bf16 %v2780_v16, %v2736_v0  ;;  %v3801_v9 = vpack.c.bf16 %v2781_v52, %v2737_v25  ;;  %v2813_v60 = vpop.permute.xlu0 %2812  ;;  %v2782_v46 = vsel %vm737_vm11, %v4394_v61, %v5493_v22  ;;  %v2826_v41 = vsel %vm784_vm13, %v2815_v48, %v5504_v36 }
 0x4f3   : > { %v3816_v49 = vpack.c.bf16 %v2782_v46, %v2738_v42  ;;  %v2825_v33 = vsel %vm784_vm13, %v2813_v60, %v2815_v48  ;;  %v2824_v56 = vsel %vm784_vm13, %v5928_v12, %v2813_v60 }
 0x4f4   : > { %3814 = vmatpush3.bf16.msra.mxu1 %v3813_v26  ;;  %3802 = vmatprep.subr.bf16.mxu0 %v3801_v9 }
 0x4f5   : > { %3815 = vmatprep.subr.bf16.mxu1 %v4415_v50  ;;  %3804 = vmatpush1.bf16.msra.mxu0 %v3803_v44 }
 0x4f6   : > { %3151 = vmatprep.subr.mxu0 %v2825_v33 }
 0x4f8   : > { %3817 = vmatpush3.bf16.msra.mxu1 %v3816_v49 }
 0x4f9   : > { %3593 = vmatprep.subr.mxu1 %v4411_v21  ;;  %3152 = vmatpush1.msra.mxu0 %v2824_v56  ;;  %v4418_v21 = vmov 1966171168  }
 0x4fa   : > { %3521 = vmatmul.mubr.msk.f32.vlgmr.msra.gmra.mrb[16].mxu0 %vm1880_vm15, %v5796_v55  ;;  %v3292_v19 = vunpack.c.l.s4 %v4418_v21 }
 0x4fc   : > { %3594 = vmatpush3.msra.mxu1 %v2826_v41  ;;  %v3293_v24 = vunpack.c.0.s8 %v3292_v19 }
 0x4fd   : > { %3596 = vmatmul.mubr.msk.f32.vlgmr.msra.gmra.mrb[16].mxu1 %vm1880_vm15, %v5796_v55 }
 0x4fe   : > { %v3296_v36 = vsub.s32 %v3293_v24, %v4488_v2 }
 0x503   : > { %v2842_v50 = vpop.permute.xlu0 %2841 }
 0x504   : > { %v2847_v22 = vrot.slane %v2842_v50, %v4504_v7 }
 0x588   : > { %v2917_v45 = vpop.f32.mrb[12].mxu0 }
 0x589   : > { %v2918_v28 = vadd.f32 %v2917_v45, %v2847_v22  ;;  %v2919_v31 = vpop.f32.mrb[13].mxu0 }
 0x58a   : > { %v2920_v12 = vadd.f32 %v2919_v31, %v2847_v22 }
 0x58c   : > { %v3287_v10 = vcombine.low %v2918_v28, %v2920_v12 }
 0x58e   : > { %v3297_v54 = vrot.slane %v3287_v10, %v3296_v36 }
 0x599   : > { %v2988_v35 = vpop.f32.mrb[12].mxu1 }
 0x59a   : > { %v2989_v32 = vadd.f32 %v2988_v35, %v2847_v22  ;;  %v2990_v59 = vpop.f32.mrb[13].mxu1 }
 0x59b   : > { %v2991_v57 = vadd.f32 %v2990_v59, %v2847_v22 }
 0x59d   : > { %v3288_v55 = vcombine.low %v2989_v32, %v2991_v57 }
 0x59f   : > { %v3304_v5 = vrot.slane %v3288_v55, %v3296_v36 }
 0x5a1   : > { %v3319_v17 = vcombine.low %v3297_v54, %v3304_v5 }
 0x5a3   : > { %v3327_v20 = vrot.slane %v3319_v17, %v3296_v36 }
 0x5b6   : > { %v3059_v7 = vpop.f32.mrb[14].mxu0 }
 0x5b7   : > { %v3060_v30 = vadd.f32 %v3059_v7, %v2847_v22  ;;  %v3061_v58 = vpop.f32.mrb[15].mxu0 }
 0x5b8   : > { %v3062_v53 = vadd.f32 %v3061_v58, %v2847_v22 }
 0x5ba   : > { %v3289_v34 = vcombine.low %v3060_v30, %v3062_v53 }
 0x5bc   : > { %v3311_v4 = vrot.slane %v3289_v34, %v3296_v36 }
 0x5bd   : > { %v3130_v47 = vpop.f32.mrb[14].mxu1 }
 0x5be   : > { %v3131_v15 = vadd.f32 %v3130_v47, %v2847_v22  ;;  %v3132_v27 = vpop.f32.mrb[15].mxu1 }
 0x5bf   : > { %v3133_v29 = vadd.f32 %v3132_v27, %v2847_v22 }
 0x5c1   : > { %v3290_v14 = vcombine.low %v3131_v15, %v3133_v29 }
 0x5c3   : > { %v3318_v2 = vrot.slane %v3290_v14, %v3296_v36 }
 0x5c5   : > { %v3320_v6 = vcombine.low %v3311_v4, %v3318_v2 }
 0x5c7   : > { %v3334_v13 = vrot.slane %v3320_v6, %v3296_v36 }
 0x5c9   : > { %v3335_v3 = vcombine.low %v3327_v20, %v3334_v13 }
 0x5cb   : > { %3361 = vst [vmem:[%s381_s25] sm:$0xff] %v3335_v3 }
 0x5cd   : > { %v3201_v11 = vpop.f32.mrb[16].mxu0 }
 0x5ce   : > { %v3202_v40 = vadd.f32 %v3201_v11, %v2847_v22  ;;  %v3203_v63 = vpop.f32.mrb[17].mxu0 }
 0x5cf   : > { %v3204_v61 = vadd.f32 %v3203_v63, %v2847_v22 }
 0x5d0   : > { %v3272_v18 = vpop.f32.mrb[16].mxu1 }
 0x5d1   : > { %v3273_v38 = vadd.f32 %v3272_v18, %v2847_v22  ;;  %v3597_v8 = vpop.f32.mrb[17].mxu1  ;;  %v3336_v43 = vcombine.low %v3202_v40, %v3204_v61 }
 0x5d3   : > { %v3350_v51 = vrot.slane %v3273_v38, %v3296_v36  ;;  %v3343_v39 = vrot.slane %v3336_v43, %v3296_v36 }
 0x5d5   : > { %v3351_v23 = vcombine.low %v3343_v39, %v3350_v51 }
 0x5d7   : > { %v3358_v62 = vrot.slane %v3351_v23, %v3296_v36 }
 0x5d9   : > { %3366 = vst.msk [vmem:[%s381_s25 + $0x8] sm:$0x7] %vm3364_vm6, %v3358_v62 }
 0x5da PF: > { %s23_s15 = sadd.s32 1, %s4402_s15  }
 0x5db   : > { %p20_p4 = scmp.ge.s32.totalorder %s23_s15, 4  }
 0x5dd   :  { %22 = sbr.rel (!%p20_p4) target bundleno = 3 (0x3), region = 106 }

// kernel: multiple_discriminator_forward.9
= control target key start
LH: loop header
LB: loop body
LE: loop exit
PB: predicated region body
PF: predicated region fallthrough
CT: control target
= control target key end

     0   :  { %s3821_s15 = smov 0   ;;  %s5144_s0 = inlined_call_operand.vmem [shape: f32[2,1,1162], index: 0, kind: input, shape index: {}]   ;;  %s5145_s1 = inlined_call_operand.vmem [shape: f32[1,1102], index: 1, kind: input, shape index: {}]   ;;  %s5146_s2 = inlined_call_operand.vmem [shape: f32[8,9], index: 2, kind: input, shape index: {}]   ;;  %s5147_s3 = inlined_call_operand.vmem [shape: f32[8,1], index: 3, kind: input, shape index: {}]   ;;  %s5148_s4 = inlined_call_operand.vmem [shape: f32[8,72], index: 4, kind: input, shape index: {}]   ;;  %s5149_s5 = inlined_call_operand.vmem [shape: f32[8,1], index: 5, kind: input, shape index: {}]   ;;  %s5150_s6 = inlined_call_operand.vmem [shape: f32[1,72], index: 6, kind: input, shape index: {}]   ;;  %s5151_s7 = inlined_call_operand.<no memory space> [shape: f32[1,1], index: 7, kind: input, shape index: {}]   ;;  %s5152_s8 = inlined_call_operand.vmem [shape: f32[2,8,1102], index: 8, kind: output, shape index: {0}]   ;;  %s5153_s9 = inlined_call_operand.vmem [shape: f32[2,8,1102], index: 9, kind: output, shape index: {1}]   ;;  %s5154_s10 = inlined_call_operand.vmem [shape: f32[2,1,1102], index: 10, kind: output, shape index: {2}]  }
   0x1   :  { %v16_v0 = vstv %s5151_s7 }
   0x2   :  { %17 = vst [vmem:[#allocation2] sm:$0x1] %v16_v0 }
   0x3 LB: > { %s2981_s16 = sadd.s32 4294967295, %s3746_s15   ;;  %p2985_p0 = scmp.ge.s32.totalorder %s3746_s15, 1  ;;  %s3746_s15 = sphi %s3821_s15, %s23_s15  }
   0x4   : > { %p318_p1 = scmp.lt.s32.totalorder %s3746_s15, 3 }
   0x6   : > { %p319_p2 = pnand %p2985_p0, %p318_p1 }
   0x7   : > { %p364_p3 = scmp.lt.s32.totalorder (!%p319_p2), %s2981_s16, 1  ;;  %v387_v1 = vlaneseq (!%p319_p2)  ;;  %s3748_s20 = smov (!%p319_p2), 127   ;;  %v3755_v21 = vmov (!%p319_p2), 0.0   ;;  %v3757_v29 = vmov (!%p319_p2), 0   ;;  %v794_v30 = vld [vmem:[%s5147_s3] sm:$0xff] (!%p319_p2)  ;;  %vm450_vm0 = vcmask (!%p319_p2), 1039360  }
   0x8   : > { %322 = sbr.rel (%p319_p2) target bundleno = 1476 (0x5c4), region = 52  ;;  %s3749_s21 = smov (!%p319_p2), 126   ;;  %886 = vmatprep.mubr.f32.mxu0 (!%p319_p2), %v3755_v21  ;;  %957 = vmatprep.mubr.f32.mxu1 (!%p319_p2), %v3755_v21  ;;  %vm724_vm1 = vcmask (!%p319_p2), 1040384   ;;  %vm5159_vm2 = vcmask (!%p319_p2), 1031168   ;;  %vm734_vm3 = vcmask (!%p319_p2), 1041408   ;;  %vm522_vm4 = vcmask (!%p319_p2), 809984  }
   0x9   : > { %v3832_v2 = vshrl.u32 (!%p319_p2), %v387_v1, 7  ;;  %s3750_s22 = smov (!%p319_p2), 99   ;;  %s3751_s23 = smov (!%p319_p2), 98   ;;  %3458 = vset.pattern.permute.xlu1 (!%p319_p2), %v3757_v29  ;;  %3599 = vset.pattern.permute.xlu0 (!%p319_p2), %v3757_v29  ;;  %vm744_vm5 = vcmask (!%p319_p2), 1042432   ;;  %vm5158_vm6 = vcmask (!%p319_p2), 801792   ;;  %vm5155_vm7 = vcmask (!%p319_p2), 1043456  }
   0xa   : > { %s3752_s24 = smov (!%p319_p2), 97   ;;  %s3753_s25 = smov (!%p319_p2), 70   ;;  %vm594_vm8 = vcmask (!%p319_p2), 793600   ;;  %vm636_vm9 = vcmask (!%p319_p2), 572416   ;;  %vm764_vm10 = vcmask (!%p319_p2), 1044480   ;;  %vm675_vm11 = vcmask (!%p319_p2), 564224  }
   0xb   : > { %v405_v3 = vsub.s32 (!%p319_p2), 4, %v3832_v2  ;;  %v409_v4 = vsub.s32 (!%p319_p2), 5, %v3832_v2  ;;  %v3838_v5 = vsub.s32 (!%p319_p2), 1, %v3832_v2  ;;  %v397_v6 = vsub.s32 (!%p319_p2), 2, %v3832_v2  ;;  %s3754_s26 = smov (!%p319_p2), 69   ;;  %s3756_s27 = smov (!%p319_p2), 68  }
   0xc   : > { %v3842_v7 = vsub.s32 (!%p319_p2), 0, %v3832_v2  ;;  %v401_v8 = vsub.s32 (!%p319_p2), 3, %v3832_v2  ;;  %v413_v19 = vsub.s32 (!%p319_p2), 6, %v3832_v2  ;;  %v417_v20 = vsub.s32 (!%p319_p2), 7, %v3832_v2  ;;  %s3761_s12 = smov (!%p319_p2), 30  }
   0xd   : > { %vm774_vm12 = vcmask (!%p319_p2), 1045504   ;;  %vm714_vm13 = vcmask (!%p319_p2), 556032   ;;  %vm784_vm14 = vcmask (!%p319_p2), 1046528   ;;  %vm5156_vm15 = vmmov (!%p319_p2), 1  }
   0xf   : > { %s5204_s16 = smov (!%p364_p3, %s2981_s16), 1 }
  0x10   : > { %s3272_s7 = smul.u32 10, %s5204_s16 }
  0x12   : > { %s3848_s19 = scalar_lea.vmem %s5144_s0, %s3272_s7  ;;  %s3273_s7 = smul.u32 72, %s5204_s16 }
  0x13   : > { %v382_v9 = vld [vmem:[%s3848_s19] sm:$0xff]  ;;  %v383_v25 = vld [vmem:[%s3848_s19 + $0x8] sm:$0x3] }
  0x14   : > { %v3853_v10 = vrot.slane %v382_v9, %v405_v3  ;;  %v3857_v11 = vrot.slane %v382_v9, %v409_v4  ;;  %v3860_v12 = vrot.slane %v382_v9, %v3838_v5  ;;  %v3864_v13 = vrot.slane %v382_v9, %v397_v6  ;;  %s4284_s19 = scalar_lea.vmem %s5152_s8, %s3273_s7 }
  0x15   : > { %v3867_v14 = vrot.slane %v382_v9, %v3842_v7  ;;  %v3871_v15 = vrot.slane %v382_v9, %v401_v8  ;;  %v3905_v22 = vrot.slane %v382_v9, %v413_v19  ;;  %v3911_v23 = vrot.slane %v382_v9, %v417_v20 }
  0x16   : > { %v3308_v16 = vpack.i.bf16 %v3857_v11, %v3853_v10  ;;  %v3298_v17 = vpack.i.bf16 %v3864_v13, %v3860_v12  ;;  %v3930_v26 = vrot.slane %v383_v25, %v3842_v7  ;;  %v615_v28 = vrot.slane %v383_v25, %v3838_v5 }
  0x17   : > { %v3303_v18 = vpack.i.bf16 %v3871_v15, %v3867_v14  ;;  %v3423_v24 = vpack.i.bf16 %v3911_v23, %v3905_v22 }
  0x18   : > { %3309 = vrot.lane.b32.xlu1 %v3308_v16, %s3748_s20  ;;  %3299 = vrot.lane.b32.xlu0 %v3298_v17, %s3748_s20  ;;  %v3443_v27 = vpack.i.bf16 %v3930_v26, %v3911_v23 }
  0x1c   : > { %3314 = vrot.lane.b32.xlu1 %v3298_v17, %s3749_s21  ;;  %3304 = vrot.lane.b32.xlu0 %v3303_v18, %s3748_s20 }
  0x20   : > { %3324 = vrot.lane.b32.xlu1 %v3308_v16, %s3749_s21  ;;  %3319 = vrot.lane.b32.xlu0 %v3303_v18, %s3749_s21 }
  0x24   : > { %3334 = vrot.lane.b32.xlu1 %v3303_v18, %s3750_s22  ;;  %3329 = vrot.lane.b32.xlu0 %v3298_v17, %s3750_s22 }
  0x28   : > { %3344 = vrot.lane.b32.xlu1 %v3298_v17, %s3751_s23  ;;  %3339 = vrot.lane.b32.xlu0 %v3308_v16, %s3750_s22 }
  0x2c   : > { %3354 = vrot.lane.b32.xlu1 %v3308_v16, %s3751_s23  ;;  %3349 = vrot.lane.b32.xlu0 %v3303_v18, %s3751_s23 }
  0x30   : > { %3364 = vrot.lane.b32.xlu1 %v3303_v18, %s3752_s24  ;;  %3359 = vrot.lane.b32.xlu0 %v3298_v17, %s3752_s24 }
  0x34   : > { %3374 = vrot.lane.b32.xlu1 %v3298_v17, %s3753_s25  ;;  %3369 = vrot.lane.b32.xlu0 %v3308_v16, %s3752_s24 }
  0x38   : > { %3384 = vrot.lane.b32.xlu1 %v3308_v16, %s3753_s25  ;;  %3379 = vrot.lane.b32.xlu0 %v3303_v18, %s3753_s25 }
  0x3c   : > { %3394 = vrot.lane.b32.xlu1 %v3303_v18, %s3754_s26  ;;  %3389 = vrot.lane.b32.xlu0 %v3298_v17, %s3754_s26 }
  0x40   : > { %3404 = vrot.lane.b32.xlu1 %v3298_v17, %s3756_s27  ;;  %3399 = vrot.lane.b32.xlu0 %v3308_v16, %s3754_s26 }
  0x44   : > { %3414 = vrot.lane.b32.xlu1 %v3308_v16, %s3756_s27  ;;  %3409 = vrot.lane.b32.xlu0 %v3303_v18, %s3756_s27 }
  0x48   : > { %3424 = vrot.lane.b32.xlu1 %v3423_v24, %s3749_s21  ;;  %3419 = vrot.lane.b32.xlu0 %v3423_v24, %s3748_s20 }
  0x4c   : > { %3434 = vrot.lane.b32.xlu1 %v3423_v24, %s3751_s23  ;;  %3429 = vrot.lane.b32.xlu0 %v3423_v24, %s3750_s22 }
  0x50   : > { %628 = vrot.lane.b32.xlu1 %v3905_v22, %s3753_s25  ;;  %3439 = vrot.lane.b32.xlu0 %v3423_v24, %s3752_s24 }
  0x54   : > { %706 = vrot.lane.b32.xlu1 %v3905_v22, %s3756_s27  ;;  %667 = vrot.lane.b32.xlu0 %v3905_v22, %s3754_s26 }
  0x58   : > { %484 = vrot.lane.b32.xlu1 %v3930_v26, %s3749_s21  ;;  %448 = vrot.lane.b32.xlu0 %v3930_v26, %s3748_s20 }
  0x5c   : > { %556 = vrot.lane.b32.xlu1 %v3930_v26, %s3751_s23  ;;  %520 = vrot.lane.b32.xlu0 %v3930_v26, %s3750_s22 }
  0x60   : > { %3444 = vrot.lane.b32.xlu1 %v3443_v27, %s3753_s25  ;;  %592 = vrot.lane.b32.xlu0 %v3930_v26, %s3752_s24 }
  0x64   : > { %3454 = vrot.lane.b32.xlu1 %v3443_v27, %s3756_s27  ;;  %3449 = vrot.lane.b32.xlu0 %v3443_v27, %s3754_s26 }
  0x68   : > { %634 = vrot.lane.b32.xlu0 %v615_v28, %s3753_s25  ;;  %673 = vrot.lane.b32.xlu1 %v615_v28, %s3754_s26 }
  0x6c   : > { %712 = vrot.lane.b32.xlu0 %v615_v28, %s3756_s27  ;;  %797 = vperm.xlu1 %3458, %v794_v30  }
  0x8a   : > { %v3954_v31 = vpop.permute.xlu1 %3309  ;;  %v3300_v32 = vpop.permute.xlu0 %3299 }
  0x8b   : > { %v3302_v41 = vunpack.i.h.bf16 %v3300_v32  ;;  %v3301_v42 = vunpack.i.l.bf16 %v3300_v32  ;;  %v3311_v47 = vunpack.i.l.bf16 %v3954_v31  ;;  %v3312_v61 = vunpack.i.h.bf16 %v3954_v31 }
  0x8d   : > { %v452_v48 = vsel %vm450_vm0, %v3301_v42, %v3302_v41 }
  0x8e   : > { %v3315_v33 = vpop.permute.xlu1 %3314  ;;  %v3305_v34 = vpop.permute.xlu0 %3304  ;;  %v726_v53 = vsel %vm724_vm1, %v3860_v12, %v452_v48 }
  0x8f   : > { %v3317_v43 = vunpack.i.h.bf16 %v3315_v33  ;;  %v3316_v44 = vunpack.i.l.bf16 %v3315_v33  ;;  %v3307_v49 = vunpack.i.h.bf16 %v3305_v34  ;;  %v3306_v50 = vunpack.i.l.bf16 %v3305_v34 }
  0x91   : > { %v488_v51 = vsel %vm5159_vm2, %v3316_v44, %v3317_v43  ;;  %v453_v57 = vsel %vm450_vm0, %v3302_v41, %v3307_v49  ;;  %v454_v58 = vsel %vm450_vm0, %v3307_v49, %v3311_v47  ;;  %v451_v59 = vsel %vm450_vm0, %v3306_v50, %v3301_v42 }
  0x92   : > { %v3956_v35 = vpop.permute.xlu1 %3324  ;;  %v3320_v36 = vpop.permute.xlu0 %3319  ;;  %v736_v62 = vsel %vm734_vm3, %v726_v53, %v488_v51  ;;  %v727_v18 = vsel %vm724_vm1, %v3864_v13, %v453_v57  ;;  %v728_v24 = vsel %vm724_vm1, %v3871_v15, %v454_v58  ;;  %v725_v25 = vsel %vm724_vm1, %v3867_v14, %v451_v59 }
  0x93   : > { %v3321_v52 = vunpack.i.l.bf16 %v3320_v36  ;;  %v3322_v54 = vunpack.i.h.bf16 %v3320_v36  ;;  %v3326_v60 = vunpack.i.l.bf16 %v3956_v35  ;;  %v3327_v14 = vunpack.i.h.bf16 %v3956_v35 }
  0x95   : > { %v487_v9 = vsel %vm5159_vm2, %v3321_v52, %v3316_v44  ;;  %v489_v27 = vsel %vm5159_vm2, %v3317_v43, %v3322_v54  ;;  %v490_v30 = vsel %vm5159_vm2, %v3322_v54, %v3326_v60 }
  0x96   : > { %v3335_v37 = vpop.permute.xlu1 %3334  ;;  %v3330_v38 = vpop.permute.xlu0 %3329  ;;  %v735_v33 = vsel %vm734_vm3, %v725_v25, %v487_v9  ;;  %v737_v42 = vsel %vm734_vm3, %v727_v18, %v489_v27  ;;  %v738_v43 = vsel %vm734_vm3, %v728_v24, %v490_v30 }
  0x97   : > { %v3336_v63 = vunpack.i.l.bf16 %v3335_v37  ;;  %v3331_v0 = vunpack.i.l.bf16 %v3330_v38  ;;  %v3337_v12 = vunpack.i.h.bf16 %v3335_v37  ;;  %v3332_v16 = vunpack.i.h.bf16 %v3330_v38 }
  0x99   : > { %v523_v34 = vsel %vm522_vm4, %v3336_v63, %v3331_v0  ;;  %v525_v37 = vsel %vm522_vm4, %v3332_v16, %v3337_v12  ;;  %v524_v38 = vsel %vm522_vm4, %v3331_v0, %v3332_v16 }
  0x9a   : > { %v3958_v39 = vpop.permute.xlu1 %3344  ;;  %v3960_v40 = vpop.permute.xlu0 %3339  ;;  %v745_v50 = vsel %vm744_vm5, %v735_v33, %v523_v34  ;;  %v746_v54 = vsel %vm744_vm5, %v736_v62, %v524_v38  ;;  %v747_v57 = vsel %vm744_vm5, %v737_v42, %v525_v37 }
  0x9b   : > { %v3341_v17 = vunpack.i.l.bf16 %v3960_v40  ;;  %v3347_v32 = vunpack.i.h.bf16 %v3958_v39  ;;  %v3346_v13 = vunpack.i.l.bf16 %v3958_v39 }
  0x9d   : > { %v526_v39 = vsel %vm522_vm4, %v3337_v12, %v3341_v17  ;;  %v560_v51 = vsel %vm5158_vm6, %v3346_v13, %v3347_v32 }
  0x9e   : > { %v3962_v45 = vpop.permute.xlu1 %3354  ;;  %v3964_v46 = vpop.permute.xlu0 %3349  ;;  %v748_v58 = vsel %vm744_vm5, %v738_v43, %v526_v39  ;;  %v756_v25 = vsel %vm5155_vm7, %v746_v54, %v560_v51 }
  0x9f   : > { %v3351_v15 = vunpack.i.l.bf16 %v3964_v46  ;;  %v3352_v36 = vunpack.i.h.bf16 %v3964_v46  ;;  %v3356_v41 = vunpack.i.l.bf16 %v3962_v45 }
  0xa1   : > { %v559_v52 = vsel %vm5158_vm6, %v3351_v15, %v3346_v13  ;;  %v561_v59 = vsel %vm5158_vm6, %v3347_v32, %v3352_v36  ;;  %v562_v63 = vsel %vm5158_vm6, %v3352_v36, %v3356_v41 }
  0xa2   : > { %v3971_v55 = vpop.permute.xlu1 %3364  ;;  %v3973_v56 = vpop.permute.xlu0 %3359  ;;  %v758_v33 = vsel %vm5155_vm7, %v748_v58, %v562_v63 }
  0xa3   : > { %v3366_v44 = vunpack.i.l.bf16 %v3971_v55  ;;  %v3361_v48 = vunpack.i.l.bf16 %v3973_v56  ;;  %v3362_v53 = vunpack.i.h.bf16 %v3973_v56  ;;  %v3367_v0 = vunpack.i.h.bf16 %v3971_v55 }
  0xa4   : > { %v755_v56 = vsel %vm5155_vm7, %v745_v50, %v559_v52  ;;  %v757_v55 = vsel %vm5155_vm7, %v747_v57, %v561_v59  ;;  %vm4062_vm7 = vmpackc.low %vm724_vm1, %vm5156_vm15  ;;  %vm5157_vm15 = vcmask 72704  }
  0xa5   : > { %v595_v62 = vsel %vm594_vm8, %v3366_v44, %v3361_v48  ;;  %v596_v27 = vsel %vm594_vm8, %v3361_v48, %v3362_v53  ;;  %v597_v34 = vsel %vm594_vm8, %v3362_v53, %v3367_v0 }
  0xa6   : > { %v3992_v28 = vpop.permute.xlu1 %3374  ;;  %v3994_v29 = vpop.permute.xlu0 %3369  ;;  %v766_v48 = vsel %vm764_vm10, %v756_v25, %v596_v27  ;;  %v767_v59 = vsel %vm764_vm10, %v757_v55, %v597_v34 }
  0xa7   : > { %v3377_v9 = vunpack.i.h.bf16 %v3992_v28  ;;  %v3376_v12 = vunpack.i.l.bf16 %v3992_v28  ;;  %v3371_v16 = vunpack.i.l.bf16 %v3994_v29 }
  0xa9   : > { %v638_v38 = vsel %vm636_vm9, %v3376_v12, %v3377_v9  ;;  %v598_v39 = vsel %vm594_vm8, %v3367_v0, %v3371_v16 }
  0xaa   : > { %v4016_v46 = vpop.permute.xlu1 %3384  ;;  %v3380_v49 = vpop.permute.xlu0 %3379  ;;  %v776_v57 = vsel %vm774_vm12, %v766_v48, %v638_v38 }
  0xab   : > { %v3381_v30 = vunpack.i.l.bf16 %v3380_v49  ;;  %v3386_v15 = vunpack.i.l.bf16 %v4016_v46  ;;  %v3382_v28 = vunpack.i.h.bf16 %v3380_v49  ;;  %v765_v49 = vsel %vm764_vm10, %v755_v56, %v595_v62 }
  0xad   : > { %v637_v50 = vsel %vm636_vm9, %v3381_v30, %v3376_v12  ;;  %v639_v54 = vsel %vm636_vm9, %v3377_v9, %v3382_v28  ;;  %v640_v58 = vsel %vm636_vm9, %v3382_v28, %v3386_v15  ;;  %v768_v30 = vsel %vm764_vm10, %v758_v33, %v598_v39 }
  0xae   : > { %v3395_v18 = vpop.permute.xlu1 %3394  ;;  %v3390_v24 = vpop.permute.xlu0 %3389  ;;  %v775_v25 = vsel %vm774_vm12, %v765_v49, %v637_v50  ;;  %v778_v38 = vsel %vm774_vm12, %v768_v30, %v640_v58 }
  0xaf   : > { %v3392_v32 = vunpack.i.h.bf16 %v3390_v24  ;;  %v3391_v13 = vunpack.i.l.bf16 %v3390_v24  ;;  %v3397_v36 = vunpack.i.h.bf16 %v3395_v18  ;;  %v3396_v37 = vunpack.i.l.bf16 %v3395_v18 }
  0xb1   : > { %v677_v44 = vsel %vm675_vm11, %v3391_v13, %v3392_v32  ;;  %v676_v9 = vsel %vm675_vm11, %v3396_v37, %v3391_v13  ;;  %v678_v56 = vsel %vm675_vm11, %v3392_v32, %v3397_v36  ;;  %v777_v13 = vsel %vm774_vm12, %v767_v59, %v639_v54 }
  0xb2   : > { %v3405_v42 = vpop.permute.xlu1 %3404  ;;  %v4045_v43 = vpop.permute.xlu0 %3399  ;;  %v786_v0 = vsel %vm784_vm14, %v776_v57, %v677_v44  ;;  %v3342_v32 = vunpack.i.h.bf16 %v3960_v40  ;;  %v785_v37 = vsel %vm784_vm14, %v775_v25, %v676_v9 }
  0xb3   : > { %v3407_v51 = vunpack.i.h.bf16 %v3405_v42  ;;  %v3406_v52 = vunpack.i.l.bf16 %v3405_v42  ;;  %v3401_v53 = vunpack.i.l.bf16 %v4045_v43  ;;  %v787_v42 = vsel %vm784_vm14, %v777_v13, %v678_v56 }
  0xb5   : > { %v716_v63 = vsel %vm714_vm13, %v3406_v52, %v3407_v51  ;;  %v679_v27 = vsel %vm675_vm11, %v3397_v36, %v3401_v53 }
  0xb6   : > { %v4068_v62 = vpop.permute.xlu1 %3414  ;;  %v3410_v18 = vpop.permute.xlu0 %3409  ;;  %v3090_v24 = vpack.c.bf16 %v716_v63, %v786_v0  ;;  %v788_v39 = vsel %vm784_vm14, %v778_v38, %v679_v27  ;;  %v3357_v63 = vunpack.i.h.bf16 %v3962_v45  ;;  %v527_v0 = vsel %vm522_vm4, %v3341_v17, %v3342_v32 }
  0xb7   : > { %v3416_v55 = vunpack.i.l.bf16 %v4068_v62  ;;  %v3412_v28 = vunpack.i.h.bf16 %v3410_v18  ;;  %v3411_v34 = vunpack.i.l.bf16 %v3410_v18  ;;  %v3402_v45 = vunpack.i.h.bf16 %v4045_v43 }
  0xb8   : > { %3092 = vmatprep.subr.msk.bf16.mxu0 %vm4062_vm7, %v3090_v24  ;;  %v563_v35 = vsel %vm5158_vm6, %v3356_v41, %v3357_v63 }
  0xb9   : > { %v715_v36 = vsel %vm714_vm13, %v3411_v34, %v3406_v52  ;;  %v718_v33 = vsel %vm714_vm13, %v3412_v28, %v3416_v55  ;;  %v717_v44 = vsel %vm714_vm13, %v3407_v51, %v3412_v28  ;;  %v455_v52 = vsel %vm450_vm0, %v3311_v47, %v3312_v61  ;;  %v4113_v47 = vld [vmem:[%s5146_s2] sm:$0xff] }
  0xba   : > { %v4089_v48 = vpop.permute.xlu1 %3424  ;;  %v4091_v49 = vpop.permute.xlu0 %3419  ;;  %v3093_v50 = vpack.c.bf16 %v715_v36, %v785_v37  ;;  %v3096_v54 = vpack.c.bf16 %v718_v33, %v788_v39  ;;  %v3099_v57 = vpack.c.bf16 %v717_v44, %v787_v42  ;;  %v491_v51 = vsel %vm5159_vm2, %v3326_v60, %v3327_v14 }
  0xbb   : > { %v3426_v58 = vunpack.i.l.bf16 %v4089_v48  ;;  %v3421_v59 = vunpack.i.l.bf16 %v4091_v49  ;;  %v3372_v60 = vunpack.i.h.bf16 %v3994_v29  ;;  %v729_v56 = vsel %vm724_vm1, %v3853_v10, %v455_v52 }
  0xbc   : > { %3095 = vmatpush1.bf16.msk.msra.mxu0 %vm4062_vm7, %v3093_v50  ;;  %3098 = vmatprep.subr.msk.bf16.mxu1 %vm4062_vm7, %v3096_v54  ;;  %v739_v31 = vsel %vm734_vm3, %v729_v56, %v491_v51  ;;  %v3422_v41 = vunpack.i.h.bf16 %v4091_v49  ;;  %v3417_v37 = vunpack.i.h.bf16 %v4068_v62  ;;  %v3427_v36 = vunpack.i.h.bf16 %v4089_v48 }
  0xbd   : > { %v456_v9 = vsel %vm450_vm0, %v3312_v61, %v3421_v59  ;;  %3101 = vmatpush1.bf16.msk.msra.mxu1 %vm4062_vm7, %v3099_v57  ;;  %v492_v18 = vsel %vm5159_vm2, %v3327_v14, %v3426_v58  ;;  %v749_v10 = vsel %vm744_vm5, %v739_v31, %v527_v0  ;;  %v3387_v14 = vunpack.i.h.bf16 %v4016_v46 }
  0xbe   : > { %v730_v40 = vsel %vm724_vm1, %v3857_v11, %v456_v9  ;;  %v4131_v17 = vpop.permute.xlu1 %3434  ;;  %v4133_v24 = vpop.permute.xlu0 %3429  ;;  %v599_v11 = vsel %vm594_vm8, %v3371_v16, %v3372_v60  ;;  %v680_v44 = vsel %vm675_vm11, %v3401_v53, %v3402_v45  ;;  %v457_v49 = vsel %vm450_vm0, %v3421_v59, %v3422_v41 }
  0xbf   : > { %v3436_v61 = vunpack.i.l.bf16 %v4131_v17  ;;  %v3431_v25 = vunpack.i.l.bf16 %v4133_v24  ;;  %2990 = vmatmul.mubr.msk.f32.vlgmr.msra.gmra.mrb[0].mxu0 %vm5157_vm15, %v4113_v47  ;;  %v740_v30 = vsel %vm734_vm3, %v730_v40, %v492_v18  ;;  %v641_v42 = vsel %vm636_vm9, %v3386_v15, %v3387_v14 }
  0xc0   : > { %2993 = vmatmul.mubr.msk.f32.vlgmr.msra.gmra.mrb[0].mxu1 %vm5157_vm15, %v4113_v47  ;;  %1028 = vmatprep.mubr.f32.mxu0 %v3755_v21  ;;  %vm5162_vm15 = vcmask 1043456   ;;  %v719_v48 = vsel %vm714_vm13, %v3416_v55, %v3417_v37  ;;  %v3432_v59 = vunpack.i.h.bf16 %v4133_v24  ;;  %v493_v62 = vsel %vm5159_vm2, %v3426_v58, %v3427_v36 }
  0xc1   : > { %v528_v27 = vsel %vm522_vm4, %v3342_v32, %v3431_v25  ;;  %1099 = vmatprep.mubr.f32.mxu1 %v3755_v21  ;;  %v564_v28 = vsel %vm5158_vm6, %v3357_v63, %v3436_v61  ;;  %v759_v16 = vsel %vm5162_vm15, %v749_v10, %v563_v35  ;;  %vm5163_vm6 = vmmov %vm5162_vm15  ;;  %v731_v55 = vsel %vm724_vm1, %v3905_v22, %v457_v49 }
  0xc2   : > { %v750_v34 = vsel %vm744_vm5, %v740_v30, %v528_v27  ;;  %v4158_v13 = vpop.permute.xlu1 %628  ;;  %v3440_v29 = vpop.permute.xlu0 %3439  ;;  %v769_v38 = vsel %vm764_vm10, %v759_v16, %v599_v11  ;;  %v3437_v9 = vunpack.i.h.bf16 %v4131_v17  ;;  %v529_v24 = vsel %vm522_vm4, %v3431_v25, %v3432_v59 }
  0xc3   : > { %v3441_v32 = vunpack.i.l.bf16 %v3440_v29  ;;  %v760_v39 = vsel %vm5163_vm6, %v750_v34, %v564_v28  ;;  %v642_v50 = vsel %vm636_vm9, %v3387_v14, %v4158_v13  ;;  %v779_v52 = vsel %vm774_vm12, %v769_v38, %v641_v42 }
  0xc4   : > { %v789_v63 = vsel %vm784_vm14, %v779_v52, %v680_v44  ;;  %v741_v31 = vsel %vm734_vm3, %v731_v55, %v493_v62  ;;  %v3759_v10 = vmov 0.0|0.0   ;;  %vm5164_vm6 = vcmask 801792  }
  0xc5   : > { %v600_v33 = vsel %vm594_vm8, %v3372_v60, %v3441_v32  ;;  %v3105_v60 = vpack.c.bf16 %v719_v48, %v789_v63  ;;  %v565_v35 = vsel %vm5164_vm6, %v3436_v61, %v3437_v9  ;;  %v751_v14 = vsel %vm744_vm5, %v741_v31, %v529_v24 }
  0xc6   : > { %v4175_v54 = vpop.permute.xlu1 %706  ;;  %v4177_v46 = vpop.permute.xlu0 %667  ;;  %v770_v15 = vsel %vm764_vm10, %v760_v39, %v600_v33  ;;  %v3442_v27 = vunpack.i.h.bf16 %v3440_v29  ;;  %vm5165_vm15 = vcmask 72704  }
  0xc7   : > { %v720_v43 = vsel %vm714_vm13, %v3417_v37, %v4175_v54  ;;  %v681_v53 = vsel %vm675_vm11, %v3402_v45, %v4177_v46  ;;  %v780_v57 = vsel %vm774_vm12, %v770_v15, %v642_v50 }
  0xc8   : > { %v790_v51 = vsel %vm784_vm14, %v780_v57, %v681_v53  ;;  %v601_v16 = vsel %vm594_vm8, %v3441_v32, %v3442_v27 }
  0xc9   : > { %v3102_v0 = vpack.c.bf16 %v720_v43, %v790_v51 }
  0xca   : > { %v485_v56 = vpop.permute.xlu1 %484  ;;  %v449_v18 = vpop.permute.xlu0 %448 }
  0xcb   : > { %v458_v40 = vsel %vm450_vm0, %v3422_v41, %v449_v18  ;;  %3104 = vmatprep.subr.msk.bf16.mxu0 %vm4062_vm7, %v3102_v0  ;;  %v733_v58 = vsel %vm724_vm1, %v3930_v26, %v449_v18  ;;  %v494_v22 = vsel %vm5159_vm2, %v3427_v36, %v485_v56  ;;  %vm5166_vm2 = vmmov %vm5164_vm6  ;;  %vm5167_vm6 = vcmask 1043456  }
  0xcc   : > { %3107 = vmatpush1.bf16.msk.msra.mxu0 %vm4062_vm7, %v3105_v60  ;;  %v732_v17 = vsel %vm724_vm1, %v3911_v23, %v458_v40  ;;  %v743_v26 = vsel %vm734_vm3, %v733_v58, %v485_v56  ;;  %vm3760_vm1 = vmmov 0   ;;  %v761_v41 = vsel %vm5167_vm6, %v751_v14, %v565_v35 }
  0xcd   : > { %3114 = vmatprep.subr.bf16.mxu0 %v3759_v10  ;;  %v742_v45 = vsel %vm734_vm3, %v732_v17, %v494_v22  ;;  %vm5168_vm3 = vmmov %vm5167_vm6  ;;  %v771_v50 = vsel %vm764_vm10, %v761_v41, %v601_v16 }
  0xce   : > { %v557_v11 = vpop.permute.xlu1 %556  ;;  %v521_v25 = vpop.permute.xlu0 %520 }
  0xcf   : > { %v530_v30 = vsel %vm522_vm4, %v3432_v59, %v521_v25  ;;  %2996 = vmatmul.mubr.msk.f32.vlgmr.msra.gmra.mrb[2].mxu0 %vm5165_vm15, %v4113_v47  ;;  %v566_v23 = vsel %vm5166_vm2, %v3437_v9, %v557_v11  ;;  %v753_v28 = vsel %vm744_vm5, %v743_v26, %v521_v25  ;;  %vm5169_vm2 = vmmov %vm5168_vm3 }
  0xd0   : > { %3045 = vmatprep.mubr.msk.f32.mxu0 %vm3760_vm1, %v3755_v21  ;;  %v752_v61 = vsel %vm744_vm5, %v742_v45, %v530_v30  ;;  %v763_v44 = vsel %vm5169_vm2, %v753_v28, %v557_v11  ;;  %vm5170_vm5 = vmmov %vm5165_vm15 }
  0xd1   : > { %v762_v36 = vsel %vm5168_vm3, %v752_v61, %v566_v23 }
  0xd2   : > { %v3445_v34 = vpop.permute.xlu1 %3444  ;;  %v593_v29 = vpop.permute.xlu0 %592 }
  0xd3   : > { %v3447_v37 = vunpack.i.h.bf16 %v3445_v34  ;;  %v3446_v38 = vunpack.i.l.bf16 %v3445_v34  ;;  %v602_v42 = vsel %vm594_vm8, %v3442_v27, %v593_v29  ;;  %v773_v59 = vsel %vm764_vm10, %v763_v44, %v593_v29 }
  0xd4   : > { %v772_v49 = vsel %vm764_vm10, %v762_v36, %v602_v42  ;;  %vm5171_vm10 = vmmov %vm5170_vm5 }
  0xd5   : > { %v643_v33 = vsel %vm636_vm9, %v4158_v13, %v3446_v38  ;;  %v644_v39 = vsel %vm636_vm9, %v3446_v38, %v3447_v37 }
  0xd6   : > { %v3455_v15 = vpop.permute.xlu1 %3454  ;;  %v3450_v48 = vpop.permute.xlu0 %3449  ;;  %v781_v52 = vsel %vm774_vm12, %v771_v50, %v643_v33  ;;  %v782_v13 = vsel %vm774_vm12, %v772_v49, %v644_v39 }
  0xd7   : > { %v3457_v32 = vunpack.i.h.bf16 %v3455_v15  ;;  %v3456_v43 = vunpack.i.l.bf16 %v3455_v15  ;;  %v3452_v53 = vunpack.i.h.bf16 %v3450_v48  ;;  %v3451_v57 = vunpack.i.l.bf16 %v3450_v48 }
  0xd9   : > { %v721_v51 = vsel %vm714_vm13, %v4175_v54, %v3456_v43  ;;  %v722_v63 = vsel %vm714_vm13, %v3456_v43, %v3457_v32  ;;  %v682_v62 = vsel %vm675_vm11, %v4177_v46, %v3451_v57  ;;  %v683_v55 = vsel %vm675_vm11, %v3451_v57, %v3452_v53 }
  0xda   : > { %v791_v0 = vsel %vm784_vm14, %v781_v52, %v682_v62  ;;  %v635_v60 = vpop.permute.xlu0 %634  ;;  %v674_v9 = vpop.permute.xlu1 %673  ;;  %v792_v56 = vsel %vm784_vm14, %v782_v13, %v683_v55  ;;  %v1249_v55 = vld [vmem:[%s5145_s1] sm:$0xff] }
  0xdb   : > { %v3111_v18 = vpack.c.bf16 %v721_v51, %v791_v0  ;;  %v645_v40 = vsel %vm636_vm9, %v3447_v37, %v635_v60  ;;  %v684_v24 = vsel %vm675_vm11, %v3452_v53, %v674_v9  ;;  %v3108_v31 = vpack.c.bf16 %v722_v63, %v792_v56 }
  0xdc   : > { %v783_v54 = vsel %vm774_vm12, %v773_v59, %v645_v40  ;;  %v4273_v0 = vrot.slane %v1249_v55, %v3842_v7  ;;  %v4276_v60 = vrot.slane %v1249_v55, %v3838_v5  ;;  %v4292_v5 = vrot.slane %v1249_v55, %v397_v6 }
  0xdd   : > { %3110 = vmatprep.subr.msk.bf16.mxu1 %vm4062_vm7, %v3108_v31  ;;  %v793_v46 = vsel %vm784_vm14, %v783_v54, %v684_v24  ;;  %v4299_v54 = vrot.slane %v1249_v55, %v401_v8 }
  0xde   : > { %v713_v58 = vpop.permute.xlu0 %712  ;;  %3113 = vmatpush1.bf16.msk.msra.mxu1 %vm4062_vm7, %v3111_v18 }
  0xdf   : > { %v723_v22 = vsel %vm714_vm13, %v3457_v32, %v713_v58 }
  0xe0   : > { %v3115_v17 = vpack.c.bf16 %v723_v22, %v793_v46 }
  0xe1   : > { %2999 = vmatmul.mubr.msk.f32.vlgmr.msra.gmra.mrb[2].mxu1 %vm5170_vm5, %v4113_v47 }
  0xe2   : > { %3117 = vmatpush3.bf16.msk.msra.mxu0 %vm4062_vm7, %v3115_v17  ;;  %1692 = vmatprep.mubr.f32.mxu1 %v3755_v21 }
  0xe5   : > { %3046 = vmatmul.mubr.msk.f32.vlgmr.msra.gmra.mrb[4].mxu0 %vm5171_vm10, %v4113_v47 }
  0xe6   : > { %1763 = vmatprep.mubr.f32.mxu0 %v3755_v21 }
  0xeb   : > { %v798_v35 = vpop.permute.xlu1 %797 }
 0x192   : > { %v888_v11 = vpop.f32.mrb[0].mxu0 }
 0x193   : > { %v889_v25 = vadd.f32 %v888_v11, %v798_v35  ;;  %v890_v14 = vpop.f32.mrb[1].mxu0  ;;  %v959_v27 = vpop.f32.mrb[0].mxu1 }
 0x194   : > { %v891_v26 = vadd.f32 %v890_v14, %v798_v35  ;;  %v960_v30 = vadd.f32 %v959_v27, %v798_v35  ;;  %v961_v45 = vpop.f32.mrb[1].mxu1  ;;  %v4333_v14 = vrot.slane %v1249_v55, %v409_v4  ;;  %v4357_v4 = vrot.slane %v1249_v55, %v413_v19 }
 0x195   : > { %v1185_v23 = vmul.f32 0.1, %v889_v25  ;;  %v962_v61 = vadd.f32 %v961_v45, %v798_v35  ;;  %vm1176_vm12 = vcmp.ge.f32.partialorder %v889_v25, 0.0 }
 0x196   : > { %v1186_v12 = vmul.f32 0.1, %v891_v26  ;;  %vm1177_vm7 = vcmp.ge.f32.partialorder %v891_v26, 0.0  ;;  %v1187_v41 = vmul.f32 0.1, %v960_v30  ;;  %vm1178_vm14 = vcmp.ge.f32.partialorder %v960_v30, 0.0 }
 0x197   : > { %v1194_v28 = vsel %vm1176_vm12, %v889_v25, %v1185_v23  ;;  %v1188_v34 = vmul.f32 0.1, %v962_v61  ;;  %vm1179_vm15 = vcmp.ge.f32.partialorder %v962_v61, 0.0  ;;  %vm1230_vm12 = vcmask 244736  }
 0x198   : > { %1212 = vrot.lane.b32.xlu0 %v1194_v28, %s3761_s12  ;;  %v1195_v47 = vsel %vm1177_vm7, %v891_v26, %v1186_v12  ;;  %v1196_v29 = vsel %vm1178_vm14, %v960_v30, %v1187_v41  ;;  %v4328_v25 = vrot.slane %v1249_v55, %v405_v3  ;;  %vm1307_vm7 = vcmask 637952  }
 0x199   : > { %1214 = vrot.lane.b32.xlu1 %v1195_v47, %s3761_s12  ;;  %v1197_v16 = vsel %vm1179_vm15, %v962_v61, %v1188_v34  ;;  %v4361_v61 = vrot.slane %v1249_v55, %v417_v20  ;;  %v4376_v20 = vld [vmem:[%s5145_s1 + $0x8] ss:$0 sm:$0xff]  ;;  %vm5172_vm14 = vcmask 1031168  }
 0x19a   : > { %vm5173_vm15 = vmmov %vm5172_vm14 }
 0x19c   : > { %1216 = vrot.lane.b32.xlu0 %v1196_v29, %s3761_s12 }
 0x19d   : > { %1218 = vrot.lane.b32.xlu1 %v1197_v16, %s3761_s12 }
 0x1a2   : > { %v1030_v37 = vpop.f32.mrb[2].mxu0 }
 0x1a3   : > { %v1031_v38 = vadd.f32 %v1030_v37, %v798_v35  ;;  %v1032_v42 = vpop.f32.mrb[3].mxu0 }
 0x1a4   : > { %v1033_v36 = vadd.f32 %v1032_v42, %v798_v35 }
 0x1a5   : > { %v1189_v33 = vmul.f32 0.1, %v1031_v38  ;;  %vm1180_vm6 = vcmp.ge.f32.partialorder %v1031_v38, 0.0 }
 0x1a6   : > { %v1190_v39 = vmul.f32 0.1, %v1033_v36  ;;  %vm1181_vm3 = vcmp.ge.f32.partialorder %v1033_v36, 0.0 }
 0x1a7   : > { %v1198_v44 = vsel %vm1180_vm6, %v1031_v38, %v1189_v33  ;;  %vm5174_vm6 = vcmask 801792  }
 0x1a8   : > { %1220 = vrot.lane.b32.xlu0 %v1198_v44, %s3761_s12  ;;  %v1199_v49 = vsel %vm1181_vm3, %v1033_v36, %v1190_v39  ;;  %v1618_v39 = vld [vmem:[%s5149_s5] sm:$0xff]  ;;  %vm5175_vm3 = vmmov %vm5174_vm6 }
 0x1a9   : > { %1222 = vrot.lane.b32.xlu1 %v1199_v49, %s3761_s12 }
 0x1b4   : > { %v1101_v50 = vpop.f32.mrb[2].mxu1 }
 0x1b5   : > { %v1102_v15 = vadd.f32 %v1101_v50, %v798_v35  ;;  %v1103_v48 = vpop.f32.mrb[3].mxu1 }
 0x1b6   : > { %v1104_v32 = vadd.f32 %v1103_v48, %v798_v35 }
 0x1b7   : > { %v1191_v43 = vmul.f32 0.1, %v1102_v15  ;;  %vm1182_vm2 = vcmp.ge.f32.partialorder %v1102_v15, 0.0 }
 0x1b8   : > { %v1192_v53 = vmul.f32 0.1, %v1104_v32  ;;  %v1172_v57 = vpop.f32.mrb[4].mxu0  ;;  %vm1183_vm5 = vcmp.ge.f32.partialorder %v1104_v32, 0.0 }
 0x1b9   : > { %v1173_v52 = vadd.f32 %v1172_v57, %v798_v35  ;;  %v1200_v59 = vsel %vm1182_vm2, %v1102_v15, %v1191_v43  ;;  %v3047_v13 = vpop.f32.mrb[5].mxu0  ;;  %vm1624_vm2 = vcmask 588800  }
 0x1ba   : > { %1224 = vrot.lane.b32.xlu0 %v1200_v59, %s3761_s12  ;;  %v1201_v51 = vsel %vm1183_vm5, %v1104_v32, %v1192_v53  ;;  %vm5176_vm5 = vmmov %vm5172_vm14 }
 0x1bb   : > { %v1193_v63 = vmul.f32 0.1, %v1173_v52  ;;  %1226 = vrot.lane.b32.xlu1 %v1201_v51, %s3761_s12  ;;  %vm1184_vm10 = vcmp.ge.f32.partialorder %v1173_v52, 0.0 }
 0x1bd   : > { %v1202_v62 = vsel %vm1184_vm10, %v1173_v52, %v1193_v63  ;;  %vm5177_vm10 = vmmov %vm5176_vm5 }
 0x1be   : > { %1228 = vrot.lane.b32.xlu0 %v1202_v62, %s3761_s12 }
 0x20a   : > { %v1213_v9 = vpop.permute.xlu0 %1212 }
 0x20b   : > { %v1248_v56 = vsel %vm1230_vm12, 0.0, %v1213_v9  ;;  %v1215_v18 = vpop.permute.xlu1 %1214 }
 0x20c   : > { %v4287_v40 = vmul.f32 %v4273_v0, %v1248_v56  ;;  %v1231_v24 = vsel %vm1230_vm12, %v1213_v9, %v1215_v18 }
 0x20d   : > { %v4295_v31 = vmul.f32 %v4276_v60, %v1231_v24 }
 0x20e   : > { %1580 = vrot.lane.b32.xlu1 %v4287_v40, %s3756_s27  ;;  %v1217_v46 = vpop.permute.xlu0 %1216  ;;  %1309 = vst [vmem:[%s4284_s19] sm:$0xff] %v4287_v40 }
 0x20f   : > { %v1232_v58 = vsel %vm1230_vm12, %v1215_v18, %v1217_v46  ;;  %v1219_v22 = vpop.permute.xlu1 %1218  ;;  %1310 = vst [vmem:[%s4284_s19 + $0x8] sm:$0xff] %v4295_v31 }
 0x210   : > { %v4309_v6 = vmul.f32 %v4292_v5, %v1232_v58  ;;  %v1233_v17 = vsel %vm1230_vm12, %v1217_v46, %v1219_v22 }
 0x211   : > { %v4313_v35 = vmul.f32 %v4299_v54, %v1233_v17 }
 0x212   : > { %v3459_v8 = vpack.i.bf16 %v4309_v6, %v4295_v31  ;;  %1311 = vst [vmem:[%s4284_s19 + $0x10] sm:$0xff] %v4309_v6 }
 0x213   : > { %v3464_v11 = vpack.i.bf16 %v4313_v35, %v4287_v40  ;;  %1312 = vst [vmem:[%s4284_s19 + $0x18] sm:$0xff] %v4313_v35 }
 0x214   : > { %3460 = vrot.lane.b32.xlu1 %v3459_v8, %s3748_s20 }
 0x215   : > { %3465 = vrot.lane.b32.xlu0 %v3464_v11, %s3748_s20 }
 0x218   : > { %3470 = vrot.lane.b32.xlu1 %v3459_v8, %s3749_s21 }
 0x219   : > { %3475 = vrot.lane.b32.xlu0 %v3459_v8, %s3750_s22 }
 0x21a   : > { %v1221_v27 = vpop.permute.xlu0 %1220 }
 0x21b   : > { %v1234_v26 = vsel %vm1230_vm12, %v1219_v22, %v1221_v27  ;;  %v1223_v30 = vpop.permute.xlu1 %1222 }
 0x21c   : > { %v4337_v45 = vmul.f32 %v4328_v25, %v1234_v26  ;;  %v1235_v23 = vsel %vm1230_vm12, %v1221_v27, %v1223_v30  ;;  %3480 = vrot.lane.b32.xlu1 %v3464_v11, %s3749_s21 }
 0x21d   : > { %v4342_v3 = vmul.f32 %v4333_v14, %v1235_v23  ;;  %3485 = vrot.lane.b32.xlu0 %v3464_v11, %s3750_s22 }
 0x21e   : > { %1313 = vst [vmem:[%s4284_s19 + $0x20] sm:$0xff] %v4337_v45 }
 0x21f   : > { %1314 = vst [vmem:[%s4284_s19 + $0x28] sm:$0xff] %v4342_v3  ;;  %v3529_v38 = vpack.i.bf16 %v4342_v3, %v4337_v45 }
 0x220   : > { %3495 = vrot.lane.b32.xlu1 %v3459_v8, %s3752_s24 }
 0x221   : > { %3490 = vrot.lane.b32.xlu0 %v3459_v8, %s3751_s23 }
 0x224   : > { %3505 = vrot.lane.b32.xlu1 %v3464_v11, %s3752_s24 }
 0x225   : > { %3500 = vrot.lane.b32.xlu0 %v3464_v11, %s3751_s23 }
 0x228   : > { %3515 = vrot.lane.b32.xlu1 %v3459_v8, %s3754_s26 }
 0x229   : > { %3510 = vrot.lane.b32.xlu0 %v3459_v8, %s3753_s25 }
 0x22c   : > { %3525 = vrot.lane.b32.xlu1 %v3464_v11, %s3754_s26  ;;  %v1225_v12 = vpop.permute.xlu0 %1224 }
 0x22d   : > { %v1236_v41 = vsel %vm1230_vm12, %v1223_v30, %v1225_v12  ;;  %v1227_v28 = vpop.permute.xlu1 %1226  ;;  %3520 = vrot.lane.b32.xlu0 %v3464_v11, %s3753_s25 }
 0x22e   : > { %v4367_v34 = vmul.f32 %v4357_v4, %v1236_v41  ;;  %v1237_v47 = vsel %vm1230_vm12, %v1225_v12, %v1227_v28 }
 0x22f   : > { %v4371_v19 = vmul.f32 %v4361_v61, %v1237_v47 }
 0x230   : > { %1582 = vrot.lane.b32.xlu1 %v4295_v31, %s3756_s27  ;;  %1315 = vst [vmem:[%s4284_s19 + $0x30] sm:$0xff] %v4367_v34  ;;  %v1229_v29 = vpop.permute.xlu0 %1228 }
 0x231   : > { %1316 = vst [vmem:[%s4284_s19 + $0x38] sm:$0xff] %v4371_v19  ;;  %v1238_v16 = vsel %vm1230_vm12, %v1227_v28, %v1229_v29  ;;  %1584 = vrot.lane.b32.xlu0 %v4309_v6, %s3756_s27  ;;  %v3554_v42 = vpack.i.bf16 %v4371_v19, %v4367_v34 }
 0x232   : > { %v4388_v37 = vmul.f32 %v4376_v20, %v1238_v16 }
 0x234   : > { %1317 = vst.msk [vmem:[%s4284_s19 + $0x40] sm:$0xff] %vm1307_vm7, %v4388_v37  ;;  %1586 = vrot.lane.b32.xlu1 %v4313_v35, %s3756_s27  ;;  %v1308_v36 = vsel %vm1307_vm7, %v4388_v37, 0.0  ;;  %s4740_s19 = scalar_lea.vmem %s5153_s9, %s3273_s7 }
 0x235   : > { %1588 = vrot.lane.b32.xlu0 %v4337_v45, %s3756_s27  ;;  %v3589_v33 = vpack.i.bf16 %v1308_v36, %v4371_v19 }
 0x238   : > { %3530 = vrot.lane.b32.xlu1 %v3529_v38, %s3748_s20 }
 0x239   : > { %3535 = vrot.lane.b32.xlu0 %v3529_v38, %s3749_s21 }
 0x23c   : > { %3540 = vrot.lane.b32.xlu1 %v3529_v38, %s3750_s22 }
 0x23d   : > { %3545 = vrot.lane.b32.xlu0 %v3529_v38, %s3751_s23 }
 0x240   : > { %3550 = vrot.lane.b32.xlu1 %v3529_v38, %s3752_s24 }
 0x241   : > { %3555 = vrot.lane.b32.xlu0 %v3554_v42, %s3748_s20 }
 0x244   : > { %3565 = vrot.lane.b32.xlu1 %v3529_v38, %s3754_s26 }
 0x245   : > { %3560 = vrot.lane.b32.xlu0 %v3529_v38, %s3753_s25 }
 0x248   : > { %3575 = vrot.lane.b32.xlu1 %v3554_v42, %s3750_s22 }
 0x249   : > { %3570 = vrot.lane.b32.xlu0 %v3554_v42, %s3749_s21 }
 0x24c   : > { %3580 = vrot.lane.b32.xlu1 %v3554_v42, %s3751_s23 }
 0x24d   : > { %3585 = vrot.lane.b32.xlu0 %v3554_v42, %s3752_s24 }
 0x250   : > { %1516 = vrot.lane.b32.xlu1 %v4367_v34, %s3753_s25 }
 0x251   : > { %1554 = vrot.lane.b32.xlu0 %v4367_v34, %s3754_s26 }
 0x254   : > { %1590 = vrot.lane.b32.xlu1 %v4342_v3, %s3756_s27 }
 0x255   : > { %1592 = vrot.lane.b32.xlu0 %v4367_v34, %s3756_s27 }
 0x258   : > { %1379 = vrot.lane.b32.xlu1 %v1308_v36, %s3749_s21 }
 0x259   : > { %1344 = vrot.lane.b32.xlu0 %v1308_v36, %s3748_s20 }
 0x25c   : > { %1449 = vrot.lane.b32.xlu1 %v1308_v36, %s3751_s23 }
 0x25d   : > { %1414 = vrot.lane.b32.xlu0 %v1308_v36, %s3750_s22 }
 0x260   : > { %3590 = vrot.lane.b32.xlu1 %v3589_v33, %s3753_s25 }
 0x261   : > { %1484 = vrot.lane.b32.xlu0 %v1308_v36, %s3752_s24 }
 0x264   : > { %1594 = vrot.lane.b32.xlu1 %v4371_v19, %s3756_s27 }
 0x265   : > { %3595 = vrot.lane.b32.xlu0 %v3589_v33, %s3754_s26 }
 0x268   : > { %1522 = vrot.lane.b32.xlu1 %v3755_v21, %s3753_s25 }
 0x269   : > { %1596 = vrot.lane.b32.xlu0 %v1308_v36, %s3756_s27 }
 0x26c   : > { %1598 = vrot.lane.b32.xlu1 %v3755_v21, %s3756_s27 }
 0x26d   : > { %1560 = vrot.lane.b32.xlu0 %v3755_v21, %s3754_s26 }
 0x271   : > { %1621 = vperm.xlu0 %3599, %v1618_v39  }
 0x280   : > { %v4443_v44 = vpop.permute.xlu1 %1580 }
 0x286   : > { %v4445_v49 = vpop.permute.xlu1 %3460 }
 0x287   : > { %v3463_v50 = vunpack.i.h.bf16 %v4445_v49  ;;  %v3462_v15 = vunpack.i.l.bf16 %v4445_v49  ;;  %v4449_v48 = vpop.permute.xlu0 %3465 }
 0x288   : > { %v3467_v32 = vunpack.i.l.bf16 %v4449_v48 }
 0x289   : > { %v1347_v43 = vsel %vm450_vm0, %v3462_v15, %v3463_v50 }
 0x28a   : > { %v1346_v53 = vsel %vm450_vm0, %v3467_v32, %v3462_v15  ;;  %v4456_v57 = vpop.permute.xlu1 %3470  ;;  %v3118_v52 = vpack.c.bf16 %v1347_v43, %v4295_v31 }
 0x28b   : > { %v3473_v59 = vunpack.i.h.bf16 %v4456_v57  ;;  %v3472_v13 = vunpack.i.l.bf16 %v4456_v57  ;;  %v4461_v51 = vpop.permute.xlu0 %3475  ;;  %v3120_v63 = vpack.c.bf16 %v1346_v53, %v4287_v40 }
 0x28c   : > { %v3478_v62 = vunpack.i.h.bf16 %v4461_v51  ;;  %v3477_v55 = vunpack.i.l.bf16 %v4461_v51  ;;  %3119 = vmatprep.subr.bf16.mxu1 %v3118_v52 }
 0x28d   : > { %3121 = vmatpush1.bf16.msra.mxu1 %v3120_v63  ;;  %v1382_v9 = vsel %vm5172_vm14, %v3472_v13, %v3473_v59  ;;  %vm5178_vm14 = vmmov %vm5175_vm3 }
 0x28e   : > { %v4469_v56 = vpop.permute.xlu1 %3480  ;;  %v1417_v18 = vsel %vm522_vm4, %v3477_v55, %v3478_v62 }
 0x28f   : > { %v3482_v24 = vunpack.i.l.bf16 %v4469_v56  ;;  %v4475_v31 = vpop.permute.xlu0 %3485  ;;  %v3122_v40 = vpack.c.bf16 %v1417_v18, %v1382_v9 }
 0x290   : > { %v3487_v46 = vunpack.i.l.bf16 %v4475_v31 }
 0x291   : > { %v1381_v58 = vsel %vm5173_vm15, %v3482_v24, %v3472_v13  ;;  %3123 = vmatprep.subr.bf16.mxu1 %v3122_v40  ;;  %vm5179_vm15 = vmmov %vm5175_vm3 }
 0x292   : > { %v1416_v22 = vsel %vm522_vm4, %v3487_v46, %v3477_v55  ;;  %v4480_v17 = vpop.permute.xlu1 %3495 }
 0x293   : > { %v3124_v8 = vpack.c.bf16 %v1416_v22, %v1381_v58  ;;  %v3498_v11 = vunpack.i.h.bf16 %v4480_v17  ;;  %v3497_v27 = vunpack.i.l.bf16 %v4480_v17  ;;  %v4484_v26 = vpop.permute.xlu0 %3490 }
 0x294   : > { %v3493_v30 = vunpack.i.h.bf16 %v4484_v26  ;;  %v3492_v23 = vunpack.i.l.bf16 %v4484_v26 }
 0x295   : > { %3125 = vmatpush1.bf16.msra.mxu1 %v3124_v8  ;;  %v1487_v12 = vsel %vm594_vm8, %v3497_v27, %v3498_v11 }
 0x296   : > { %v4491_v41 = vpop.permute.xlu1 %3505  ;;  %v1452_v28 = vsel %vm5174_vm6, %v3492_v23, %v3493_v30  ;;  %vm5180_vm6 = vmmov %vm5176_vm5 }
 0x297   : > { %v3507_v47 = vunpack.i.l.bf16 %v4491_v41  ;;  %v4497_v29 = vpop.permute.xlu0 %3500  ;;  %v3126_v16 = vpack.c.bf16 %v1487_v12, %v1452_v28 }
 0x298   : > { %v3502_v38 = vunpack.i.l.bf16 %v4497_v29 }
 0x299   : > { %v1486_v42 = vsel %vm594_vm8, %v3507_v47, %v3497_v27  ;;  %3127 = vmatprep.subr.bf16.mxu1 %v3126_v16  ;;  %v4535_v47 = vld [vmem:[%s5148_s4] sm:$0xff]  ;;  %v3468_v16 = vunpack.i.h.bf16 %v4449_v48  ;;  %v3488_v48 = vunpack.i.h.bf16 %v4475_v31  ;;  %v3503_v31 = vunpack.i.h.bf16 %v4497_v29 }
 0x29a   : > { %v1451_v36 = vsel %vm5175_vm3, %v3502_v38, %v3492_v23  ;;  %v4502_v33 = vpop.permute.xlu1 %3515  ;;  %vm5181_vm3 = vmmov %vm5176_vm5 }
 0x29b   : > { %v3128_v39 = vpack.c.bf16 %v1486_v42, %v1451_v36  ;;  %v3518_v15 = vunpack.i.h.bf16 %v4502_v33  ;;  %v3517_v32 = vunpack.i.l.bf16 %v4502_v33  ;;  %v4506_v43 = vpop.permute.xlu0 %3510 }
 0x29c   : > { %v3513_v53 = vunpack.i.h.bf16 %v4506_v43  ;;  %v3512_v52 = vunpack.i.l.bf16 %v4506_v43 }
 0x29d   : > { %3129 = vmatpush1.bf16.msra.mxu1 %v3128_v39  ;;  %v1563_v13 = vsel %vm675_vm11, %v3517_v32, %v3518_v15 }
 0x29e   : > { %v4513_v63 = vpop.permute.xlu1 %3525  ;;  %v1525_v55 = vsel %vm636_vm9, %v3512_v52, %v3513_v53 }
 0x29f   : > { %v3527_v9 = vunpack.i.l.bf16 %v4513_v63  ;;  %v4519_v18 = vpop.permute.xlu0 %3520  ;;  %v3130_v24 = vpack.c.bf16 %v1563_v13, %v1525_v55 }
 0x2a0   : > { %v3522_v40 = vunpack.i.l.bf16 %v4519_v18 }
 0x2a1   : > { %v1562_v46 = vsel %vm675_vm11, %v3527_v9, %v3517_v32  ;;  %3131 = vmatprep.subr.bf16.mxu1 %v3130_v24  ;;  %v1348_v32 = vsel %vm450_vm0, %v3463_v50, %v3468_v16  ;;  %v1418_v50 = vsel %vm522_vm4, %v3478_v62, %v3488_v48 }
 0x2a2   : > { %v1524_v58 = vsel %vm636_vm9, %v3522_v40, %v3512_v52  ;;  %v1583_v22 = vpop.permute.xlu1 %1582  ;;  %v3483_v52 = vunpack.i.h.bf16 %v4469_v56  ;;  %v3508_v56 = vunpack.i.h.bf16 %v4491_v41 }
 0x2a3   : > { %v3132_v8 = vpack.c.bf16 %v1562_v46, %v1524_v58  ;;  %v4524_v27 = vpop.permute.xlu0 %1584  ;;  %v1600_v38 = vsel %vm714_vm13, %v4443_v44, %v1583_v22  ;;  %v3136_v46 = vpack.c.bf16 %v1348_v32, %v4309_v6 }
 0x2a4   : > { %v1601_v23 = vsel %vm714_vm13, %v1583_v22, %v4524_v27  ;;  %v1383_v49 = vsel %vm5176_vm5, %v3473_v59, %v3483_v52  ;;  %v1488_v29 = vsel %vm594_vm8, %v3498_v11, %v3508_v56  ;;  %vm5182_vm5 = vmmov %vm5178_vm14 }
 0x2a5   : > { %3133 = vmatpush1.bf16.msra.mxu1 %v3132_v8  ;;  %v3140_v22 = vpack.c.bf16 %v1418_v50, %v1383_v49  ;;  %v1453_v8 = vsel %vm5178_vm14, %v3493_v30, %v3503_v31  ;;  %vm5184_vm14 = vmmov 1  }
 0x2a6   : > { %v4528_v12 = vpop.permute.xlu1 %1586  ;;  %1644 = vmatprep.subr.mxu1 %v1601_v23  ;;  %v3528_v23 = vunpack.i.h.bf16 %v4513_v63  ;;  %v3144_v63 = vpack.c.bf16 %v1488_v29, %v1453_v8 }
 0x2a7   : > { %v4530_v28 = vpop.permute.xlu0 %1588 }
 0x2a9   : > { %1645 = vmatpush1.msra.mxu1 %v1600_v38  ;;  %v3523_v38 = vunpack.i.h.bf16 %v4519_v18 }
 0x2aa   : > { %v3531_v42 = vpop.permute.xlu1 %3530  ;;  %3003 = vmatmul.mubr.msk.f32.vlgmr.msra.gmra.mrb[4].mxu1 %vm1624_vm2, %v4535_v47 }
 0x2ab   : > { %v3532_v36 = vunpack.i.l.bf16 %v3531_v42  ;;  %v4542_v39 = vpop.permute.xlu0 %3535  ;;  %1834 = vmatprep.mubr.f32.mxu1 %v3755_v21  ;;  %v3533_v58 = vunpack.i.h.bf16 %v3531_v42 }
 0x2ac   : > { %v3537_v44 = vunpack.i.l.bf16 %v4542_v39 }
 0x2ad   : > { %v1349_v13 = vsel %vm450_vm0, %v3468_v16, %v3532_v36  ;;  %v1350_v42 = vsel %vm450_vm0, %v3532_v36, %v3533_v58 }
 0x2ae   : > { %v3541_v55 = vpop.permute.xlu1 %3540  ;;  %v3134_v9 = vpack.c.bf16 %v1349_v13, %v4313_v35  ;;  %v1384_v6 = vsel %vm5177_vm10, %v3483_v52, %v3537_v44  ;;  %v3152_v36 = vpack.c.bf16 %v1350_v42, %v4337_v45  ;;  %vm5183_vm10 = vmmov %vm5182_vm5 }
 0x2af   : > { %v3542_v24 = vunpack.i.l.bf16 %v3541_v55  ;;  %v4553_v40 = vpop.permute.xlu0 %3545  ;;  %v3543_v49 = vunpack.i.h.bf16 %v3541_v55 }
 0x2b0   : > { %3135 = vmatprep.subr.bf16.mxu0 %v3134_v9  ;;  %v3547_v35 = vunpack.i.l.bf16 %v4553_v40  ;;  %v1564_v9 = vsel %vm675_vm11, %v3518_v15, %v3528_v23 }
 0x2b1   : > { %3137 = vmatpush1.bf16.msra.mxu0 %v3136_v46  ;;  %v1419_v57 = vsel %vm522_vm4, %v3488_v48, %v3542_v24  ;;  %v1526_v46 = vsel %vm636_vm9, %v3513_v53, %v3523_v38  ;;  %v1420_v55 = vsel %vm522_vm4, %v3542_v24, %v3543_v49  ;;  %v3548_v24 = vunpack.i.h.bf16 %v4553_v40 }
 0x2b2   : > { %v4569_v59 = vpop.permute.xlu1 %3550  ;;  %v3138_v51 = vpack.c.bf16 %v1419_v57, %v1384_v6  ;;  %v1454_v17 = vsel %vm5179_vm15, %v3503_v31, %v3547_v35  ;;  %v3148_v43 = vpack.c.bf16 %v1564_v9, %v1526_v46  ;;  %vm4669_vm15 = vmpackc.low %vm5184_vm14, %vm1307_vm7 }
 0x2b3   : > { %v3552_v62 = vunpack.i.l.bf16 %v4569_v59  ;;  %v4572_v41 = vpop.permute.xlu0 %3555 }
 0x2b4   : > { %v3557_v16 = vunpack.i.l.bf16 %v4572_v41  ;;  %3139 = vmatprep.subr.bf16.mxu0 %v3138_v51  ;;  %v1603_v51 = vsel %vm714_vm13, %v4528_v12, %v4530_v28  ;;  %v3558_v46 = vunpack.i.h.bf16 %v4572_v41 }
 0x2b5   : > { %3141 = vmatpush1.bf16.msra.mxu0 %v3140_v22  ;;  %v1489_v11 = vsel %vm594_vm8, %v3508_v56, %v3552_v62 }
 0x2b6   : > { %v3566_v32 = vpop.permute.xlu1 %3565  ;;  %v3142_v26 = vpack.c.bf16 %v1489_v11, %v1454_v17  ;;  %v1351_v30 = vsel %vm450_vm0, %v3533_v58, %v3557_v16  ;;  %v3553_v58 = vunpack.i.h.bf16 %v4569_v59 }
 0x2b7   : > { %v3567_v52 = vunpack.i.l.bf16 %v3566_v32  ;;  %v3561_v48 = vpop.permute.xlu0 %3560  ;;  %v3150_v18 = vpack.c.bf16 %v1351_v30, %v4342_v3  ;;  %v3538_v3 = vunpack.i.h.bf16 %v4542_v39  ;;  %v3568_v39 = vunpack.i.h.bf16 %v3566_v32 }
 0x2b8   : > { %v3562_v13 = vunpack.i.l.bf16 %v3561_v48  ;;  %3143 = vmatprep.subr.bf16.mxu0 %v3142_v26  ;;  %v1490_v11 = vsel %vm594_vm8, %v3552_v62, %v3553_v58  ;;  %v3563_v26 = vunpack.i.h.bf16 %v3561_v48 }
 0x2b9   : > { %3145 = vmatpush1.bf16.msra.mxu0 %v3144_v63  ;;  %3151 = vmatprep.subr.bf16.mxu1 %v3150_v18  ;;  %v1565_v50 = vsel %vm675_vm11, %v3528_v23, %v3567_v52  ;;  %v1385_v29 = vsel %vm5181_vm3, %v3537_v44, %v3538_v3 }
 0x2ba   : > { %v4600_v56 = vpop.permute.xlu1 %3575  ;;  %3153 = vmatpush1.bf16.msra.mxu1 %v3152_v36  ;;  %v1527_v45 = vsel %vm636_vm9, %v3523_v38, %v3562_v13  ;;  %v1602_v38 = vsel %vm714_vm13, %v4524_v27, %v4528_v12  ;;  %v3156_v42 = vpack.c.bf16 %v1420_v55, %v1385_v29  ;;  %v1455_v12 = vsel %vm5183_vm10, %v3547_v35, %v3548_v24  ;;  %vm5188_vm10 = vmmov %vm5182_vm5 }
 0x2bb   : > { %v3577_v33 = vunpack.i.l.bf16 %v4600_v56  ;;  %v4605_v31 = vpop.permute.xlu0 %3570  ;;  %v3146_v15 = vpack.c.bf16 %v1565_v50, %v1527_v45  ;;  %v3160_v48 = vpack.c.bf16 %v1490_v11, %v1455_v12  ;;  %v1566_v36 = vsel %vm675_vm11, %v3567_v52, %v3568_v39 }
 0x2bc   : > { %v3572_v53 = vunpack.i.l.bf16 %v4605_v31  ;;  %v1528_v40 = vsel %vm636_vm9, %v3562_v13, %v3563_v26  ;;  %v3578_v45 = vunpack.i.h.bf16 %v4600_v56  ;;  %v1352_v52 = vsel %vm450_vm0, %v3557_v16, %v3558_v46 }
 0x2bd   : > { %3147 = vmatprep.subr.bf16.mxu0 %v3146_v15  ;;  %v1421_v6 = vsel %vm522_vm4, %v3543_v49, %v3577_v33  ;;  %v3164_v50 = vpack.c.bf16 %v1566_v36, %v1528_v40  ;;  %v3573_v13 = vunpack.i.h.bf16 %v4605_v31 }
 0x2be   : > { %v4611_v57 = vpop.permute.xlu1 %3580  ;;  %3149 = vmatpush1.bf16.msra.mxu0 %v3148_v43  ;;  %v1386_v22 = vsel %vm5180_vm6, %v3538_v3, %v3572_v53  ;;  %vm5187_vm6 = vmmov %vm5181_vm3 }
 0x2bf   : > { %v3582_v59 = vunpack.i.l.bf16 %v4611_v57  ;;  %v4622_v8 = vpop.permute.xlu0 %3585  ;;  %1715 = vmatprep.subr.mxu0 %v1603_v51  ;;  %v3154_v23 = vpack.c.bf16 %v1421_v6, %v1386_v22  ;;  %v3168_v6 = vpack.c.bf16 %v1352_v52, %v4367_v34  ;;  %v1422_v51 = vsel %vm522_vm4, %v3577_v33, %v3578_v45 }
 0x2c0   : > { %v3587_v17 = vunpack.i.l.bf16 %v4622_v8  ;;  %v1387_v16 = vsel %vm5187_vm6, %v3572_v53, %v3573_v13  ;;  %v3583_v31 = vunpack.i.h.bf16 %v4611_v57 }
 0x2c1   : > { %3155 = vmatprep.subr.bf16.mxu1 %v3154_v23  ;;  %v1456_v44 = vsel %vm5182_vm5, %v3548_v24, %v3582_v59 }
 0x2c2   : > { %v4632_v30 = vpop.permute.xlu1 %1516  ;;  %1716 = vmatpush1.msra.mxu0 %v1602_v38  ;;  %3157 = vmatpush1.bf16.msra.mxu1 %v3156_v42  ;;  %v1491_v27 = vsel %vm594_vm8, %v3553_v58, %v3587_v17  ;;  %v1457_v23 = vsel %vm5182_vm5, %v3582_v59, %v3583_v31 }
 0x2c3   : > { %v1529_v62 = vsel %vm636_vm9, %v3563_v26, %v4632_v30  ;;  %v4642_v32 = vpop.permute.xlu0 %1554  ;;  %3004 = vmatmul.mubr.msk.f32.vlgmr.msra.gmra.mrb[6].mxu0 %vm1624_vm2, %v4535_v47  ;;  %v3158_v63 = vpack.c.bf16 %v1491_v27, %v1456_v44 }
 0x2c4   : > { %v1567_v18 = vsel %vm675_vm11, %v3568_v39, %v4642_v32  ;;  %1905 = vmatprep.mubr.f32.mxu0 %v3755_v21 }
 0x2c5   : > { %v3162_v35 = vpack.c.bf16 %v1567_v18, %v1529_v62  ;;  %3159 = vmatprep.subr.bf16.mxu1 %v3158_v63 }
 0x2c6   : > { %v1591_v9 = vpop.permute.xlu1 %1590  ;;  %3161 = vmatpush1.bf16.msra.mxu1 %v3160_v48 }
 0x2c7   : > { %v4652_v49 = vpop.permute.xlu0 %1592  ;;  %3163 = vmatprep.subr.bf16.mxu1 %v3162_v35  ;;  %v1604_v58 = vsel %vm714_vm13, %v4530_v28, %v1591_v9  ;;  %v3588_v28 = vunpack.i.h.bf16 %v4622_v8 }
 0x2c8   : > { %v1605_v15 = vsel %vm714_vm13, %v1591_v9, %v4652_v49 }
 0x2c9   : > { %v1492_v38 = vsel %vm594_vm8, %v3587_v17, %v3588_v28 }
 0x2ca   : > { %v1380_v3 = vpop.permute.xlu1 %1379  ;;  %3165 = vmatpush1.bf16.msra.mxu1 %v3164_v50  ;;  %v3176_v27 = vpack.c.bf16 %v1492_v38, %v1457_v23 }
 0x2cb   : > { %v1345_v43 = vpop.permute.xlu0 %1344  ;;  %1786 = vmatprep.subr.mxu1 %v1605_v15  ;;  %v1388_v34 = vsel %vm5181_vm3, %v3573_v13, %v1380_v3 }
 0x2cc   : > { %v1353_v55 = vsel %vm450_vm0, %v3558_v46, %v1345_v43 }
 0x2cd   : > { %v3166_v56 = vpack.c.bf16 %v1353_v55, %v4371_v19  ;;  %v3183_v19 = vpack.c.bf16 %v1345_v43, %v4388_v37  ;;  %v3172_v37 = vpack.c.bf16 %v1422_v51, %v1387_v16 }
 0x2ce   : > { %v1450_v22 = vpop.permute.xlu1 %1449  ;;  %1787 = vmatpush1.msra.mxu1 %v1604_v58 }
 0x2cf   : > { %v1415_v29 = vpop.permute.xlu0 %1414  ;;  %3005 = vmatmul.mubr.msk.f32.vlgmr.msra.gmra.mrb[6].mxu1 %vm1624_vm2, %v4535_v47  ;;  %3167 = vmatprep.subr.bf16.mxu0 %v3166_v56  ;;  %v1458_v39 = vsel %vm5188_vm10, %v3583_v31, %v1450_v22 }
 0x2d0   : > { %v1423_v33 = vsel %vm522_vm4, %v3578_v45, %v1415_v29  ;;  %3182 = vmatprep.subr.bf16.mxu1 %v3759_v10  ;;  %3169 = vmatpush1.bf16.msra.mxu0 %v3168_v6  ;;  %v3187_v42 = vpack.c.bf16 %v1415_v29, %v1380_v3 }
 0x2d1   : > { %v3170_v24 = vpack.c.bf16 %v1423_v33, %v1388_v34  ;;  %3185 = vmatpush3.bf16.msk.msra.mxu1 %vm4669_vm15, %v3183_v19  ;;  %3066 = vmatprep.mubr.msk.f32.mxu1 %vm3760_vm1, %v3755_v21 }
 0x2d2   : > { %v3591_v53 = vpop.permute.xlu1 %3590  ;;  %3186 = vmatprep.subr.bf16.mxu1 %v3759_v10 }
 0x2d3   : > { %v1485_v11 = vpop.permute.xlu0 %1484  ;;  %3171 = vmatprep.subr.bf16.mxu0 %v3170_v24  ;;  %v3593_v12 = vunpack.i.h.bf16 %v3591_v53  ;;  %v3592_v62 = vunpack.i.l.bf16 %v3591_v53 }
 0x2d4   : > { %v1493_v26 = vsel %vm594_vm8, %v3588_v28, %v1485_v11  ;;  %3173 = vmatpush1.bf16.msra.mxu0 %v3172_v37  ;;  %v3190_v57 = vpack.c.bf16 %v1485_v11, %v1450_v22 }
 0x2d5   : > { %v3174_v44 = vpack.c.bf16 %v1493_v26, %v1458_v39  ;;  %3188 = vmatpush3.bf16.msra.mxu1 %v3187_v42  ;;  %v1530_v48 = vsel %vm636_vm9, %v4632_v30, %v3592_v62  ;;  %v1531_v36 = vsel %vm636_vm9, %v3592_v62, %v3593_v12 }
 0x2d6   : > { %3189 = vmatprep.subr.bf16.mxu1 %v3759_v10  ;;  %v1595_v59 = vpop.permute.xlu1 %1594 }
 0x2d7   : > { %v3596_v8 = vpop.permute.xlu0 %3595  ;;  %3175 = vmatprep.subr.bf16.mxu0 %v3174_v44  ;;  %v1606_v15 = vsel %vm714_vm13, %v4652_v49, %v1595_v59 }
 0x2d8   : > { %v3598_v17 = vunpack.i.h.bf16 %v3596_v8  ;;  %v3597_v63 = vunpack.i.l.bf16 %v3596_v8  ;;  %3177 = vmatpush1.bf16.msra.mxu0 %v3176_v27 }
 0x2d9   : > { %3191 = vmatpush3.bf16.msra.mxu1 %v3190_v57 }
 0x2da   : > { %v1568_v18 = vsel %vm675_vm11, %v4642_v32, %v3597_v63  ;;  %v1569_v40 = vsel %vm675_vm11, %v3597_v63, %v3598_v17  ;;  %3192 = vmatprep.subr.bf16.mxu1 %v3759_v10  ;;  %v4703_v50 = vpop.permute.xlu1 %1522 }
 0x2db   : > { %v3180_v35 = vpack.c.bf16 %v1568_v18, %v1530_v48  ;;  %v1597_v9 = vpop.permute.xlu0 %1596  ;;  %v3178_v46 = vpack.c.bf16 %v1569_v40, %v1531_v36  ;;  %v1532_v30 = vsel %vm636_vm9, %v3593_v12, %v4703_v50 }
 0x2dc   : > { %v1607_v45 = vsel %vm714_vm13, %v1595_v59, %v1597_v9 }
 0x2dd   : > { %3179 = vmatprep.subr.bf16.mxu0 %v3178_v46 }
 0x2de   : > { %3181 = vmatpush1.bf16.msra.mxu0 %v3180_v35  ;;  %v4714_v13 = vpop.permute.xlu1 %1598 }
 0x2df   : > { %v4706_v3 = vpop.permute.xlu0 %1560  ;;  %1857 = vmatprep.subr.mxu0 %v1607_v45  ;;  %v1608_v43 = vsel %vm714_vm13, %v1597_v9, %v4714_v13 }
 0x2e0   : > { %v1570_v32 = vsel %vm675_vm11, %v3598_v17, %v4706_v3 }
 0x2e1   : > { %v3193_v52 = vpack.c.bf16 %v1570_v32, %v1532_v30 }
 0x2e2   : > { %1858 = vmatpush1.msra.mxu0 %v1606_v15 }
 0x2e3   : > { %3006 = vmatmul.mubr.msk.f32.vlgmr.msra.gmra.mrb[8].mxu0 %vm1624_vm2, %v4535_v47  ;;  %3194 = vmatpush3.bf16.msra.mxu1 %v3193_v52 }
 0x2e4   : > { %3064 = vmatprep.subr.mxu1 %v3755_v21  ;;  %2492 = vmatprep.mubr.f32.mxu0 %v3755_v21 }
 0x2e7   : > { %3065 = vmatpush3.msra.mxu1 %v1608_v43 }
 0x2e8   : > { %3067 = vmatmul.mubr.msk.f32.vlgmr.msra.gmra.mrb[8].mxu1 %vm1624_vm2, %v4535_v47 }
 0x2e9   : > { %2563 = vmatprep.mubr.f32.mxu1 %v3755_v21 }
 0x2f0   : > { %v1622_v49 = vpop.permute.xlu0 %1621 }
 0x37d   : > { %v1694_v55 = vpop.f32.mrb[4].mxu1 }
 0x37e   : > { %v1695_v58 = vadd.f32 %v1694_v55, %v1622_v49  ;;  %v1696_v56 = vpop.f32.mrb[5].mxu1 }
 0x37f   : > { %v1697_v6 = vadd.f32 %v1696_v56, %v1622_v49 }
 0x380   : > { %vm1982_vm14 = vcmp.ge.f32.partialorder %v1695_v58, 0.0  ;;  %v1991_v51 = vmul.f32 0.1, %v1695_v58 }
 0x381   : > { %vm1983_vm6 = vcmp.ge.f32.partialorder %v1697_v6, 0.0  ;;  %v1992_v22 = vmul.f32 0.1, %v1697_v6 }
 0x382   : > { %v2000_v16 = vsel %vm1982_vm14, %v1695_v58, %v1991_v51 }
 0x383   : > { %2018 = vrot.lane.b32.xlu1 %v2000_v16, %s3761_s12  ;;  %v2001_v31 = vsel %vm1983_vm6, %v1697_v6, %v1992_v22 }
 0x387   : > { %2020 = vrot.lane.b32.xlu1 %v2001_v31, %s3761_s12 }
 0x396   : > { %v1765_v28 = vpop.f32.mrb[6].mxu0 }
 0x397   : > { %v1766_v19 = vadd.f32 %v1765_v28, %v1622_v49  ;;  %v1767_v47 = vpop.f32.mrb[7].mxu0 }
 0x398   : > { %v1768_v29 = vadd.f32 %v1767_v47, %v1622_v49 }
 0x399   : > { %vm1984_vm3 = vcmp.ge.f32.partialorder %v1766_v19, 0.0  ;;  %v1993_v34 = vmul.f32 0.1, %v1766_v19 }
 0x39a   : > { %vm1985_vm5 = vcmp.ge.f32.partialorder %v1768_v29, 0.0  ;;  %v1994_v33 = vmul.f32 0.1, %v1768_v29 }
 0x39b   : > { %v2002_v24 = vsel %vm1984_vm3, %v1766_v19, %v1993_v34 }
 0x39c   : > { %2022 = vrot.lane.b32.xlu0 %v2002_v24, %s3761_s12  ;;  %v2003_v37 = vsel %vm1985_vm5, %v1768_v29, %v1994_v33 }
 0x39d   : > { %2024 = vrot.lane.b32.xlu1 %v2003_v37, %s3761_s12  ;;  %v2415_v37 = vld [vmem:[#allocation2] sm:$0x1] }
 0x3a2   : > { %v1836_v53 = vpop.f32.mrb[6].mxu1 }
 0x3a3   : > { %v1837_v23 = vadd.f32 %v1836_v53, %v1622_v49  ;;  %v1838_v38 = vpop.f32.mrb[7].mxu1 }
 0x3a4   : > { %v1839_v42 = vadd.f32 %v1838_v38, %v1622_v49 }
 0x3a5   : > { %vm1986_vm10 = vcmp.ge.f32.partialorder %v1837_v23, 0.0  ;;  %v1995_v11 = vmul.f32 0.1, %v1837_v23 }
 0x3a6   : > { %vm1987_vm14 = vcmp.ge.f32.partialorder %v1839_v42, 0.0  ;;  %v1996_v39 = vmul.f32 0.1, %v1839_v42 }
 0x3a7   : > { %v2004_v26 = vsel %vm1986_vm10, %v1837_v23, %v1995_v11 }
 0x3a8   : > { %2026 = vrot.lane.b32.xlu0 %v2004_v26, %s3761_s12  ;;  %v2005_v44 = vsel %vm1987_vm14, %v1839_v42, %v1996_v39 }
 0x3a9   : > { %2028 = vrot.lane.b32.xlu1 %v2005_v44, %s3761_s12 }
 0x3b6   : > { %v1907_v27 = vpop.f32.mrb[8].mxu0 }
 0x3b7   : > { %v1908_v12 = vadd.f32 %v1907_v27, %v1622_v49  ;;  %v1909_v62 = vpop.f32.mrb[9].mxu0 }
 0x3b8   : > { %v1910_v57 = vadd.f32 %v1909_v62, %v1622_v49 }
 0x3b9   : > { %vm1988_vm6 = vcmp.ge.f32.partialorder %v1908_v12, 0.0  ;;  %v1997_v59 = vmul.f32 0.1, %v1908_v12 }
 0x3ba   : > { %vm1989_vm3 = vcmp.ge.f32.partialorder %v1910_v57, 0.0  ;;  %v1998_v8 = vmul.f32 0.1, %v1910_v57 }
 0x3bb   : > { %v1978_v17 = vpop.f32.mrb[8].mxu1  ;;  %v2006_v63 = vsel %vm1988_vm6, %v1908_v12, %v1997_v59 }
 0x3bc   : > { %v1979_v48 = vadd.f32 %v1978_v17, %v1622_v49  ;;  %2030 = vrot.lane.b32.xlu0 %v2006_v63, %s3761_s12  ;;  %v2007_v18 = vsel %vm1989_vm3, %v1910_v57, %v1998_v8  ;;  %v3068_v36 = vpop.f32.mrb[9].mxu1 }
 0x3bd   : > { %2032 = vrot.lane.b32.xlu1 %v2007_v18, %s3761_s12 }
 0x3be   : > { %vm1990_vm5 = vcmp.ge.f32.partialorder %v1979_v48, 0.0  ;;  %v1999_v40 = vmul.f32 0.1, %v1979_v48 }
 0x3c0   : > { %v2008_v35 = vsel %vm1990_vm5, %v1979_v48, %v1999_v40 }
 0x3c1   : > { %2034 = vrot.lane.b32.xlu0 %v2008_v35, %s3761_s12 }
 0x3f5   : > { %v2019_v9 = vpop.permute.xlu1 %2018 }
 0x3f6   : > { %v2053_v46 = vsel %vm1230_vm12, 0.0, %v2019_v9 }
 0x3f7   : > { %v4743_v45 = vmul.f32 %v2053_v46, %v4273_v0 }
 0x3f9   : > { %2379 = vrot.lane.b32.xlu1 %v4743_v45, %s3756_s27  ;;  %v2021_v30 = vpop.permute.xlu1 %2020  ;;  %2113 = vst [vmem:[%s4740_s19] sm:$0xff] %v4743_v45 }
 0x3fa   : > { %v2036_v32 = vsel %vm1230_vm12, %v2019_v9, %v2021_v30 }
 0x3fb   : > { %v4751_v15 = vmul.f32 %v2036_v32, %v4276_v60 }
 0x3fd   : > { %2381 = vrot.lane.b32.xlu1 %v4751_v15, %s3756_s27  ;;  %2114 = vst [vmem:[%s4740_s19 + $0x8] sm:$0xff] %v4751_v15 }
 0x40e   : > { %v2023_v52 = vpop.permute.xlu0 %2022 }
 0x40f   : > { %v2037_v0 = vsel %vm1230_vm12, %v2021_v30, %v2023_v52  ;;  %v2025_v43 = vpop.permute.xlu1 %2024 }
 0x410   : > { %v4759_v49 = vmul.f32 %v2037_v0, %v4292_v5  ;;  %v2038_v55 = vsel %vm1230_vm12, %v2023_v52, %v2025_v43 }
 0x411   : > { %v4763_v58 = vmul.f32 %v2038_v55, %v4299_v54 }
 0x412   : > { %v3610_v60 = vpack.i.bf16 %v4759_v49, %v4751_v15  ;;  %2115 = vst [vmem:[%s4740_s19 + $0x10] sm:$0xff] %v4759_v49 }
 0x413   : > { %2116 = vst [vmem:[%s4740_s19 + $0x18] sm:$0xff] %v4763_v58 }
 0x414   : > { %3611 = vrot.lane.b32.xlu0 %v3610_v60, %s3750_s22  ;;  %3601 = vrot.lane.b32.xlu1 %v3610_v60, %s3748_s20 }
 0x418   : > { %3621 = vrot.lane.b32.xlu0 %v3610_v60, %s3752_s24  ;;  %3606 = vrot.lane.b32.xlu1 %v3610_v60, %s3749_s21 }
 0x41a   : > { %v2027_v5 = vpop.permute.xlu0 %2026 }
 0x41b   : > { %v2039_v54 = vsel %vm1230_vm12, %v2025_v43, %v2027_v5  ;;  %v2029_v56 = vpop.permute.xlu1 %2028 }
 0x41c   : > { %v4777_v6 = vmul.f32 %v2039_v54, %v4328_v25  ;;  %v2040_v51 = vsel %vm1230_vm12, %v2027_v5, %v2029_v56  ;;  %3626 = vrot.lane.b32.xlu0 %v3610_v60, %s3753_s25  ;;  %3616 = vrot.lane.b32.xlu1 %v3610_v60, %s3751_s23  ;;  %v3640_v25 = vpack.i.bf16 %v4763_v58, %v4743_v45 }
 0x41d   : > { %v4783_v22 = vmul.f32 %v2040_v51, %v4333_v14 }
 0x41e   : > { %2117 = vst [vmem:[%s4740_s19 + $0x20] sm:$0xff] %v4777_v6 }
 0x41f   : > { %2118 = vst [vmem:[%s4740_s19 + $0x28] sm:$0xff] %v4783_v22  ;;  %v3670_v29 = vpack.i.bf16 %v4783_v22, %v4777_v6 }
 0x420   : > { %2383 = vrot.lane.b32.xlu0 %v4759_v49, %s3756_s27  ;;  %3631 = vrot.lane.b32.xlu1 %v3610_v60, %s3754_s26 }
 0x424   : > { %3641 = vrot.lane.b32.xlu1 %v3640_v25, %s3749_s21  ;;  %3636 = vrot.lane.b32.xlu0 %v3640_v25, %s3748_s20 }
 0x428   : > { %3651 = vrot.lane.b32.xlu1 %v3640_v25, %s3751_s23  ;;  %3646 = vrot.lane.b32.xlu0 %v3640_v25, %s3750_s22 }
 0x42c   : > { %3666 = vrot.lane.b32.xlu1 %v3640_v25, %s3754_s26  ;;  %3656 = vrot.lane.b32.xlu0 %v3640_v25, %s3752_s24 }
 0x42e   : > { %v2031_v14 = vpop.permute.xlu0 %2030 }
 0x42f   : > { %v2041_v16 = vsel %vm1230_vm12, %v2029_v56, %v2031_v14  ;;  %v2033_v31 = vpop.permute.xlu1 %2032 }
 0x430   : > { %v4802_v28 = vmul.f32 %v2041_v16, %v4357_v4  ;;  %v2042_v19 = vsel %vm1230_vm12, %v2031_v14, %v2033_v31  ;;  %2385 = vrot.lane.b32.xlu1 %v4763_v58, %s3756_s27  ;;  %3661 = vrot.lane.b32.xlu0 %v3640_v25, %s3753_s25 }
 0x431   : > { %v4809_v47 = vmul.f32 %v2042_v19, %v4361_v61 }
 0x432   : > { %2119 = vst [vmem:[%s4740_s19 + $0x30] sm:$0xff] %v4802_v28 }
 0x433   : > { %v2035_v34 = vpop.permute.xlu0 %2034  ;;  %2120 = vst [vmem:[%s4740_s19 + $0x38] sm:$0xff] %v4809_v47  ;;  %v3705_v61 = vpack.i.bf16 %v4809_v47, %v4802_v28 }
 0x434   : > { %v2043_v4 = vsel %vm1230_vm12, %v2033_v31, %v2035_v34  ;;  %2387 = vrot.lane.b32.xlu0 %v4777_v6, %s3756_s27  ;;  %3671 = vrot.lane.b32.xlu1 %v3670_v29, %s3748_s20  ;;  %vm5189_vm12 = vcmask 1031168  }
 0x435   : > { %v4822_v33 = vmul.f32 %v4376_v20, %v2043_v4  ;;  %vm5191_vm10 = vmmov %vm5189_vm12 }
 0x436   : > { %vm5193_vm6 = vmmov %vm5191_vm10 }
 0x437   : > { %2121 = vst.msk [vmem:[%s4740_s19 + $0x40] sm:$0xff] %vm1307_vm7, %v4822_v33  ;;  %v2112_v20 = vsel %vm1307_vm7, %v4822_v33, 0.0  ;;  %vm5190_vm7 = vcmask 801792   ;;  %vm5194_vm3 = vmmov %vm5193_vm6 }
 0x438   : > { %3676 = vrot.lane.b32.xlu0 %v3670_v29, %s3749_s21  ;;  %3681 = vrot.lane.b32.xlu1 %v3670_v29, %s3750_s22  ;;  %v3730_v24 = vpack.i.bf16 %v2112_v20, %v4809_v47  ;;  %vm5192_vm14 = vmmov %vm5190_vm7 }
 0x439   : > { %vm5195_vm5 = vmmov %vm5190_vm7 }
 0x43c   : > { %3691 = vrot.lane.b32.xlu0 %v3670_v29, %s3752_s24  ;;  %3686 = vrot.lane.b32.xlu1 %v3670_v29, %s3751_s23 }
 0x440   : > { %3696 = vrot.lane.b32.xlu0 %v3670_v29, %s3753_s25  ;;  %3701 = vrot.lane.b32.xlu1 %v3670_v29, %s3754_s26 }
 0x444   : > { %2284 = vrot.lane.b32.xlu1 %v4802_v28, %s3752_s24  ;;  %3706 = vrot.lane.b32.xlu0 %v3705_v61, %s3748_s20 }
 0x448   : > { %3716 = vrot.lane.b32.xlu1 %v3705_v61, %s3750_s22  ;;  %3711 = vrot.lane.b32.xlu0 %v3705_v61, %s3749_s21 }
 0x44c   : > { %2319 = vrot.lane.b32.xlu1 %v4802_v28, %s3753_s25  ;;  %2355 = vrot.lane.b32.xlu0 %v4802_v28, %s3754_s26 }
 0x450   : > { %2389 = vrot.lane.b32.xlu1 %v4783_v22, %s3756_s27  ;;  %2391 = vrot.lane.b32.xlu0 %v4802_v28, %s3756_s27 }
 0x454   : > { %2183 = vrot.lane.b32.xlu1 %v2112_v20, %s3749_s21  ;;  %3721 = vrot.lane.b32.xlu0 %v3705_v61, %s3751_s23 }
 0x458   : > { %2253 = vrot.lane.b32.xlu1 %v2112_v20, %s3751_s23  ;;  %2148 = vrot.lane.b32.xlu0 %v2112_v20, %s3748_s20 }
 0x45c   : > { %3731 = vrot.lane.b32.xlu1 %v3730_v24, %s3753_s25  ;;  %2218 = vrot.lane.b32.xlu0 %v2112_v20, %s3750_s22  ;;  %s3274_s22 = smul.u32 9, %s5204_s16 }
 0x45e   : > { %s381_s25 = scalar_lea.vmem %s5154_s10, %s3274_s22 }
 0x460   : > { %2393 = vrot.lane.b32.xlu1 %v4809_v47, %s3756_s27  ;;  %3726 = vrot.lane.b32.xlu0 %v3730_v24, %s3752_s24 }
 0x464   : > { %2418 = vperm.xlu1 %3458, %v2415_v37   ;;  %3736 = vrot.lane.b32.xlu0 %v3730_v24, %s3754_s26 }
 0x468   : > { %2395 = vrot.lane.b32.xlu0 %v2112_v20, %s3756_s27 }
 0x46b   : > { %v4862_v53 = vpop.permute.xlu1 %2379 }
 0x46f   : > { %v4864_v23 = vpop.permute.xlu1 %2381 }
 0x486   : > { %v4866_v38 = vpop.permute.xlu0 %3611  ;;  %v4868_v42 = vpop.permute.xlu1 %3601 }
 0x487   : > { %v3604_v11 = vunpack.i.h.bf16 %v4868_v42  ;;  %v3603_v39 = vunpack.i.l.bf16 %v4868_v42  ;;  %v3614_v48 = vunpack.i.h.bf16 %v4866_v38  ;;  %v3613_v18 = vunpack.i.l.bf16 %v4866_v38 }
 0x489   : > { %v2151_v26 = vsel %vm450_vm0, %v3603_v39, %v3604_v11  ;;  %v2221_v5 = vsel %vm522_vm4, %v3613_v18, %v3614_v48 }
 0x48a   : > { %v4875_v44 = vpop.permute.xlu0 %3621  ;;  %v4877_v27 = vpop.permute.xlu1 %3606  ;;  %v3195_v12 = vpack.c.bf16 %v2151_v26, %v4751_v15 }
 0x48b   : > { %v3609_v17 = vunpack.i.h.bf16 %v4877_v27  ;;  %v3608_v63 = vunpack.i.l.bf16 %v4877_v27  ;;  %v3624_v52 = vunpack.i.h.bf16 %v4875_v44  ;;  %v3623_v0 = vunpack.i.l.bf16 %v4875_v44 }
 0x48c   : > { %3196 = vmatprep.subr.bf16.mxu0 %v3195_v12 }
 0x48d   : > { %v2186_v30 = vsel %vm5189_vm12, %v3608_v63, %v3609_v17  ;;  %v2291_v20 = vsel %vm594_vm8, %v3623_v0, %v3624_v52  ;;  %vm5196_vm12 = vmmov %vm5195_vm5 }
 0x48e   : > { %v4880_v62 = vpop.permute.xlu0 %3626  ;;  %v4882_v57 = vpop.permute.xlu1 %3616  ;;  %v3199_v56 = vpack.c.bf16 %v2221_v5, %v2186_v30 }
 0x48f   : > { %v3619_v9 = vunpack.i.h.bf16 %v4882_v57  ;;  %v3618_v46 = vunpack.i.l.bf16 %v4882_v57  ;;  %v3629_v19 = vunpack.i.h.bf16 %v4880_v62  ;;  %v3628_v29 = vunpack.i.l.bf16 %v4880_v62 }
 0x492   : > { %v4884_v59 = vpop.permute.xlu0 %2383  ;;  %v4886_v8 = vpop.permute.xlu1 %3631 }
 0x493   : > { %v3634_v51 = vunpack.i.h.bf16 %v4886_v8  ;;  %v3633_v25 = vunpack.i.l.bf16 %v4886_v8 }
 0x496   : > { %v3637_v36 = vpop.permute.xlu0 %3636  ;;  %v4892_v40 = vpop.permute.xlu1 %3641 }
 0x497   : > { %v3638_v35 = vunpack.i.l.bf16 %v3637_v36  ;;  %v3643_v15 = vunpack.i.l.bf16 %v4892_v40  ;;  %v3639_v5 = vunpack.i.h.bf16 %v3637_v36  ;;  %v2398_v36 = vsel %vm714_vm13, %v4864_v23, %v4884_v59 }
 0x499   : > { %v2150_v32 = vsel %vm450_vm0, %v3638_v35, %v3603_v39  ;;  %v2185_v14 = vsel %vm5191_vm10, %v3643_v15, %v3608_v63  ;;  %v2362_v39 = vsel %vm675_vm11, %v3633_v25, %v3634_v51  ;;  %vm5198_vm10 = vmmov %vm5194_vm3 }
 0x49a   : > { %v3197_v43 = vpack.c.bf16 %v2150_v32, %v4743_v45  ;;  %v4904_v55 = vpop.permute.xlu0 %3646  ;;  %v4906_v60 = vpop.permute.xlu1 %3651  ;;  %v2256_v45 = vsel %vm5190_vm7, %v3618_v46, %v3619_v9  ;;  %v2326_v32 = vsel %vm636_vm9, %v3628_v29, %v3629_v19  ;;  %vm5197_vm7 = vmmov %vm5194_vm3 }
 0x49b   : > { %v3648_v54 = vunpack.i.l.bf16 %v4904_v55  ;;  %v3653_v31 = vunpack.i.l.bf16 %v4906_v60  ;;  %v3203_v37 = vpack.c.bf16 %v2291_v20, %v2256_v45 }
 0x49c   : > { %3198 = vmatpush1.bf16.msra.mxu0 %v3197_v43  ;;  %v3207_v43 = vpack.c.bf16 %v2362_v39, %v2326_v32 }
 0x49d   : > { %v2220_v16 = vsel %vm522_vm4, %v3648_v54, %v3613_v18  ;;  %3200 = vmatprep.subr.bf16.mxu0 %v3199_v56  ;;  %v2255_v26 = vsel %vm5192_vm14, %v3653_v31, %v3618_v46  ;;  %v2397_v31 = vsel %vm714_vm13, %v4862_v53, %v4864_v23  ;;  %vm5199_vm14 = vmmov %vm5195_vm5 }
 0x49e   : > { %v3201_v34 = vpack.c.bf16 %v2220_v16, %v2185_v14  ;;  %v3657_v4 = vpop.permute.xlu0 %3656  ;;  %v4922_v61 = vpop.permute.xlu1 %3666  ;;  %v2152_v16 = vsel %vm450_vm0, %v3604_v11, %v3639_v5  ;;  %v4967_v11 = vld [vmem:[%s5150_s6] sm:$0x1] }
 0x49f   : > { %v3658_v24 = vunpack.i.l.bf16 %v3657_v4  ;;  %v3668_v63 = vunpack.i.l.bf16 %v4922_v61 }
 0x4a0   : > { %3202 = vmatpush1.bf16.msra.mxu0 %v3201_v34 }
 0x4a1   : > { %v2290_v12 = vsel %vm594_vm8, %v3658_v24, %v3623_v0  ;;  %3204 = vmatprep.subr.bf16.mxu0 %v3203_v37  ;;  %v2361_v46 = vsel %vm675_vm11, %v3668_v63, %v3633_v25  ;;  %v3213_v24 = vpack.c.bf16 %v2152_v16, %v4759_v49  ;;  %v3644_v37 = vunpack.i.h.bf16 %v4892_v40 }
 0x4a2   : > { %v3205_v18 = vpack.c.bf16 %v2290_v12, %v2255_v26  ;;  %v4933_v35 = vpop.permute.xlu0 %3661  ;;  %v4935_v30 = vpop.permute.xlu1 %2385  ;;  %v3654_v12 = vunpack.i.h.bf16 %v4906_v60 }
 0x4a3   : > { %v3663_v15 = vunpack.i.l.bf16 %v4933_v35  ;;  %v2187_v38 = vsel %vm5194_vm3, %v3609_v17, %v3644_v37 }
 0x4a4   : > { %3206 = vmatpush1.bf16.msra.mxu0 %v3205_v18  ;;  %v2257_v44 = vsel %vm5196_vm12, %v3619_v9, %v3654_v12 }
 0x4a5   : > { %v2325_v0 = vsel %vm636_vm9, %v3663_v15, %v3628_v29  ;;  %3208 = vmatprep.subr.bf16.mxu0 %v3207_v43  ;;  %v3649_v29 = vunpack.i.h.bf16 %v4904_v55  ;;  %v3659_v55 = vunpack.i.h.bf16 %v3657_v4  ;;  %v3664_v43 = vunpack.i.h.bf16 %v4933_v35 }
 0x4a6   : > { %v3209_v54 = vpack.c.bf16 %v2361_v46, %v2325_v0  ;;  %v4943_v56 = vpop.permute.xlu0 %2387  ;;  %v4945_v45 = vpop.permute.xlu1 %3671  ;;  %v3669_v46 = vunpack.i.h.bf16 %v4922_v61 }
 0x4a7   : > { %v3673_v14 = vunpack.i.l.bf16 %v4945_v45  ;;  %v2222_v23 = vsel %vm522_vm4, %v3614_v48, %v3649_v29  ;;  %v2292_v60 = vsel %vm594_vm8, %v3624_v52, %v3659_v55  ;;  %v3674_v52 = vunpack.i.h.bf16 %v4945_v45 }
 0x4a8   : > { %3210 = vmatpush1.bf16.msra.mxu0 %v3209_v54  ;;  %v3217_v4 = vpack.c.bf16 %v2222_v23, %v2187_v38  ;;  %v3221_v35 = vpack.c.bf16 %v2292_v60, %v2257_v44 }
 0x4a9   : > { %2444 = vmatprep.subr.mxu0 %v2398_v36  ;;  %v2153_v25 = vsel %vm450_vm0, %v3639_v5, %v3673_v14  ;;  %v2327_v36 = vsel %vm636_vm9, %v3629_v19, %v3664_v43 }
 0x4aa   : > { %v4959_v34 = vpop.permute.xlu0 %3676  ;;  %v4961_v20 = vpop.permute.xlu1 %3681  ;;  %v3211_v42 = vpack.c.bf16 %v2153_v25, %v4763_v58 }
 0x4ab   : > { %v3678_v39 = vunpack.i.l.bf16 %v4959_v34  ;;  %v3683_v53 = vunpack.i.l.bf16 %v4961_v20 }
 0x4ac   : > { %2445 = vmatpush1.msra.mxu0 %v2397_v31  ;;  %3212 = vmatprep.subr.bf16.mxu1 %v3211_v42  ;;  %v2363_v31 = vsel %vm675_vm11, %v3634_v51, %v3669_v46  ;;  %v3679_v42 = vunpack.i.h.bf16 %v4959_v34  ;;  %v2400_v34 = vsel %vm714_vm13, %v4935_v30, %v4943_v56 }
 0x4ad   : > { %3010 = vmatmul.mubr.msk.f32.vlgmr.msra.gmra.mrb[10].mxu0 %vm1624_vm2, %v4967_v11  ;;  %3214 = vmatpush1.bf16.msra.mxu1 %v3213_v24  ;;  %v2188_v58 = vsel %vm5193_vm6, %v3644_v37, %v3678_v39  ;;  %v2223_v26 = vsel %vm522_vm4, %v3649_v29, %v3683_v53  ;;  %v2154_v29 = vsel %vm450_vm0, %v3673_v14, %v3674_v52  ;;  %v3684_v24 = vunpack.i.h.bf16 %v4961_v20  ;;  %vm5200_vm6 = vmmov %vm5195_vm5 }
 0x4ae   : > { %v4979_v49 = vpop.permute.xlu0 %3691  ;;  %v4981_v40 = vpop.permute.xlu1 %3686  ;;  %2634 = vmatprep.mubr.f32.mxu0 %v3755_v21  ;;  %v3215_v48 = vpack.c.bf16 %v2223_v26, %v2188_v58  ;;  %v3225_v62 = vpack.c.bf16 %v2363_v31, %v2327_v36  ;;  %v3229_v8 = vpack.c.bf16 %v2154_v29, %v4777_v6  ;;  %v2189_v20 = vsel %vm5197_vm7, %v3678_v39, %v3679_v42 }
 0x4af   : > { %v3693_v63 = vunpack.i.l.bf16 %v4979_v49  ;;  %v3688_v18 = vunpack.i.l.bf16 %v4981_v40  ;;  %v2399_v26 = vsel %vm714_vm13, %v4884_v59, %v4935_v30  ;;  %v3689_v59 = vunpack.i.h.bf16 %v4981_v40 }
 0x4b0   : > { %3216 = vmatprep.subr.bf16.mxu1 %v3215_v48 }
 0x4b1   : > { %v2258_v32 = vsel %vm5195_vm5, %v3654_v12, %v3688_v18  ;;  %v2293_v15 = vsel %vm594_vm8, %v3659_v55, %v3693_v63  ;;  %3218 = vmatpush1.bf16.msra.mxu1 %v3217_v4  ;;  %v2224_v55 = vsel %vm522_vm4, %v3683_v53, %v3684_v24 }
 0x4b2   : > { %v5001_v27 = vpop.permute.xlu0 %3696  ;;  %v5003_v17 = vpop.permute.xlu1 %3701  ;;  %v3219_v5 = vpack.c.bf16 %v2293_v15, %v2258_v32  ;;  %v3233_v4 = vpack.c.bf16 %v2224_v55, %v2189_v20  ;;  %v3694_v32 = vunpack.i.h.bf16 %v4979_v49 }
 0x4b3   : > { %v3698_v0 = vunpack.i.l.bf16 %v5001_v27  ;;  %v3703_v54 = vunpack.i.l.bf16 %v5003_v17 }
 0x4b4   : > { %3220 = vmatprep.subr.bf16.mxu1 %v3219_v5  ;;  %v3704_v5 = vunpack.i.h.bf16 %v5003_v17  ;;  %v2294_v44 = vsel %vm594_vm8, %v3693_v63, %v3694_v32 }
 0x4b5   : > { %v2328_v16 = vsel %vm636_vm9, %v3664_v43, %v3698_v0  ;;  %v2364_v61 = vsel %vm675_vm11, %v3669_v46, %v3703_v54  ;;  %3222 = vmatpush1.bf16.msra.mxu1 %v3221_v35  ;;  %v3699_v43 = vunpack.i.h.bf16 %v5001_v27 }
 0x4b6   : > { %v3707_v25 = vpop.permute.xlu0 %3706  ;;  %v5021_v57 = vpop.permute.xlu1 %2284  ;;  %v3223_v9 = vpack.c.bf16 %v2364_v61, %v2328_v16 }
 0x4b7   : > { %v3708_v45 = vunpack.i.l.bf16 %v3707_v25  ;;  %v3709_v30 = vunpack.i.h.bf16 %v3707_v25  ;;  %v2295_v35 = vsel %vm594_vm8, %v3694_v32, %v5021_v57  ;;  %v2329_v29 = vsel %vm636_vm9, %v3698_v0, %v3699_v43 }
 0x4b8   : > { %3224 = vmatprep.subr.bf16.mxu1 %v3223_v9 }
 0x4b9   : > { %v2155_v19 = vsel %vm450_vm0, %v3674_v52, %v3708_v45  ;;  %3226 = vmatpush1.bf16.msra.mxu1 %v3225_v62  ;;  %v2259_v52 = vsel %vm5199_vm14, %v3688_v18, %v3689_v59  ;;  %v2156_v25 = vsel %vm450_vm0, %v3708_v45, %v3709_v30 }
 0x4ba   : > { %v5030_v37 = vpop.permute.xlu0 %3711  ;;  %v5032_v58 = vpop.permute.xlu1 %3716  ;;  %v3227_v23 = vpack.c.bf16 %v2155_v19, %v4783_v22  ;;  %2515 = vmatprep.subr.mxu1 %v2400_v34  ;;  %v3237_v18 = vpack.c.bf16 %v2294_v44, %v2259_v52  ;;  %v3245_v19 = vpack.c.bf16 %v2156_v25, %v4802_v28 }
 0x4bb   : > { %v3713_v51 = vunpack.i.l.bf16 %v5030_v37  ;;  %v3718_v14 = vunpack.i.l.bf16 %v5032_v58  ;;  %v3714_v49 = vunpack.i.h.bf16 %v5030_v37  ;;  %v3719_v63 = vunpack.i.h.bf16 %v5032_v58 }
 0x4bc   : > { %3228 = vmatprep.subr.bf16.mxu0 %v3227_v23 }
 0x4bd   : > { %3230 = vmatpush1.bf16.msra.mxu0 %v3229_v8  ;;  %v2190_v22 = vsel %vm5198_vm10, %v3679_v42, %v3713_v51  ;;  %v2225_v6 = vsel %vm522_vm4, %v3684_v24, %v3718_v14  ;;  %2516 = vmatpush1.msra.mxu1 %v2399_v26  ;;  %v2365_v42 = vsel %vm675_vm11, %v3703_v54, %v3704_v5 }
 0x4be   : > { %v5048_v12 = vpop.permute.xlu0 %2355  ;;  %v5050_v38 = vpop.permute.xlu1 %2319  ;;  %v3231_v48 = vpack.c.bf16 %v2225_v6, %v2190_v22  ;;  %3011 = vmatmul.mubr.msk.f32.vlgmr.msra.gmra.mrb[10].mxu1 %vm1624_vm2, %v4967_v11  ;;  %v2191_v37 = vsel %vm5194_vm3, %v3713_v51, %v3714_v49  ;;  %v2226_v58 = vsel %vm522_vm4, %v3718_v14, %v3719_v63  ;;  %v3241_v27 = vpack.c.bf16 %v2365_v42, %v2329_v29 }
 0x4bf   : > { %2705 = vmatprep.mubr.f32.mxu1 %v3755_v21  ;;  %v2366_v16 = vsel %vm675_vm11, %v3704_v5, %v5048_v12  ;;  %v2330_v61 = vsel %vm636_vm9, %v3699_v43, %v5050_v38  ;;  %v3249_v8 = vpack.c.bf16 %v2226_v58, %v2191_v37 }
 0x4c0   : > { %3232 = vmatprep.subr.bf16.mxu0 %v3231_v48  ;;  %v3239_v24 = vpack.c.bf16 %v2366_v16, %v2330_v61 }
 0x4c1   : > { %3234 = vmatpush1.bf16.msra.mxu0 %v3233_v4 }
 0x4c2   : > { %v5055_v39 = vpop.permute.xlu0 %2391  ;;  %v2390_v53 = vpop.permute.xlu1 %2389 }
 0x4c3   : > { %v2402_v28 = vsel %vm714_vm13, %v2390_v53, %v5055_v39  ;;  %v2401_v55 = vsel %vm714_vm13, %v4943_v56, %v2390_v53 }
 0x4c6   : > { %v3722_v15 = vpop.permute.xlu0 %3721  ;;  %v5059_v60 = vpop.permute.xlu1 %2183 }
 0x4c7   : > { %v3723_v46 = vunpack.i.l.bf16 %v3722_v15 }
 0x4c9   : > { %v2260_v36 = vsel %vm5200_vm6, %v3689_v59, %v3723_v46 }
 0x4ca   : > { %v2149_v40 = vpop.permute.xlu0 %2148  ;;  %v3235_v9 = vpack.c.bf16 %v2295_v35, %v2260_v36  ;;  %v2254_v62 = vpop.permute.xlu1 %2253 }
 0x4cb   : > { %v2157_v31 = vsel %vm450_vm0, %v3709_v30, %v2149_v40  ;;  %vm5201_vm0 = vmmov %vm5194_vm3  ;;  %v3260_v6 = vpack.c.bf16 %v2149_v40, %v4822_v33 }
 0x4cc   : > { %v3243_v45 = vpack.c.bf16 %v2157_v31, %v4809_v47  ;;  %3236 = vmatprep.subr.bf16.mxu0 %v3235_v9  ;;  %v2192_v17 = vsel %vm5201_vm0, %v3714_v49, %v5059_v60  ;;  %v3724_v47 = vunpack.i.h.bf16 %v3722_v15 }
 0x4cd   : > { %3238 = vmatpush1.bf16.msra.mxu0 %v3237_v18  ;;  %v3762_v18 = vmov 1966171168  }
 0x4ce   : > { %v2219_v23 = vpop.permute.xlu0 %2218  ;;  %3240 = vmatprep.subr.bf16.mxu0 %v3239_v24  ;;  %3244 = vmatprep.subr.bf16.mxu1 %v3243_v45  ;;  %v3732_v51 = vpop.permute.xlu1 %3731  ;;  %v2261_v22 = vsel %vm5195_vm5, %v3723_v46, %v3724_v47  ;;  %v2796_v31 = vunpack.c.l.s4 %v3762_v18 }
 0x4cf   : > { %v2227_v0 = vsel %vm522_vm4, %v3719_v63, %v2219_v23  ;;  %3246 = vmatpush1.bf16.msra.mxu1 %v3245_v19  ;;  %vm5202_vm4 = vmmov %vm5195_vm5  ;;  %v3734_v48 = vunpack.i.h.bf16 %v3732_v51  ;;  %v3733_v4 = vunpack.i.l.bf16 %v3732_v51 }
 0x4d0   : > { %v3247_v54 = vpack.c.bf16 %v2227_v0, %v2192_v17  ;;  %v2262_v26 = vsel %vm5202_vm4, %v3724_v47, %v2254_v62  ;;  %v2797_v29 = vunpack.c.0.s8 %v2796_v31 }
 0x4d1   : > { %3242 = vmatpush1.bf16.msra.mxu0 %v3241_v27  ;;  %v2331_v43 = vsel %vm636_vm9, %v5050_v38, %v3733_v4  ;;  %v2332_v46 = vsel %vm636_vm9, %v3733_v4, %v3734_v48  ;;  %v2333_v61 = vsel %vm636_vm9, %v3734_v48, %v4703_v50 }
 0x4d2   : > { %v3727_v34 = vpop.permute.xlu0 %3726  ;;  %2586 = vmatprep.subr.mxu0 %v2402_v28  ;;  %3248 = vmatprep.subr.bf16.mxu1 %v3247_v54  ;;  %v2394_v16 = vpop.permute.xlu1 %2393 }
 0x4d3   : > { %v3729_v14 = vunpack.i.h.bf16 %v3727_v34  ;;  %v3728_v20 = vunpack.i.l.bf16 %v3727_v34  ;;  %3250 = vmatpush1.bf16.msra.mxu1 %v3249_v8  ;;  %v2403_v36 = vsel %vm714_vm13, %v5055_v39, %v2394_v16 }
 0x4d5   : > { %v2296_v32 = vsel %vm594_vm8, %v5021_v57, %v3728_v20  ;;  %2587 = vmatpush1.msra.mxu0 %v2401_v55  ;;  %v2297_v59 = vsel %vm594_vm8, %v3728_v20, %v3729_v14  ;;  %v3264_v57 = vpack.c.bf16 %v2219_v23, %v5059_v60  ;;  %v3267_v60 = vpack.c.bf16 %v3729_v14, %v2254_v62 }
 0x4d6   : > { %v3253_v30 = vpack.c.bf16 %v2296_v32, %v2261_v22  ;;  %v3737_v15 = vpop.permute.xlu0 %3736  ;;  %3012 = vmatmul.mubr.msk.f32.vlgmr.msra.gmra.mrb[12].mxu0 %vm1624_vm2, %v4967_v11  ;;  %3259 = vmatprep.subr.bf16.mxu0 %v3759_v10  ;;  %v3251_v56 = vpack.c.bf16 %v2297_v59, %v2262_v26  ;;  %vm2859_vm8 = vcmp.lt.s32.totalorder %v387_v1, 78 }
 0x4d7   : > { %v3739_v53 = vunpack.i.h.bf16 %v3737_v15  ;;  %v3738_v33 = vunpack.i.l.bf16 %v3737_v15  ;;  %3262 = vmatpush3.bf16.msk.msra.mxu0 %vm4669_vm15, %v3260_v6  ;;  %3087 = vmatprep.mubr.msk.f32.mxu0 %vm3760_vm1, %v3755_v21 }
 0x4d8   : > { %3252 = vmatprep.subr.bf16.mxu1 %v3251_v56  ;;  %3263 = vmatprep.subr.bf16.mxu0 %v3759_v10 }
 0x4d9   : > { %v2367_v5 = vsel %vm675_vm11, %v5048_v12, %v3738_v33  ;;  %3254 = vmatpush1.bf16.msra.mxu1 %v3253_v30  ;;  %v2368_v41 = vsel %vm675_vm11, %v3738_v33, %v3739_v53  ;;  %v2369_v12 = vsel %vm675_vm11, %v3739_v53, %v4706_v3 }
 0x4da   : > { %v3257_v44 = vpack.c.bf16 %v2367_v5, %v2331_v43  ;;  %v2396_v52 = vpop.permute.xlu0 %2395  ;;  %v3255_v35 = vpack.c.bf16 %v2368_v41, %v2332_v46  ;;  %v3270_v25 = vpack.c.bf16 %v2369_v12, %v2333_v61 }
 0x4db   : > { %3265 = vmatpush3.bf16.msra.mxu0 %v3264_v57  ;;  %v2404_v38 = vsel %vm714_vm13, %v2394_v16, %v2396_v52  ;;  %v2405_v3 = vsel %vm714_vm13, %v2396_v52, %v4714_v13  ;;  %v2800_v13 = vsub.s32 %v2797_v29, %v3832_v2 }
 0x4dc   : > { %3256 = vmatprep.subr.bf16.mxu1 %v3255_v35  ;;  %3266 = vmatprep.subr.bf16.mxu0 %v3759_v10 }
 0x4dd   : > { %3258 = vmatpush1.bf16.msra.mxu1 %v3257_v44 }
 0x4de   : > { %2657 = vmatprep.subr.mxu1 %v2404_v38 }
 0x4df   : > { %3268 = vmatpush3.bf16.msra.mxu0 %v3267_v60 }
 0x4e0   : > { %3269 = vmatprep.subr.bf16.mxu0 %v3759_v10 }
 0x4e1   : > { %2658 = vmatpush1.msra.mxu1 %v2403_v36 }
 0x4e2   : > { %3013 = vmatmul.mubr.msk.f32.vlgmr.msra.gmra.mrb[12].mxu1 %vm1624_vm2, %v4967_v11 }
 0x4e3   : > { %3271 = vmatpush3.bf16.msra.mxu0 %v3270_v25  ;;  %v2419_v50 = vpop.permute.xlu1 %2418 }
 0x4e4   : > { %3085 = vmatprep.subr.mxu0 %v3755_v21  ;;  %v2424_v39 = vrot.slane %v2419_v50, %v3842_v7 }
 0x4e7   : > { %3086 = vmatpush3.msra.mxu0 %v2405_v3 }
 0x4e8   : > { %3088 = vmatmul.mubr.msk.f32.vlgmr.msra.gmra.mrb[14].mxu0 %vm1624_vm2, %v4967_v11 }
 0x580   : > { %v2494_v49 = vpop.f32.mrb[10].mxu0 }
 0x581   : > { %v2495_v10 = vadd.f32 %v2494_v49, %v2424_v39  ;;  %v2496_v63 = vpop.f32.mrb[11].mxu0 }
 0x582   : > { %v2497_v40 = vadd.f32 %v2496_v63, %v2424_v39 }
 0x584   : > { %v2791_v9 = vcombine.low %v2495_v10, %v2497_v40 }
 0x586   : > { %v2801_v11 = vrot.slane %v2791_v9, %v2800_v13 }
 0x591   : > { %v2565_v42 = vpop.f32.mrb[10].mxu1 }
 0x592   : > { %v2566_v21 = vadd.f32 %v2565_v42, %v2424_v39  ;;  %v2567_v24 = vpop.f32.mrb[11].mxu1 }
 0x593   : > { %v2568_v45 = vadd.f32 %v2567_v24, %v2424_v39 }
 0x595   : > { %v2792_v62 = vcombine.low %v2566_v21, %v2568_v45 }
 0x597   : > { %v2808_v19 = vrot.slane %v2792_v62, %v2800_v13 }
 0x599   : > { %v2823_v37 = vcombine.low %v2801_v11, %v2808_v19 }
 0x59b   : > { %v2831_v6 = vrot.slane %v2823_v37, %v2800_v13 }
 0x5a9   : > { %v2636_v7 = vpop.f32.mrb[12].mxu0 }
 0x5aa   : > { %v2637_v58 = vadd.f32 %v2636_v7, %v2424_v39  ;;  %v2638_v23 = vpop.f32.mrb[13].mxu0 }
 0x5ab   : > { %v2639_v27 = vadd.f32 %v2638_v23, %v2424_v39 }
 0x5ad   : > { %v2793_v17 = vcombine.low %v2637_v58, %v2639_v27 }
 0x5af   : > { %v2815_v51 = vrot.slane %v2793_v17, %v2800_v13 }
 0x5b5   : > { %v2707_v0 = vpop.f32.mrb[12].mxu1 }
 0x5b6   : > { %v2708_v47 = vadd.f32 %v2707_v0, %v2424_v39  ;;  %v2709_v54 = vpop.f32.mrb[13].mxu1 }
 0x5b7   : > { %v2710_v8 = vadd.f32 %v2709_v54, %v2424_v39 }
 0x5b9   : > { %v2794_v28 = vcombine.low %v2708_v47, %v2710_v8 }
 0x5bb   : > { %v2822_v34 = vrot.slane %v2794_v28, %v2800_v13  ;;  %v2778_v2 = vpop.f32.mrb[14].mxu0 }
 0x5bc   : > { %v2779_v14 = vadd.f32 %v2778_v2, %v2424_v39  ;;  %v3089_v20 = vpop.f32.mrb[15].mxu0 }
 0x5bd   : > { %v2824_v55 = vcombine.low %v2815_v51, %v2822_v34 }
 0x5be   : > { %v2846_v22 = vrot.slane %v2779_v14, %v2800_v13 }
 0x5bf   : > { %v2838_v26 = vrot.slane %v2824_v55, %v2800_v13 }
 0x5c0   : > { %v2853_v48 = vrot.slane %v2846_v22, %v2800_v13 }
 0x5c1   : > { %v2839_v4 = vcombine.low %v2831_v6, %v2838_v26 }
 0x5c2   : > { %2861 = vst.msk [vmem:[%s381_s25 + $0x8] sm:$0x1] %vm2859_vm8, %v2853_v48 }
 0x5c3   : > { %2856 = vst [vmem:[%s381_s25] sm:$0xff] %v2839_v4 }
 0x5c4 PF: > { %s23_s15 = sadd.s32 1, %s3746_s15  }
 0x5c5   : > { %p20_p4 = scmp.ge.s32.totalorder %s23_s15, 4  }
 0x5c7   :  { %22 = sbr.rel (!%p20_p4) target bundleno = 3 (0x3), region = 106 }

// kernel: multiple_discriminator_forward.6
= control target key start
LH: loop header
LB: loop body
LE: loop exit
PB: predicated region body
PF: predicated region fallthrough
CT: control target
= control target key end

     0   :  { %s1708_s19 = smov 0   ;;  %s2330_s0 = inlined_call_operand.vmem [shape: f32[2,1,504], index: 0, kind: input, shape index: {}]   ;;  %s2331_s1 = inlined_call_operand.vmem [shape: f32[4,5], index: 1, kind: input, shape index: {}]   ;;  %s2332_s2 = inlined_call_operand.vmem [shape: f32[4,1], index: 2, kind: input, shape index: {}]   ;;  %s2333_s3 = inlined_call_operand.vmem [shape: f32[496,184], index: 3, kind: input, shape index: {}]   ;;  %s2334_s4 = inlined_call_operand.vmem [shape: f32[8,20], index: 4, kind: input, shape index: {}]   ;;  %s2335_s5 = inlined_call_operand.vmem [shape: f32[8,1], index: 5, kind: input, shape index: {}]   ;;  %s2336_s6 = inlined_call_operand.vmem [shape: f32[176,68], index: 6, kind: input, shape index: {}]   ;;  %s2337_s7 = inlined_call_operand.vmem [shape: f32[1,24], index: 7, kind: input, shape index: {}]   ;;  %s2338_s8 = inlined_call_operand.<no memory space> [shape: f32[1,1], index: 8, kind: input, shape index: {}]   ;;  %s2339_s9 = inlined_call_operand.vmem [shape: f32[2,4,176], index: 9, kind: output, shape index: {0}]   ;;  %s2340_s10 = inlined_call_operand.vmem [shape: f32[2,8,64], index: 10, kind: output, shape index: {1}]   ;;  %s2341_s11 = inlined_call_operand.vmem [shape: f32[2,1,64], index: 11, kind: output, shape index: {2}]  }
   0x1   :  { %v17_v0 = vstv %s2338_s8 }
   0x2   :  { %18 = vst [vmem:[#allocation2] sm:$0x1] %v17_v0 }
   0x3 LB: > { %s1393_s20 = sadd.s32 4294967295, %s1635_s19   ;;  %p1397_p0 = scmp.ge.s32.totalorder %s1635_s19, 1  ;;  %s1635_s19 = sphi %s1708_s19, %s24_s19  }
   0x4   : > { %p343_p1 = scmp.lt.s32.totalorder %s1635_s19, 3 }
   0x6   : > { %p344_p2 = pnand %p1397_p0, %p343_p1 }
   0x7   : > { %p389_p3 = scmp.lt.s32.totalorder (!%p344_p2), %s1393_s20, 1  ;;  %v408_v1 = vlaneseq (!%p344_p2)  ;;  %s1637_s24 = smov (!%p344_p2), 126   ;;  %v1639_v10 = vmov (!%p344_p2), 0.0   ;;  %v690_v12 = vld [vmem:[%s2333_s3 + $0x8] sm:$0xff] (!%p344_p2)  ;;  %v692_v13 = vld [vmem:[%s2333_s3 + $0x18] sm:$0xff] (!%p344_p2)  ;;  %v689_v16 = vld [vmem:[%s2333_s3] sm:$0xff] (!%p344_p2) }
   0x8   : > { %347 = sbr.rel (%p344_p2) target bundleno = 1504 (0x5e0), region = 56  ;;  %s1638_s25 = smov (!%p344_p2), 124   ;;  %599 = vmatprep.mubr.f32.mxu1 (!%p344_p2), %v1639_v10  ;;  %v1430_v15 = vpack.c.bf16 (!%p344_p2), %v692_v13, %v690_v12  ;;  %v691_v17 = vld [vmem:[%s2333_s3 + $0x10] sm:$0xff] (!%p344_p2)  ;;  %v1642_v18 = vmov (!%p344_p2), 0   ;;  %v694_v20 = vld [vmem:[%s2333_s3 + $0x28] sm:$0xff] (!%p344_p2)  ;;  %v696_v21 = vld [vmem:[%s2333_s3 + $0x38] sm:$0xff] (!%p344_p2) }
   0x9   : > { %v1718_v2 = vshrl.u32 (!%p344_p2), %v408_v1, 7  ;;  %s1640_s26 = smov (!%p344_p2), 122   ;;  %s1641_s27 = smov (!%p344_p2), 120   ;;  %1612 = vset.pattern.permute.xlu0 (!%p344_p2), %v1642_v18  ;;  %v1432_v19 = vpack.c.bf16 (!%p344_p2), %v691_v17, %v689_v16  ;;  %v693_v22 = vld [vmem:[%s2333_s3 + $0x20] sm:$0xff] (!%p344_p2)  ;;  %1628 = vset.pattern.permute.xlu1 (!%p344_p2), %v1642_v18  ;;  %v1434_v23 = vpack.c.bf16 (!%p344_p2), %v696_v21, %v694_v20  ;;  %v695_v24 = vld [vmem:[%s2333_s3 + $0x30] sm:$0xff] (!%p344_p2)  ;;  %v698_v25 = vld [vmem:[%s2333_s3 + $0x48] sm:$0xff] (!%p344_p2) }
   0xa   : > { %1431 = vmatprep.subr.bf16.mxu0 (!%p344_p2), %v1430_v15  ;;  %v700_v26 = vld [vmem:[%s2333_s3 + $0x58] sm:$0xff] (!%p344_p2)  ;;  %v1436_v27 = vpack.c.bf16 (!%p344_p2), %v695_v24, %v693_v22  ;;  %v697_v28 = vld [vmem:[%s2333_s3 + $0x40] sm:$0xff] (!%p344_p2)  ;;  %v699_v29 = vld [vmem:[%s2333_s3 + $0x50] sm:$0xff] (!%p344_p2)  ;;  %vm436_vm0 = vcmask (!%p344_p2), 1031168   ;;  %vm452_vm1 = vcmask (!%p344_p2), 1014784   ;;  %vm468_vm2 = vcmask (!%p344_p2), 998400  }
   0xb   : > { %v414_v3 = vsub.s32 (!%p344_p2), 1, %v1718_v2  ;;  %v410_v4 = vsub.s32 (!%p344_p2), 0, %v1718_v2  ;;  %v418_v5 = vsub.s32 (!%p344_p2), 2, %v1718_v2  ;;  %v422_v11 = vsub.s32 (!%p344_p2), 3, %v1718_v2  ;;  %1433 = vmatpush1.bf16.msra.mxu0 (!%p344_p2), %v1432_v19  ;;  %v702_v31 = vld [vmem:[%s2333_s3 + $0x68] sm:$0xff] (!%p344_p2)  ;;  %v704_v32 = vld [vmem:[%s2333_s3 + $0x78] sm:$0xff] (!%p344_p2) }
   0xc   : > { %1435 = vmatprep.subr.bf16.mxu0 (!%p344_p2), %v1434_v23  ;;  %v1438_v30 = vpack.c.bf16 (!%p344_p2), %v700_v26, %v698_v25  ;;  %v1440_v33 = vpack.c.bf16 (!%p344_p2), %v699_v29, %v697_v28  ;;  %v1442_v34 = vpack.c.bf16 (!%p344_p2), %v704_v32, %v702_v31  ;;  %v701_v35 = vld [vmem:[%s2333_s3 + $0x60] sm:$0xff] (!%p344_p2)  ;;  %v703_v36 = vld [vmem:[%s2333_s3 + $0x70] sm:$0xff] (!%p344_p2)  ;;  %v706_v38 = vld [vmem:[%s2333_s3 + $0x88] sm:$0xff] (!%p344_p2)  ;;  %vm492_vm3 = vcmask (!%p344_p2), 1040384  }
   0xd   : > { %v512_v37 = vld [vmem:[%s2332_s2] sm:$0xf] (!%p344_p2)  ;;  %v708_v39 = vld [vmem:[%s2333_s3 + $0x98] sm:$0xff] (!%p344_p2)  ;;  %v1444_v40 = vpack.c.bf16 (!%p344_p2), %v703_v36, %v701_v35  ;;  %v707_v43 = vld [vmem:[%s2333_s3 + $0x90] sm:$0xff] (!%p344_p2)  ;;  %vm497_vm4 = vcmask (!%p344_p2), 1041408   ;;  %vm484_vm5 = vcmask (!%p344_p2), 982016  }
   0xe   : > { %v1446_v41 = vpack.c.bf16 (!%p344_p2), %v708_v39, %v706_v38  ;;  %v705_v42 = vld [vmem:[%s2333_s3 + $0x80] sm:$0xff] (!%p344_p2)  ;;  %v710_v44 = vld [vmem:[%s2333_s3 + $0xa8] sm:$0xff] (!%p344_p2)  ;;  %v712_v45 = vld [vmem:[%s2333_s3 + $0xb8] sm:$0xff] (!%p344_p2)  ;;  %vm502_vm6 = vcmask (!%p344_p2), 1042432   ;;  %vm507_vm7 = vcmask (!%p344_p2), 1043456   ;;  %vm522_vm8 = vcmask (!%p344_p2), 1044480  }
   0xf   : > { %s2343_s20 = smov (!%p389_p3, %s1393_s20), 1  ;;  %1437 = vmatpush1.bf16.msra.mxu0 %v1436_v27  ;;  %v1448_v46 = vpack.c.bf16 %v707_v43, %v705_v42  ;;  %v1450_v47 = vpack.c.bf16 %v712_v45, %v710_v44  ;;  %v709_v48 = vld [vmem:[%s2333_s3 + $0xa0] sm:$0xff]  ;;  %v711_v49 = vld [vmem:[%s2333_s3 + $0xb0] sm:$0xff]  ;;  %v714_v50 = vld [vmem:[%s2333_s3 + $0xc8] sm:$0xff]  ;;  %vm518_vm9 = vcmask 39936   ;;  %vm813_vm14 = vcmask 916480  }
  0x10   : > { %s1398_s8 = sshll.u32 %s2343_s20, 2  ;;  %1439 = vmatprep.subr.bf16.mxu0 %v1438_v30  ;;  %v716_v51 = vld [vmem:[%s2333_s3 + $0xd8] sm:$0xff]  ;;  %v1452_v52 = vpack.c.bf16 %v711_v49, %v709_v48  ;;  %v713_v54 = vld [vmem:[%s2333_s3 + $0xc0] sm:$0xff]  ;;  %v715_v55 = vld [vmem:[%s2333_s3 + $0xd0] sm:$0xff]  ;;  %s1416_s28 = sshll.u32 %s2343_s20, 3  ;;  %vm963_vm15 = vcmask 392196  }
  0x11   : > { %s392_s23 = scalar_lea.vmem %s2330_s0, %s1398_s8  ;;  %v1454_v53 = vpack.c.bf16 %v716_v51, %v714_v50  ;;  %v718_v56 = vld [vmem:[%s2333_s3 + $0xe8] sm:$0xff]  ;;  %v720_v57 = vld [vmem:[%s2333_s3 + $0xf8] sm:$0xff]  ;;  %v1456_v58 = vpack.c.bf16 %v715_v55, %v713_v54  ;;  %v717_v60 = vld [vmem:[%s2333_s3 + $0xe0] sm:$0xff]  ;;  %s397_s12 = scalar_lea.vmem %s2339_s9, %s1416_s28 }
  0x12   : > { %v405_v6 = vld [vmem:[%s392_s23] sm:$0xf]  ;;  %v1458_v59 = vpack.c.bf16 %v720_v57, %v718_v56  ;;  %v719_v61 = vld [vmem:[%s2333_s3 + $0xf0] sm:$0xff]  ;;  %v722_v62 = vld [vmem:[%s2333_s3 + $0x108] sm:$0xff]  ;;  %s401_s18 = scalar_lea.vmem %s2340_s10, %s1416_s28  ;;  %s404_s28 = scalar_lea.vmem %s2341_s11, %s2343_s20 }
  0x13   : > { %v1727_v7 = vrot.slane %v405_v6, %v414_v3  ;;  %v1731_v8 = vrot.slane %v405_v6, %v410_v4  ;;  %v1737_v9 = vrot.slane %v405_v6, %v418_v5  ;;  %v1767_v14 = vrot.slane %v405_v6, %v422_v11  ;;  %1441 = vmatpush1.bf16.msra.mxu0 %v1440_v33  ;;  %v724_v63 = vld [vmem:[%s2333_s3 + $0x118] sm:$0xff]  ;;  %v721_v3 = vld [vmem:[%s2333_s3 + $0x100] sm:$0xff]  ;;  %v723_v5 = vld [vmem:[%s2333_s3 + $0x110] sm:$0xff] }
  0x14   : > { %1443 = vmatprep.subr.bf16.mxu0 %v1442_v34  ;;  %v1460_v0 = vpack.c.bf16 %v719_v61, %v717_v60  ;;  %v1462_v1 = vpack.c.bf16 %v724_v63, %v722_v62  ;;  %v726_v6 = vld [vmem:[%s2333_s3 + $0x128] sm:$0xff]  ;;  %v728_v11 = vld [vmem:[%s2333_s3 + $0x138] sm:$0xff]  ;;  %v1464_v12 = vpack.c.bf16 %v723_v5, %v721_v3  ;;  %v725_v15 = vld [vmem:[%s2333_s3 + $0x120] sm:$0xff] }
  0x15   : > { %430 = vrot.lane.b32.xlu0 %v1727_v7, %s1637_s24  ;;  %428 = vrot.lane.b32.xlu1 %v1731_v8, %s1637_s24  ;;  %v1466_v13 = vpack.c.bf16 %v728_v11, %v726_v6  ;;  %v727_v16 = vld [vmem:[%s2333_s3 + $0x130] sm:$0xff]  ;;  %v730_v17 = vld [vmem:[%s2333_s3 + $0x148] sm:$0xff] }
  0x16   : > { %v732_v18 = vld [vmem:[%s2333_s3 + $0x158] sm:$0xff]  ;;  %v1468_v19 = vpack.c.bf16 %v727_v16, %v725_v15  ;;  %v729_v21 = vld [vmem:[%s2333_s3 + $0x140] sm:$0xff]  ;;  %v731_v22 = vld [vmem:[%s2333_s3 + $0x150] sm:$0xff] }
  0x17   : > { %1445 = vmatpush1.bf16.msra.mxu0 %v1444_v40  ;;  %v1470_v20 = vpack.c.bf16 %v732_v18, %v730_v17  ;;  %v734_v23 = vld [vmem:[%s2333_s3 + $0x168] sm:$0xff]  ;;  %v736_v24 = vld [vmem:[%s2333_s3 + $0x178] sm:$0xff]  ;;  %v1472_v25 = vpack.c.bf16 %v731_v22, %v729_v21  ;;  %v733_v27 = vld [vmem:[%s2333_s3 + $0x160] sm:$0xff] }
  0x18   : > { %1447 = vmatprep.subr.bf16.mxu0 %v1446_v41  ;;  %v1474_v26 = vpack.c.bf16 %v736_v24, %v734_v23  ;;  %v735_v28 = vld [vmem:[%s2333_s3 + $0x170] sm:$0xff]  ;;  %v738_v29 = vld [vmem:[%s2333_s3 + $0x188] sm:$0xff]  ;;  %v740_v30 = vld [vmem:[%s2333_s3 + $0x198] sm:$0xff] }
  0x19   : > { %432 = vrot.lane.b32.xlu0 %v1737_v9, %s1637_s24  ;;  %446 = vrot.lane.b32.xlu1 %v1727_v7, %s1638_s25  ;;  %v1476_v31 = vpack.c.bf16 %v735_v28, %v733_v27  ;;  %v1478_v32 = vpack.c.bf16 %v740_v30, %v738_v29  ;;  %v737_v33 = vld [vmem:[%s2333_s3 + $0x180] sm:$0xff]  ;;  %v739_v34 = vld [vmem:[%s2333_s3 + $0x190] sm:$0xff] }
  0x1a   : > { %v742_v35 = vld [vmem:[%s2333_s3 + $0x1a8] sm:$0xff]  ;;  %v744_v36 = vld [vmem:[%s2333_s3 + $0x1b8] sm:$0xff]  ;;  %v741_v39 = vld [vmem:[%s2333_s3 + $0x1a0] sm:$0xff] }
  0x1b   : > { %1449 = vmatpush1.bf16.msra.mxu0 %v1448_v46  ;;  %v1482_v38 = vpack.c.bf16 %v744_v36, %v742_v35  ;;  %v743_v40 = vld [vmem:[%s2333_s3 + $0x1b0] sm:$0xff]  ;;  %v406_v6 = vld [vmem:[%s2331_s1] sm:$0xf]  ;;  %v754_v16 = vld [vmem:[%s2333_s3 + $0x208] sm:$0xff] }
  0x1c   : > { %1451 = vmatprep.subr.bf16.mxu0 %v1450_v47  ;;  %v1484_v41 = vpack.c.bf16 %v743_v40, %v741_v39  ;;  %v756_v17 = vld [vmem:[%s2333_s3 + $0x218] sm:$0xff]  ;;  %v757_v35 = vld [vmem:[%s2333_s3 + $0x220] sm:$0xff]  ;;  %v759_v36 = vld [vmem:[%s2333_s3 + $0x230] sm:$0xff] }
  0x1d   : > { %448 = vrot.lane.b32.xlu0 %v1737_v9, %s1638_s25  ;;  %444 = vrot.lane.b32.xlu1 %v1731_v8, %s1638_s25  ;;  %v1494_v24 = vpack.c.bf16 %v756_v17, %v754_v16  ;;  %v1500_v39 = vpack.c.bf16 %v759_v36, %v757_v35  ;;  %v748_v35 = vld [vmem:[%s2333_s3 + $0x1d8] sm:$0xff] }
  0x1f   : > { %1453 = vmatpush1.bf16.msra.mxu0 %v1452_v52 }
  0x20   : > { %1455 = vmatprep.subr.bf16.mxu0 %v1454_v53 }
  0x21   : > { %462 = vrot.lane.b32.xlu0 %v1727_v7, %s1640_s26  ;;  %464 = vrot.lane.b32.xlu1 %v1737_v9, %s1640_s26 }
  0x23   : > { %1457 = vmatpush1.bf16.msra.mxu0 %v1456_v58 }
  0x24   : > { %1459 = vmatprep.subr.bf16.mxu0 %v1458_v59 }
  0x25   : > { %460 = vrot.lane.b32.xlu0 %v1731_v8, %s1640_s26  ;;  %478 = vrot.lane.b32.xlu1 %v1727_v7, %s1641_s27 }
  0x27   : > { %1461 = vmatpush1.bf16.msra.mxu0 %v1460_v0 }
  0x28   : > { %1463 = vmatprep.subr.bf16.mxu0 %v1462_v1 }
  0x29   : > { %480 = vrot.lane.b32.xlu0 %v1737_v9, %s1641_s27  ;;  %476 = vrot.lane.b32.xlu1 %v1731_v8, %s1641_s27 }
  0x2b   : > { %1465 = vmatpush1.bf16.msra.mxu0 %v1464_v12 }
  0x2c   : > { %1467 = vmatprep.subr.bf16.mxu0 %v1466_v13 }
  0x2d   : > { %434 = vrot.lane.b32.xlu0 %v1767_v14, %s1637_s24  ;;  %450 = vrot.lane.b32.xlu1 %v1767_v14, %s1638_s25 }
  0x2f   : > { %1469 = vmatpush1.bf16.msra.mxu0 %v1468_v19 }
  0x30   : > { %1471 = vmatprep.subr.bf16.mxu0 %v1470_v20  ;;  %v755_v20 = vld [vmem:[%s2333_s3 + $0x210] sm:$0xff] }
  0x31   : > { %466 = vrot.lane.b32.xlu0 %v1767_v14, %s1640_s26  ;;  %482 = vrot.lane.b32.xlu1 %v1767_v14, %s1641_s27 }
  0x33   : > { %1473 = vmatpush1.bf16.msra.mxu0 %v1472_v25  ;;  %v760_v25 = vld [vmem:[%s2333_s3 + $0x238] sm:$0xff] }
  0x34   : > { %1475 = vmatprep.subr.bf16.mxu0 %v1474_v26 }
  0x35   : > { %515 = vperm.xlu0 %1612, %v512_v37   ;;  %v1480_v37 = vpack.c.bf16 %v739_v34, %v737_v33 }
  0x37   : > { %1477 = vmatpush1.bf16.msra.mxu0 %v1476_v31 }
  0x38   : > { %1479 = vmatprep.subr.bf16.mxu0 %v1478_v32 }
  0x3b   : > { %1481 = vmatpush1.bf16.msra.mxu0 %v1480_v37  ;;  %v762_v37 = vld [vmem:[%s2333_s3 + $0x248] sm:$0xff] }
  0x3c   : > { %1483 = vmatprep.subr.bf16.mxu0 %v1482_v38  ;;  %v764_v38 = vld [vmem:[%s2333_s3 + $0x258] sm:$0xff] }
  0x3d   : > { %v1502_v40 = vpack.c.bf16 %v764_v38, %v762_v37  ;;  %v797_v37 = vld [vmem:[%s2333_s3 + $0x360] sm:$0xff]  ;;  %v799_v38 = vld [vmem:[%s2333_s3 + $0x370] sm:$0xff] }
  0x3f   : > { %1485 = vmatpush1.bf16.msra.mxu0 %v1484_v41  ;;  %v761_v41 = vld [vmem:[%s2333_s3 + $0x240] sm:$0xff] }
  0x87   : > { %v431_v42 = vpop.permute.xlu0 %430  ;;  %v429_v43 = vpop.permute.xlu1 %428 }
  0x88   : > { %v437_v50 = vsel %vm436_vm0, %v429_v43, %v431_v42  ;;  %v766_v43 = vld [vmem:[%s2333_s3 + $0x268] sm:$0xff] }
  0x89   : > { %v493_v58 = vsel %vm492_vm3, %v1731_v8, %v437_v50  ;;  %v772_v50 = vld [vmem:[%s2333_s3 + $0x298] sm:$0xff] }
  0x8b   : > { %v433_v44 = vpop.permute.xlu0 %432  ;;  %v447_v45 = vpop.permute.xlu1 %446 }
  0x8c   : > { %v438_v51 = vsel %vm436_vm0, %v431_v42, %v433_v44  ;;  %v763_v42 = vld [vmem:[%s2333_s3 + $0x250] sm:$0xff] }
  0x8d   : > { %v494_v59 = vsel %vm492_vm3, %v1727_v7, %v438_v51 }
  0x8f   : > { %v449_v46 = vpop.permute.xlu0 %448  ;;  %v445_v47 = vpop.permute.xlu1 %444 }
  0x90   : > { %v454_v54 = vsel %vm452_vm1, %v447_v45, %v449_v46  ;;  %v453_v55 = vsel %vm452_vm1, %v445_v47, %v447_v45  ;;  %v1504_v45 = vpack.c.bf16 %v763_v42, %v761_v41  ;;  %v765_v47 = vld [vmem:[%s2333_s3 + $0x260] sm:$0xff]  ;;  %v747_v41 = vld [vmem:[%s2333_s3 + $0x1d0] sm:$0xff] }
  0x91   : > { %v499_v60 = vsel %vm497_vm4, %v494_v59, %v454_v54  ;;  %v498_v61 = vsel %vm497_vm4, %v493_v58, %v453_v55  ;;  %v771_v54 = vld [vmem:[%s2333_s3 + $0x290] sm:$0xff]  ;;  %v774_v55 = vld [vmem:[%s2333_s3 + $0x2a8] sm:$0xff]  ;;  %v773_v59 = vld [vmem:[%s2333_s3 + $0x2a0] sm:$0xff] }
  0x93   : > { %v463_v48 = vpop.permute.xlu0 %462  ;;  %v465_v49 = vpop.permute.xlu1 %464 }
  0x94   : > { %v470_v56 = vsel %vm468_vm2, %v463_v48, %v465_v49 }
  0x95   : > { %v504_v3 = vsel %vm502_vm6, %v499_v60, %v470_v56  ;;  %v776_v56 = vld [vmem:[%s2333_s3 + $0x2b8] sm:$0xff]  ;;  %v775_v60 = vld [vmem:[%s2333_s3 + $0x2b0] sm:$0xff] }
  0x96   : > { %v1514_v58 = vpack.c.bf16 %v776_v56, %v774_v55  ;;  %v806_v55 = vld [vmem:[%s2333_s3 + $0x3a8] sm:$0xff]  ;;  %v808_v56 = vld [vmem:[%s2333_s3 + $0x3b8] sm:$0xff] }
  0x97   : > { %v461_v52 = vpop.permute.xlu0 %460  ;;  %v479_v53 = vpop.permute.xlu1 %478 }
  0x98   : > { %v469_v57 = vsel %vm468_vm2, %v461_v52, %v463_v48  ;;  %v767_v48 = vld [vmem:[%s2333_s3 + $0x270] sm:$0xff] }
  0x99   : > { %v503_v5 = vsel %vm502_vm6, %v498_v61, %v469_v57  ;;  %v1508_v51 = vpack.c.bf16 %v767_v48, %v765_v47  ;;  %v778_v61 = vld [vmem:[%s2333_s3 + $0x2c8] sm:$0xff]  ;;  %v752_v47 = vld [vmem:[%s2333_s3 + $0x1f8] sm:$0xff]  ;;  %v801_v48 = vld [vmem:[%s2333_s3 + $0x380] sm:$0xff] }
  0x9b   : > { %v481_v62 = vpop.permute.xlu0 %480  ;;  %v477_v63 = vpop.permute.xlu1 %476 }
  0x9c   : > { %v486_v0 = vsel %vm484_vm5, %v479_v53, %v481_v62  ;;  %v485_v1 = vsel %vm484_vm5, %v477_v63, %v479_v53  ;;  %v769_v53 = vld [vmem:[%s2333_s3 + $0x280] sm:$0xff]  ;;  %v1516_v63 = vpack.c.bf16 %v775_v60, %v773_v59  ;;  %v807_v59 = vld [vmem:[%s2333_s3 + $0x3b0] sm:$0xff] }
  0x9d   : > { %v509_v8 = vsel %vm507_vm7, %v504_v3, %v486_v0  ;;  %v508_v7 = vsel %vm507_vm7, %v503_v5, %v485_v1  ;;  %v1512_v57 = vpack.c.bf16 %v771_v54, %v769_v53  ;;  %v777_v1 = vld [vmem:[%s2333_s3 + $0x2c0] sm:$0xff]  ;;  %v779_v3 = vld [vmem:[%s2333_s3 + $0x2d0] sm:$0xff]  ;;  %v782_v5 = vld [vmem:[%s2333_s3 + $0x2e8] sm:$0xff] }
  0x9e   : > { %1402 = vmatprep.subr.msk.mxu1 %vm522_vm8, %v509_v8  ;;  %v784_v8 = vld [vmem:[%s2333_s3 + $0x2f8] sm:$0xff]  ;;  %v751_v53 = vld [vmem:[%s2333_s3 + $0x1f0] sm:$0xff] }
  0x9f   : > { %v435_v11 = vpop.permute.xlu0 %434  ;;  %1403 = vmatpush1.msk.msra.mxu1 %vm522_vm8, %v508_v7  ;;  %v451_v12 = vpop.permute.xlu1 %450  ;;  %v1520_v7 = vpack.c.bf16 %v779_v3, %v777_v1  ;;  %v811_v1 = vld [vmem:[%s2333_s3 + $0x3d0] sm:$0xff] }
  0xa0   : > { %v439_v13 = vsel %vm436_vm0, %v433_v44, %v435_v11  ;;  %v496_v15 = vsel %vm492_vm3, %v1767_v14, %v435_v11  ;;  %1404 = vmatmul.mubr.msk.f32.vlgmr.msra.gmra.mrb[0].mxu1 %vm518_vm9, %v406_v6  ;;  %v455_v19 = vsel %vm452_vm1, %v449_v46, %v451_v12  ;;  %v753_v14 = vld [vmem:[%s2333_s3 + $0x200] sm:$0xff]  ;;  %v768_v44 = vld [vmem:[%s2333_s3 + $0x278] sm:$0xff] }
  0xa1   : > { %v495_v18 = vsel %vm492_vm3, %v1737_v9, %v439_v13  ;;  %670 = vmatprep.mubr.f32.mxu1 %v1639_v10  ;;  %v501_v21 = vsel %vm497_vm4, %v496_v15, %v451_v12  ;;  %v758_v9 = vld [vmem:[%s2333_s3 + $0x228] sm:$0xff]  ;;  %v1496_v32 = vpack.c.bf16 %v755_v20, %v753_v14  ;;  %v1506_v46 = vpack.c.bf16 %v768_v44, %v766_v43  ;;  %v781_v11 = vld [vmem:[%s2333_s3 + $0x2e0] sm:$0xff]  ;;  %v783_v12 = vld [vmem:[%s2333_s3 + $0x2f0] sm:$0xff] }
  0xa2   : > { %v500_v26 = vsel %vm497_vm4, %v495_v18, %v455_v19  ;;  %v1498_v34 = vpack.c.bf16 %v760_v25, %v758_v9  ;;  %v786_v13 = vld [vmem:[%s2333_s3 + $0x308] sm:$0xff]  ;;  %v788_v15 = vld [vmem:[%s2333_s3 + $0x318] sm:$0xff]  ;;  %v1524_v16 = vpack.c.bf16 %v783_v12, %v781_v11  ;;  %v785_v18 = vld [vmem:[%s2333_s3 + $0x300] sm:$0xff]  ;;  %vm1112_vm4 = vcmask 392192  }
  0xa3   : > { %v467_v22 = vpop.permute.xlu0 %466  ;;  %v483_v23 = vpop.permute.xlu1 %482  ;;  %v1526_v17 = vpack.c.bf16 %v788_v15, %v786_v13  ;;  %v787_v19 = vld [vmem:[%s2333_s3 + $0x310] sm:$0xff]  ;;  %v790_v14 = vld [vmem:[%s2333_s3 + $0x328] sm:$0xff]  ;;  %v792_v20 = vld [vmem:[%s2333_s3 + $0x338] sm:$0xff] }
  0xa4   : > { %v471_v27 = vsel %vm468_vm2, %v465_v49, %v467_v22  ;;  %v506_v28 = vsel %vm502_vm6, %v501_v21, %v467_v22  ;;  %v487_v29 = vsel %vm484_vm5, %v481_v62, %v483_v23  ;;  %v770_v49 = vld [vmem:[%s2333_s3 + $0x288] sm:$0xff]  ;;  %v780_v62 = vld [vmem:[%s2333_s3 + $0x2d8] sm:$0xff]  ;;  %v1528_v21 = vpack.c.bf16 %v787_v19, %v785_v18  ;;  %vm964_vm3 = vmor %vm963_vm15, %vm507_vm7 }
  0xa5   : > { %v505_v30 = vsel %vm502_vm6, %v500_v26, %v471_v27  ;;  %v511_v31 = vsel %vm507_vm7, %v506_v28, %v483_v23  ;;  %v1510_v52 = vpack.c.bf16 %v772_v50, %v770_v49  ;;  %v1518_v0 = vpack.c.bf16 %v780_v62, %v778_v61  ;;  %v789_v23 = vld [vmem:[%s2333_s3 + $0x320] sm:$0xff]  ;;  %v794_v9 = vld [vmem:[%s2333_s3 + $0x348] sm:$0xff]  ;;  %v796_v25 = vld [vmem:[%s2333_s3 + $0x358] sm:$0xff] }
  0xa6   : > { %v510_v33 = vsel %vm507_vm7, %v505_v30, %v487_v29  ;;  %1405 = vmatprep.subr.msk.mxu1 %vm522_vm8, %v511_v31  ;;  %v1530_v22 = vpack.c.bf16 %v792_v20, %v790_v14  ;;  %v1534_v27 = vpack.c.bf16 %v796_v25, %v794_v9  ;;  %v793_v28 = vld [vmem:[%s2333_s3 + $0x340] sm:$0xff]  ;;  %v795_v29 = vld [vmem:[%s2333_s3 + $0x350] sm:$0xff]  ;;  %v798_v30 = vld [vmem:[%s2333_s3 + $0x368] sm:$0xff]  ;;  %vm1186_vm6 = vcmask 523264  }
  0xa7   : > { %1406 = vmatpush1.msk.msra.mxu1 %vm522_vm8, %v510_v33  ;;  %v800_v31 = vld [vmem:[%s2333_s3 + $0x378] sm:$0xff]  ;;  %v802_v43 = vld [vmem:[%s2333_s3 + $0x388] sm:$0xff]  ;;  %v803_v49 = vld [vmem:[%s2333_s3 + $0x390] sm:$0xff]  ;;  %vm1280_vm8 = vcmask 516096  }
  0xa8   : > { %1407 = vmatmul.mubr.msk.f32.vlgmr.msra.gmra.mrb[2].mxu1 %vm518_vm9, %v406_v6  ;;  %1495 = vmatprep.subr.bf16.mxu1 %v1494_v24  ;;  %v1522_v6 = vpack.c.bf16 %v784_v8, %v782_v5  ;;  %v791_v24 = vld [vmem:[%s2333_s3 + $0x330] sm:$0xff]  ;;  %v1538_v33 = vpack.c.bf16 %v800_v31, %v798_v30  ;;  %v804_v44 = vld [vmem:[%s2333_s3 + $0x398] sm:$0xff]  ;;  %v810_v61 = vld [vmem:[%s2333_s3 + $0x3c8] sm:$0xff] }
  0xa9   : > { %1497 = vmatpush1.bf16.msra.mxu1 %v1496_v32  ;;  %v1532_v26 = vpack.c.bf16 %v791_v24, %v789_v23  ;;  %v1536_v32 = vpack.c.bf16 %v795_v29, %v793_v28  ;;  %v812_v62 = vld [vmem:[%s2333_s3 + $0x3d8] sm:$0xff] }
  0xaa   : > { %1499 = vmatprep.subr.bf16.mxu1 %v1498_v34  ;;  %v746_v34 = vld [vmem:[%s2333_s3 + $0x1c8] sm:$0xff] }
  0xab   : > { %v1486_v36 = vpack.c.bf16 %v748_v35, %v746_v34  ;;  %v1090_v34 = vld [vmem:[%s2336_s6] sm:$0xff]  ;;  %v1091_v35 = vld [vmem:[%s2336_s6 + $0x8] sm:$0xff] }
  0xad   : > { %1501 = vmatpush1.bf16.msra.mxu1 %v1500_v39  ;;  %v745_v39 = vld [vmem:[%s2333_s3 + $0x1c0] sm:$0xff]  ;;  %1487 = vmatprep.subr.bf16.mxu0 %v1486_v36  ;;  %v1643_v36 = vmov 0.0|0.0  }
  0xae   : > { %1503 = vmatprep.subr.bf16.mxu1 %v1502_v40  ;;  %v1540_v40 = vpack.c.bf16 %v799_v38, %v797_v37  ;;  %v1488_v42 = vpack.c.bf16 %v747_v41, %v745_v39  ;;  %v1559_v37 = vpack.c.bf16 %v1091_v35, %v1090_v34  ;;  %v1092_v38 = vld [vmem:[%s2336_s6 + $0x10] sm:$0xff]  ;;  %v1093_v39 = vld [vmem:[%s2336_s6 + $0x18] sm:$0xff]  ;;  %v1094_v41 = vld [vmem:[%s2336_s6 + $0x20] sm:$0xff] }
  0xb0   : > { %1489 = vmatpush1.bf16.msra.mxu0 %v1488_v42  ;;  %v1095_v42 = vld [vmem:[%s2336_s6 + $0x28] sm:$0xff] }
  0xb1   : > { %1505 = vmatpush1.bf16.msra.mxu1 %v1504_v45  ;;  %v750_v45 = vld [vmem:[%s2333_s3 + $0x1e8] sm:$0xff] }
  0xb2   : > { %1507 = vmatprep.subr.bf16.mxu1 %v1506_v46  ;;  %v1542_v46 = vpack.c.bf16 %v804_v44, %v802_v43  ;;  %v1490_v50 = vpack.c.bf16 %v752_v47, %v750_v45  ;;  %v999_v43 = vld [vmem:[%s2335_s5] sm:$0xff]  ;;  %v1565_v44 = vpack.c.bf16 %v1095_v42, %v1094_v41  ;;  %v1096_v45 = vld [vmem:[%s2336_s6 + $0x30] sm:$0xff] }
  0xb3   : > { %v1196_v41 = vld [vmem:[#allocation2] sm:$0x1] }
  0xb4   : > { %1491 = vmatprep.subr.bf16.mxu0 %v1490_v50  ;;  %v516_v5 = vpop.permute.xlu0 %515 }
  0xb5   : > { %1509 = vmatpush1.bf16.msra.mxu1 %v1508_v51  ;;  %v1544_v51 = vpack.c.bf16 %v803_v49, %v801_v48  ;;  %v1098_v48 = vld [vmem:[%s2336_s6 + $0x40] sm:$0xff]  ;;  %v1099_v49 = vld [vmem:[%s2336_s6 + $0x48] sm:$0xff] }
  0xb6   : > { %1511 = vmatprep.subr.bf16.mxu1 %v1510_v52  ;;  %v749_v52 = vld [vmem:[%s2333_s3 + $0x1e0] sm:$0xff]  ;;  %v1571_v50 = vpack.c.bf16 %v1099_v49, %v1098_v48 }
  0xb7   : > { %v1492_v54 = vpack.c.bf16 %v751_v53, %v749_v52  ;;  %v1101_v52 = vld [vmem:[%s2336_s6 + $0x58] sm:$0xff] }
  0xb9   : > { %1513 = vmatpush1.bf16.msra.mxu1 %v1512_v57  ;;  %1493 = vmatpush1.bf16.msra.mxu0 %v1492_v54  ;;  %v1546_v57 = vpack.c.bf16 %v808_v56, %v806_v55  ;;  %v1102_v54 = vld [vmem:[%s2336_s6 + $0x60] sm:$0xff]  ;;  %v1103_v55 = vld [vmem:[%s2336_s6 + $0x68] sm:$0xff] }
  0xba   : > { %1515 = vmatprep.subr.bf16.mxu1 %v1514_v58  ;;  %v805_v58 = vld [vmem:[%s2333_s3 + $0x3a0] sm:$0xff]  ;;  %1558 = vmatprep.subr.bf16.mxu0 %v1643_v36  ;;  %v1577_v56 = vpack.c.bf16 %v1103_v55, %v1102_v54 }
  0xbb   : > { %v1548_v60 = vpack.c.bf16 %v807_v59, %v805_v58  ;;  %v1105_v58 = vld [vmem:[%s2336_s6 + $0x78] sm:$0xff] }
  0xbd   : > { %1517 = vmatpush1.bf16.msra.mxu1 %v1516_v63  ;;  %v1550_v63 = vpack.c.bf16 %v812_v62, %v810_v61  ;;  %v1107_v61 = vld [vmem:[%s2336_s6 + $0x88] sm:$0xff] }
  0xbe   : > { %1519 = vmatprep.subr.bf16.mxu1 %v1518_v0  ;;  %v809_v0 = vld [vmem:[%s2333_s3 + $0x3c0] sm:$0xff] }
  0xbf   : > { %v1552_v3 = vpack.c.bf16 %v811_v1, %v809_v0 }
  0xc1   : > { %1521 = vmatpush1.bf16.msra.mxu1 %v1520_v7 }
  0xc2   : > { %1523 = vmatprep.subr.bf16.mxu1 %v1522_v6 }
  0xc5   : > { %1525 = vmatpush1.bf16.msra.mxu1 %v1524_v16 }
  0xc6   : > { %1527 = vmatprep.subr.bf16.mxu1 %v1526_v17 }
  0xc9   : > { %1529 = vmatpush1.bf16.msra.mxu1 %v1528_v21 }
  0xca   : > { %1531 = vmatprep.subr.bf16.mxu1 %v1530_v22 }
  0xcd   : > { %1533 = vmatpush1.bf16.msra.mxu1 %v1532_v26 }
  0xce   : > { %1535 = vmatprep.subr.bf16.mxu1 %v1534_v27 }
  0xd1   : > { %1537 = vmatpush1.bf16.msra.mxu1 %v1536_v32 }
  0xd2   : > { %1539 = vmatprep.subr.bf16.mxu1 %v1538_v33 }
  0xd5   : > { %1541 = vmatpush1.bf16.msra.mxu1 %v1540_v40  ;;  %v1562_v40 = vpack.c.bf16 %v1093_v39, %v1092_v38 }
  0xd6   : > { %1543 = vmatprep.subr.bf16.mxu1 %v1542_v46  ;;  %v1097_v46 = vld [vmem:[%s2336_s6 + $0x38] sm:$0xff] }
  0xd7   : > { %v1568_v47 = vpack.c.bf16 %v1097_v46, %v1096_v45 }
  0xd9   : > { %1545 = vmatpush1.bf16.msra.mxu1 %v1544_v51  ;;  %v1100_v51 = vld [vmem:[%s2336_s6 + $0x50] sm:$0xff] }
  0xda   : > { %1547 = vmatprep.subr.bf16.mxu1 %v1546_v57  ;;  %v1574_v53 = vpack.c.bf16 %v1101_v52, %v1100_v51  ;;  %v1104_v57 = vld [vmem:[%s2336_s6 + $0x70] sm:$0xff] }
  0xdb   : > { %v1580_v59 = vpack.c.bf16 %v1105_v58, %v1104_v57 }
  0xdd   : > { %1549 = vmatpush1.bf16.msra.mxu1 %v1548_v60  ;;  %v1106_v60 = vld [vmem:[%s2336_s6 + $0x80] sm:$0xff] }
  0xde   : > { %1551 = vmatprep.subr.bf16.mxu1 %v1550_v63  ;;  %v1583_v62 = vpack.c.bf16 %v1107_v61, %v1106_v60 }
  0xe1   : > { %1553 = vmatpush1.bf16.msra.mxu1 %v1552_v3 }
 0x173   : > { %v601_v8 = vpop.f32.mrb[0].mxu1 }
 0x174   : > { %v602_v7 = vadd.f32 %v601_v8, %v516_v5  ;;  %v603_v6 = vpop.f32.mrb[1].mxu1 }
 0x175   : > { %v604_v11 = vadd.f32 %v603_v6, %v516_v5 }
 0x176   : > { %vm677_vm10 = vcmp.ge.f32.partialorder %v602_v7, 0.0  ;;  %v681_v12 = vmul.f32 0.1, %v602_v7 }
 0x177   : > { %vm678_vm11 = vcmp.ge.f32.partialorder %v604_v11, 0.0  ;;  %v682_v13 = vmul.f32 0.1, %v604_v11 }
 0x178   : > { %v685_v15 = vsel %vm677_vm10, %v602_v7, %v681_v12 }
 0x179   : > { %v686_v16 = vsel %vm678_vm11, %v604_v11, %v682_v13 }
 0x17a   : > { %881 = vmatprep.mubr.f32.mxu0 %v686_v16 }
 0x17b   : > { %v672_v17 = vpop.f32.mrb[2].mxu1  ;;  %882 = vmatmul.mubr.f32.vlgmr.msra.gmra.mrb[0].mxu0 %v685_v15 }
 0x17c   : > { %v673_v18 = vadd.f32 %v672_v17, %v516_v5  ;;  %v674_v19 = vpop.f32.mrb[3].mxu1  ;;  %1560 = vmatpush1.bf16.msra.mxu0 %v1559_v37 }
 0x17d   : > { %v675_v14 = vadd.f32 %v674_v19, %v516_v5  ;;  %1561 = vmatprep.subr.bf16.mxu0 %v1643_v36 }
 0x17e   : > { %v683_v20 = vmul.f32 0.1, %v673_v18  ;;  %vm679_vm12 = vcmp.ge.f32.partialorder %v673_v18, 0.0 }
 0x17f   : > { %vm680_vm13 = vcmp.ge.f32.partialorder %v675_v14, 0.0  ;;  %v684_v21 = vmul.f32 0.1, %v675_v14 }
 0x180   : > { %v687_v23 = vsel %vm679_vm12, %v673_v18, %v683_v20  ;;  %1563 = vmatpush1.bf16.msra.mxu0 %v1562_v40 }
 0x181   : > { %v688_v22 = vsel %vm680_vm13, %v675_v14, %v684_v21  ;;  %1564 = vmatprep.subr.bf16.mxu0 %v1643_v36 }
 0x182   : > { %1408 = vmatprep.mubr.msk.f32.mxu1 %vm813_vm14, %v688_v22 }
 0x183   : > { %953 = vmatmul.mubr.f32.vlgmr.msra.gmra.mrb[4].mxu1 %v687_v23  ;;  %v966_v23 = vld [vmem:[%s2334_s4] sm:$0xff] }
 0x184   : > { %1077 = vmatprep.mubr.f32.mxu1 %v1639_v10  ;;  %1566 = vmatpush1.bf16.msra.mxu0 %v1565_v44  ;;  %v1188_v44 = vld [vmem:[%s2337_s7] sm:$0x1] }
 0x185   : > { %1567 = vmatprep.subr.bf16.mxu0 %v1643_v36 }
 0x188   : > { %1569 = vmatpush1.bf16.msra.mxu0 %v1568_v47 }
 0x189   : > { %1570 = vmatprep.subr.bf16.mxu0 %v1643_v36 }
 0x18c   : > { %1572 = vmatpush1.bf16.msra.mxu0 %v1571_v50 }
 0x18d   : > { %1573 = vmatprep.subr.bf16.mxu0 %v1643_v36 }
 0x190   : > { %1575 = vmatpush1.bf16.msra.mxu0 %v1574_v53 }
 0x191   : > { %1576 = vmatprep.subr.bf16.mxu0 %v1643_v36 }
 0x194   : > { %1578 = vmatpush1.bf16.msra.mxu0 %v1577_v56 }
 0x195   : > { %1579 = vmatprep.subr.bf16.mxu0 %v1643_v36 }
 0x198   : > { %1581 = vmatpush1.bf16.msra.mxu0 %v1580_v59 }
 0x199   : > { %1582 = vmatprep.subr.bf16.mxu0 %v1643_v36 }
 0x19c   : > { %1584 = vmatpush1.bf16.msra.mxu0 %v1583_v62 }
 0x19d   : > { %1585 = vmatprep.subr.bf16.mxu0 %v1643_v36 }
 0x24e   : > { %v883_v24 = vpop.f32.mrb[0].mxu0 }
 0x24f   : > { %v885_v9 = vpop.f32.mrb[1].mxu0 }
 0x256   : > { %v954_v25 = vpop.f32.mrb[4].mxu1 }
 0x257   : > { %v2190_v26 = vadd.f32 %v954_v25, %v883_v24  ;;  %v956_v27 = vpop.f32.mrb[5].mxu1  ;;  %v1109_v25 = vld [vmem:[%s2336_s6 + $0x98] sm:$0xff] }
 0x258   : > { %v2192_v28 = vadd.f32 %v956_v27, %v885_v9  ;;  %v1108_v9 = vld [vmem:[%s2336_s6 + $0x90] sm:$0xff]  ;;  %v1110_v27 = vld [vmem:[%s2336_s6 + $0xa0] sm:$0xff] }
 0x259   : > { %v967_v29 = vrot.slane %v2190_v26, 4 }
 0x25a   : > { %v961_v30 = vcombine.low %v2190_v26, %v2192_v28  ;;  %v968_v31 = vrot.slane %v2192_v28, 4  ;;  %v1618_v33 = vpack.i.bf16 %v2192_v28, %v2190_v26 }
 0x25c   : > { %v1623_v32 = vpack.i.bf16 %v968_v31, %v967_v29  ;;  %965 = vst.msk [vmem:[%s397_s12] sm:$0xff] %vm964_vm3, %v961_v30 }
 0x25e   : > { %1624 = vrot.lane.b32.xlu0 %v1623_v32, %s1640_s26  ;;  %1614 = vrot.lane.b32.xlu1 %v1623_v32, %s1637_s24 }
 0x262   : > { %992 = vrot.lane.b32.xlu0 %v2192_v28, %s1641_s27  ;;  %1619 = vrot.lane.b32.xlu1 %v1618_v33, %s1638_s25 }
 0x266   : > { %990 = vrot.lane.b32.xlu1 %v2190_v26, %s1641_s27 }
 0x26a   : > { %1002 = vperm.xlu1 %1628, %v999_v43  }
 0x2d0   : > { %v1625_v63 = vpop.permute.xlu0 %1624  ;;  %v1615_v0 = vpop.permute.xlu1 %1614 }
 0x2d1   : > { %v1617_v1 = vunpack.i.h.bf16 %v1615_v0  ;;  %v1616_v3 = vunpack.i.l.bf16 %v1615_v0  ;;  %v1627_v5 = vunpack.i.h.bf16 %v1625_v63  ;;  %v1626_v8 = vunpack.i.l.bf16 %v1625_v63 }
 0x2d3   : > { %v973_v6 = vsel %vm436_vm0, %v1616_v3, %v1617_v1  ;;  %v987_v13 = vsel %vm468_vm2, %v1626_v8, %v1627_v5  ;;  %v996_v16 = vsel %vm507_vm7, %v2192_v28, %v1617_v1  ;;  %vm1005_vm0 = vcmask 162816   ;;  %v1111_v28 = vld [vmem:[%s2336_s6 + $0xa8] sm:$0xff] }
 0x2d4   : > { %v1620_v7 = vpop.permute.xlu1 %1619  ;;  %v995_v19 = vsel %vm507_vm7, %v2190_v26, %v973_v6  ;;  %v993_v21 = vpop.permute.xlu0 %992  ;;  %v1586_v26 = vpack.c.bf16 %v1109_v25, %v1108_v9  ;;  %v1589_v29 = vpack.c.bf16 %v1111_v28, %v1110_v27 }
 0x2d5   : > { %v1622_v11 = vunpack.i.h.bf16 %v1620_v7  ;;  %v1621_v12 = vunpack.i.l.bf16 %v1620_v7 }
 0x2d6   : > { %1587 = vmatpush1.bf16.msra.mxu0 %v1586_v26 }
 0x2d7   : > { %v980_v15 = vsel %vm452_vm1, %v1621_v12, %v1622_v11  ;;  %v998_v17 = vsel %vm507_vm7, %v1622_v11, %v1627_v5  ;;  %1588 = vmatprep.subr.bf16.mxu0 %v1643_v36 }
 0x2d8   : > { %v1554_v18 = vpack.c.bf16 %v998_v17, %v996_v16  ;;  %v997_v14 = vsel %vm507_vm7, %v980_v15, %v987_v13  ;;  %v991_v22 = vpop.permute.xlu1 %990 }
 0x2d9   : > { %v1556_v20 = vpack.c.bf16 %v997_v14, %v995_v19  ;;  %v994_v24 = vsel %vm484_vm5, %v991_v22, %v993_v21  ;;  %vm1644_vm5 = vmmov 0  }
 0x2da   : > { %1555 = vmatprep.subr.bf16.mxu1 %v1554_v18  ;;  %1590 = vmatpush1.bf16.msra.mxu0 %v1589_v29 }
 0x2db   : > { %1557 = vmatpush1.bf16.msra.mxu1 %v1556_v20 }
 0x2dc   : > { %1409 = vmatprep.subr.msk.mxu1 %vm507_vm7, %v993_v21 }
 0x2df   : > { %1410 = vmatpush1.msk.msra.mxu1 %vm507_vm7, %v994_v24  ;;  %vm1206_vm7 = vcmask 195584  }
 0x2e0   : > { %1411 = vmatmul.mubr.msk.f32.vlgmr.msra.gmra.mrb[6].mxu1 %vm1005_vm0, %v966_v23  ;;  %1591 = vmatprep.subr.bf16.mxu1 %v1643_v36 }
 0x2e1   : > { %1427 = vmatprep.mubr.msk.f32.mxu1 %vm1644_vm5, %v1639_v10 }
 0x2e9   : > { %v1003_v30 = vpop.permute.xlu1 %1002 }
 0x3b3   : > { %v1079_v31 = vpop.f32.mrb[6].mxu1 }
 0x3b4   : > { %v1080_v32 = vadd.f32 %v1079_v31, %v1003_v30  ;;  %v1081_v33 = vpop.f32.mrb[7].mxu1 }
 0x3b5   : > { %v1082_v34 = vadd.f32 %v1081_v33, %v1003_v30 }
 0x3b6   : > { %v1086_v35 = vmul.f32 0.1, %v1080_v32  ;;  %vm1084_vm1 = vcmp.ge.f32.partialorder %v1080_v32, 0.0 }
 0x3b7   : > { %vm1085_vm2 = vcmp.ge.f32.partialorder %v1082_v34, 0.0  ;;  %v1087_v36 = vmul.f32 0.1, %v1082_v34 }
 0x3b8   : > { %v1088_v38 = vsel %vm1084_vm1, %v1080_v32, %v1086_v35 }
 0x3b9   : > { %v1089_v37 = vsel %vm1085_vm2, %v1082_v34, %v1087_v36 }
 0x3ba   : > { %1412 = vmatprep.mubr.msk.f32.mxu0 %vm1112_vm4, %v1089_v37 }
 0x3bb   : > { %1181 = vmatmul.mubr.f32.vlgmr.msra.gmra.mrb[2].mxu0 %v1088_v38 }
 0x48e   : > { %v1182_v39 = vpop.f32.mrb[2].mxu0 }
 0x48f   : > { %1187 = vst.msk [vmem:[%s401_s18] sm:$0xff] %vm1186_vm6, %v1182_v39  ;;  %1193 = vrot.lane.b32.xlu1 %v1182_v39, %s1638_s25  ;;  %1190 = vrot.lane.b32.xlu0 %v1182_v39, %s1637_s24  ;;  %v1184_v40 = vpop.f32.mrb[3].mxu0 }
 0x493   : > { %1199 = vperm.xlu0 %1612, %v1196_v41  }
 0x501   : > { %v1191_v42 = vpop.permute.xlu0 %1190  ;;  %v1194_v45 = vpop.permute.xlu1 %1193 }
 0x502   : > { %v1592_v43 = vpack.c.bf16 %v1191_v42, %v1182_v39 }
 0x504   : > { %1593 = vmatpush3.bf16.msra.mxu1 %v1592_v43 }
 0x505   : > { %1425 = vmatprep.subr.mxu1 %v1639_v10 }
 0x508   : > { %1426 = vmatpush3.msra.mxu1 %v1194_v45 }
 0x509   : > { %1428 = vmatmul.mubr.msk.f32.vlgmr.msra.gmra.mrb[8].mxu1 %vm1206_vm7, %v1188_v44 }
 0x512   : > { %v1200_v46 = vpop.permute.xlu0 %1199 }
 0x513   : > { %v1205_v47 = vrot.slane %v1200_v46, %v410_v4 }
 0x5dc   : > { %v1276_v48 = vpop.f32.mrb[8].mxu1 }
 0x5dd   : > { %v1277_v49 = vadd.f32 %v1276_v48, %v1205_v47  ;;  %v1429_v10 = vpop.f32.mrb[9].mxu1 }
 0x5df   : > { %1281 = vst.msk [vmem:[%s404_s28] sm:$0x1] %vm1280_vm8, %v1277_v49 }
 0x5e0 PF: > { %s24_s19 = sadd.s32 1, %s1635_s19  }
 0x5e1   : > { %p21_p4 = scmp.ge.s32.totalorder %s24_s19, 4  }
 0x5e3   :  { %23 = sbr.rel (!%p21_p4) target bundleno = 3 (0x3), region = 110 }

// kernel: multiple_discriminator_forward.7
= control target key start
LH: loop header
LB: loop body
LE: loop exit
PB: predicated region body
PF: predicated region fallthrough
CT: control target
= control target key end

     0   :  { %s1732_s19 = smov 0   ;;  %s2373_s0 = inlined_call_operand.vmem [shape: f32[2,1,516], index: 0, kind: input, shape index: {}]   ;;  %s2374_s1 = inlined_call_operand.vmem [shape: f32[4,5], index: 1, kind: input, shape index: {}]   ;;  %s2375_s2 = inlined_call_operand.vmem [shape: f32[4,1], index: 2, kind: input, shape index: {}]   ;;  %s2376_s3 = inlined_call_operand.vmem [shape: f32[504,198], index: 3, kind: input, shape index: {}]   ;;  %s2377_s4 = inlined_call_operand.vmem [shape: f32[8,20], index: 4, kind: input, shape index: {}]   ;;  %s2378_s5 = inlined_call_operand.vmem [shape: f32[8,1], index: 5, kind: input, shape index: {}]   ;;  %s2379_s6 = inlined_call_operand.vmem [shape: f32[186,72], index: 6, kind: input, shape index: {}]   ;;  %s2380_s7 = inlined_call_operand.vmem [shape: f32[1,24], index: 7, kind: input, shape index: {}]   ;;  %s2381_s8 = inlined_call_operand.<no memory space> [shape: f32[1,1], index: 8, kind: input, shape index: {}]   ;;  %s2382_s9 = inlined_call_operand.vmem [shape: f32[2,4,186], index: 9, kind: output, shape index: {0}]   ;;  %s2383_s10 = inlined_call_operand.vmem [shape: f32[2,8,66], index: 10, kind: output, shape index: {1}]   ;;  %s2384_s11 = inlined_call_operand.vmem [shape: f32[2,1,66], index: 11, kind: output, shape index: {2}]  }
   0x1   :  { %v17_v0 = vstv %s2381_s8 }
   0x2   :  { %18 = vst [vmem:[#allocation2] sm:$0x1] %v17_v0 }
   0x3 LB: > { %s1410_s20 = sadd.s32 4294967295, %s1658_s19   ;;  %p1414_p0 = scmp.ge.s32.totalorder %s1658_s19, 1  ;;  %s1658_s19 = sphi %s1732_s19, %s24_s19  }
   0x4   : > { %p343_p1 = scmp.lt.s32.totalorder %s1658_s19, 3 }
   0x6   : > { %p344_p2 = pnand %p1414_p0, %p343_p1 }
   0x7   : > { %p389_p3 = scmp.lt.s32.totalorder (!%p344_p2), %s1410_s20, 1  ;;  %v408_v1 = vlaneseq (!%p344_p2)  ;;  %s1660_s24 = smov (!%p344_p2), 125   ;;  %v1663_v10 = vmov (!%p344_p2), 0.0   ;;  %v700_v14 = vld [vmem:[%s2376_s3 + $0x8] sm:$0xff] (!%p344_p2)  ;;  %v702_v15 = vld [vmem:[%s2376_s3 + $0x18] sm:$0xff] (!%p344_p2)  ;;  %v699_v18 = vld [vmem:[%s2376_s3] sm:$0xff] (!%p344_p2) }
   0x8   : > { %347 = sbr.rel (%p344_p2) target bundleno = 1509 (0x5e5), region = 56  ;;  %s1661_s25 = smov (!%p344_p2), 122   ;;  %609 = vmatprep.mubr.f32.mxu1 (!%p344_p2), %v1663_v10  ;;  %v1447_v17 = vpack.c.bf16 (!%p344_p2), %v702_v15, %v700_v14  ;;  %v701_v19 = vld [vmem:[%s2376_s3 + $0x10] sm:$0xff] (!%p344_p2)  ;;  %v1665_v20 = vmov (!%p344_p2), 0   ;;  %v704_v22 = vld [vmem:[%s2376_s3 + $0x28] sm:$0xff] (!%p344_p2)  ;;  %v706_v23 = vld [vmem:[%s2376_s3 + $0x38] sm:$0xff] (!%p344_p2) }
   0x9   : > { %v1742_v2 = vshrl.u32 (!%p344_p2), %v408_v1, 7  ;;  %s1662_s26 = smov (!%p344_p2), 119   ;;  %s1664_s27 = smov (!%p344_p2), 116   ;;  %1635 = vset.pattern.permute.xlu0 (!%p344_p2), %v1665_v20  ;;  %v1449_v21 = vpack.c.bf16 (!%p344_p2), %v701_v19, %v699_v18  ;;  %v703_v24 = vld [vmem:[%s2376_s3 + $0x20] sm:$0xff] (!%p344_p2)  ;;  %1651 = vset.pattern.permute.xlu1 (!%p344_p2), %v1665_v20  ;;  %v1451_v25 = vpack.c.bf16 (!%p344_p2), %v706_v23, %v704_v22  ;;  %v705_v26 = vld [vmem:[%s2376_s3 + $0x30] sm:$0xff] (!%p344_p2)  ;;  %v708_v27 = vld [vmem:[%s2376_s3 + $0x48] sm:$0xff] (!%p344_p2) }
   0xa   : > { %1448 = vmatprep.subr.bf16.mxu0 (!%p344_p2), %v1447_v17  ;;  %v710_v28 = vld [vmem:[%s2376_s3 + $0x58] sm:$0xff] (!%p344_p2)  ;;  %v1453_v29 = vpack.c.bf16 (!%p344_p2), %v705_v26, %v703_v24  ;;  %v707_v30 = vld [vmem:[%s2376_s3 + $0x40] sm:$0xff] (!%p344_p2)  ;;  %v709_v31 = vld [vmem:[%s2376_s3 + $0x50] sm:$0xff] (!%p344_p2)  ;;  %vm436_vm0 = vcmask (!%p344_p2), 1022976   ;;  %vm452_vm1 = vcmask (!%p344_p2), 998400   ;;  %vm474_vm2 = vcmask (!%p344_p2), 973824  }
   0xb   : > { %v414_v3 = vsub.s32 (!%p344_p2), 1, %v1742_v2  ;;  %v410_v4 = vsub.s32 (!%p344_p2), 0, %v1742_v2  ;;  %v418_v5 = vsub.s32 (!%p344_p2), 2, %v1742_v2  ;;  %v422_v11 = vsub.s32 (!%p344_p2), 3, %v1742_v2  ;;  %1450 = vmatpush1.bf16.msra.mxu0 (!%p344_p2), %v1449_v21  ;;  %v712_v33 = vld [vmem:[%s2376_s3 + $0x68] sm:$0xff] (!%p344_p2)  ;;  %v714_v34 = vld [vmem:[%s2376_s3 + $0x78] sm:$0xff] (!%p344_p2) }
   0xc   : > { %v462_v13 = vsub.s32 (!%p344_p2), 4, %v1742_v2  ;;  %1452 = vmatprep.subr.bf16.mxu0 (!%p344_p2), %v1451_v25  ;;  %v1455_v32 = vpack.c.bf16 (!%p344_p2), %v710_v28, %v708_v27  ;;  %v1457_v35 = vpack.c.bf16 (!%p344_p2), %v709_v31, %v707_v30  ;;  %v1459_v36 = vpack.c.bf16 (!%p344_p2), %v714_v34, %v712_v33  ;;  %v711_v37 = vld [vmem:[%s2376_s3 + $0x60] sm:$0xff] (!%p344_p2)  ;;  %v713_v38 = vld [vmem:[%s2376_s3 + $0x70] sm:$0xff] (!%p344_p2)  ;;  %v716_v40 = vld [vmem:[%s2376_s3 + $0x88] sm:$0xff] (!%p344_p2) }
   0xd   : > { %v522_v39 = vld [vmem:[%s2375_s2] sm:$0xf] (!%p344_p2)  ;;  %v718_v41 = vld [vmem:[%s2376_s3 + $0x98] sm:$0xff] (!%p344_p2)  ;;  %v1461_v42 = vpack.c.bf16 (!%p344_p2), %v713_v38, %v711_v37  ;;  %v717_v45 = vld [vmem:[%s2376_s3 + $0x90] sm:$0xff] (!%p344_p2)  ;;  %vm502_vm3 = vcmask (!%p344_p2), 1040384   ;;  %vm507_vm4 = vcmask (!%p344_p2), 1041408  }
   0xe   : > { %v1463_v43 = vpack.c.bf16 (!%p344_p2), %v718_v41, %v716_v40  ;;  %v715_v44 = vld [vmem:[%s2376_s3 + $0x80] sm:$0xff] (!%p344_p2)  ;;  %v720_v46 = vld [vmem:[%s2376_s3 + $0xa8] sm:$0xff] (!%p344_p2)  ;;  %v722_v47 = vld [vmem:[%s2376_s3 + $0xb8] sm:$0xff] (!%p344_p2)  ;;  %vm493_vm5 = vcmask (!%p344_p2), 949248   ;;  %vm512_vm6 = vcmask (!%p344_p2), 1042432   ;;  %vm517_vm7 = vcmask (!%p344_p2), 1043456  }
   0xf   : > { %s2386_s20 = smov (!%p389_p3, %s1410_s20), 1  ;;  %1454 = vmatpush1.bf16.msra.mxu0 %v1453_v29  ;;  %v1465_v48 = vpack.c.bf16 %v717_v45, %v715_v44  ;;  %v1467_v49 = vpack.c.bf16 %v722_v47, %v720_v46  ;;  %v719_v50 = vld [vmem:[%s2376_s3 + $0xa0] sm:$0xff]  ;;  %v721_v51 = vld [vmem:[%s2376_s3 + $0xb0] sm:$0xff]  ;;  %v724_v52 = vld [vmem:[%s2376_s3 + $0xc8] sm:$0xff]  ;;  %vm532_vm8 = vcmask 1044480   ;;  %vm528_vm9 = vcmask 39936  }
  0x10   : > { %s1617_s8 = smul.u32 5, %s2386_s20  ;;  %1456 = vmatprep.subr.bf16.mxu0 %v1455_v32  ;;  %v726_v53 = vld [vmem:[%s2376_s3 + $0xd8] sm:$0xff]  ;;  %v1469_v54 = vpack.c.bf16 %v721_v51, %v719_v50  ;;  %v723_v56 = vld [vmem:[%s2376_s3 + $0xc0] sm:$0xff]  ;;  %v725_v57 = vld [vmem:[%s2376_s3 + $0xd0] sm:$0xff]  ;;  %vm825_vm14 = vcmask 982016   ;;  %s1433_s13 = sshll.u32 %s2386_s20, 3 }
  0x11   : > { %v1471_v55 = vpack.c.bf16 %v726_v53, %v724_v52  ;;  %v728_v58 = vld [vmem:[%s2376_s3 + $0xe8] sm:$0xff]  ;;  %v730_v59 = vld [vmem:[%s2376_s3 + $0xf8] sm:$0xff]  ;;  %v1473_v60 = vpack.c.bf16 %v725_v57, %v723_v56  ;;  %v727_v62 = vld [vmem:[%s2376_s3 + $0xe0] sm:$0xff]  ;;  %vm975_vm15 = vcmask 474116   ;;  %s397_s16 = scalar_lea.vmem %s2382_s9, %s1433_s13  ;;  %s401_s30 = scalar_lea.vmem %s2383_s10, %s1433_s13 }
  0x12   : > { %s392_s23 = scalar_lea.vmem %s2373_s0, %s1617_s8  ;;  %v1475_v61 = vpack.c.bf16 %v730_v59, %v728_v58  ;;  %v729_v63 = vld [vmem:[%s2376_s3 + $0xf0] sm:$0xff]  ;;  %v732_v0 = vld [vmem:[%s2376_s3 + $0x108] sm:$0xff]  ;;  %v734_v1 = vld [vmem:[%s2376_s3 + $0x118] sm:$0xff]  ;;  %s404_s13 = scalar_lea.vmem %s2384_s11, %s2386_s20 }
  0x13   : > { %v405_v6 = vld [vmem:[%s392_s23] sm:$0x1f]  ;;  %1458 = vmatpush1.bf16.msra.mxu0 %v1457_v35  ;;  %v738_v14 = vld [vmem:[%s2376_s3 + $0x138] sm:$0xff]  ;;  %v737_v18 = vld [vmem:[%s2376_s3 + $0x130] sm:$0xff] }
  0x14   : > { %v1751_v7 = vrot.slane %v405_v6, %v414_v3  ;;  %v1755_v8 = vrot.slane %v405_v6, %v410_v4  ;;  %v1761_v9 = vrot.slane %v405_v6, %v418_v5  ;;  %v1785_v12 = vrot.slane %v405_v6, %v422_v11  ;;  %1460 = vmatprep.subr.bf16.mxu0 %v1459_v36  ;;  %v733_v11 = vld [vmem:[%s2376_s3 + $0x110] sm:$0xff]  ;;  %v735_v17 = vld [vmem:[%s2376_s3 + $0x120] sm:$0xff]  ;;  %v740_v19 = vld [vmem:[%s2376_s3 + $0x148] sm:$0xff] }
  0x15   : > { %v463_v16 = vrot.slane %v405_v6, %v462_v13  ;;  %v1477_v3 = vpack.c.bf16 %v729_v63, %v727_v62  ;;  %v1479_v5 = vpack.c.bf16 %v734_v1, %v732_v0  ;;  %v731_v6 = vld [vmem:[%s2376_s3 + $0x100] sm:$0xff]  ;;  %v736_v13 = vld [vmem:[%s2376_s3 + $0x128] sm:$0xff]  ;;  %v742_v20 = vld [vmem:[%s2376_s3 + $0x158] sm:$0xff]  ;;  %v1485_v21 = vpack.c.bf16 %v737_v18, %v735_v17 }
  0x16   : > { %430 = vrot.lane.b32.xlu0 %v1751_v7, %s1660_s24  ;;  %428 = vrot.lane.b32.xlu1 %v1755_v8, %s1660_s24  ;;  %v1481_v15 = vpack.c.bf16 %v733_v11, %v731_v6  ;;  %v1487_v22 = vpack.c.bf16 %v742_v20, %v740_v19  ;;  %v739_v23 = vld [vmem:[%s2376_s3 + $0x140] sm:$0xff]  ;;  %v741_v24 = vld [vmem:[%s2376_s3 + $0x150] sm:$0xff] }
  0x17   : > { %1462 = vmatpush1.bf16.msra.mxu0 %v1461_v42  ;;  %v744_v25 = vld [vmem:[%s2376_s3 + $0x168] sm:$0xff]  ;;  %v746_v26 = vld [vmem:[%s2376_s3 + $0x178] sm:$0xff]  ;;  %v1489_v27 = vpack.c.bf16 %v741_v24, %v739_v23  ;;  %v743_v29 = vld [vmem:[%s2376_s3 + $0x160] sm:$0xff] }
  0x18   : > { %1464 = vmatprep.subr.bf16.mxu0 %v1463_v43  ;;  %v1491_v28 = vpack.c.bf16 %v746_v26, %v744_v25  ;;  %v745_v30 = vld [vmem:[%s2376_s3 + $0x170] sm:$0xff]  ;;  %v748_v31 = vld [vmem:[%s2376_s3 + $0x188] sm:$0xff]  ;;  %v750_v32 = vld [vmem:[%s2376_s3 + $0x198] sm:$0xff] }
  0x19   : > { %v1493_v33 = vpack.c.bf16 %v745_v30, %v743_v29  ;;  %v1495_v34 = vpack.c.bf16 %v750_v32, %v748_v31  ;;  %v747_v35 = vld [vmem:[%s2376_s3 + $0x180] sm:$0xff]  ;;  %v749_v36 = vld [vmem:[%s2376_s3 + $0x190] sm:$0xff]  ;;  %v752_v37 = vld [vmem:[%s2376_s3 + $0x1a8] sm:$0xff] }
  0x1a   : > { %432 = vrot.lane.b32.xlu0 %v1761_v9, %s1660_s24  ;;  %446 = vrot.lane.b32.xlu1 %v1751_v7, %s1661_s25  ;;  %v754_v38 = vld [vmem:[%s2376_s3 + $0x1b8] sm:$0xff]  ;;  %v751_v41 = vld [vmem:[%s2376_s3 + $0x1a0] sm:$0xff] }
  0x1b   : > { %1466 = vmatpush1.bf16.msra.mxu0 %v1465_v48  ;;  %v1499_v40 = vpack.c.bf16 %v754_v38, %v752_v37  ;;  %v753_v42 = vld [vmem:[%s2376_s3 + $0x1b0] sm:$0xff]  ;;  %v766_v23 = vld [vmem:[%s2376_s3 + $0x218] sm:$0xff]  ;;  %v768_v31 = vld [vmem:[%s2376_s3 + $0x228] sm:$0xff] }
  0x1c   : > { %1468 = vmatprep.subr.bf16.mxu0 %v1467_v49  ;;  %v1501_v43 = vpack.c.bf16 %v753_v42, %v751_v41  ;;  %v770_v32 = vld [vmem:[%s2376_s3 + $0x238] sm:$0xff]  ;;  %v767_v41 = vld [vmem:[%s2376_s3 + $0x220] sm:$0xff]  ;;  %v769_v42 = vld [vmem:[%s2376_s3 + $0x230] sm:$0xff] }
  0x1e   : > { %448 = vrot.lane.b32.xlu0 %v1761_v9, %s1661_s25  ;;  %444 = vrot.lane.b32.xlu1 %v1755_v8, %s1661_s25 }
  0x1f   : > { %1470 = vmatpush1.bf16.msra.mxu0 %v1469_v54 }
  0x20   : > { %1472 = vmatprep.subr.bf16.mxu0 %v1471_v55 }
  0x22   : > { %466 = vrot.lane.b32.xlu0 %v1751_v7, %s1662_s26  ;;  %468 = vrot.lane.b32.xlu1 %v1761_v9, %s1662_s26 }
  0x23   : > { %1474 = vmatpush1.bf16.msra.mxu0 %v1473_v60 }
  0x24   : > { %1476 = vmatprep.subr.bf16.mxu0 %v1475_v61 }
  0x26   : > { %464 = vrot.lane.b32.xlu0 %v1755_v8, %s1662_s26  ;;  %485 = vrot.lane.b32.xlu1 %v1751_v7, %s1664_s27 }
  0x27   : > { %1478 = vmatpush1.bf16.msra.mxu0 %v1477_v3 }
  0x28   : > { %1480 = vmatprep.subr.bf16.mxu0 %v1479_v5 }
  0x2a   : > { %487 = vrot.lane.b32.xlu0 %v1761_v9, %s1664_s27  ;;  %483 = vrot.lane.b32.xlu1 %v1755_v8, %s1664_s27 }
  0x2b   : > { %1482 = vmatpush1.bf16.msra.mxu0 %v1481_v15 }
  0x2e   : > { %434 = vrot.lane.b32.xlu0 %v1785_v12, %s1660_s24  ;;  %450 = vrot.lane.b32.xlu1 %v1785_v12, %s1661_s25 }
  0x32   : > { %470 = vrot.lane.b32.xlu0 %v1785_v12, %s1662_s26  ;;  %472 = vrot.lane.b32.xlu1 %v463_v16, %s1662_s26 }
  0x36   : > { %489 = vrot.lane.b32.xlu0 %v1785_v12, %s1664_s27  ;;  %491 = vrot.lane.b32.xlu1 %v463_v16, %s1664_s27  ;;  %v1483_v16 = vpack.c.bf16 %v738_v14, %v736_v13  ;;  %v406_v13 = vld [vmem:[%s2374_s1] sm:$0xf] }
  0x38   : > { %1484 = vmatprep.subr.bf16.mxu0 %v1483_v16 }
  0x39   : > { %1486 = vmatpush1.bf16.msra.mxu0 %v1485_v21 }
  0x3a   : > { %525 = vperm.xlu0 %1635, %v522_v39   ;;  %1488 = vmatprep.subr.bf16.mxu0 %v1487_v22  ;;  %v1497_v39 = vpack.c.bf16 %v749_v36, %v747_v35  ;;  %v764_v22 = vld [vmem:[%s2376_s3 + $0x208] sm:$0xff] }
  0x3b   : > { %v1511_v30 = vpack.c.bf16 %v766_v23, %v764_v22 }
  0x3d   : > { %1490 = vmatpush1.bf16.msra.mxu0 %v1489_v27 }
  0x3e   : > { %1492 = vmatprep.subr.bf16.mxu0 %v1491_v28 }
  0x41   : > { %1494 = vmatpush1.bf16.msra.mxu0 %v1493_v33 }
  0x42   : > { %1496 = vmatprep.subr.bf16.mxu0 %v1495_v34 }
  0x45   : > { %1498 = vmatpush1.bf16.msra.mxu0 %v1497_v39 }
  0x46   : > { %1500 = vmatprep.subr.bf16.mxu0 %v1499_v40  ;;  %v1515_v40 = vpack.c.bf16 %v770_v32, %v768_v31  ;;  %v806_v31 = vld [vmem:[%s2376_s3 + $0x358] sm:$0xff] }
  0x49   : > { %1502 = vmatpush1.bf16.msra.mxu0 %v1501_v43  ;;  %v772_v43 = vld [vmem:[%s2376_s3 + $0x248] sm:$0xff] }
  0x88   : > { %v431_v44 = vpop.permute.xlu0 %430  ;;  %v429_v45 = vpop.permute.xlu1 %428 }
  0x89   : > { %v437_v52 = vsel %vm436_vm0, %v429_v45, %v431_v44  ;;  %v1517_v45 = vpack.c.bf16 %v769_v42, %v767_v41  ;;  %v809_v41 = vld [vmem:[%s2376_s3 + $0x370] sm:$0xff] }
  0x8a   : > { %v503_v60 = vsel %vm502_vm3, %v1755_v8, %v437_v52 }
  0x8c   : > { %v433_v46 = vpop.permute.xlu0 %432  ;;  %v447_v47 = vpop.permute.xlu1 %446 }
  0x8d   : > { %v438_v53 = vsel %vm436_vm0, %v431_v44, %v433_v46  ;;  %v774_v44 = vld [vmem:[%s2376_s3 + $0x258] sm:$0xff] }
  0x8e   : > { %v504_v61 = vsel %vm502_vm3, %v1751_v7, %v438_v53  ;;  %v775_v53 = vld [vmem:[%s2376_s3 + $0x260] sm:$0xff] }
  0x90   : > { %v449_v48 = vpop.permute.xlu0 %448  ;;  %v445_v49 = vpop.permute.xlu1 %444 }
  0x91   : > { %v454_v56 = vsel %vm452_vm1, %v447_v47, %v449_v48  ;;  %v453_v57 = vsel %vm452_vm1, %v445_v49, %v447_v47  ;;  %v771_v47 = vld [vmem:[%s2376_s3 + $0x240] sm:$0xff]  ;;  %v776_v49 = vld [vmem:[%s2376_s3 + $0x268] sm:$0xff] }
  0x92   : > { %v509_v62 = vsel %vm507_vm4, %v504_v61, %v454_v56  ;;  %v508_v63 = vsel %vm507_vm4, %v503_v60, %v453_v57  ;;  %v782_v56 = vld [vmem:[%s2376_s3 + $0x298] sm:$0xff]  ;;  %v781_v60 = vld [vmem:[%s2376_s3 + $0x290] sm:$0xff]  ;;  %v784_v61 = vld [vmem:[%s2376_s3 + $0x2a8] sm:$0xff] }
  0x94   : > { %v467_v50 = vpop.permute.xlu0 %466  ;;  %v469_v51 = vpop.permute.xlu1 %468 }
  0x95   : > { %v476_v58 = vsel %vm474_vm2, %v467_v50, %v469_v51 }
  0x96   : > { %v514_v6 = vsel %vm512_vm6, %v509_v62, %v476_v58  ;;  %v786_v62 = vld [vmem:[%s2376_s3 + $0x2b8] sm:$0xff] }
  0x98   : > { %v465_v54 = vpop.permute.xlu0 %464  ;;  %v486_v55 = vpop.permute.xlu1 %485 }
  0x99   : > { %v475_v59 = vsel %vm474_vm2, %v465_v54, %v467_v50  ;;  %v778_v50 = vld [vmem:[%s2376_s3 + $0x278] sm:$0xff]  ;;  %v777_v54 = vld [vmem:[%s2376_s3 + $0x270] sm:$0xff] }
  0x9a   : > { %v513_v11 = vsel %vm512_vm6, %v508_v63, %v475_v59  ;;  %v1523_v52 = vpack.c.bf16 %v778_v50, %v776_v49  ;;  %v1525_v57 = vpack.c.bf16 %v777_v54, %v775_v53  ;;  %v779_v59 = vld [vmem:[%s2376_s3 + $0x280] sm:$0xff]  ;;  %v812_v49 = vld [vmem:[%s2376_s3 + $0x388] sm:$0xff]  ;;  %v814_v50 = vld [vmem:[%s2376_s3 + $0x398] sm:$0xff] }
  0x9b   : > { %v1529_v63 = vpack.c.bf16 %v781_v60, %v779_v59  ;;  %v813_v53 = vld [vmem:[%s2376_s3 + $0x390] sm:$0xff]  ;;  %v760_v54 = vld [vmem:[%s2376_s3 + $0x1e8] sm:$0xff] }
  0x9c   : > { %v488_v0 = vpop.permute.xlu0 %487  ;;  %v484_v1 = vpop.permute.xlu1 %483  ;;  %v761_v59 = vld [vmem:[%s2376_s3 + $0x1f0] sm:$0xff]  ;;  %v816_v60 = vld [vmem:[%s2376_s3 + $0x3a8] sm:$0xff] }
  0x9d   : > { %v495_v3 = vsel %vm493_vm5, %v486_v55, %v488_v0  ;;  %v494_v5 = vsel %vm493_vm5, %v484_v1, %v486_v55  ;;  %v780_v55 = vld [vmem:[%s2376_s3 + $0x288] sm:$0xff]  ;;  %v783_v1 = vld [vmem:[%s2376_s3 + $0x2a0] sm:$0xff] }
  0x9e   : > { %v519_v8 = vsel %vm517_vm7, %v514_v6, %v495_v3  ;;  %v518_v7 = vsel %vm517_vm7, %v513_v11, %v494_v5  ;;  %v1527_v58 = vpack.c.bf16 %v782_v56, %v780_v55  ;;  %v785_v3 = vld [vmem:[%s2376_s3 + $0x2b0] sm:$0xff]  ;;  %v788_v5 = vld [vmem:[%s2376_s3 + $0x2c8] sm:$0xff]  ;;  %v790_v6 = vld [vmem:[%s2376_s3 + $0x2d8] sm:$0xff] }
  0x9f   : > { %1418 = vmatprep.subr.msk.mxu1 %vm532_vm8, %v519_v8  ;;  %v1533_v11 = vpack.c.bf16 %v785_v3, %v783_v1  ;;  %v1535_v8 = vpack.c.bf16 %v790_v6, %v788_v5  ;;  %v762_v55 = vld [vmem:[%s2376_s3 + $0x1f8] sm:$0xff]  ;;  %v820_v5 = vld [vmem:[%s2376_s3 + $0x3c8] sm:$0xff] }
  0xa0   : > { %v435_v14 = vpop.permute.xlu0 %434  ;;  %1419 = vmatpush1.msk.msra.mxu1 %vm532_vm8, %v518_v7  ;;  %v451_v15 = vpop.permute.xlu1 %450  ;;  %v787_v7 = vld [vmem:[%s2376_s3 + $0x2c0] sm:$0xff]  ;;  %v822_v6 = vld [vmem:[%s2376_s3 + $0x3d8] sm:$0xff] }
  0xa1   : > { %1420 = vmatmul.mubr.msk.f32.vlgmr.msra.gmra.mrb[0].mxu1 %vm528_vm9, %v406_v13  ;;  %v439_v16 = vsel %vm436_vm0, %v433_v46, %v435_v14  ;;  %v506_v20 = vsel %vm502_vm3, %v1785_v12, %v435_v14  ;;  %v455_v21 = vsel %vm452_vm1, %v449_v48, %v451_v15  ;;  %v765_v12 = vld [vmem:[%s2376_s3 + $0x210] sm:$0xff]  ;;  %v1519_v46 = vpack.c.bf16 %v774_v44, %v772_v43  ;;  %v792_v14 = vld [vmem:[%s2376_s3 + $0x2e8] sm:$0xff]  ;;  %v758_v44 = vld [vmem:[%s2376_s3 + $0x1d8] sm:$0xff] }
  0xa2   : > { %680 = vmatprep.mubr.f32.mxu1 %v1663_v10  ;;  %v505_v19 = vsel %vm502_vm3, %v1761_v9, %v439_v16  ;;  %v763_v9 = vld [vmem:[%s2376_s3 + $0x200] sm:$0xff]  ;;  %v511_v27 = vsel %vm507_vm4, %v506_v20, %v451_v15  ;;  %v773_v48 = vld [vmem:[%s2376_s3 + $0x250] sm:$0xff]  ;;  %v794_v15 = vld [vmem:[%s2376_s3 + $0x2f8] sm:$0xff] }
  0xa3   : > { %v510_v26 = vsel %vm507_vm4, %v505_v19, %v455_v21  ;;  %v1513_v39 = vpack.c.bf16 %v765_v12, %v763_v9  ;;  %v793_v19 = vld [vmem:[%s2376_s3 + $0x2f0] sm:$0xff]  ;;  %v796_v20 = vld [vmem:[%s2376_s3 + $0x308] sm:$0xff]  ;;  %v798_v21 = vld [vmem:[%s2376_s3 + $0x318] sm:$0xff] }
  0xa4   : > { %v471_v17 = vpop.permute.xlu0 %470  ;;  %v473_v18 = vpop.permute.xlu1 %472  ;;  %v1543_v23 = vpack.c.bf16 %v798_v21, %v796_v20  ;;  %v800_v9 = vld [vmem:[%s2376_s3 + $0x328] sm:$0xff]  ;;  %v802_v12 = vld [vmem:[%s2376_s3 + $0x338] sm:$0xff]  ;;  %vm976_vm3 = vmor %vm975_vm15, %vm517_vm7 }
  0xa5   : > { %v477_v24 = vsel %vm474_vm2, %v469_v51, %v471_v17  ;;  %v478_v25 = vsel %vm474_vm2, %v471_v17, %v473_v18  ;;  %v1521_v51 = vpack.c.bf16 %v773_v48, %v771_v47  ;;  %v1539_v17 = vpack.c.bf16 %v794_v15, %v792_v14  ;;  %v791_v18 = vld [vmem:[%s2376_s3 + $0x2e0] sm:$0xff]  ;;  %v756_v43 = vld [vmem:[%s2376_s3 + $0x1c8] sm:$0xff]  ;;  %v757_v47 = vld [vmem:[%s2376_s3 + $0x1d0] sm:$0xff] }
  0xa6   : > { %v515_v33 = vsel %vm512_vm6, %v510_v26, %v477_v24  ;;  %v516_v34 = vsel %vm512_vm6, %v511_v27, %v478_v25  ;;  %v1541_v22 = vpack.c.bf16 %v793_v19, %v791_v18  ;;  %v795_v24 = vld [vmem:[%s2376_s3 + $0x300] sm:$0xff]  ;;  %v797_v25 = vld [vmem:[%s2376_s3 + $0x310] sm:$0xff]  ;;  %v1547_v27 = vpack.c.bf16 %v802_v12, %v800_v9  ;;  %v824_v14 = vld [vmem:[%s2376_s3 + $0x3e8] sm:$0xff] }
  0xa7   : > { %v1545_v26 = vpack.c.bf16 %v797_v25, %v795_v24  ;;  %v823_v15 = vld [vmem:[%s2376_s3 + $0x3e0] sm:$0xff] }
  0xa8   : > { %v490_v28 = vpop.permute.xlu0 %489  ;;  %v492_v29 = vpop.permute.xlu1 %491 }
  0xa9   : > { %v496_v35 = vsel %vm493_vm5, %v488_v0, %v490_v28  ;;  %v497_v36 = vsel %vm493_vm5, %v490_v28, %v492_v29  ;;  %v1531_v0 = vpack.c.bf16 %v786_v62, %v784_v61  ;;  %v799_v28 = vld [vmem:[%s2376_s3 + $0x320] sm:$0xff]  ;;  %v801_v29 = vld [vmem:[%s2376_s3 + $0x330] sm:$0xff]  ;;  %v818_v62 = vld [vmem:[%s2376_s3 + $0x3b8] sm:$0xff] }
  0xaa   : > { %v520_v37 = vsel %vm517_vm7, %v515_v33, %v496_v35  ;;  %v521_v38 = vsel %vm517_vm7, %v516_v34, %v497_v36  ;;  %v1549_v32 = vpack.c.bf16 %v801_v29, %v799_v28  ;;  %v803_v34 = vld [vmem:[%s2376_s3 + $0x340] sm:$0xff]  ;;  %v805_v35 = vld [vmem:[%s2376_s3 + $0x350] sm:$0xff]  ;;  %v808_v36 = vld [vmem:[%s2376_s3 + $0x368] sm:$0xff]  ;;  %v1563_v1 = vpack.c.bf16 %v818_v62, %v816_v60 }
  0xab   : > { %1421 = vmatprep.subr.msk.mxu1 %vm532_vm8, %v521_v38  ;;  %v1553_v38 = vpack.c.bf16 %v805_v35, %v803_v34  ;;  %v1113_v60 = vld [vmem:[%s2379_s6 + $0x58] sm:$0xff]  ;;  %v1114_v62 = vld [vmem:[%s2379_s6 + $0x60] sm:$0xff] }
  0xac   : > { %1422 = vmatpush1.msk.msra.mxu1 %vm532_vm8, %v520_v37  ;;  %v810_v37 = vld [vmem:[%s2376_s3 + $0x378] sm:$0xff]  ;;  %vm1668_vm8 = vmmov 0  }
  0xad   : > { %1423 = vmatmul.mubr.msk.f32.vlgmr.msra.gmra.mrb[2].mxu1 %vm528_vm9, %v406_v13  ;;  %1512 = vmatprep.subr.bf16.mxu1 %v1511_v30  ;;  %v789_v13 = vld [vmem:[%s2376_s3 + $0x2d0] sm:$0xff]  ;;  %v804_v30 = vld [vmem:[%s2376_s3 + $0x348] sm:$0xff]  ;;  %vm1223_vm9 = vcmask 195584  }
  0xae   : > { %1514 = vmatpush1.bf16.msra.mxu1 %v1513_v39  ;;  %v1537_v16 = vpack.c.bf16 %v789_v13, %v787_v7  ;;  %v1551_v33 = vpack.c.bf16 %v806_v31, %v804_v30  ;;  %v1555_v39 = vpack.c.bf16 %v810_v37, %v808_v36  ;;  %v821_v7 = vld [vmem:[%s2376_s3 + $0x3d0] sm:$0xff] }
  0xaf   : > { %1516 = vmatprep.subr.bf16.mxu1 %v1515_v40  ;;  %v807_v40 = vld [vmem:[%s2376_s3 + $0x360] sm:$0xff] }
  0xb0   : > { %v1557_v42 = vpack.c.bf16 %v809_v41, %v807_v40 }
  0xb2   : > { %1518 = vmatpush1.bf16.msra.mxu1 %v1517_v45  ;;  %v755_v45 = vld [vmem:[%s2376_s3 + $0x1c0] sm:$0xff] }
  0xb3   : > { %1520 = vmatprep.subr.bf16.mxu1 %v1519_v46  ;;  %v1503_v46 = vpack.c.bf16 %v758_v44, %v756_v43  ;;  %v1505_v48 = vpack.c.bf16 %v757_v47, %v755_v45  ;;  %v1103_v43 = vld [vmem:[%s2379_s6 + $0x8] sm:$0xff]  ;;  %v1666_v44 = vmov 0.0|0.0   ;;  %v1105_v47 = vld [vmem:[%s2379_s6 + $0x18] sm:$0xff] }
  0xb5   : > { %1504 = vmatprep.subr.bf16.mxu0 %v1503_v46  ;;  %v1104_v46 = vld [vmem:[%s2379_s6 + $0x10] sm:$0xff] }
  0xb6   : > { %1522 = vmatpush1.bf16.msra.mxu1 %v1521_v51  ;;  %v811_v51 = vld [vmem:[%s2376_s3 + $0x380] sm:$0xff]  ;;  %1506 = vmatpush1.bf16.msra.mxu0 %v1505_v48  ;;  %v1579_v48 = vpack.c.bf16 %v1105_v47, %v1104_v46 }
  0xb7   : > { %1524 = vmatprep.subr.bf16.mxu1 %v1523_v52  ;;  %v1559_v52 = vpack.c.bf16 %v814_v50, %v812_v49  ;;  %v1561_v56 = vpack.c.bf16 %v813_v53, %v811_v51  ;;  %v1106_v49 = vld [vmem:[%s2379_s6 + $0x20] sm:$0xff]  ;;  %v1107_v50 = vld [vmem:[%s2379_s6 + $0x28] sm:$0xff]  ;;  %v1108_v53 = vld [vmem:[%s2379_s6 + $0x30] sm:$0xff] }
  0xb8   : > { %v1011_v51 = vld [vmem:[%s2378_s5] sm:$0xff] }
  0xba   : > { %1526 = vmatpush1.bf16.msra.mxu1 %v1525_v57  ;;  %v1507_v57 = vpack.c.bf16 %v762_v55, %v760_v54  ;;  %v1109_v54 = vld [vmem:[%s2379_s6 + $0x38] sm:$0xff] }
  0xbb   : > { %1528 = vmatprep.subr.bf16.mxu1 %v1527_v58  ;;  %v759_v58 = vld [vmem:[%s2376_s3 + $0x1e0] sm:$0xff]  ;;  %v1585_v55 = vpack.c.bf16 %v1109_v54, %v1108_v53 }
  0xbc   : > { %v1509_v61 = vpack.c.bf16 %v761_v59, %v759_v58  ;;  %1508 = vmatprep.subr.bf16.mxu0 %v1507_v57  ;;  %v1111_v57 = vld [vmem:[%s2379_s6 + $0x48] sm:$0xff]  ;;  %v1112_v59 = vld [vmem:[%s2379_s6 + $0x50] sm:$0xff] }
  0xbe   : > { %1530 = vmatpush1.bf16.msra.mxu1 %v1529_v63  ;;  %v815_v63 = vld [vmem:[%s2376_s3 + $0x3a0] sm:$0xff]  ;;  %1510 = vmatpush1.bf16.msra.mxu0 %v1509_v61  ;;  %v1591_v61 = vpack.c.bf16 %v1113_v60, %v1112_v59 }
  0xbf   : > { %1532 = vmatprep.subr.bf16.mxu1 %v1531_v0  ;;  %v817_v0 = vld [vmem:[%s2376_s3 + $0x3b0] sm:$0xff]  ;;  %1575 = vmatprep.subr.bf16.mxu0 %v1666_v44 }
  0xc0   : > { %v1565_v3 = vpack.c.bf16 %v817_v0, %v815_v63  ;;  %v1115_v63 = vld [vmem:[%s2379_s6 + $0x68] sm:$0xff] }
  0xc1   : > { %v1594_v0 = vpack.c.bf16 %v1115_v63, %v1114_v62 }
  0xc2   : > { %1534 = vmatpush1.bf16.msra.mxu1 %v1533_v11  ;;  %v1567_v11 = vpack.c.bf16 %v822_v6, %v820_v5  ;;  %v1118_v6 = vld [vmem:[%s2379_s6 + $0x80] sm:$0xff] }
  0xc3   : > { %1536 = vmatprep.subr.bf16.mxu1 %v1535_v8  ;;  %v819_v8 = vld [vmem:[%s2376_s3 + $0x3c0] sm:$0xff] }
  0xc4   : > { %v1569_v13 = vpack.c.bf16 %v821_v7, %v819_v8  ;;  %v1120_v7 = vld [vmem:[%s2379_s6 + $0x90] sm:$0xff] }
  0xc6   : > { %1538 = vmatpush1.bf16.msra.mxu1 %v1537_v16  ;;  %v526_v16 = vpop.permute.xlu0 %525 }
  0xc7   : > { %1540 = vmatprep.subr.bf16.mxu1 %v1539_v17 }
  0xca   : > { %1542 = vmatpush1.bf16.msra.mxu1 %v1541_v22 }
  0xcb   : > { %1544 = vmatprep.subr.bf16.mxu1 %v1543_v23 }
  0xce   : > { %1546 = vmatpush1.bf16.msra.mxu1 %v1545_v26 }
  0xcf   : > { %1548 = vmatprep.subr.bf16.mxu1 %v1547_v27 }
  0xd2   : > { %1550 = vmatpush1.bf16.msra.mxu1 %v1549_v32 }
  0xd3   : > { %1552 = vmatprep.subr.bf16.mxu1 %v1551_v33 }
  0xd6   : > { %1554 = vmatpush1.bf16.msra.mxu1 %v1553_v38 }
  0xd7   : > { %1556 = vmatprep.subr.bf16.mxu1 %v1555_v39 }
  0xda   : > { %1558 = vmatpush1.bf16.msra.mxu1 %v1557_v42  ;;  %v1102_v42 = vld [vmem:[%s2379_s6] sm:$0xff] }
  0xdb   : > { %1560 = vmatprep.subr.bf16.mxu1 %v1559_v52  ;;  %v1576_v45 = vpack.c.bf16 %v1103_v43, %v1102_v42  ;;  %v1582_v52 = vpack.c.bf16 %v1107_v50, %v1106_v49 }
  0xde   : > { %1562 = vmatpush1.bf16.msra.mxu1 %v1561_v56  ;;  %v1110_v56 = vld [vmem:[%s2379_s6 + $0x40] sm:$0xff] }
  0xdf   : > { %1564 = vmatprep.subr.bf16.mxu1 %v1563_v1  ;;  %v1588_v58 = vpack.c.bf16 %v1111_v57, %v1110_v56  ;;  %v1116_v1 = vld [vmem:[%s2379_s6 + $0x70] sm:$0xff] }
  0xe2   : > { %1566 = vmatpush1.bf16.msra.mxu1 %v1565_v3  ;;  %v1117_v3 = vld [vmem:[%s2379_s6 + $0x78] sm:$0xff] }
  0xe3   : > { %1568 = vmatprep.subr.bf16.mxu1 %v1567_v11  ;;  %v1597_v5 = vpack.c.bf16 %v1117_v3, %v1116_v1  ;;  %v1119_v11 = vld [vmem:[%s2379_s6 + $0x88] sm:$0xff] }
  0xe4   : > { %v1600_v8 = vpack.c.bf16 %v1119_v11, %v1118_v6 }
  0xe6   : > { %1570 = vmatpush1.bf16.msra.mxu1 %v1569_v13  ;;  %v1121_v13 = vld [vmem:[%s2379_s6 + $0x98] sm:$0xff] }
  0xe7   : > { %960 = vmatprep.subr.mxu1 %v824_v14  ;;  %v1603_v14 = vpack.c.bf16 %v1121_v13, %v1120_v7 }
  0xea   : > { %961 = vmatpush1.msra.mxu1 %v823_v15 }
 0x174   : > { %v611_v17 = vpop.f32.mrb[0].mxu1 }
 0x175   : > { %v612_v18 = vadd.f32 %v611_v17, %v526_v16  ;;  %v613_v19 = vpop.f32.mrb[1].mxu1 }
 0x176   : > { %v614_v20 = vadd.f32 %v613_v19, %v526_v16 }
 0x177   : > { %vm687_vm10 = vcmp.ge.f32.partialorder %v612_v18, 0.0  ;;  %v691_v21 = vmul.f32 0.1, %v612_v18 }
 0x178   : > { %vm688_vm11 = vcmp.ge.f32.partialorder %v614_v20, 0.0  ;;  %v692_v22 = vmul.f32 0.1, %v614_v20 }
 0x179   : > { %v695_v23 = vsel %vm687_vm10, %v612_v18, %v691_v21  ;;  %vm1297_vm10 = vcmask 532480  }
 0x17a   : > { %v696_v24 = vsel %vm688_vm11, %v614_v20, %v692_v22 }
 0x17b   : > { %893 = vmatprep.mubr.f32.mxu0 %v696_v24 }
 0x17c   : > { %894 = vmatmul.mubr.f32.vlgmr.msra.gmra.mrb[0].mxu0 %v695_v23 }
 0x17d   : > { %1577 = vmatpush1.bf16.msra.mxu0 %v1576_v45 }
 0x17e   : > { %1578 = vmatprep.subr.bf16.mxu0 %v1666_v44 }
 0x180   : > { %v682_v25 = vpop.f32.mrb[2].mxu1 }
 0x181   : > { %v683_v9 = vadd.f32 %v682_v25, %v526_v16  ;;  %v684_v12 = vpop.f32.mrb[3].mxu1  ;;  %1580 = vmatpush1.bf16.msra.mxu0 %v1579_v48 }
 0x182   : > { %v685_v26 = vadd.f32 %v684_v12, %v526_v16  ;;  %1581 = vmatprep.subr.bf16.mxu0 %v1666_v44 }
 0x183   : > { %v693_v27 = vmul.f32 0.1, %v683_v9  ;;  %vm689_vm12 = vcmp.ge.f32.partialorder %v683_v9, 0.0 }
 0x184   : > { %vm690_vm13 = vcmp.ge.f32.partialorder %v685_v26, 0.0  ;;  %v694_v28 = vmul.f32 0.1, %v685_v26 }
 0x185   : > { %v697_v30 = vsel %vm689_vm12, %v683_v9, %v693_v27  ;;  %1583 = vmatpush1.bf16.msra.mxu0 %v1582_v52  ;;  %v1213_v52 = vld [vmem:[#allocation2] sm:$0x1] }
 0x186   : > { %v698_v29 = vsel %vm690_vm13, %v685_v26, %v694_v28  ;;  %1584 = vmatprep.subr.bf16.mxu0 %v1666_v44 }
 0x187   : > { %1424 = vmatprep.mubr.msk.f32.mxu1 %vm825_vm14, %v698_v29 }
 0x188   : > { %965 = vmatmul.mubr.f32.vlgmr.msra.gmra.mrb[4].mxu1 %v697_v30 }
 0x189   : > { %1089 = vmatprep.mubr.f32.mxu1 %v1663_v10  ;;  %1586 = vmatpush1.bf16.msra.mxu0 %v1585_v55  ;;  %v1205_v55 = vld [vmem:[%s2380_s7] sm:$0x1] }
 0x18a   : > { %1587 = vmatprep.subr.bf16.mxu0 %v1666_v44 }
 0x18d   : > { %1589 = vmatpush1.bf16.msra.mxu0 %v1588_v58 }
 0x18e   : > { %1590 = vmatprep.subr.bf16.mxu0 %v1666_v44 }
 0x191   : > { %1592 = vmatpush1.bf16.msra.mxu0 %v1591_v61 }
 0x192   : > { %1593 = vmatprep.subr.bf16.mxu0 %v1666_v44 }
 0x195   : > { %1595 = vmatpush1.bf16.msra.mxu0 %v1594_v0 }
 0x196   : > { %1596 = vmatprep.subr.bf16.mxu0 %v1666_v44 }
 0x199   : > { %1598 = vmatpush1.bf16.msra.mxu0 %v1597_v5 }
 0x19a   : > { %1599 = vmatprep.subr.bf16.mxu0 %v1666_v44 }
 0x19d   : > { %1601 = vmatpush1.bf16.msra.mxu0 %v1600_v8 }
 0x19e   : > { %1602 = vmatprep.subr.bf16.mxu0 %v1666_v44 }
 0x1a1   : > { %1604 = vmatpush1.bf16.msra.mxu0 %v1603_v14 }
 0x1a2   : > { %1605 = vmatprep.subr.bf16.mxu0 %v1666_v44 }
 0x24f   : > { %v895_v31 = vpop.f32.mrb[0].mxu0 }
 0x250   : > { %v897_v32 = vpop.f32.mrb[1].mxu0 }
 0x25b   : > { %v966_v33 = vpop.f32.mrb[4].mxu1 }
 0x25c   : > { %v2225_v34 = vadd.f32 %v966_v33, %v895_v31  ;;  %v968_v35 = vpop.f32.mrb[5].mxu1  ;;  %v978_v33 = vld [vmem:[%s2377_s4] sm:$0xff] }
 0x25d   : > { %v2227_v36 = vadd.f32 %v968_v35, %v897_v32 }
 0x25e   : > { %v979_v37 = vrot.slane %v2225_v34, 4 }
 0x25f   : > { %v973_v38 = vcombine.low %v2225_v34, %v2227_v36  ;;  %v980_v39 = vrot.slane %v2227_v36, 4  ;;  %v1641_v41 = vpack.i.bf16 %v2227_v36, %v2225_v34 }
 0x261   : > { %v1646_v40 = vpack.i.bf16 %v980_v39, %v979_v37  ;;  %977 = vst.msk [vmem:[%s397_s16] sm:$0xff] %vm976_vm3, %v973_v38  ;;  %v1124_v38 = vld [vmem:[%s2379_s6 + $0xb0] sm:$0xff]  ;;  %v1125_v39 = vld [vmem:[%s2379_s6 + $0xb8] sm:$0x3] }
 0x263   : > { %1647 = vrot.lane.b32.xlu0 %v1646_v40, %s1662_s26  ;;  %1637 = vrot.lane.b32.xlu1 %v1646_v40, %s1660_s24  ;;  %v1609_v40 = vpack.c.bf16 %v1125_v39, %v1124_v38 }
 0x267   : > { %1004 = vrot.lane.b32.xlu0 %v2227_v36, %s1664_s27  ;;  %1642 = vrot.lane.b32.xlu1 %v1641_v41, %s1661_s25 }
 0x26b   : > { %1002 = vrot.lane.b32.xlu1 %v2225_v34, %s1664_s27 }
 0x26f   : > { %1014 = vperm.xlu1 %1651, %v1011_v51  }
 0x2d5   : > { %v1648_v15 = vpop.permute.xlu0 %1647  ;;  %v1638_v16 = vpop.permute.xlu1 %1637 }
 0x2d6   : > { %v1640_v17 = vunpack.i.h.bf16 %v1638_v16  ;;  %v1639_v18 = vunpack.i.l.bf16 %v1638_v16  ;;  %v1650_v19 = vunpack.i.h.bf16 %v1648_v15  ;;  %v1649_v20 = vunpack.i.l.bf16 %v1648_v15 }
 0x2d8   : > { %v985_v22 = vsel %vm436_vm0, %v1639_v18, %v1640_v17  ;;  %v999_v25 = vsel %vm474_vm2, %v1649_v20, %v1650_v19  ;;  %v1008_v12 = vsel %vm517_vm7, %v2227_v36, %v1640_v17  ;;  %vm1017_vm0 = vcmask 162816   ;;  %v1123_v36 = vld [vmem:[%s2379_s6 + $0xa8] sm:$0xff] }
 0x2d9   : > { %v1643_v21 = vpop.permute.xlu1 %1642  ;;  %v1007_v28 = vsel %vm517_vm7, %v2225_v34, %v985_v22  ;;  %v1005_v31 = vpop.permute.xlu0 %1004  ;;  %v1122_v34 = vld [vmem:[%s2379_s6 + $0xa0] sm:$0xff] }
 0x2da   : > { %v1645_v23 = vunpack.i.h.bf16 %v1643_v21  ;;  %v1644_v24 = vunpack.i.l.bf16 %v1643_v21  ;;  %v1606_v37 = vpack.c.bf16 %v1123_v36, %v1122_v34 }
 0x2dc   : > { %v992_v9 = vsel %vm452_vm1, %v1644_v24, %v1645_v23  ;;  %v1010_v26 = vsel %vm517_vm7, %v1645_v23, %v1650_v19  ;;  %1607 = vmatpush1.bf16.msra.mxu0 %v1606_v37  ;;  %vm1667_vm1 = vmmov 1  }
 0x2dd   : > { %v1571_v27 = vpack.c.bf16 %v1010_v26, %v1008_v12  ;;  %v1009_v29 = vsel %vm517_vm7, %v992_v9, %v999_v25  ;;  %v1003_v32 = vpop.permute.xlu1 %1002  ;;  %1608 = vmatprep.subr.bf16.mxu0 %v1666_v44  ;;  %vm1610_vm2 = vmpackc.low %vm507_vm4, %vm1667_vm1  ;;  %vm1203_vm4 = vcmask 539648  }
 0x2de   : > { %v1573_v30 = vpack.c.bf16 %v1009_v29, %v1007_v28  ;;  %v1006_v35 = vsel %vm493_vm5, %v1003_v32, %v1005_v31 }
 0x2df   : > { %1572 = vmatprep.subr.bf16.mxu1 %v1571_v27 }
 0x2e0   : > { %1574 = vmatpush1.bf16.msra.mxu1 %v1573_v30  ;;  %1611 = vmatpush1.bf16.msk.msra.mxu0 %vm1610_vm2, %v1609_v40 }
 0x2e1   : > { %1425 = vmatprep.subr.msk.mxu1 %vm517_vm7, %v1005_v31 }
 0x2e4   : > { %1426 = vmatpush1.msk.msra.mxu1 %vm517_vm7, %v1006_v35  ;;  %vm1126_vm7 = vcmask 474112  }
 0x2e5   : > { %1427 = vmatmul.mubr.msk.f32.vlgmr.msra.gmra.mrb[6].mxu1 %vm1017_vm0, %v978_v33  ;;  %1612 = vmatprep.subr.bf16.mxu1 %v1666_v44 }
 0x2e6   : > { %1444 = vmatprep.mubr.msk.f32.mxu1 %vm1668_vm8, %v1663_v10 }
 0x2ee   : > { %v1015_v41 = vpop.permute.xlu1 %1014 }
 0x3b8   : > { %v1091_v42 = vpop.f32.mrb[6].mxu1 }
 0x3b9   : > { %v1092_v43 = vadd.f32 %v1091_v42, %v1015_v41  ;;  %v1093_v45 = vpop.f32.mrb[7].mxu1 }
 0x3ba   : > { %v1094_v46 = vadd.f32 %v1093_v45, %v1015_v41 }
 0x3bb   : > { %v1098_v44 = vmul.f32 0.1, %v1092_v43  ;;  %vm1096_vm5 = vcmp.ge.f32.partialorder %v1092_v43, 0.0 }
 0x3bc   : > { %vm1097_vm6 = vcmp.ge.f32.partialorder %v1094_v46, 0.0  ;;  %v1099_v47 = vmul.f32 0.1, %v1094_v46 }
 0x3bd   : > { %v1100_v49 = vsel %vm1096_vm5, %v1092_v43, %v1098_v44 }
 0x3be   : > { %v1101_v48 = vsel %vm1097_vm6, %v1094_v46, %v1099_v47 }
 0x3bf   : > { %1429 = vmatprep.mubr.msk.f32.mxu0 %vm1126_vm7, %v1101_v48 }
 0x3c0   : > { %1198 = vmatmul.mubr.f32.vlgmr.msra.gmra.mrb[2].mxu0 %v1100_v49 }
 0x493   : > { %v1199_v50 = vpop.f32.mrb[2].mxu0 }
 0x494   : > { %1204 = vst.msk [vmem:[%s401_s30] sm:$0xff] %vm1203_vm4, %v1199_v50  ;;  %1210 = vrot.lane.b32.xlu1 %v1199_v50, %s1661_s25  ;;  %1207 = vrot.lane.b32.xlu0 %v1199_v50, %s1660_s24  ;;  %v1201_v51 = vpop.f32.mrb[3].mxu0 }
 0x498   : > { %1216 = vperm.xlu0 %1635, %v1213_v52  }
 0x506   : > { %v1208_v53 = vpop.permute.xlu0 %1207  ;;  %v1211_v56 = vpop.permute.xlu1 %1210 }
 0x507   : > { %v1613_v54 = vpack.c.bf16 %v1208_v53, %v1199_v50 }
 0x509   : > { %1614 = vmatpush3.bf16.msra.mxu1 %v1613_v54 }
 0x50a   : > { %1442 = vmatprep.subr.mxu1 %v1663_v10 }
 0x50d   : > { %1443 = vmatpush3.msra.mxu1 %v1211_v56 }
 0x50e   : > { %1445 = vmatmul.mubr.msk.f32.vlgmr.msra.gmra.mrb[8].mxu1 %vm1223_vm9, %v1205_v55 }
 0x517   : > { %v1217_v57 = vpop.permute.xlu0 %1216 }
 0x518   : > { %v1222_v58 = vrot.slane %v1217_v57, %v410_v4 }
 0x5e1   : > { %v1293_v59 = vpop.f32.mrb[8].mxu1 }
 0x5e2   : > { %v1294_v60 = vadd.f32 %v1293_v59, %v1222_v58  ;;  %v1446_v10 = vpop.f32.mrb[9].mxu1 }
 0x5e4   : > { %1298 = vst.msk [vmem:[%s404_s13] sm:$0x1] %vm1297_vm10, %v1294_v60 }
 0x5e5 PF: > { %s24_s19 = sadd.s32 1, %s1658_s19  }
 0x5e6   : > { %p21_p4 = scmp.ge.s32.totalorder %s24_s19, 4  }
 0x5e8   :  { %23 = sbr.rel (!%p21_p4) target bundleno = 3 (0x3), region = 110 }

</bundles_post_ra>
